<compile_context>
chip_gen: v6e
topology: v6e:2x2x1
jax: 0.10.0
libtpu: 0.0.40
codegen_flags: <defaults>
</compile_context>

<pallas_src>
import math

import jax
import jax.numpy as jnp
from jax.experimental import pallas as pl
from jax.experimental.pallas import tpu as pltpu

# ---- module hyper-parameters (mirrors the PyTorch script) -------------------
text = "hello pallas tpu gru kernel world"
chars = sorted(list(set(text)))
itos = {i: ch for i, ch in enumerate(chars)}
vocab_size = len(itos)

d_model = 24
n_hidden = 200

# ---- TPU padding -------------------------------------------------------------
B_PAD = 8       # sublane multiple for the (tiny) batch
D_PAD = 128     # lane multiple for d_model
H_PAD = 256     # lane multiple for n_hidden
V_PAD = 128     # lane multiple for vocab_size


# =============================================================================
# Single fused Pallas kernel:
#   1) wzr_all = emb @ [W_z | W_r] + [b_z | b_r]   (all T at once)
#      wc_all  = emb @ W_c + b_c                   (all T at once)
#   2) serial GRU recurrence via in-kernel fori_loop (h = loop carry)
#   3) logits  = h_all @ V + b_V                   (all T at once)
# =============================================================================
def gru_fused_kernel(emb_ref,      # (T*B_PAD, D_PAD)
                     wzr_ref,      # (D_PAD, 2*H_PAD)   columns: [z | r]
                     bzr_ref,      # (1, 2*H_PAD)
                     wc_ref,       # (D_PAD, H_PAD)
                     bc_ref,       # (1, H_PAD)
                     u_ref,        # (H_PAD, 2*H_PAD)   columns: [z | r]
                     uc_ref,       # (H_PAD, H_PAD)
                     v_ref,        # (H_PAD, V_PAD)
                     vb_ref,       # (1, V_PAD)
                     h0_ref,       # (B_PAD, H_PAD)
                     logits_ref,   # out: (T*B_PAD, V_PAD)
                     wzr_scr,      # VMEM (T*B_PAD, 2*H_PAD)
                     wc_scr,       # VMEM (T*B_PAD, H_PAD)
                     h_all_scr):   # VMEM (T*B_PAD, H_PAD)
    n_steps = wzr_scr.shape[0] // B_PAD  # static

    # ---- hoisted input projections (biases folded in once) ------------------
    wzr_scr[...] = (jnp.dot(emb_ref[...], wzr_ref[...],
                            preferred_element_type=jnp.float32)
                    + bzr_ref[...])
    wc_scr[...] = (jnp.dot(emb_ref[...], wc_ref[...],
                           preferred_element_type=jnp.float32)
                   + bc_ref[...])

    # ---- serial recurrence ---------------------------------------------------
    def step(t, h):
        off = pl.multiple_of(t * B_PAD, B_PAD)
        wzr = wzr_scr[pl.ds(off, B_PAD), :]                    # (B_PAD, 2*H_PAD)
        wc = wc_scr[pl.ds(off, B_PAD), :]                      # (B_PAD, H_PAD)

        gates = jax.nn.sigmoid(
            wzr + jnp.dot(h, u_ref[...], preferred_element_type=jnp.float32))
        z_t = gates[:, :H_PAD]
        r_t = gates[:, H_PAD:]

        c_t = jnp.tanh(
            wc + jnp.dot(r_t * h, uc_ref[...],
                         preferred_element_type=jnp.float32))

        h_new = h + z_t * (c_t - h)
        h_all_scr[pl.ds(off, B_PAD), :] = h_new
        return h_new

    jax.lax.fori_loop(0, n_steps, step, h0_ref[...], unroll=True)

    # ---- hoisted output projection over all timesteps ------------------------
    logits_ref[...] = (jnp.dot(h_all_scr[...], v_ref[...],
                               preferred_element_type=jnp.float32)
                       + vb_ref[...])


def gru_pallas(emb_flat, w_zr, b_zr, w_c, b_c, u_w, uc_w, v_w, v_b, h0):
    TB = emb_flat.shape[0]
    return pl.pallas_call(
        gru_fused_kernel,
        out_shape=jax.ShapeDtypeStruct((TB, V_PAD), jnp.float32),
        scratch_shapes=[
            pltpu.VMEM((TB, 2 * H_PAD), jnp.float32),   # Wzr_all
            pltpu.VMEM((TB, H_PAD), jnp.float32),       # Wc_all
            pltpu.VMEM((TB, H_PAD), jnp.float32),       # h_all
        ],
    )(emb_flat, w_zr, b_zr, w_c, b_c, u_w, uc_w, v_w, v_b, h0)


# =============================================================================
# Parameter init (deterministic, matches PyTorch default Linear/Embedding init)
# =============================================================================
def init_params(key):
    ks = jax.random.split(key, 9)

    def linear_w(k, out_f, in_f):
        bound = 1.0 / math.sqrt(in_f)
        return jax.random.uniform(k, (out_f, in_f), jnp.float32, -bound, bound)

    def linear_b(k, out_f, in_f):
        bound = 1.0 / math.sqrt(in_f)
        return jax.random.uniform(k, (out_f,), jnp.float32, -bound, bound)

    params = dict(
        C=jax.random.normal(ks[0], (vocab_size, d_model), jnp.float32),
        W_w=linear_w(ks[1], 2 * n_hidden, d_model),
        W_b=linear_b(ks[2], 2 * n_hidden, d_model),
        U_w=linear_w(ks[3], 2 * n_hidden, n_hidden),
        Wc_w=linear_w(ks[4], n_hidden, d_model),
        Wc_b=linear_b(ks[5], n_hidden, d_model),
        Uc_w=linear_w(ks[6], n_hidden, n_hidden),
        V_w=linear_w(ks[7], vocab_size, n_hidden),
        V_b=linear_b(ks[8], vocab_size, n_hidden),
        h_0=0.1 * jnp.ones((1, n_hidden), jnp.float32),
    )
    return params


# =============================================================================
# One-time padded / fused TPU weight layout (hoisted OUT of the jitted forward)
# =============================================================================
def prepare_padded_params(params):
    W_w, W_b = params["W_w"], params["W_b"]
    Wc_w, Wc_b = params["Wc_w"], params["Wc_b"]
    U_w, Uc_w = params["U_w"], params["Uc_w"]
    V_w, V_b = params["V_w"], params["V_b"]

    # input projection: columns [0:H_PAD)=z, [H_PAD:2H_PAD)=r
    w_zr = jnp.zeros((D_PAD, 2 * H_PAD), jnp.float32)
    w_zr = w_zr.at[:d_model, :n_hidden].set(W_w[:n_hidden].T)
    w_zr = w_zr.at[:d_model, H_PAD:H_PAD + n_hidden].set(W_w[n_hidden:].T)
    b_zr = jnp.zeros((1, 2 * H_PAD), jnp.float32)
    b_zr = b_zr.at[0, :n_hidden].set(W_b[:n_hidden])
    b_zr = b_zr.at[0, H_PAD:H_PAD + n_hidden].set(W_b[n_hidden:])

    w_c = jnp.zeros((D_PAD, H_PAD), jnp.float32)
    w_c = w_c.at[:d_model, :n_hidden].set(Wc_w.T)
    b_c = jnp.zeros((1, H_PAD), jnp.float32).at[0, :n_hidden].set(Wc_b)

    # recurrent weights (zero padding keeps pad lanes from leaking into real ones)
    u_w = jnp.zeros((H_PAD, 2 * H_PAD), jnp.float32)
    u_w = u_w.at[:n_hidden, :n_hidden].set(U_w[:n_hidden].T)
    u_w = u_w.at[:n_hidden, H_PAD:H_PAD + n_hidden].set(U_w[n_hidden:].T)

    uc_w = jnp.zeros((H_PAD, H_PAD), jnp.float32)
    uc_w = uc_w.at[:n_hidden, :n_hidden].set(Uc_w.T)

    # output projection
    v_w = jnp.zeros((H_PAD, V_PAD), jnp.float32)
    v_w = v_w.at[:n_hidden, :vocab_size].set(V_w.T)
    v_b = jnp.zeros((1, V_PAD), jnp.float32).at[0, :vocab_size].set(V_b)

    # initial hidden state (padded lanes stay exactly zero)
    h0 = jnp.zeros((B_PAD, H_PAD), jnp.float32)
    h0 = h0.at[:, :n_hidden].set(jnp.broadcast_to(params["h_0"],
                                                  (B_PAD, n_hidden)))

    return dict(C=params["C"], w_zr=w_zr, b_zr=b_zr, w_c=w_c, b_c=b_c,
                u_w=u_w, uc_w=uc_w, v_w=v_w, v_b=v_b, h0=h0)


# =============================================================================
# Forward wrapper (embedding gather, activation padding, loss = plain-JAX glue)
# =============================================================================
@jax.jit
def gru_forward(padded, xb, targets):
    B, T = xb.shape
    emb = padded["C"][xb]                            # (B, T, d_model)
    emb_tm = jnp.transpose(emb, (1, 0, 2))           # (T, B, d_model)
    emb_p = jnp.zeros((T, B_PAD, D_PAD), jnp.float32)
    emb_p = emb_p.at[:, :B, :d_model].set(emb_tm)
    emb_flat = emb_p.reshape(T * B_PAD, D_PAD)

    logits_flat_p = gru_pallas(emb_flat,
                               padded["w_zr"], padded["b_zr"],
                               padded["w_c"], padded["b_c"],
                               padded["u_w"], padded["uc_w"],
                               padded["v_w"], padded["v_b"],
                               padded["h0"])                     # (T*B_PAD, V_PAD)

    logits_p = logits_flat_p.reshape(T, B_PAD, V_PAD)
    logits = jnp.transpose(logits_p[:, :B, :vocab_size], (1, 0, 2))  # (B,T,V)
    logits_flat = logits.reshape(-1, vocab_size)
    t_flat = targets.reshape(-1)
    logp = jax.nn.log_softmax(logits_flat, axis=-1)
    loss = -jnp.mean(jnp.take_along_axis(logp, t_flat[:, None], axis=1))
    return logits_flat, loss


# Pure-JAX reference mirroring the PyTorch forward exactly (for verification).
def gru_reference(params, xb, targets):
    B, T = xb.shape
    emb = params["C"][xb]
    h_t = jnp.broadcast_to(params["h_0"], (B, n_hidden))
    h_all = []
    for t in range(T):
        x_t = emb[:, t, :]
        gates = jax.nn.sigmoid(x_t @ params["W_w"].T + params["W_b"]
                               + h_t @ params["U_w"].T)
        z_t, r_t = gates[:, :n_hidden], gates[:, n_hidden:]
        c_t = jnp.tanh(x_t @ params["Wc_w"].T + params["Wc_b"]
                       + (r_t * h_t) @ params["Uc_w"].T)
        h_t = (1.0 - z_t) * h_t + z_t * c_t
        h_all.append(h_t)
    h_all = jnp.stack(h_all, axis=1)                   # (B, T, n_hidden)
    logits = h_all @ params["V_w"].T + params["V_b"]   # (B, T, vocab)
    logits_flat = logits.reshape(-1, vocab_size)
    t_flat = targets.reshape(-1)
    logp = jax.nn.log_softmax(logits_flat, axis=-1)
    loss = -jnp.mean(jnp.take_along_axis(logp, t_flat[:, None], axis=1))
    return logits_flat, loss


if __name__ == "__main__":
    key = jax.random.PRNGKey(0)
    params = init_params(key)

    # padded / fused TPU layout computed ONCE, outside the jitted forward
    padded = prepare_padded_params(params)
    padded = jax.tree_util.tree_map(jnp.asarray, padded)

    B, T = 2, 8
    kx, kt = jax.random.split(jax.random.PRNGKey(1))
    xb = jax.random.randint(kx, (B, T), 0, vocab_size, dtype=jnp.int32)
    targets = jax.random.randint(kt, (B, T), 0, vocab_size, dtype=jnp.int32)

    logits, loss = gru_forward(padded, xb, targets)
    jax.block_until_ready((logits, loss))

    ref_logits, ref_loss = gru_reference(params, xb, targets)
    assert logits.shape == (B * T, vocab_size)
    assert jnp.allclose(logits, ref_logits, atol=2e-4, rtol=2e-4), "logits mismatch"
    assert jnp.allclose(loss, ref_loss, atol=2e-4, rtol=2e-4), "loss mismatch"

    print("KERNEL_OK")
</pallas_src>

<mosaic_0001>
module attributes {stable_mosaic.version = 11 : i64} {
  func.func @gru_fused_kernel(%arg0: memref<64x128xf32, #tpu.memory_space<vmem>>, %arg1: memref<128x512xf32, #tpu.memory_space<vmem>>, %arg2: memref<1x512xf32, #tpu.memory_space<vmem>>, %arg3: memref<128x256xf32, #tpu.memory_space<vmem>>, %arg4: memref<1x256xf32, #tpu.memory_space<vmem>>, %arg5: memref<256x512xf32, #tpu.memory_space<vmem>>, %arg6: memref<256x256xf32, #tpu.memory_space<vmem>>, %arg7: memref<256x128xf32, #tpu.memory_space<vmem>>, %arg8: memref<1x128xf32, #tpu.memory_space<vmem>>, %arg9: memref<8x256xf32, #tpu.memory_space<vmem>>, %arg10: memref<64x128xf32, #tpu.memory_space<vmem>>, %arg11: memref<64x512xf32, #tpu.memory_space<vmem>>, %arg12: memref<64x256xf32, #tpu.memory_space<vmem>>, %arg13: memref<64x256xf32, #tpu.memory_space<vmem>>) attributes {dimension_semantics = [], scalar_prefetch = 0 : i64, scratch_operands = 3 : i64, tpu.core_type = #tpu.core_type<tc>} {
    %c0 = arith.constant 0 : index
    %c0_0 = arith.constant 0 : index
    %0 = vector.load %arg0[%c0, %c0_0] : memref<64x128xf32, #tpu.memory_space<vmem>>, vector<64x128xf32>
    %c0_1 = arith.constant 0 : index
    %c0_2 = arith.constant 0 : index
    %1 = vector.load %arg1[%c0_1, %c0_2] : memref<128x512xf32, #tpu.memory_space<vmem>>, vector<128x512xf32>
    %cst = arith.constant dense<0.000000e+00> : vector<64x512xf32>
    %2 = tpu.matmul %0, %1, %cst {dimension_numbers = #tpu.dot_dimension_numbers<[1], [0], [0], [1], [0, 0, 1, 1], [], []>} : vector<64x128xf32>, vector<128x512xf32>, vector<64x512xf32> -> vector<64x512xf32>
    %c0_3 = arith.constant 0 : index
    %c0_4 = arith.constant 0 : index
    %3 = vector.load %arg2[%c0_3, %c0_4] : memref<1x512xf32, #tpu.memory_space<vmem>>, vector<1x512xf32>
    %4 = vector.broadcast %3 : vector<1x512xf32> to vector<64x512xf32>
    %5 = arith.addf %2, %4 : vector<64x512xf32>
    %c0_5 = arith.constant 0 : index
    %c0_6 = arith.constant 0 : index
    %6 = vector.load %arg11[%c0_5, %c0_6] : memref<64x512xf32, #tpu.memory_space<vmem>>, vector<64x512xf32>
    tpu.vector_store %arg11[%c0_5, %c0_6], %5 {strides = array<i32>} : memref<64x512xf32, #tpu.memory_space<vmem>>, vector<64x512xf32>,
    %c0_7 = arith.constant 0 : index
    %c0_8 = arith.constant 0 : index
    %7 = vector.load %arg0[%c0_7, %c0_8] : memref<64x128xf32, #tpu.memory_space<vmem>>, vector<64x128xf32>
    %c0_9 = arith.constant 0 : index
    %c0_10 = arith.constant 0 : index
    %8 = vector.load %arg3[%c0_9, %c0_10] : memref<128x256xf32, #tpu.memory_space<vmem>>, vector<128x256xf32>
    %cst_11 = arith.constant dense<0.000000e+00> : vector<64x256xf32>
    %9 = tpu.matmul %7, %8, %cst_11 {dimension_numbers = #tpu.dot_dimension_numbers<[1], [0], [0], [1], [0, 0, 1, 1], [], []>} : vector<64x128xf32>, vector<128x256xf32>, vector<64x256xf32> -> vector<64x256xf32>
    %c0_12 = arith.constant 0 : index
    %c0_13 = arith.constant 0 : index
    %10 = vector.load %arg4[%c0_12, %c0_13] : memref<1x256xf32, #tpu.memory_space<vmem>>, vector<1x256xf32>
    %11 = vector.broadcast %10 : vector<1x256xf32> to vector<64x256xf32>
    %12 = arith.addf %9, %11 : vector<64x256xf32>
    %c0_14 = arith.constant 0 : index
    %c0_15 = arith.constant 0 : index
    %13 = vector.load %arg12[%c0_14, %c0_15] : memref<64x256xf32, #tpu.memory_space<vmem>>, vector<64x256xf32>
    tpu.vector_store %arg12[%c0_14, %c0_15], %12 {strides = array<i32>} : memref<64x256xf32, #tpu.memory_space<vmem>>, vector<64x256xf32>,
    %c0_16 = arith.constant 0 : index
    %c0_17 = arith.constant 0 : index
    %14 = vector.load %arg9[%c0_16, %c0_17] : memref<8x256xf32, #tpu.memory_space<vmem>>, vector<8x256xf32>
    %c0_i32 = arith.constant 0 : i32
    %c8_i32 = arith.constant 8 : i32
    %15 = arith.muli %c0_i32, %c8_i32 : i32
    %16 = tpu.assume_multiple %15, 8 : i32
    %17 = arith.index_cast %16 : i32 to index
    %c0_18 = arith.constant 0 : index
    %18 = vector.load %arg11[%17, %c0_18] : memref<64x512xf32, #tpu.memory_space<vmem>>, vector<8x512xf32>
    %19 = arith.index_cast %16 : i32 to index
    %c0_19 = arith.constant 0 : index
    %20 = vector.load %arg12[%19, %c0_19] : memref<64x256xf32, #tpu.memory_space<vmem>>, vector<8x256xf32>
    %c0_20 = arith.constant 0 : index
    %c0_21 = arith.constant 0 : index
    %21 = vector.load %arg5[%c0_20, %c0_21] : memref<256x512xf32, #tpu.memory_space<vmem>>, vector<256x512xf32>
    %cst_22 = arith.constant dense<0.000000e+00> : vector<8x512xf32>
    %22 = tpu.matmul %14, %21, %cst_22 {dimension_numbers = #tpu.dot_dimension_numbers<[1], [0], [0], [1], [0, 0, 1, 1], [], []>} : vector<8x256xf32>, vector<256x512xf32>, vector<8x512xf32> -> vector<8x512xf32>
    %23 = arith.addf %18, %22 : vector<8x512xf32>
    %24 = arith.negf %23 : vector<8x512xf32>
    %25 = math.exp %24 : vector<8x512xf32>
    %cst_23 = arith.constant 1.000000e+00 : f32
    %26 = vector.broadcast %cst_23 : f32 to vector<8x512xf32>
    %27 = arith.addf %26, %25 : vector<8x512xf32>
    %28 = arith.divf %26, %27 : vector<8x512xf32>
    %29 = vector.extract_strided_slice %28 {offsets = [0, 0], sizes = [8, 256], strides = [1, 1]} : vector<8x512xf32> to vector<8x256xf32>
    %30 = vector.extract_strided_slice %28 {offsets = [0, 256], sizes = [8, 256], strides = [1, 1]} : vector<8x512xf32> to vector<8x256xf32>
    %31 = arith.mulf %30, %14 : vector<8x256xf32>
    %c0_24 = arith.constant 0 : index
    %c0_25 = arith.constant 0 : index
    %32 = vector.load %arg6[%c0_24, %c0_25] : memref<256x256xf32, #tpu.memory_space<vmem>>, vector<256x256xf32>
    %cst_26 = arith.constant dense<0.000000e+00> : vector<8x256xf32>
    %33 = tpu.matmul %31, %32, %cst_26 {dimension_numbers = #tpu.dot_dimension_numbers<[1], [0], [0], [1], [0, 0, 1, 1], [], []>} : vector<8x256xf32>, vector<256x256xf32>, vector<8x256xf32> -> vector<8x256xf32>
    %34 = arith.addf %20, %33 : vector<8x256xf32>
    %35 = math.tanh %34 : vector<8x256xf32>
    %36 = arith.subf %35, %14 : vector<8x256xf32>
    %37 = arith.mulf %29, %36 : vector<8x256xf32>
    %38 = arith.addf %14, %37 : vector<8x256xf32>
    %39 = arith.index_cast %16 : i32 to index
    %c0_27 = arith.constant 0 : index
    %40 = vector.load %arg13[%39, %c0_27] : memref<64x256xf32, #tpu.memory_space<vmem>>, vector<8x256xf32>
    tpu.vector_store %arg13[%39, %c0_27], %38 {strides = array<i32>} : memref<64x256xf32, #tpu.memory_space<vmem>>, vector<8x256xf32>,
    %c1_i32 = arith.constant 1 : i32
    %c8_i32_28 = arith.constant 8 : i32
    %41 = arith.muli %c1_i32, %c8_i32_28 : i32
    %42 = tpu.assume_multiple %41, 8 : i32
    %43 = arith.index_cast %42 : i32 to index
    %c0_29 = arith.constant 0 : index
    %44 = vector.load %arg11[%43, %c0_29] : memref<64x512xf32, #tpu.memory_space<vmem>>, vector<8x512xf32>
    %45 = arith.index_cast %42 : i32 to index
    %c0_30 = arith.constant 0 : index
    %46 = vector.load %arg12[%45, %c0_30] : memref<64x256xf32, #tpu.memory_space<vmem>>, vector<8x256xf32>
    %c0_31 = arith.constant 0 : index
    %c0_32 = arith.constant 0 : index
    %47 = vector.load %arg5[%c0_31, %c0_32] : memref<256x512xf32, #tpu.memory_space<vmem>>, vector<256x512xf32>
    %cst_33 = arith.constant dense<0.000000e+00> : vector<8x512xf32>
    %48 = tpu.matmul %38, %47, %cst_33 {dimension_numbers = #tpu.dot_dimension_numbers<[1], [0], [0], [1], [0, 0, 1, 1], [], []>} : vector<8x256xf32>, vector<256x512xf32>, vector<8x512xf32> -> vector<8x512xf32>
    %49 = arith.addf %44, %48 : vector<8x512xf32>
    %50 = arith.negf %49 : vector<8x512xf32>
    %51 = math.exp %50 : vector<8x512xf32>
    %cst_34 = arith.constant 1.000000e+00 : f32
    %52 = vector.broadcast %cst_34 : f32 to vector<8x512xf32>
    %53 = arith.addf %52, %51 : vector<8x512xf32>
    %54 = arith.divf %52, %53 : vector<8x512xf32>
    %55 = vector.extract_strided_slice %54 {offsets = [0, 0], sizes = [8, 256], strides = [1, 1]} : vector<8x512xf32> to vector<8x256xf32>
    %56 = vector.extract_strided_slice %54 {offsets = [0, 256], sizes = [8, 256], strides = [1, 1]} : vector<8x512xf32> to vector<8x256xf32>
    %57 = arith.mulf %56, %38 : vector<8x256xf32>
    %c0_35 = arith.constant 0 : index
    %c0_36 = arith.constant 0 : index
    %58 = vector.load %arg6[%c0_35, %c0_36] : memref<256x256xf32, #tpu.memory_space<vmem>>, vector<256x256xf32>
    %cst_37 = arith.constant dense<0.000000e+00> : vector<8x256xf32>
    %59 = tpu.matmul %57, %58, %cst_37 {dimension_numbers = #tpu.dot_dimension_numbers<[1], [0], [0], [1], [0, 0, 1, 1], [], []>} : vector<8x256xf32>, vector<256x256xf32>, vector<8x256xf32> -> vector<8x256xf32>
    %60 = arith.addf %46, %59 : vector<8x256xf32>
    %61 = math.tanh %60 : vector<8x256xf32>
    %62 = arith.subf %61, %38 : vector<8x256xf32>
    %63 = arith.mulf %55, %62 : vector<8x256xf32>
    %64 = arith.addf %38, %63 : vector<8x256xf32>
    %65 = arith.index_cast %42 : i32 to index
    %c0_38 = arith.constant 0 : index
    %66 = vector.load %arg13[%65, %c0_38] : memref<64x256xf32, #tpu.memory_space<vmem>>, vector<8x256xf32>
    tpu.vector_store %arg13[%65, %c0_38], %64 {strides = array<i32>} : memref<64x256xf32, #tpu.memory_space<vmem>>, vector<8x256xf32>,
    %c2_i32 = arith.constant 2 : i32
    %c8_i32_39 = arith.constant 8 : i32
    %67 = arith.muli %c2_i32, %c8_i32_39 : i32
    %68 = tpu.assume_multiple %67, 8 : i32
    %69 = arith.index_cast %68 : i32 to index
    %c0_40 = arith.constant 0 : index
    %70 = vector.load %arg11[%69, %c0_40] : memref<64x512xf32, #tpu.memory_space<vmem>>, vector<8x512xf32>
    %71 = arith.index_cast %68 : i32 to index
    %c0_41 = arith.constant 0 : index
    %72 = vector.load %arg12[%71, %c0_41] : memref<64x256xf32, #tpu.memory_space<vmem>>, vector<8x256xf32>
    %c0_42 = arith.constant 0 : index
    %c0_43 = arith.constant 0 : index
    %73 = vector.load %arg5[%c0_42, %c0_43] : memref<256x512xf32, #tpu.memory_space<vmem>>, vector<256x512xf32>
    %cst_44 = arith.constant dense<0.000000e+00> : vector<8x512xf32>
    %74 = tpu.matmul %64, %73, %cst_44 {dimension_numbers = #tpu.dot_dimension_numbers<[1], [0], [0], [1], [0, 0, 1, 1], [], []>} : vector<8x256xf32>, vector<256x512xf32>, vector<8x512xf32> -> vector<8x512xf32>
    %75 = arith.addf %70, %74 : vector<8x512xf32>
    %76 = arith.negf %75 : vector<8x512xf32>
    %77 = math.exp %76 : vector<8x512xf32>
    %cst_45 = arith.constant 1.000000e+00 : f32
    %78 = vector.broadcast %cst_45 : f32 to vector<8x512xf32>
    %79 = arith.addf %78, %77 : vector<8x512xf32>
    %80 = arith.divf %78, %79 : vector<8x512xf32>
    %81 = vector.extract_strided_slice %80 {offsets = [0, 0], sizes = [8, 256], strides = [1, 1]} : vector<8x512xf32> to vector<8x256xf32>
    %82 = vector.extract_strided_slice %80 {offsets = [0, 256], sizes = [8, 256], strides = [1, 1]} : vector<8x512xf32> to vector<8x256xf32>
    %83 = arith.mulf %82, %64 : vector<8x256xf32>
    %c0_46 = arith.constant 0 : index
    %c0_47 = arith.constant 0 : index
    %84 = vector.load %arg6[%c0_46, %c0_47] : memref<256x256xf32, #tpu.memory_space<vmem>>, vector<256x256xf32>
    %cst_48 = arith.constant dense<0.000000e+00> : vector<8x256xf32>
    %85 = tpu.matmul %83, %84, %cst_48 {dimension_numbers = #tpu.dot_dimension_numbers<[1], [0], [0], [1], [0, 0, 1, 1], [], []>} : vector<8x256xf32>, vector<256x256xf32>, vector<8x256xf32> -> vector<8x256xf32>
    %86 = arith.addf %72, %85 : vector<8x256xf32>
    %87 = math.tanh %86 : vector<8x256xf32>
    %88 = arith.subf %87, %64 : vector<8x256xf32>
    %89 = arith.mulf %81, %88 : vector<8x256xf32>
    %90 = arith.addf %64, %89 : vector<8x256xf32>
    %91 = arith.index_cast %68 : i32 to index
    %c0_49 = arith.constant 0 : index
    %92 = vector.load %arg13[%91, %c0_49] : memref<64x256xf32, #tpu.memory_space<vmem>>, vector<8x256xf32>
    tpu.vector_store %arg13[%91, %c0_49], %90 {strides = array<i32>} : memref<64x256xf32, #tpu.memory_space<vmem>>, vector<8x256xf32>,
    %c3_i32 = arith.constant 3 : i32
    %c8_i32_50 = arith.constant 8 : i32
    %93 = arith.muli %c3_i32, %c8_i32_50 : i32
    %94 = tpu.assume_multiple %93, 8 : i32
    %95 = arith.index_cast %94 : i32 to index
    %c0_51 = arith.constant 0 : index
    %96 = vector.load %arg11[%95, %c0_51] : memref<64x512xf32, #tpu.memory_space<vmem>>, vector<8x512xf32>
    %97 = arith.index_cast %94 : i32 to index
    %c0_52 = arith.constant 0 : index
    %98 = vector.load %arg12[%97, %c0_52] : memref<64x256xf32, #tpu.memory_space<vmem>>, vector<8x256xf32>
    %c0_53 = arith.constant 0 : index
    %c0_54 = arith.constant 0 : index
    %99 = vector.load %arg5[%c0_53, %c0_54] : memref<256x512xf32, #tpu.memory_space<vmem>>, vector<256x512xf32>
    %cst_55 = arith.constant dense<0.000000e+00> : vector<8x512xf32>
    %100 = tpu.matmul %90, %99, %cst_55 {dimension_numbers = #tpu.dot_dimension_numbers<[1], [0], [0], [1], [0, 0, 1, 1], [], []>} : vector<8x256xf32>, vector<256x512xf32>, vector<8x512xf32> -> vector<8x512xf32>
    %101 = arith.addf %96, %100 : vector<8x512xf32>
    %102 = arith.negf %101 : vector<8x512xf32>
    %103 = math.exp %102 : vector<8x512xf32>
    %cst_56 = arith.constant 1.000000e+00 : f32
    %104 = vector.broadcast %cst_56 : f32 to vector<8x512xf32>
    %105 = arith.addf %104, %103 : vector<8x512xf32>
    %106 = arith.divf %104, %105 : vector<8x512xf32>
    %107 = vector.extract_strided_slice %106 {offsets = [0, 0], sizes = [8, 256], strides = [1, 1]} : vector<8x512xf32> to vector<8x256xf32>
    %108 = vector.extract_strided_slice %106 {offsets = [0, 256], sizes = [8, 256], strides = [1, 1]} : vector<8x512xf32> to vector<8x256xf32>
    %109 = arith.mulf %108, %90 : vector<8x256xf32>
    %c0_57 = arith.constant 0 : index
    %c0_58 = arith.constant 0 : index
    %110 = vector.load %arg6[%c0_57, %c0_58] : memref<256x256xf32, #tpu.memory_space<vmem>>, vector<256x256xf32>
    %cst_59 = arith.constant dense<0.000000e+00> : vector<8x256xf32>
    %111 = tpu.matmul %109, %110, %cst_59 {dimension_numbers = #tpu.dot_dimension_numbers<[1], [0], [0], [1], [0, 0, 1, 1], [], []>} : vector<8x256xf32>, vector<256x256xf32>, vector<8x256xf32> -> vector<8x256xf32>
    %112 = arith.addf %98, %111 : vector<8x256xf32>
    %113 = math.tanh %112 : vector<8x256xf32>
    %114 = arith.subf %113, %90 : vector<8x256xf32>
    %115 = arith.mulf %107, %114 : vector<8x256xf32>
    %116 = arith.addf %90, %115 : vector<8x256xf32>
    %117 = arith.index_cast %94 : i32 to index
    %c0_60 = arith.constant 0 : index
    %118 = vector.load %arg13[%117, %c0_60] : memref<64x256xf32, #tpu.memory_space<vmem>>, vector<8x256xf32>
    tpu.vector_store %arg13[%117, %c0_60], %116 {strides = array<i32>} : memref<64x256xf32, #tpu.memory_space<vmem>>, vector<8x256xf32>,
    %c4_i32 = arith.constant 4 : i32
    %c8_i32_61 = arith.constant 8 : i32
    %119 = arith.muli %c4_i32, %c8_i32_61 : i32
    %120 = tpu.assume_multiple %119, 8 : i32
    %121 = arith.index_cast %120 : i32 to index
    %c0_62 = arith.constant 0 : index
    %122 = vector.load %arg11[%121, %c0_62] : memref<64x512xf32, #tpu.memory_space<vmem>>, vector<8x512xf32>
    %123 = arith.index_cast %120 : i32 to index
    %c0_63 = arith.constant 0 : index
    %124 = vector.load %arg12[%123, %c0_63] : memref<64x256xf32, #tpu.memory_space<vmem>>, vector<8x256xf32>
    %c0_64 = arith.constant 0 : index
    %c0_65 = arith.constant 0 : index
    %125 = vector.load %arg5[%c0_64, %c0_65] : memref<256x512xf32, #tpu.memory_space<vmem>>, vector<256x512xf32>
    %cst_66 = arith.constant dense<0.000000e+00> : vector<8x512xf32>
    %126 = tpu.matmul %116, %125, %cst_66 {dimension_numbers = #tpu.dot_dimension_numbers<[1], [0], [0], [1], [0, 0, 1, 1], [], []>} : vector<8x256xf32>, vector<256x512xf32>, vector<8x512xf32> -> vector<8x512xf32>
    %127 = arith.addf %122, %126 : vector<8x512xf32>
    %128 = arith.negf %127 : vector<8x512xf32>
    %129 = math.exp %128 : vector<8x512xf32>
    %cst_67 = arith.constant 1.000000e+00 : f32
    %130 = vector.broadcast %cst_67 : f32 to vector<8x512xf32>
    %131 = arith.addf %130, %129 : vector<8x512xf32>
    %132 = arith.divf %130, %131 : vector<8x512xf32>
    %133 = vector.extract_strided_slice %132 {offsets = [0, 0], sizes = [8, 256], strides = [1, 1]} : vector<8x512xf32> to vector<8x256xf32>
    %134 = vector.extract_strided_slice %132 {offsets = [0, 256], sizes = [8, 256], strides = [1, 1]} : vector<8x512xf32> to vector<8x256xf32>
    %135 = arith.mulf %134, %116 : vector<8x256xf32>
    %c0_68 = arith.constant 0 : index
    %c0_69 = arith.constant 0 : index
    %136 = vector.load %arg6[%c0_68, %c0_69] : memref<256x256xf32, #tpu.memory_space<vmem>>, vector<256x256xf32>
    %cst_70 = arith.constant dense<0.000000e+00> : vector<8x256xf32>
    %137 = tpu.matmul %135, %136, %cst_70 {dimension_numbers = #tpu.dot_dimension_numbers<[1], [0], [0], [1], [0, 0, 1, 1], [], []>} : vector<8x256xf32>, vector<256x256xf32>, vector<8x256xf32> -> vector<8x256xf32>
    %138 = arith.addf %124, %137 : vector<8x256xf32>
    %139 = math.tanh %138 : vector<8x256xf32>
    %140 = arith.subf %139, %116 : vector<8x256xf32>
    %141 = arith.mulf %133, %140 : vector<8x256xf32>
    %142 = arith.addf %116, %141 : vector<8x256xf32>
    %143 = arith.index_cast %120 : i32 to index
    %c0_71 = arith.constant 0 : index
    %144 = vector.load %arg13[%143, %c0_71] : memref<64x256xf32, #tpu.memory_space<vmem>>, vector<8x256xf32>
    tpu.vector_store %arg13[%143, %c0_71], %142 {strides = array<i32>} : memref<64x256xf32, #tpu.memory_space<vmem>>, vector<8x256xf32>,
    %c5_i32 = arith.constant 5 : i32
    %c8_i32_72 = arith.constant 8 : i32
    %145 = arith.muli %c5_i32, %c8_i32_72 : i32
    %146 = tpu.assume_multiple %145, 8 : i32
    %147 = arith.index_cast %146 : i32 to index
    %c0_73 = arith.constant 0 : index
    %148 = vector.load %arg11[%147, %c0_73] : memref<64x512xf32, #tpu.memory_space<vmem>>, vector<8x512xf32>
    %149 = arith.index_cast %146 : i32 to index
    %c0_74 = arith.constant 0 : index
    %150 = vector.load %arg12[%149, %c0_74] : memref<64x256xf32, #tpu.memory_space<vmem>>, vector<8x256xf32>
    %c0_75 = arith.constant 0 : index
    %c0_76 = arith.constant 0 : index
    %151 = vector.load %arg5[%c0_75, %c0_76] : memref<256x512xf32, #tpu.memory_space<vmem>>, vector<256x512xf32>
    %cst_77 = arith.constant dense<0.000000e+00> : vector<8x512xf32>
    %152 = tpu.matmul %142, %151, %cst_77 {dimension_numbers = #tpu.dot_dimension_numbers<[1], [0], [0], [1], [0, 0, 1, 1], [], []>} : vector<8x256xf32>, vector<256x512xf32>, vector<8x512xf32> -> vector<8x512xf32>
    %153 = arith.addf %148, %152 : vector<8x512xf32>
    %154 = arith.negf %153 : vector<8x512xf32>
    %155 = math.exp %154 : vector<8x512xf32>
    %cst_78 = arith.constant 1.000000e+00 : f32
    %156 = vector.broadcast %cst_78 : f32 to vector<8x512xf32>
    %157 = arith.addf %156, %155 : vector<8x512xf32>
    %158 = arith.divf %156, %157 : vector<8x512xf32>
    %159 = vector.extract_strided_slice %158 {offsets = [0, 0], sizes = [8, 256], strides = [1, 1]} : vector<8x512xf32> to vector<8x256xf32>
    %160 = vector.extract_strided_slice %158 {offsets = [0, 256], sizes = [8, 256], strides = [1, 1]} : vector<8x512xf32> to vector<8x256xf32>
    %161 = arith.mulf %160, %142 : vector<8x256xf32>
    %c0_79 = arith.constant 0 : index
    %c0_80 = arith.constant 0 : index
    %162 = vector.load %arg6[%c0_79, %c0_80] : memref<256x256xf32, #tpu.memory_space<vmem>>, vector<256x256xf32>
    %cst_81 = arith.constant dense<0.000000e+00> : vector<8x256xf32>
    %163 = tpu.matmul %161, %162, %cst_81 {dimension_numbers = #tpu.dot_dimension_numbers<[1], [0], [0], [1], [0, 0, 1, 1], [], []>} : vector<8x256xf32>, vector<256x256xf32>, vector<8x256xf32> -> vector<8x256xf32>
    %164 = arith.addf %150, %163 : vector<8x256xf32>
    %165 = math.tanh %164 : vector<8x256xf32>
    %166 = arith.subf %165, %142 : vector<8x256xf32>
    %167 = arith.mulf %159, %166 : vector<8x256xf32>
    %168 = arith.addf %142, %167 : vector<8x256xf32>
    %169 = arith.index_cast %146 : i32 to index
    %c0_82 = arith.constant 0 : index
    %170 = vector.load %arg13[%169, %c0_82] : memref<64x256xf32, #tpu.memory_space<vmem>>, vector<8x256xf32>
    tpu.vector_store %arg13[%169, %c0_82], %168 {strides = array<i32>} : memref<64x256xf32, #tpu.memory_space<vmem>>, vector<8x256xf32>,
    %c6_i32 = arith.constant 6 : i32
    %c8_i32_83 = arith.constant 8 : i32
    %171 = arith.muli %c6_i32, %c8_i32_83 : i32
    %172 = tpu.assume_multiple %171, 8 : i32
    %173 = arith.index_cast %172 : i32 to index
    %c0_84 = arith.constant 0 : index
    %174 = vector.load %arg11[%173, %c0_84] : memref<64x512xf32, #tpu.memory_space<vmem>>, vector<8x512xf32>
    %175 = arith.index_cast %172 : i32 to index
    %c0_85 = arith.constant 0 : index
    %176 = vector.load %arg12[%175, %c0_85] : memref<64x256xf32, #tpu.memory_space<vmem>>, vector<8x256xf32>
    %c0_86 = arith.constant 0 : index
    %c0_87 = arith.constant 0 : index
    %177 = vector.load %arg5[%c0_86, %c0_87] : memref<256x512xf32, #tpu.memory_space<vmem>>, vector<256x512xf32>
    %cst_88 = arith.constant dense<0.000000e+00> : vector<8x512xf32>
    %178 = tpu.matmul %168, %177, %cst_88 {dimension_numbers = #tpu.dot_dimension_numbers<[1], [0], [0], [1], [0, 0, 1, 1], [], []>} : vector<8x256xf32>, vector<256x512xf32>, vector<8x512xf32> -> vector<8x512xf32>
    %179 = arith.addf %174, %178 : vector<8x512xf32>
    %180 = arith.negf %179 : vector<8x512xf32>
    %181 = math.exp %180 : vector<8x512xf32>
    %cst_89 = arith.constant 1.000000e+00 : f32
    %182 = vector.broadcast %cst_89 : f32 to vector<8x512xf32>
    %183 = arith.addf %182, %181 : vector<8x512xf32>
    %184 = arith.divf %182, %183 : vector<8x512xf32>
    %185 = vector.extract_strided_slice %184 {offsets = [0, 0], sizes = [8, 256], strides = [1, 1]} : vector<8x512xf32> to vector<8x256xf32>
    %186 = vector.extract_strided_slice %184 {offsets = [0, 256], sizes = [8, 256], strides = [1, 1]} : vector<8x512xf32> to vector<8x256xf32>
    %187 = arith.mulf %186, %168 : vector<8x256xf32>
    %c0_90 = arith.constant 0 : index
    %c0_91 = arith.constant 0 : index
    %188 = vector.load %arg6[%c0_90, %c0_91] : memref<256x256xf32, #tpu.memory_space<vmem>>, vector<256x256xf32>
    %cst_92 = arith.constant dense<0.000000e+00> : vector<8x256xf32>
    %189 = tpu.matmul %187, %188, %cst_92 {dimension_numbers = #tpu.dot_dimension_numbers<[1], [0], [0], [1], [0, 0, 1, 1], [], []>} : vector<8x256xf32>, vector<256x256xf32>, vector<8x256xf32> -> vector<8x256xf32>
    %190 = arith.addf %176, %189 : vector<8x256xf32>
    %191 = math.tanh %190 : vector<8x256xf32>
    %192 = arith.subf %191, %168 : vector<8x256xf32>
    %193 = arith.mulf %185, %192 : vector<8x256xf32>
    %194 = arith.addf %168, %193 : vector<8x256xf32>
    %195 = arith.index_cast %172 : i32 to index
    %c0_93 = arith.constant 0 : index
    %196 = vector.load %arg13[%195, %c0_93] : memref<64x256xf32, #tpu.memory_space<vmem>>, vector<8x256xf32>
    tpu.vector_store %arg13[%195, %c0_93], %194 {strides = array<i32>} : memref<64x256xf32, #tpu.memory_space<vmem>>, vector<8x256xf32>,
    %c7_i32 = arith.constant 7 : i32
    %c8_i32_94 = arith.constant 8 : i32
    %197 = arith.muli %c7_i32, %c8_i32_94 : i32
    %198 = tpu.assume_multiple %197, 8 : i32
    %199 = arith.index_cast %198 : i32 to index
    %c0_95 = arith.constant 0 : index
    %200 = vector.load %arg11[%199, %c0_95] : memref<64x512xf32, #tpu.memory_space<vmem>>, vector<8x512xf32>
    %201 = arith.index_cast %198 : i32 to index
    %c0_96 = arith.constant 0 : index
    %202 = vector.load %arg12[%201, %c0_96] : memref<64x256xf32, #tpu.memory_space<vmem>>, vector<8x256xf32>
    %c0_97 = arith.constant 0 : index
    %c0_98 = arith.constant 0 : index
    %203 = vector.load %arg5[%c0_97, %c0_98] : memref<256x512xf32, #tpu.memory_space<vmem>>, vector<256x512xf32>
    %cst_99 = arith.constant dense<0.000000e+00> : vector<8x512xf32>
    %204 = tpu.matmul %194, %203, %cst_99 {dimension_numbers = #tpu.dot_dimension_numbers<[1], [0], [0], [1], [0, 0, 1, 1], [], []>} : vector<8x256xf32>, vector<256x512xf32>, vector<8x512xf32> -> vector<8x512xf32>
    %205 = arith.addf %200, %204 : vector<8x512xf32>
    %206 = arith.negf %205 : vector<8x512xf32>
    %207 = math.exp %206 : vector<8x512xf32>
    %cst_100 = arith.constant 1.000000e+00 : f32
    %208 = vector.broadcast %cst_100 : f32 to vector<8x512xf32>
    %209 = arith.addf %208, %207 : vector<8x512xf32>
    %210 = arith.divf %208, %209 : vector<8x512xf32>
    %211 = vector.extract_strided_slice %210 {offsets = [0, 0], sizes = [8, 256], strides = [1, 1]} : vector<8x512xf32> to vector<8x256xf32>
    %212 = vector.extract_strided_slice %210 {offsets = [0, 256], sizes = [8, 256], strides = [1, 1]} : vector<8x512xf32> to vector<8x256xf32>
    %213 = arith.mulf %212, %194 : vector<8x256xf32>
    %c0_101 = arith.constant 0 : index
    %c0_102 = arith.constant 0 : index
    %214 = vector.load %arg6[%c0_101, %c0_102] : memref<256x256xf32, #tpu.memory_space<vmem>>, vector<256x256xf32>
    %cst_103 = arith.constant dense<0.000000e+00> : vector<8x256xf32>
    %215 = tpu.matmul %213, %214, %cst_103 {dimension_numbers = #tpu.dot_dimension_numbers<[1], [0], [0], [1], [0, 0, 1, 1], [], []>} : vector<8x256xf32>, vector<256x256xf32>, vector<8x256xf32> -> vector<8x256xf32>
    %216 = arith.addf %202, %215 : vector<8x256xf32>
    %217 = math.tanh %216 : vector<8x256xf32>
    %218 = arith.subf %217, %194 : vector<8x256xf32>
    %219 = arith.mulf %211, %218 : vector<8x256xf32>
    %220 = arith.addf %194, %219 : vector<8x256xf32>
    %221 = arith.index_cast %198 : i32 to index
    %c0_104 = arith.constant 0 : index
    %222 = vector.load %arg13[%221, %c0_104] : memref<64x256xf32, #tpu.memory_space<vmem>>, vector<8x256xf32>
    tpu.vector_store %arg13[%221, %c0_104], %220 {strides = array<i32>} : memref<64x256xf32, #tpu.memory_space<vmem>>, vector<8x256xf32>,
    %c8_i32_105 = arith.constant 8 : i32
    %c0_106 = arith.constant 0 : index
    %c0_107 = arith.constant 0 : index
    %223 = vector.load %arg13[%c0_106, %c0_107] : memref<64x256xf32, #tpu.memory_space<vmem>>, vector<64x256xf32>
    %c0_108 = arith.constant 0 : index
    %c0_109 = arith.constant 0 : index
    %224 = vector.load %arg7[%c0_108, %c0_109] : memref<256x128xf32, #tpu.memory_space<vmem>>, vector<256x128xf32>
    %cst_110 = arith.constant dense<0.000000e+00> : vector<64x128xf32>
    %225 = tpu.matmul %223, %224, %cst_110 {dimension_numbers = #tpu.dot_dimension_numbers<[1], [0], [0], [1], [0, 0, 1, 1], [], []>} : vector<64x256xf32>, vector<256x128xf32>, vector<64x128xf32> -> vector<64x128xf32>
    %c0_111 = arith.constant 0 : index
    %c0_112 = arith.constant 0 : index
    %226 = vector.load %arg8[%c0_111, %c0_112] : memref<1x128xf32, #tpu.memory_space<vmem>>, vector<1x128xf32>
    %227 = vector.broadcast %226 : vector<1x128xf32> to vector<64x128xf32>
    %228 = arith.addf %225, %227 : vector<64x128xf32>
    %c0_113 = arith.constant 0 : index
    %c0_114 = arith.constant 0 : index
    %229 = vector.load %arg10[%c0_113, %c0_114] : memref<64x128xf32, #tpu.memory_space<vmem>>, vector<64x128xf32>
    tpu.vector_store %arg10[%c0_113, %c0_114], %228 {strides = array<i32>} : memref<64x128xf32, #tpu.memory_space<vmem>>, vector<64x128xf32>,
    return
  }
}

</mosaic_0001>

<bundles_post_ra>
// kernel: gru_forward.1
= control target key start
LH: loop header
LB: loop body
LE: loop exit
PB: predicated region body
PF: predicated region fallthrough
CT: control target
= control target key end

     0   :  { %15 = vsyncpa [#allocation6], 0  ;;  %s8247_s0 = inlined_call_operand.vmem [shape: f32[64,128], index: 0, kind: input, shape index: {}]   ;;  %s8248_s1 = inlined_call_operand.hbm [shape: f32[128,512], index: 1, kind: input, shape index: {}]   ;;  %s8249_s2 = inlined_call_operand.vmem [shape: f32[1,512], index: 2, kind: input, shape index: {}]   ;;  %s8250_s3 = inlined_call_operand.vmem [shape: f32[128,256], index: 3, kind: input, shape index: {}]   ;;  %s8251_s4 = inlined_call_operand.vmem [shape: f32[1,256], index: 4, kind: input, shape index: {}]   ;;  %s8252_s5 = inlined_call_operand.hbm [shape: f32[256,512], index: 5, kind: input, shape index: {}]   ;;  %s8253_s6 = inlined_call_operand.hbm [shape: f32[256,256], index: 6, kind: input, shape index: {}]   ;;  %s8254_s7 = inlined_call_operand.hbm [shape: f32[256,128], index: 7, kind: input, shape index: {}]   ;;  %s8255_s8 = inlined_call_operand.vmem [shape: f32[1,128], index: 8, kind: input, shape index: {}]   ;;  %s8256_s9 = inlined_call_operand.vmem [shape: f32[8,256], index: 9, kind: input, shape index: {}]   ;;  %s8257_s10 = inlined_call_operand.vmem [shape: f32[64,128], index: 10, kind: output, shape index: {}]  }
   0x1   :  { %16 = vsyncpa [#allocation8], 0 }
   0x2   :  { %17 = vsyncpa [#allocation11], 0  ;;  %s4858_s13 = smov [#allocation7]   ;;  %s4859_s15 = smov [#allocation5]  }
   0x3   :  { %s43_s14 = sshll.u32 %s4858_s13, 4  ;;  %s25_s16 = sshll.u32 %s4859_s15, 4  ;;  %s44_s14 = int_to_ptr.vmem [resolvable:$true] %s43_s14  ;;  %s26_s16 = int_to_ptr.vmem [resolvable:$true] %s25_s16 }
   0x4   :  { %s4780_s17 = scalar_lea.vmem %s44_s14, 16384  ;;  %p4785_p1 = scmp.lt.s32.totalorder %s44_s14, %s44_s14 }
   0x5   :  { %p4781_p0 = scmp.ne.s32.totalorder %s44_s14, %s4780_s17  ;;  %p4786_p2 = scmp.lt.s32.totalorder %s4780_s17, %s4780_s17 }
   0x7   :  { %p4787_p3 = por %p4786_p2, %p4785_p1 }
   0x9   :  { %p4788_p4 = pnand %p4787_p3, %p4781_p0 }
   0xb   :  { %4791 = shalt.err (!%p4788_p4)
}
   0xc   :  { %s4860_s18 = smov 512   ;;  %s4861_s19 = smov 32  }
   0xd   :  { %49 = dma.hbm_to_vmem [thread:$0]  %s8252_s5, 16384, %s44_s14, [#allocation8], %s4860_s18, %s4860_s18, %s4861_s19  }
   0xe   :  { %s4800_s22 = scalar_lea.vmem %s26_s16, 8192  ;;  %p4805_p6 = scmp.lt.s32.totalorder %s26_s16, %s26_s16 }
   0xf   :  { %p4801_p5 = scmp.ne.s32.totalorder %s26_s16, %s4800_s22  ;;  %p4806_p7 = scmp.lt.s32.totalorder %s4800_s22, %s4800_s22 }
  0x11   :  { %p4807_p8 = por %p4806_p7, %p4805_p6 }
  0x13   :  { %p4808_p9 = pnand %p4807_p8, %p4801_p5 }
  0x15   :  { %4811 = shalt.err (!%p4808_p9)
}
  0x16   :  { %31 = dma.hbm_to_vmem [thread:$0]  %s8248_s1, 8192, %s26_s16, [#allocation6], %s4860_s18, %s4860_s18, %s4861_s19  }
  0x17   :  { %s4862_s25 = smov [#allocation9]  }
  0x18   :  { %s55_s26 = sshll.u32 %s4862_s25, 4  ;;  %s56_s26 = int_to_ptr.vmem [resolvable:$true] %s55_s26 }
  0x19   :  { %s4820_s27 = scalar_lea.vmem %s56_s26, 8192  ;;  %p4825_p11 = scmp.lt.s32.totalorder %s56_s26, %s56_s26 }
  0x1a   :  { %p4821_p10 = scmp.ne.s32.totalorder %s56_s26, %s4820_s27  ;;  %p4826_p12 = scmp.lt.s32.totalorder %s4820_s27, %s4820_s27 }
  0x1c   :  { %p4827_p13 = por %p4826_p12, %p4825_p11 }
  0x1e   :  { %p4828_p0 = pnand %p4827_p13, %p4821_p10 }
  0x20   :  { %4831 = shalt.err (!%p4828_p0)
}
  0x21   :  { %s4863_s5 = smov 256   ;;  %s4864_s28 = smov 16  }
  0x22   :  { %61 = dma.hbm_to_vmem [thread:$0]  %s8253_s6, 8192, %s56_s26, [#allocation8], %s4863_s5, %s4863_s5, %s4864_s28  }
  0x23   :  { %s4865_s11 = smov [#allocation10]  }
  0x24   :  { %s67_s12 = sshll.u32 %s4865_s11, 4  ;;  %s68_s12 = int_to_ptr.vmem [resolvable:$true] %s67_s12 }
  0x25   :  { %s4840_s1 = scalar_lea.vmem %s68_s12, 4096  ;;  %p4845_p2 = scmp.lt.s32.totalorder %s68_s12, %s68_s12 }
  0x26   :  { %p4841_p1 = scmp.ne.s32.totalorder %s68_s12, %s4840_s1  ;;  %p4846_p3 = scmp.lt.s32.totalorder %s4840_s1, %s4840_s1 }
  0x28   :  { %p4847_p4 = por %p4846_p3, %p4845_p2 }
  0x2a   :  { %p4848_p5 = pnand %p4847_p4, %p4841_p1 }
  0x2c   :  { %4851 = shalt.err (!%p4848_p5)
}
  0x2d   :  { %s4866_s13 = smov 128   ;;  %s4867_s14 = smov 8  }
  0x2e   :  { %73 = dma.hbm_to_vmem [thread:$0]  %s8254_s7, 4096, %s68_s12, [#allocation11], %s4866_s13, %s4866_s13, %s4867_s14  }
  0x2f   :  { %4852 = dma.done.wait [#allocation6], 8192  }
  0x30   :  { %4853 = vsyncadd [#allocation6], 4294959104 }
  0x31   :  { %4854 = dma.done.wait [#allocation8], 24576  }
  0x32   :  { %4855 = vsyncadd [#allocation8], 4294942720 }
  0x33   :  { %4856 = dma.done.wait [#allocation11], 4096  }
  0x34   :  { %4857 = vsyncadd [#allocation11], 4294963200  ;;  %v4868_v0 = vmov 0.0   ;;  %v159_v1 = vld [vmem:[#allocation5 + $0x1e8] sm:$0xff]  ;;  %v161_v2 = vld [vmem:[#allocation5 + $0x1f8] sm:$0xff] }
  0x35   :  { %248 = vmatprep.mubr.f32.mxu0 %v4868_v0  ;;  %361 = vmatprep.mubr.f32.mxu1 %v4868_v0  ;;  %v158_v3 = vld [vmem:[#allocation5 + $0x1e0] sm:$0xff]  ;;  %v160_v4 = vld [vmem:[#allocation5 + $0x1f0] sm:$0xff]  ;;  %v155_v5 = vld [vmem:[#allocation5 + $0x1c8] sm:$0xff] }
  0x36   :  { %184 = vmatprep.subr.mxu0 %v159_v1  ;;  %297 = vmatprep.subr.mxu1 %v161_v2  ;;  %v157_v6 = vld [vmem:[#allocation5 + $0x1d8] sm:$0xff]  ;;  %v154_v7 = vld [vmem:[#allocation5 + $0x1c0] sm:$0xff]  ;;  %v156_v8 = vld [vmem:[#allocation5 + $0x1d0] sm:$0xff] }
  0x37   :  { %185 = vmatpush1.msra.mxu0 %v158_v3  ;;  %298 = vmatpush1.msra.mxu1 %v160_v4  ;;  %v151_v9 = vld [vmem:[#allocation5 + $0x1a8] sm:$0xff]  ;;  %v153_v10 = vld [vmem:[#allocation5 + $0x1b8] sm:$0xff]  ;;  %v150_v11 = vld [vmem:[#allocation5 + $0x1a0] sm:$0xff] }
  0x38   :  { %186 = vmatprep.subr.mxu0 %v155_v5  ;;  %299 = vmatprep.subr.mxu1 %v157_v6  ;;  %v152_v12 = vld [vmem:[#allocation5 + $0x1b0] sm:$0xff]  ;;  %v147_v13 = vld [vmem:[#allocation5 + $0x188] sm:$0xff]  ;;  %v149_v14 = vld [vmem:[#allocation5 + $0x198] sm:$0xff] }
  0x39   :  { %187 = vmatpush1.msra.mxu0 %v154_v7  ;;  %300 = vmatpush1.msra.mxu1 %v156_v8  ;;  %v146_v15 = vld [vmem:[#allocation5 + $0x180] sm:$0xff]  ;;  %v148_v16 = vld [vmem:[#allocation5 + $0x190] sm:$0xff]  ;;  %v143_v17 = vld [vmem:[#allocation5 + $0x168] sm:$0xff] }
  0x3a   :  { %188 = vmatprep.subr.mxu0 %v151_v9  ;;  %301 = vmatprep.subr.mxu1 %v153_v10  ;;  %v145_v18 = vld [vmem:[#allocation5 + $0x178] sm:$0xff]  ;;  %v142_v19 = vld [vmem:[#allocation5 + $0x160] sm:$0xff]  ;;  %v144_v20 = vld [vmem:[#allocation5 + $0x170] sm:$0xff] }
  0x3b   :  { %189 = vmatpush1.msra.mxu0 %v150_v11  ;;  %302 = vmatpush1.msra.mxu1 %v152_v12  ;;  %v139_v21 = vld [vmem:[#allocation5 + $0x148] sm:$0xff]  ;;  %v141_v22 = vld [vmem:[#allocation5 + $0x158] sm:$0xff]  ;;  %v138_v23 = vld [vmem:[#allocation5 + $0x140] sm:$0xff] }
  0x3c   :  { %190 = vmatprep.subr.mxu0 %v147_v13  ;;  %303 = vmatprep.subr.mxu1 %v149_v14  ;;  %v140_v24 = vld [vmem:[#allocation5 + $0x150] sm:$0xff]  ;;  %v135_v25 = vld [vmem:[#allocation5 + $0x128] sm:$0xff]  ;;  %v137_v26 = vld [vmem:[#allocation5 + $0x138] sm:$0xff] }
  0x3d   :  { %191 = vmatpush1.msra.mxu0 %v146_v15  ;;  %304 = vmatpush1.msra.mxu1 %v148_v16  ;;  %v134_v27 = vld [vmem:[#allocation5 + $0x120] sm:$0xff]  ;;  %v136_v28 = vld [vmem:[#allocation5 + $0x130] sm:$0xff]  ;;  %v131_v29 = vld [vmem:[#allocation5 + $0x108] sm:$0xff] }
  0x3e   :  { %192 = vmatprep.subr.mxu0 %v143_v17  ;;  %305 = vmatprep.subr.mxu1 %v145_v18  ;;  %v133_v30 = vld [vmem:[#allocation5 + $0x118] sm:$0xff]  ;;  %v130_v31 = vld [vmem:[#allocation5 + $0x100] sm:$0xff]  ;;  %v132_v32 = vld [vmem:[#allocation5 + $0x110] sm:$0xff] }
  0x3f   :  { %193 = vmatpush1.msra.mxu0 %v142_v19  ;;  %306 = vmatpush1.msra.mxu1 %v144_v20  ;;  %v127_v33 = vld [vmem:[#allocation5 + $0xe8] sm:$0xff]  ;;  %v129_v34 = vld [vmem:[#allocation5 + $0xf8] sm:$0xff]  ;;  %v126_v35 = vld [vmem:[#allocation5 + $0xe0] sm:$0xff] }
  0x40   :  { %194 = vmatprep.subr.mxu0 %v139_v21  ;;  %307 = vmatprep.subr.mxu1 %v141_v22  ;;  %v128_v36 = vld [vmem:[#allocation5 + $0xf0] sm:$0xff]  ;;  %v123_v37 = vld [vmem:[#allocation5 + $0xc8] sm:$0xff]  ;;  %v125_v38 = vld [vmem:[#allocation5 + $0xd8] sm:$0xff] }
  0x41   :  { %195 = vmatpush1.msra.mxu0 %v138_v23  ;;  %308 = vmatpush1.msra.mxu1 %v140_v24  ;;  %v122_v39 = vld [vmem:[#allocation5 + $0xc0] sm:$0xff]  ;;  %v124_v40 = vld [vmem:[#allocation5 + $0xd0] sm:$0xff]  ;;  %v119_v41 = vld [vmem:[#allocation5 + $0xa8] sm:$0xff] }
  0x42   :  { %196 = vmatprep.subr.mxu0 %v135_v25  ;;  %309 = vmatprep.subr.mxu1 %v137_v26  ;;  %v121_v42 = vld [vmem:[#allocation5 + $0xb8] sm:$0xff]  ;;  %v118_v43 = vld [vmem:[#allocation5 + $0xa0] sm:$0xff]  ;;  %v120_v44 = vld [vmem:[#allocation5 + $0xb0] sm:$0xff] }
  0x43   :  { %197 = vmatpush1.msra.mxu0 %v134_v27  ;;  %310 = vmatpush1.msra.mxu1 %v136_v28  ;;  %v115_v45 = vld [vmem:[#allocation5 + $0x88] sm:$0xff]  ;;  %v117_v46 = vld [vmem:[#allocation5 + $0x98] sm:$0xff]  ;;  %v114_v47 = vld [vmem:[#allocation5 + $0x80] sm:$0xff] }
  0x44   :  { %198 = vmatprep.subr.mxu0 %v131_v29  ;;  %311 = vmatprep.subr.mxu1 %v133_v30  ;;  %v116_v48 = vld [vmem:[#allocation5 + $0x90] sm:$0xff]  ;;  %v111_v49 = vld [vmem:[#allocation5 + $0x68] sm:$0xff]  ;;  %v113_v50 = vld [vmem:[#allocation5 + $0x78] sm:$0xff] }
  0x45   :  { %199 = vmatpush1.msra.mxu0 %v130_v31  ;;  %312 = vmatpush1.msra.mxu1 %v132_v32  ;;  %v110_v51 = vld [vmem:[#allocation5 + $0x60] sm:$0xff]  ;;  %v112_v52 = vld [vmem:[#allocation5 + $0x70] sm:$0xff]  ;;  %v107_v53 = vld [vmem:[#allocation5 + $0x48] sm:$0xff] }
  0x46   :  { %200 = vmatprep.subr.mxu0 %v127_v33  ;;  %313 = vmatprep.subr.mxu1 %v129_v34  ;;  %v109_v54 = vld [vmem:[#allocation5 + $0x58] sm:$0xff]  ;;  %v106_v55 = vld [vmem:[#allocation5 + $0x40] sm:$0xff]  ;;  %v108_v56 = vld [vmem:[#allocation5 + $0x50] sm:$0xff] }
  0x47   :  { %201 = vmatpush1.msra.mxu0 %v126_v35  ;;  %314 = vmatpush1.msra.mxu1 %v128_v36  ;;  %v103_v57 = vld [vmem:[#allocation5 + $0x28] sm:$0xff]  ;;  %v105_v58 = vld [vmem:[#allocation5 + $0x38] sm:$0xff]  ;;  %v102_v59 = vld [vmem:[#allocation5 + $0x20] sm:$0xff] }
  0x48   :  { %202 = vmatprep.subr.mxu0 %v123_v37  ;;  %315 = vmatprep.subr.mxu1 %v125_v38  ;;  %v104_v60 = vld [vmem:[#allocation5 + $0x30] sm:$0xff]  ;;  %v99_v61 = vld [vmem:[#allocation5 + $0x8] sm:$0xff]  ;;  %v101_v62 = vld [vmem:[#allocation5 + $0x18] sm:$0xff] }
  0x49   :  { %203 = vmatpush1.msra.mxu0 %v122_v39  ;;  %316 = vmatpush1.msra.mxu1 %v124_v40  ;;  %v98_v63 = vld [vmem:[#allocation5] sm:$0xff]  ;;  %v100_v1 = vld [vmem:[#allocation5 + $0x10] sm:$0xff]  ;;  %v481_v3 = vld [vmem:[%s8250_s3 + $0xf8] sm:$0xff] }
  0x4a   :  { %204 = vmatprep.subr.mxu0 %v119_v41  ;;  %317 = vmatprep.subr.mxu1 %v121_v42  ;;  %v4941_v2 = vld [vmem:[%s8247_s0] sm:$0xff]  ;;  %v698_v4 = vld [vmem:[#allocation7 + $0x1e8] sm:$0xff]  ;;  %v480_v5 = vld [vmem:[%s8250_s3 + $0xf0] sm:$0xff] }
  0x4b   :  { %205 = vmatpush1.msra.mxu0 %v118_v43  ;;  %318 = vmatpush1.msra.mxu1 %v120_v44  ;;  %v697_v6 = vld [vmem:[#allocation7 + $0x1e0] sm:$0xff]  ;;  %v479_v7 = vld [vmem:[%s8250_s3 + $0xe8] sm:$0xff]  ;;  %v477_v12 = vld [vmem:[%s8250_s3 + $0xd8] sm:$0xff] }
  0x4c   :  { %206 = vmatprep.subr.mxu0 %v115_v45  ;;  %319 = vmatprep.subr.mxu1 %v117_v46  ;;  %v694_v8 = vld [vmem:[#allocation7 + $0x1c8] sm:$0xff]  ;;  %v478_v9 = vld [vmem:[%s8250_s3 + $0xe0] sm:$0xff]  ;;  %v476_v14 = vld [vmem:[%s8250_s3 + $0xd0] sm:$0xff] }
  0x4d   :  { %207 = vmatpush1.msra.mxu0 %v114_v47  ;;  %320 = vmatpush1.msra.mxu1 %v116_v48  ;;  %v693_v10 = vld [vmem:[#allocation7 + $0x1c0] sm:$0xff]  ;;  %v4960_v11 = vld [vmem:[%s8247_s0 + $0x8] sm:$0xff]  ;;  %v4979_v20 = vld [vmem:[%s8247_s0 + $0x10] sm:$0xff] }
  0x4e   :  { %208 = vmatprep.subr.mxu0 %v111_v49  ;;  %321 = vmatprep.subr.mxu1 %v113_v50  ;;  %v690_v13 = vld [vmem:[#allocation7 + $0x1a8] sm:$0xff]  ;;  %v689_v15 = vld [vmem:[#allocation7 + $0x1a0] sm:$0xff]  ;;  %v473_v21 = vld [vmem:[%s8250_s3 + $0xb8] sm:$0xff] }
  0x4f   :  { %209 = vmatpush1.msra.mxu0 %v110_v51  ;;  %322 = vmatpush1.msra.mxu1 %v112_v52  ;;  %v475_v16 = vld [vmem:[%s8250_s3 + $0xc8] sm:$0xff]  ;;  %v474_v18 = vld [vmem:[%s8250_s3 + $0xc0] sm:$0xff]  ;;  %v472_v23 = vld [vmem:[%s8250_s3 + $0xb0] sm:$0xff] }
  0x50   :  { %210 = vmatprep.subr.mxu0 %v107_v53  ;;  %323 = vmatprep.subr.mxu1 %v109_v54  ;;  %v686_v17 = vld [vmem:[#allocation7 + $0x188] sm:$0xff]  ;;  %v685_v19 = vld [vmem:[#allocation7 + $0x180] sm:$0xff]  ;;  %v4998_v29 = vld [vmem:[%s8247_s0 + $0x18] sm:$0xff] }
  0x51   :  { %211 = vmatpush1.msra.mxu0 %v106_v55  ;;  %324 = vmatpush1.msra.mxu1 %v108_v56  ;;  %v682_v22 = vld [vmem:[#allocation7 + $0x168] sm:$0xff]  ;;  %v681_v24 = vld [vmem:[#allocation7 + $0x160] sm:$0xff]  ;;  %v469_v30 = vld [vmem:[%s8250_s3 + $0x98] sm:$0xff] }
  0x52   :  { %212 = vmatprep.subr.mxu0 %v103_v57  ;;  %325 = vmatprep.subr.mxu1 %v105_v58  ;;  %v471_v25 = vld [vmem:[%s8250_s3 + $0xa8] sm:$0xff]  ;;  %v470_v27 = vld [vmem:[%s8250_s3 + $0xa0] sm:$0xff]  ;;  %v468_v32 = vld [vmem:[%s8250_s3 + $0x90] sm:$0xff] }
  0x53   :  { %213 = vmatpush1.msra.mxu0 %v102_v59  ;;  %326 = vmatpush1.msra.mxu1 %v104_v60  ;;  %v678_v26 = vld [vmem:[#allocation7 + $0x148] sm:$0xff]  ;;  %v677_v28 = vld [vmem:[#allocation7 + $0x140] sm:$0xff]  ;;  %v465_v39 = vld [vmem:[%s8250_s3 + $0x78] sm:$0xff] }
  0x54   :  { %214 = vmatprep.subr.mxu0 %v99_v61  ;;  %327 = vmatprep.subr.mxu1 %v101_v62  ;;  %v674_v31 = vld [vmem:[#allocation7 + $0x128] sm:$0xff]  ;;  %v673_v33 = vld [vmem:[#allocation7 + $0x120] sm:$0xff]  ;;  %v464_v41 = vld [vmem:[%s8250_s3 + $0x70] sm:$0xff] }
  0x55   :  { %215 = vmatpush1.msra.mxu0 %v98_v63  ;;  %328 = vmatpush1.msra.mxu1 %v100_v1  ;;  %v467_v34 = vld [vmem:[%s8250_s3 + $0x88] sm:$0xff]  ;;  %v466_v36 = vld [vmem:[%s8250_s3 + $0x80] sm:$0xff]  ;;  %v461_v48 = vld [vmem:[%s8250_s3 + $0x58] sm:$0xff] }
  0x56   :  { %249 = vmatmul.mubr.f32.vlgmr.msra.gmra.mxu0 %v4941_v2  ;;  %494 = vmatprep.subr.mxu0 %v481_v3  ;;  %v670_v35 = vld [vmem:[#allocation7 + $0x108] sm:$0xff]  ;;  %v669_v37 = vld [vmem:[#allocation7 + $0x100] sm:$0xff]  ;;  %v460_v50 = vld [vmem:[%s8250_s3 + $0x50] sm:$0xff] }
  0x57   :  { %765 = vmatprep.subr.mxu1 %v698_v4  ;;  %362 = vmatmul.mubr.f32.vlgmr.msra.gmra.mxu1 %v4941_v2  ;;  %v5017_v38 = vld [vmem:[%s8247_s0 + $0x20] sm:$0xff]  ;;  %v666_v40 = vld [vmem:[#allocation7 + $0xe8] sm:$0xff]  ;;  %v5055_v56 = vld [vmem:[%s8247_s0 + $0x30] sm:$0xff] }
  0x58   :  { %495 = vmatpush1.msra.mxu0 %v480_v5  ;;  %766 = vmatpush1.msra.mxu1 %v697_v6  ;;  %v665_v42 = vld [vmem:[#allocation7 + $0xe0] sm:$0xff]  ;;  %v463_v43 = vld [vmem:[%s8250_s3 + $0x68] sm:$0xff]  ;;  %v457_v57 = vld [vmem:[%s8250_s3 + $0x38] sm:$0xff] }
  0x59   :  { %496 = vmatprep.subr.mxu0 %v479_v7  ;;  %767 = vmatprep.subr.mxu1 %v694_v8  ;;  %v662_v44 = vld [vmem:[#allocation7 + $0xc8] sm:$0xff]  ;;  %v462_v45 = vld [vmem:[%s8250_s3 + $0x60] sm:$0xff]  ;;  %v456_v59 = vld [vmem:[%s8250_s3 + $0x30] sm:$0xff] }
  0x5a   :  { %254 = vmatprep.mubr.f32.mxu0 %v4868_v0  ;;  %497 = vmatpush1.msra.mxu0 %v478_v9  ;;  %v661_v46 = vld [vmem:[#allocation7 + $0xc0] sm:$0xff]  ;;  %v5036_v47 = vld [vmem:[%s8247_s0 + $0x28] sm:$0xff]  ;;  %v5074_v3 = vld [vmem:[%s8247_s0 + $0x38] sm:$0xff] }
  0x5b   :  { %768 = vmatpush1.msra.mxu1 %v693_v10  ;;  %255 = vmatmul.mubr.f32.gmra.mxu0 %v4960_v11  ;;  %v658_v49 = vld [vmem:[#allocation7 + $0xa8] sm:$0xff]  ;;  %v657_v51 = vld [vmem:[#allocation7 + $0xa0] sm:$0xff]  ;;  %v453_v4 = vld [vmem:[%s8250_s3 + $0x18] sm:$0xff] }
  0x5c   :  { %498 = vmatprep.subr.mxu0 %v477_v12  ;;  %769 = vmatprep.subr.mxu1 %v690_v13  ;;  %v459_v52 = vld [vmem:[%s8250_s3 + $0x48] sm:$0xff]  ;;  %v458_v54 = vld [vmem:[%s8250_s3 + $0x40] sm:$0xff]  ;;  %v452_v6 = vld [vmem:[%s8250_s3 + $0x10] sm:$0xff] }
  0x5d   :  { %499 = vmatpush1.msra.mxu0 %v476_v14  ;;  %770 = vmatpush1.msra.mxu1 %v689_v15  ;;  %v654_v53 = vld [vmem:[#allocation7 + $0x88] sm:$0xff]  ;;  %v653_v55 = vld [vmem:[#allocation7 + $0x80] sm:$0xff]  ;;  %v5090_v14 = vld [vmem:[#allocation7 + $0x1f8] sm:$0xff] }
  0x5e   :  { %500 = vmatprep.subr.mxu0 %v475_v16  ;;  %771 = vmatprep.subr.mxu1 %v686_v17  ;;  %v650_v58 = vld [vmem:[#allocation7 + $0x68] sm:$0xff]  ;;  %v649_v60 = vld [vmem:[#allocation7 + $0x60] sm:$0xff]  ;;  %v699_v16 = vld [vmem:[#allocation7 + $0x1f0] sm:$0xff] }
  0x5f   :  { %260 = vmatprep.mubr.f32.mxu0 %v4868_v0  ;;  %501 = vmatpush1.msra.mxu0 %v474_v18  ;;  %v455_v61 = vld [vmem:[%s8250_s3 + $0x28] sm:$0xff]  ;;  %v454_v63 = vld [vmem:[%s8250_s3 + $0x20] sm:$0xff]  ;;  %v5094_v18 = vld [vmem:[#allocation7 + $0x1d8] sm:$0xff] }
  0x60   :  { %772 = vmatpush1.msra.mxu1 %v685_v19  ;;  %261 = vmatmul.mubr.f32.gmra.mxu0 %v4979_v20  ;;  %v646_v62 = vld [vmem:[#allocation7 + $0x48] sm:$0xff]  ;;  %v645_v1 = vld [vmem:[#allocation7 + $0x40] sm:$0xff] }
  0x61   :  { %502 = vmatprep.subr.mxu0 %v473_v21  ;;  %773 = vmatprep.subr.mxu1 %v682_v22  ;;  %v642_v5 = vld [vmem:[#allocation7 + $0x28] sm:$0xff]  ;;  %v641_v7 = vld [vmem:[#allocation7 + $0x20] sm:$0xff]  ;;  %v5097_v21 = vld [vmem:[#allocation7 + $0x1d0] sm:$0xff] }
  0x62   :  { %503 = vmatpush1.msra.mxu0 %v472_v23  ;;  %774 = vmatpush1.msra.mxu1 %v681_v24  ;;  %v451_v8 = vld [vmem:[%s8250_s3 + $0x8] sm:$0xff]  ;;  %v450_v10 = vld [vmem:[%s8250_s3] sm:$0xff]  ;;  %v5100_v23 = vld [vmem:[#allocation7 + $0x1b8] sm:$0xff] }
  0x63   :  { %504 = vmatprep.subr.mxu0 %v471_v25  ;;  %775 = vmatprep.subr.mxu1 %v678_v26  ;;  %v638_v9 = vld [vmem:[#allocation7 + $0x8] sm:$0xff]  ;;  %v637_v12 = vld [vmem:[#allocation7] sm:$0xff]  ;;  %v5103_v24 = vld [vmem:[#allocation7 + $0x1b0] sm:$0xff] }
  0x64   :  { %266 = vmatprep.mubr.f32.mxu0 %v4868_v0  ;;  %505 = vmatpush1.msra.mxu0 %v470_v27  ;;  %v762_v13 = vld [vmem:[#allocation7 + $0x3e8] sm:$0xff]  ;;  %v761_v15 = vld [vmem:[#allocation7 + $0x3e0] sm:$0xff]  ;;  %v5107_v26 = vld [vmem:[#allocation7 + $0x198] sm:$0xff] }
  0x65   :  { %776 = vmatpush1.msra.mxu1 %v677_v28  ;;  %267 = vmatmul.mubr.f32.gmra.mxu0 %v4998_v29  ;;  %v758_v17 = vld [vmem:[#allocation7 + $0x3c8] sm:$0xff]  ;;  %v757_v19 = vld [vmem:[#allocation7 + $0x3c0] sm:$0xff]  ;;  %v5111_v28 = vld [vmem:[#allocation7 + $0x190] sm:$0xff] }
  0x66   :  { %506 = vmatprep.subr.mxu0 %v469_v30  ;;  %777 = vmatprep.subr.mxu1 %v674_v31  ;;  %v754_v22 = vld [vmem:[#allocation7 + $0x3a8] sm:$0xff]  ;;  %v749_v27 = vld [vmem:[#allocation7 + $0x380] sm:$0xff]  ;;  %v5114_v31 = vld [vmem:[#allocation7 + $0x178] sm:$0xff] }
  0x67   :  { %507 = vmatpush1.msra.mxu0 %v468_v32  ;;  %778 = vmatpush1.msra.mxu1 %v673_v33  ;;  %v750_v25 = vld [vmem:[#allocation7 + $0x388] sm:$0xff]  ;;  %v745_v32 = vld [vmem:[#allocation7 + $0x360] sm:$0xff]  ;;  %v5117_v33 = vld [vmem:[#allocation7 + $0x170] sm:$0xff] }
  0x68   :  { %508 = vmatprep.subr.mxu0 %v467_v34  ;;  %779 = vmatprep.subr.mxu1 %v670_v35  ;;  %v746_v30 = vld [vmem:[#allocation7 + $0x368] sm:$0xff]  ;;  %v5121_v35 = vld [vmem:[#allocation7 + $0x158] sm:$0xff] }
  0x69   :  { %272 = vmatprep.mubr.f32.mxu0 %v4868_v0  ;;  %509 = vmatpush1.msra.mxu0 %v466_v36  ;;  %v742_v34 = vld [vmem:[#allocation7 + $0x348] sm:$0xff]  ;;  %v741_v36 = vld [vmem:[#allocation7 + $0x340] sm:$0xff] }
  0x6a   :  { %780 = vmatpush1.msra.mxu1 %v669_v37  ;;  %273 = vmatmul.mubr.f32.gmra.mxu0 %v5017_v38  ;;  %v5125_v37 = vld [vmem:[#allocation7 + $0x150] sm:$0xff] }
  0x6b   :  { %510 = vmatprep.subr.mxu0 %v465_v39  ;;  %781 = vmatprep.subr.mxu1 %v666_v40  ;;  %v738_v39 = vld [vmem:[#allocation7 + $0x328] sm:$0xff]  ;;  %v5128_v40 = vld [vmem:[#allocation7 + $0x138] sm:$0xff] }
  0x6c   :  { %511 = vmatpush1.msra.mxu0 %v464_v41  ;;  %782 = vmatpush1.msra.mxu1 %v665_v42  ;;  %v737_v41 = vld [vmem:[#allocation7 + $0x320] sm:$0xff]  ;;  %v5131_v42 = vld [vmem:[#allocation7 + $0x130] sm:$0xff] }
  0x6d   :  { %512 = vmatprep.subr.mxu0 %v463_v43  ;;  %783 = vmatprep.subr.mxu1 %v662_v44  ;;  %v734_v43 = vld [vmem:[#allocation7 + $0x308] sm:$0xff]  ;;  %v5135_v44 = vld [vmem:[#allocation7 + $0x118] sm:$0xff] }
  0x6e   :  { %278 = vmatprep.mubr.f32.mxu0 %v4868_v0  ;;  %513 = vmatpush1.msra.mxu0 %v462_v45  ;;  %v733_v45 = vld [vmem:[#allocation7 + $0x300] sm:$0xff] }
  0x6f   :  { %784 = vmatpush1.msra.mxu1 %v661_v46  ;;  %279 = vmatmul.mubr.f32.gmra.mxu0 %v5036_v47  ;;  %v5139_v46 = vld [vmem:[#allocation7 + $0x110] sm:$0xff] }
  0x70   :  { %514 = vmatprep.subr.mxu0 %v461_v48  ;;  %785 = vmatprep.subr.mxu1 %v658_v49  ;;  %v730_v48 = vld [vmem:[#allocation7 + $0x2e8] sm:$0xff]  ;;  %v5142_v49 = vld [vmem:[#allocation7 + $0xf8] sm:$0xff] }
  0x71   :  { %515 = vmatpush1.msra.mxu0 %v460_v50  ;;  %786 = vmatpush1.msra.mxu1 %v657_v51  ;;  %v729_v50 = vld [vmem:[#allocation7 + $0x2e0] sm:$0xff]  ;;  %v5145_v51 = vld [vmem:[#allocation7 + $0xf0] sm:$0xff] }
  0x72   :  { %516 = vmatprep.subr.mxu0 %v459_v52  ;;  %787 = vmatprep.subr.mxu1 %v654_v53  ;;  %v726_v52 = vld [vmem:[#allocation7 + $0x2c8] sm:$0xff]  ;;  %v5149_v53 = vld [vmem:[#allocation7 + $0xd8] sm:$0xff] }
  0x73   :  { %284 = vmatprep.mubr.f32.mxu0 %v4868_v0  ;;  %517 = vmatpush1.msra.mxu0 %v458_v54  ;;  %v725_v54 = vld [vmem:[#allocation7 + $0x2c0] sm:$0xff] }
  0x74   :  { %788 = vmatpush1.msra.mxu1 %v653_v55  ;;  %285 = vmatmul.mubr.f32.gmra.mxu0 %v5055_v56  ;;  %v5153_v55 = vld [vmem:[#allocation7 + $0xd0] sm:$0xff] }
  0x75   :  { %518 = vmatprep.subr.mxu0 %v457_v57  ;;  %789 = vmatprep.subr.mxu1 %v650_v58  ;;  %v722_v57 = vld [vmem:[#allocation7 + $0x2a8] sm:$0xff]  ;;  %v5156_v58 = vld [vmem:[#allocation7 + $0xb8] sm:$0xff] }
  0x76   :  { %519 = vmatpush1.msra.mxu0 %v456_v59  ;;  %790 = vmatpush1.msra.mxu1 %v649_v60  ;;  %v721_v59 = vld [vmem:[#allocation7 + $0x2a0] sm:$0xff]  ;;  %v5159_v60 = vld [vmem:[#allocation7 + $0xb0] sm:$0xff] }
  0x77   :  { %520 = vmatprep.subr.mxu0 %v455_v61  ;;  %791 = vmatprep.subr.mxu1 %v646_v62  ;;  %v718_v61 = vld [vmem:[#allocation7 + $0x288] sm:$0xff]  ;;  %v5163_v62 = vld [vmem:[#allocation7 + $0x98] sm:$0xff] }
  0x78   :  { %290 = vmatprep.mubr.f32.mxu0 %v4868_v0  ;;  %521 = vmatpush1.msra.mxu0 %v454_v63  ;;  %v717_v63 = vld [vmem:[#allocation7 + $0x280] sm:$0xff] }
  0x79   :  { %792 = vmatpush1.msra.mxu1 %v645_v1  ;;  %291 = vmatmul.mubr.f32.gmra.mxu0 %v5074_v3  ;;  %v5167_v1 = vld [vmem:[#allocation7 + $0x90] sm:$0xff] }
  0x7a   :  { %522 = vmatprep.subr.mxu0 %v453_v4  ;;  %793 = vmatprep.subr.mxu1 %v642_v5  ;;  %v714_v4 = vld [vmem:[#allocation7 + $0x268] sm:$0xff]  ;;  %v5170_v5 = vld [vmem:[#allocation7 + $0x78] sm:$0xff] }
  0x7b   :  { %523 = vmatpush1.msra.mxu0 %v452_v6  ;;  %794 = vmatpush1.msra.mxu1 %v641_v7  ;;  %v713_v6 = vld [vmem:[#allocation7 + $0x260] sm:$0xff]  ;;  %v5173_v7 = vld [vmem:[#allocation7 + $0x70] sm:$0xff] }
  0x7c   :  { %524 = vmatprep.subr.mxu0 %v451_v8  ;;  %795 = vmatprep.subr.mxu1 %v638_v9  ;;  %v710_v8 = vld [vmem:[#allocation7 + $0x248] sm:$0xff]  ;;  %v5177_v9 = vld [vmem:[#allocation7 + $0x58] sm:$0xff] }
  0x7d   :  { %525 = vmatpush1.msra.mxu0 %v450_v10  ;;  %558 = vmatprep.mubr.f32.mxu0 %v4868_v0  ;;  %v709_v10 = vld [vmem:[#allocation7 + $0x240] sm:$0xff] }
  0x7e   :  { %796 = vmatpush1.msra.mxu1 %v637_v12  ;;  %559 = vmatmul.mubr.f32.vlgmr.msra.gmra.mxu0 %v4941_v2  ;;  %v753_v2 = vld [vmem:[#allocation7 + $0x3a0] sm:$0xff]  ;;  %v5181_v12 = vld [vmem:[#allocation7 + $0x50] sm:$0xff] }
  0x7f   :  { %797 = vmatprep.subr.mxu1 %v762_v13  ;;  %836 = vmatprep.subr.mxu0 %v5090_v14  ;;  %v706_v13 = vld [vmem:[#allocation7 + $0x228] sm:$0xff] }
  0x80   :  { %798 = vmatpush2.msra.mxu1 %v761_v15  ;;  %837 = vmatpush1.msra.mxu0 %v699_v16  ;;  %v5184_v15 = vld [vmem:[#allocation7 + $0x38] sm:$0xff]  ;;  %v705_v16 = vld [vmem:[#allocation7 + $0x220] sm:$0xff] }
  0x81   :  { %799 = vmatprep.subr.mxu1 %v758_v17  ;;  %838 = vmatprep.subr.mxu0 %v5094_v18  ;;  %v5187_v17 = vld [vmem:[#allocation7 + $0x30] sm:$0xff] }
  0x82   :  { %367 = vmatprep.mubr.f32.mxu1 %v4868_v0  ;;  %800 = vmatpush2.msra.mxu1 %v757_v19  ;;  %v702_v19 = vld [vmem:[#allocation7 + $0x208] sm:$0xff] }
  0x83   :  { %839 = vmatpush1.msra.mxu0 %v5097_v21  ;;  %368 = vmatmul.mubr.f32.gmra.mxu1 %v4960_v11 }
  0x84   :  { %801 = vmatprep.subr.mxu1 %v754_v22  ;;  %840 = vmatprep.subr.mxu0 %v5100_v23  ;;  %v5191_v22 = vld [vmem:[#allocation7 + $0x18] sm:$0xff] }
  0x85   :  { %802 = vmatpush2.msra.mxu1 %v753_v2  ;;  %841 = vmatpush1.msra.mxu0 %v5103_v24  ;;  %v701_v2 = vld [vmem:[#allocation7 + $0x200] sm:$0xff] }
  0x86   :  { %803 = vmatprep.subr.mxu1 %v750_v25  ;;  %842 = vmatprep.subr.mxu0 %v5107_v26  ;;  %v5197_v25 = vld [vmem:[%s8256_s9 + $0x8] sm:$0xff] }
  0x87   :  { %373 = vmatprep.mubr.f32.mxu1 %v4868_v0  ;;  %804 = vmatpush2.msra.mxu1 %v749_v27  ;;  %v5200_v27 = vld [vmem:[#allocation7 + $0x10] sm:$0xff] }
  0x88   :  { %843 = vmatpush1.msra.mxu0 %v5111_v28  ;;  %374 = vmatmul.mubr.f32.gmra.mxu1 %v4979_v20 }
  0x89   :  { %805 = vmatprep.subr.mxu1 %v746_v30  ;;  %844 = vmatprep.subr.mxu0 %v5114_v31  ;;  %v5205_v30 = vld [vmem:[%s8256_s9] sm:$0xff] }
  0x8a   :  { %806 = vmatpush2.msra.mxu1 %v745_v32  ;;  %845 = vmatpush1.msra.mxu0 %v5117_v33  ;;  %v5208_v32 = vld [vmem:[#allocation7 + $0x3f8] sm:$0xff] }
  0x8b   :  { %807 = vmatprep.subr.mxu1 %v742_v34  ;;  %846 = vmatprep.subr.mxu0 %v5121_v35  ;;  %v5211_v34 = vld [vmem:[#allocation7 + $0x3f0] sm:$0xff] }
  0x8c   :  { %379 = vmatprep.mubr.f32.mxu1 %v4868_v0  ;;  %808 = vmatpush2.msra.mxu1 %v741_v36  ;;  %v5215_v36 = vld [vmem:[#allocation7 + $0x3d8] sm:$0xff] }
  0x8d   :  { %847 = vmatpush1.msra.mxu0 %v5125_v37  ;;  %380 = vmatmul.mubr.f32.gmra.mxu1 %v4998_v29 }
  0x8e   :  { %809 = vmatprep.subr.mxu1 %v738_v39  ;;  %848 = vmatprep.subr.mxu0 %v5128_v40  ;;  %v5219_v39 = vld [vmem:[#allocation7 + $0x3d0] sm:$0xff] }
  0x8f   :  { %810 = vmatpush2.msra.mxu1 %v737_v41  ;;  %849 = vmatpush1.msra.mxu0 %v5131_v42  ;;  %v5222_v41 = vld [vmem:[#allocation7 + $0x3b8] sm:$0xff] }
  0x90   :  { %811 = vmatprep.subr.mxu1 %v734_v43  ;;  %850 = vmatprep.subr.mxu0 %v5135_v44  ;;  %v5226_v43 = vld [vmem:[#allocation7 + $0x3b0] sm:$0xff] }
  0x91   :  { %385 = vmatprep.mubr.f32.mxu1 %v4868_v0  ;;  %812 = vmatpush2.msra.mxu1 %v733_v45  ;;  %v5230_v45 = vld [vmem:[#allocation7 + $0x398] sm:$0xff] }
  0x92   :  { %851 = vmatpush1.msra.mxu0 %v5139_v46  ;;  %386 = vmatmul.mubr.f32.gmra.mxu1 %v5017_v38 }
  0x93   :  { %813 = vmatprep.subr.mxu1 %v730_v48  ;;  %852 = vmatprep.subr.mxu0 %v5142_v49  ;;  %v5233_v48 = vld [vmem:[#allocation7 + $0x390] sm:$0xff] }
  0x94   :  { %814 = vmatpush2.msra.mxu1 %v729_v50  ;;  %853 = vmatpush1.msra.mxu0 %v5145_v51  ;;  %v5236_v50 = vld [vmem:[#allocation7 + $0x378] sm:$0xff] }
  0x95   :  { %815 = vmatprep.subr.mxu1 %v726_v52  ;;  %854 = vmatprep.subr.mxu0 %v5149_v53  ;;  %v5244_v52 = vld [vmem:[#allocation7 + $0x358] sm:$0xff] }
  0x96   :  { %391 = vmatprep.mubr.f32.mxu1 %v4868_v0  ;;  %816 = vmatpush2.msra.mxu1 %v725_v54  ;;  %v5247_v54 = vld [vmem:[#allocation7 + $0x350] sm:$0xff] }
  0x97   :  { %855 = vmatpush1.msra.mxu0 %v5153_v55  ;;  %392 = vmatmul.mubr.f32.gmra.mxu1 %v5036_v47 }
  0x98   :  { %817 = vmatprep.subr.mxu1 %v722_v57  ;;  %856 = vmatprep.subr.mxu0 %v5156_v58  ;;  %v5250_v57 = vld [vmem:[#allocation7 + $0x338] sm:$0xff] }
  0x99   :  { %818 = vmatpush2.msra.mxu1 %v721_v59  ;;  %857 = vmatpush1.msra.mxu0 %v5159_v60  ;;  %v5258_v59 = vld [vmem:[#allocation7 + $0x318] sm:$0xff] }
  0x9a   :  { %819 = vmatprep.subr.mxu1 %v718_v61  ;;  %858 = vmatprep.subr.mxu0 %v5163_v62  ;;  %8665 = vst [vmem:[#allocation15_spill] sm:$0xff] %v5258_v59  ;;  %v5261_v61 = vld [vmem:[#allocation7 + $0x310] sm:$0xff] }
  0x9b   :  { %397 = vmatprep.mubr.f32.mxu1 %v4868_v0  ;;  %820 = vmatpush2.msra.mxu1 %v717_v63  ;;  %8666 = vst [vmem:[#allocation16_spill] sm:$0xff] %v5261_v61  ;;  %v732_v63 = vld [vmem:[#allocation7 + $0x2f8] sm:$0xff] }
  0x9c   :  { %859 = vmatpush1.msra.mxu0 %v5167_v1  ;;  %398 = vmatmul.mubr.f32.gmra.mxu1 %v5055_v56 }
  0x9d   :  { %821 = vmatprep.subr.mxu1 %v714_v4  ;;  %860 = vmatprep.subr.mxu0 %v5170_v5  ;;  %v728_v4 = vld [vmem:[#allocation7 + $0x2d8] sm:$0xff] }
  0x9e   :  { %822 = vmatpush2.msra.mxu1 %v713_v6  ;;  %861 = vmatpush1.msra.mxu0 %v5173_v7  ;;  %v727_v6 = vld [vmem:[#allocation7 + $0x2d0] sm:$0xff] }
  0x9f   :  { %823 = vmatprep.subr.mxu1 %v710_v8  ;;  %862 = vmatprep.subr.mxu0 %v5177_v9  ;;  %v724_v8 = vld [vmem:[#allocation7 + $0x2b8] sm:$0xff] }
  0xa0   :  { %403 = vmatprep.mubr.f32.mxu1 %v4868_v0  ;;  %824 = vmatpush2.msra.mxu1 %v709_v10  ;;  %v723_v10 = vld [vmem:[#allocation7 + $0x2b0] sm:$0xff] }
  0xa1   :  { %863 = vmatpush1.msra.mxu0 %v5181_v12  ;;  %404 = vmatmul.mubr.f32.gmra.mxu1 %v5074_v3 }
  0xa2   :  { %825 = vmatprep.subr.mxu1 %v706_v13  ;;  %864 = vmatprep.subr.mxu0 %v5184_v15  ;;  %v719_v13 = vld [vmem:[#allocation7 + $0x290] sm:$0xff] }
  0xa3   :  { %826 = vmatpush2.msra.mxu1 %v705_v16  ;;  %865 = vmatpush1.msra.mxu0 %v5187_v17  ;;  %v716_v16 = vld [vmem:[#allocation7 + $0x278] sm:$0xff] }
  0xa4   :  { %827 = vmatprep.subr.mxu1 %v702_v19  ;;  %866 = vmatprep.subr.mxu0 %v5191_v22  ;;  %v715_v19 = vld [vmem:[#allocation7 + $0x270] sm:$0xff] }
  0xa5   :  { %828 = vmatpush2.msra.mxu1 %v701_v2  ;;  %829 = vmatprep.mubr.f32.mxu1 %v5197_v25  ;;  %v712_v2 = vld [vmem:[#allocation7 + $0x258] sm:$0xff] }
  0xa6   :  { %867 = vmatpush1.msra.mxu0 %v5200_v27  ;;  %830 = vmatmul.mubr.f32.vlgmr.msra.gmra.mxu1 %v5205_v30 }
  0xa7   :  { %868 = vmatprep.subr.mxu0 %v5208_v32  ;;  %564 = vmatprep.mubr.f32.mxu0 %v4868_v0 }
  0xa8   :  { %869 = vmatpush2.msra.mxu0 %v5211_v34 }
  0xa9   :  { %565 = vmatmul.mubr.f32.gmra.mxu0 %v4960_v11  ;;  %870 = vmatprep.subr.mxu0 %v5215_v36  ;;  %v5240_v11 = vld [vmem:[#allocation7 + $0x370] sm:$0xff] }
  0xaa   :  { %871 = vmatpush2.msra.mxu0 %v5219_v39  ;;  %570 = vmatprep.mubr.f32.mxu0 %v4868_v0 }
  0xab   :  { %872 = vmatprep.subr.mxu0 %v5222_v41 }
  0xac   :  { %873 = vmatpush2.msra.mxu0 %v5226_v43 }
  0xad   :  { %571 = vmatmul.mubr.f32.gmra.mxu0 %v4979_v20  ;;  %874 = vmatprep.subr.mxu0 %v5230_v45  ;;  %v5254_v20 = vld [vmem:[#allocation7 + $0x330] sm:$0xff] }
  0xae   :  { %875 = vmatpush2.msra.mxu0 %v5233_v48  ;;  %576 = vmatprep.mubr.f32.mxu0 %v4868_v0 }
  0xaf   :  { %876 = vmatprep.subr.mxu0 %v5236_v50 }
  0xb0   :  { %877 = vmatpush2.msra.mxu0 %v5240_v11 }
  0xb1   :  { %577 = vmatmul.mubr.f32.gmra.mxu0 %v4998_v29  ;;  %878 = vmatprep.subr.mxu0 %v5244_v52  ;;  %v731_v29 = vld [vmem:[#allocation7 + $0x2f0] sm:$0xff] }
  0xb2   :  { %879 = vmatpush2.msra.mxu0 %v5247_v54  ;;  %582 = vmatprep.mubr.f32.mxu0 %v4868_v0 }
  0xb3   :  { %880 = vmatprep.subr.mxu0 %v5250_v57 }
  0xb4   :  { %881 = vmatpush2.msra.mxu0 %v5254_v20 }
  0xb5   :  { %583 = vmatmul.mubr.f32.gmra.mxu0 %v5017_v38  ;;  %882 = vmatprep.subr.mxu0 %v5258_v59  ;;  %v720_v38 = vld [vmem:[#allocation7 + $0x298] sm:$0xff] }
  0xb6   :  { %883 = vmatpush2.msra.mxu0 %v5261_v61  ;;  %588 = vmatprep.mubr.f32.mxu0 %v4868_v0 }
  0xb7   :  { %884 = vmatprep.subr.mxu0 %v732_v63  ;;  %v708_v63 = vld [vmem:[#allocation7 + $0x238] sm:$0xff] }
  0xb8   :  { %885 = vmatpush2.msra.mxu0 %v731_v29  ;;  %v707_v29 = vld [vmem:[#allocation7 + $0x230] sm:$0xff] }
  0xb9   :  { %589 = vmatmul.mubr.f32.gmra.mxu0 %v5036_v47  ;;  %886 = vmatprep.subr.mxu0 %v728_v4  ;;  %v711_v47 = vld [vmem:[#allocation7 + $0x250] sm:$0xff]  ;;  %v704_v4 = vld [vmem:[#allocation7 + $0x218] sm:$0xff] }
  0xba   :  { %887 = vmatpush2.msra.mxu0 %v727_v6  ;;  %594 = vmatprep.mubr.f32.mxu0 %v4868_v0  ;;  %v5278_v6 = vld [vmem:[#allocation9 + $0xf0] sm:$0xff] }
  0xbb   :  { %888 = vmatprep.subr.mxu0 %v724_v8  ;;  %8668 = vst [vmem:[#allocation18_spill] sm:$0xff] %v5278_v6  ;;  %v5284_v8 = vld [vmem:[#allocation9 + $0xe0] sm:$0xff] }
  0xbc   :  { %889 = vmatpush2.msra.mxu0 %v723_v10  ;;  %8670 = vst [vmem:[#allocation20_spill] sm:$0xff] %v5284_v8  ;;  %v5287_v10 = vld [vmem:[#allocation9 + $0xd8] sm:$0xff] }
  0xbd   :  { %595 = vmatmul.mubr.f32.gmra.mxu0 %v5055_v56  ;;  %890 = vmatprep.subr.mxu0 %v720_v38  ;;  %v703_v56 = vld [vmem:[#allocation7 + $0x210] sm:$0xff]  ;;  %8671 = vst [vmem:[#allocation21_spill] sm:$0xff] %v5287_v10 }
  0xbe   :  { %891 = vmatpush2.msra.mxu0 %v719_v13  ;;  %600 = vmatprep.mubr.f32.mxu0 %v4868_v0  ;;  %v5275_v0 = vld [vmem:[#allocation9 + $0xf8] sm:$0xff]  ;;  %v5290_v38 = vld [vmem:[#allocation9 + $0xd0] sm:$0xff]  ;;  %v5293_v13 = vld [vmem:[#allocation9 + $0xc8] sm:$0xff] }
  0xbf   :  { %892 = vmatprep.subr.mxu0 %v716_v16  ;;  %8667 = vst [vmem:[#allocation17_spill] sm:$0xff] %v5275_v0  ;;  %1001 = vmatprep.subr.mxu1 %v5275_v0  ;;  %8672 = vst [vmem:[#allocation22_spill] sm:$0xff] %v5290_v38  ;;  %v5296_v16 = vld [vmem:[#allocation9 + $0xc0] sm:$0xff] }
  0xc0   :  { %893 = vmatpush2.msra.mxu0 %v715_v19  ;;  %1002 = vmatpush1.msra.mxu1 %v5278_v6  ;;  %8673 = vst [vmem:[#allocation23_spill] sm:$0xff] %v5293_v13  ;;  %8674 = vst [vmem:[#allocation24_spill] sm:$0xff] %v5296_v16  ;;  %v5299_v19 = vld [vmem:[#allocation9 + $0xb8] sm:$0xff] }
  0xc1   :  { %601 = vmatmul.mubr.f32.gmra.mxu0 %v5074_v3  ;;  %894 = vmatprep.subr.mxu0 %v712_v2  ;;  %v5281_v3 = vld [vmem:[#allocation9 + $0xe8] sm:$0xff]  ;;  %8675 = vst [vmem:[#allocation25_spill] sm:$0xff] %v5299_v19  ;;  %v5302_v2 = vld [vmem:[#allocation9 + $0xb0] sm:$0xff] }
  0xc2   :  { %895 = vmatpush2.msra.mxu0 %v711_v47  ;;  %900 = vmatprep.mubr.f32.mxu0 %v5197_v25  ;;  %8669 = vst [vmem:[#allocation19_spill] sm:$0xff] %v5281_v3  ;;  %8676 = vst [vmem:[#allocation26_spill] sm:$0xff] %v5302_v2  ;;  %v5305_v47 = vld [vmem:[#allocation9 + $0xa8] sm:$0xff] }
  0xc3   :  { %896 = vmatprep.subr.mxu0 %v708_v63  ;;  %1003 = vmatprep.subr.mxu1 %v5281_v3  ;;  %8677 = vst [vmem:[#allocation27_spill] sm:$0xff] %v5305_v47  ;;  %v5308_v63 = vld [vmem:[#allocation9 + $0xa0] sm:$0xff] }
  0xc4   :  { %897 = vmatpush2.msra.mxu0 %v707_v29  ;;  %1004 = vmatpush1.msra.mxu1 %v5284_v8  ;;  %8678 = vst [vmem:[#allocation28_spill] sm:$0xff] %v5308_v63  ;;  %v5311_v29 = vld [vmem:[#allocation9 + $0x98] sm:$0xff] }
  0xc5   :  { %898 = vmatprep.subr.mxu0 %v704_v4  ;;  %1005 = vmatprep.subr.mxu1 %v5287_v10  ;;  %8679 = vst [vmem:[#allocation29_spill] sm:$0xff] %v5311_v29  ;;  %v5314_v4 = vld [vmem:[#allocation9 + $0x90] sm:$0xff] }
  0xc6   :  { %899 = vmatpush2.msra.mxu0 %v703_v56  ;;  %1006 = vmatpush1.msra.mxu1 %v5290_v38  ;;  %8680 = vst [vmem:[#allocation30_spill] sm:$0xff] %v5314_v4  ;;  %v5317_v56 = vld [vmem:[#allocation9 + $0x88] sm:$0xff] }
  0xc7   :  { %901 = vmatmul.mubr.f32.vlgmr.msra.gmra.mxu0 %v5205_v30  ;;  %1007 = vmatprep.subr.mxu1 %v5293_v13  ;;  %8681 = vst [vmem:[#allocation31_spill] sm:$0xff] %v5317_v56 }
  0xc8   :  { %1008 = vmatpush1.msra.mxu1 %v5296_v16  ;;  %v5364_v16 = vld [vmem:[#allocation9 + $0x10] sm:$0xff] }
  0xc9   :  { %1009 = vmatprep.subr.mxu1 %v5299_v19  ;;  %v5343_v19 = vld [vmem:[#allocation9 + $0x40] sm:$0xff]  ;;  %8697 = vst [vmem:[#allocation47_spill] sm:$0xff] %v5364_v16 }
  0xca   :  { %1010 = vmatpush1.msra.mxu1 %v5302_v2  ;;  %v5320_v2 = vld [vmem:[#allocation9 + $0x80] sm:$0xff]  ;;  %8690 = vst [vmem:[#allocation40_spill] sm:$0xff] %v5343_v19 }
  0xcb   :  { %1011 = vmatprep.subr.mxu1 %v5305_v47  ;;  %8682 = vst [vmem:[#allocation32_spill] sm:$0xff] %v5320_v2  ;;  %v5323_v47 = vld [vmem:[#allocation9 + $0x78] sm:$0xff] }
  0xcc   :  { %1012 = vmatpush1.msra.mxu1 %v5308_v63  ;;  %8683 = vst [vmem:[#allocation33_spill] sm:$0xff] %v5323_v47  ;;  %v5326_v63 = vld [vmem:[#allocation9 + $0x70] sm:$0xff] }
  0xcd   :  { %1013 = vmatprep.subr.mxu1 %v5311_v29  ;;  %8684 = vst [vmem:[#allocation34_spill] sm:$0xff] %v5326_v63  ;;  %v5329_v29 = vld [vmem:[#allocation9 + $0x68] sm:$0xff] }
  0xce   :  { %1014 = vmatpush1.msra.mxu1 %v5314_v4  ;;  %8685 = vst [vmem:[#allocation35_spill] sm:$0xff] %v5329_v29  ;;  %v5332_v4 = vld [vmem:[#allocation9 + $0x60] sm:$0xff] }
  0xcf   :  { %1015 = vmatprep.subr.mxu1 %v5317_v56  ;;  %8686 = vst [vmem:[#allocation36_spill] sm:$0xff] %v5332_v4  ;;  %v5335_v56 = vld [vmem:[#allocation9 + $0x58] sm:$0xff] }
  0xd0   :  { %1016 = vmatpush1.msra.mxu1 %v5320_v2  ;;  %8687 = vst [vmem:[#allocation37_spill] sm:$0xff] %v5335_v56  ;;  %v5338_v2 = vld [vmem:[#allocation9 + $0x50] sm:$0xff] }
  0xd1   :  { %1017 = vmatprep.subr.mxu1 %v5323_v47  ;;  %8688 = vst [vmem:[#allocation38_spill] sm:$0xff] %v5338_v2  ;;  %v5341_v47 = vld [vmem:[#allocation9 + $0x48] sm:$0xff] }
  0xd2   :  { %1018 = vmatpush1.msra.mxu1 %v5326_v63  ;;  %8689 = vst [vmem:[#allocation39_spill] sm:$0xff] %v5341_v47  ;;  %v164_v63 = vlaneseq }
  0xd3   :  { %1019 = vmatprep.subr.mxu1 %v5329_v29  ;;  %v5347_v29 = vld [vmem:[#allocation9 + $0x38] sm:$0xff] }
  0xd4   :  { %1020 = vmatpush1.msra.mxu1 %v5332_v4  ;;  %8691 = vst [vmem:[#allocation41_spill] sm:$0xff] %v5347_v29  ;;  %v5350_v4 = vld [vmem:[#allocation9 + $0x30] sm:$0xff] }
  0xd5   :  { %1021 = vmatprep.subr.mxu1 %v5335_v56  ;;  %8692 = vst [vmem:[#allocation42_spill] sm:$0xff] %v5350_v4  ;;  %v5353_v56 = vld [vmem:[#allocation9 + $0x28] sm:$0xff] }
  0xd6   :  { %1022 = vmatpush1.msra.mxu1 %v5338_v2  ;;  %8693 = vst [vmem:[#allocation43_spill] sm:$0xff] %v5353_v56  ;;  %v5356_v2 = vld [vmem:[#allocation9 + $0x20] sm:$0xff] }
  0xd7   :  { %1023 = vmatprep.subr.mxu1 %v5341_v47  ;;  %8694 = vst [vmem:[#allocation44_spill] sm:$0xff] %v5356_v2  ;;  %v5359_v47 = vld [vmem:[#allocation9 + $0x18] sm:$0xff] }
  0xd8   :  { %1024 = vmatpush1.msra.mxu1 %v5343_v19  ;;  %8695 = vst [vmem:[#allocation45_spill] sm:$0xff] %v5359_v47  ;;  %v5361_v19 = vshrl.u32 %v164_v63, 7  ;;  %v5377_v63 = vld [vmem:[#allocation9 + $0x1f0] sm:$0xff] }
  0xd9   :  { %1025 = vmatprep.subr.mxu1 %v5347_v29  ;;  %v5367_v29 = vld [vmem:[#allocation9 + $0x8] sm:$0xff]  ;;  %8701 = vst [vmem:[#allocation51_spill] sm:$0xff] %v5377_v63 }
  0xda   :  { %1026 = vmatpush1.msra.mxu1 %v5350_v4  ;;  %8696 = vst [vmem:[#allocation46_spill] sm:$0xff] %v5361_v19  ;;  %8698 = vst [vmem:[#allocation48_spill] sm:$0xff] %v5367_v29  ;;  %v5370_v4 = vld [vmem:[#allocation9] sm:$0xff] }
  0xdb   :  { %1027 = vmatprep.subr.mxu1 %v5353_v56  ;;  %8699 = vst [vmem:[#allocation49_spill] sm:$0xff] %v5370_v4  ;;  %v5373_v56 = vld [vmem:[#allocation9 + $0x1f8] sm:$0xff] }
  0xdc   :  { %1028 = vmatpush1.msra.mxu1 %v5356_v2  ;;  %8700 = vst [vmem:[#allocation50_spill] sm:$0xff] %v5373_v56  ;;  %v5392_v2 = vld [vmem:[#allocation9 + $0x1d8] sm:$0xff] }
  0xdd   :  { %1029 = vmatprep.subr.mxu1 %v5359_v47  ;;  %8704 = vst [vmem:[#allocation54_spill] sm:$0xff] %v5392_v2  ;;  %v5403_v47 = vld [vmem:[#allocation9 + $0x1c8] sm:$0xff] }
  0xde   :  { %1030 = vmatpush1.msra.mxu1 %v5364_v16  ;;  %v5382_v16 = vld [vmem:[%s8249_s2] sm:$0xf]  ;;  %8707 = vst [vmem:[#allocation56_spill] sm:$0xff] %v5403_v47 }
  0xdf   :  { %1031 = vmatprep.subr.mxu1 %v5367_v29  ;;  %v5385_v29 = vld [vmem:[#allocation9 + $0x1e8] sm:$0xff] }
  0xe0   :  { %1032 = vmatpush1.msra.mxu1 %v5370_v4  ;;  %8702 = vst [vmem:[#allocation52_spill] sm:$0xff] %v5385_v29  ;;  %v5389_v4 = vld [vmem:[#allocation9 + $0x1e0] sm:$0xff] }
  0xe1   :  { %1033 = vmatprep.subr.mxu1 %v5373_v56  ;;  %8703 = vst [vmem:[#allocation53_spill] sm:$0xff] %v5389_v4  ;;  %v8705_v56 = vsub.s32 0, %v5361_v19 }
  0xe2   :  { %1034 = vmatpush2.msra.mxu1 %v5377_v63  ;;  %v5400_v63 = vld [vmem:[#allocation9 + $0x1d0] sm:$0xff] }
  0xe3   :  { %1035 = vmatprep.subr.mxu1 %v5385_v29  ;;  %v5397_v13 = vrot.slane %v5382_v16, %v8705_v56  ;;  %8706 = vst [vmem:[#allocation55_spill] sm:$0xff] %v5400_v63  ;;  %v8708_v29 = vsub.s32 1, %v5361_v19  ;;  %v5414_v56 = vld [vmem:[#allocation9 + $0x1b8] sm:$0xff] }
  0xe4   :  { %1036 = vmatpush2.msra.mxu1 %v5389_v4  ;;  %v5411_v4 = vld [vmem:[#allocation9 + $0x1c0] sm:$0xff]  ;;  %8710 = vst [vmem:[#allocation58_spill] sm:$0xff] %v5414_v56 }
  0xe5   :  { %1037 = vmatprep.subr.mxu1 %v5392_v2  ;;  %v5408_v38 = vrot.slane %v5382_v16, %v8708_v29  ;;  %8709 = vst [vmem:[#allocation57_spill] sm:$0xff] %v5411_v4  ;;  %v5423_v29 = vld [vmem:[#allocation9 + $0x1a8] sm:$0xff] }
  0xe6   :  { %1038 = vmatpush2.msra.mxu1 %v5400_v63  ;;  %v5420_v63 = vld [vmem:[#allocation9 + $0x1b0] sm:$0xff]  ;;  %8713 = vst [vmem:[#allocation61_spill] sm:$0xff] %v5423_v29 }
  0xe7   :  { %1039 = vmatprep.subr.mxu1 %v5403_v47  ;;  %8712 = vst [vmem:[#allocation60_spill] sm:$0xff] %v5420_v63 }
  0xe8   :  { %1040 = vmatpush2.msra.mxu1 %v5411_v4  ;;  %v5429_v4 = vld [vmem:[#allocation9 + $0x1a0] sm:$0xff] }
  0xe9   :  { %1041 = vmatprep.subr.mxu1 %v5414_v56  ;;  %8715 = vst [vmem:[#allocation63_spill] sm:$0xff] %v5429_v4  ;;  %v5435_v56 = vld [vmem:[#allocation9 + $0x190] sm:$0xff] }
  0xea   :  { %1042 = vmatpush2.msra.mxu1 %v5420_v63  ;;  %8717 = vst [vmem:[#allocation65_spill] sm:$0xff] %v5435_v56 }
  0xeb   :  { %1043 = vmatprep.subr.mxu1 %v5423_v29  ;;  %v5444_v29 = vld [vmem:[#allocation9 + $0x180] sm:$0xff] }
  0xec   :  { %1044 = vmatpush2.msra.mxu1 %v5429_v4  ;;  %8720 = vst [vmem:[#allocation68_spill] sm:$0xff] %v5444_v29 }
 0x116   :  { %v250_v10 = vpop.f32.mrf.mxu0 }
 0x117   :  { %v5417_v2 = vadd.f32 %v250_v10, %v5397_v13  ;;  %v5432_v10 = vld [vmem:[#allocation9 + $0x198] sm:$0xff] }
 0x118   :  { %v252_v8 = vpop.f32.mrf.mxu0  ;;  %8716 = vst [vmem:[#allocation64_spill] sm:$0xff] %v5432_v10  ;;  %1045 = vmatprep.subr.mxu1 %v5432_v10  ;;  %v5450_v10 = vld [vmem:[#allocation9 + $0x178] sm:$0xff] }
 0x119   :  { %8711 = vst [vmem:[#allocation59_spill] sm:$0xff] %v5417_v2  ;;  %v5426_v47 = vadd.f32 %v252_v8, %v5408_v38  ;;  %1046 = vmatpush2.msra.mxu1 %v5435_v56  ;;  %v5441_v8 = vld [vmem:[#allocation9 + $0x188] sm:$0xff]  ;;  %8722 = vst [vmem:[#allocation70_spill] sm:$0xff] %v5450_v10 }
 0x11a   :  { %8719 = vst [vmem:[#allocation67_spill] sm:$0xff] %v5441_v8  ;;  %1047 = vmatprep.subr.mxu1 %v5441_v8  ;;  %v5460_v8 = vld [vmem:[#allocation9 + $0x158] sm:$0xff]  ;;  %v5469_v2 = vld [vmem:[#allocation9 + $0x148] sm:$0xff] }
 0x11b   :  { %8714 = vst [vmem:[#allocation62_spill] sm:$0xff] %v5426_v47  ;;  %v256_v3 = vpop.f32.mrf.mxu0  ;;  %1048 = vmatpush2.msra.mxu1 %v5444_v29  ;;  %v5452_v47 = vld [vmem:[#allocation9 + $0x170] sm:$0xff]  ;;  %8726 = vst [vmem:[#allocation74_spill] sm:$0xff] %v5460_v8 }
 0x11c   :  { %v5438_v63 = vadd.f32 %v256_v3, %v5397_v13  ;;  %8723 = vst [vmem:[#allocation71_spill] sm:$0xff] %v5452_v47  ;;  %v5454_v3 = vld [vmem:[#allocation9 + $0x168] sm:$0xff]  ;;  %1049 = vmatprep.subr.mxu1 %v5450_v10  ;;  %8729 = vst [vmem:[#allocation77_spill] sm:$0xff] %v5469_v2 }
 0x11d   :  { %v258_v6 = vpop.f32.mrf.mxu0  ;;  %8724 = vst [vmem:[#allocation72_spill] sm:$0xff] %v5454_v3  ;;  %1050 = vmatpush2.msra.mxu1 %v5452_v47  ;;  %v5475_v47 = vld [vmem:[#allocation9 + $0x140] sm:$0xff] }
 0x11e   :  { %8718 = vst [vmem:[#allocation66_spill] sm:$0xff] %v5438_v63  ;;  %v5447_v4 = vadd.f32 %v258_v6, %v5408_v38  ;;  %v5457_v63 = vld [vmem:[#allocation9 + $0x160] sm:$0xff]  ;;  %1051 = vmatprep.subr.mxu1 %v5454_v3  ;;  %8731 = vst [vmem:[#allocation79_spill] sm:$0xff] %v5475_v47  ;;  %v5481_v3 = vld [vmem:[#allocation9 + $0x130] sm:$0xff] }
 0x11f   :  { %8725 = vst [vmem:[#allocation73_spill] sm:$0xff] %v5457_v63  ;;  %1052 = vmatpush2.msra.mxu1 %v5457_v63  ;;  %8733 = vst [vmem:[#allocation81_spill] sm:$0xff] %v5481_v3 }
 0x120   :  { %8721 = vst [vmem:[#allocation69_spill] sm:$0xff] %v5447_v4  ;;  %v262_v56 = vpop.f32.mrf.mxu0  ;;  %v5466_v4 = vld [vmem:[#allocation9 + $0x150] sm:$0xff]  ;;  %1053 = vmatprep.subr.mxu1 %v5460_v8  ;;  %v5490_v8 = vld [vmem:[#allocation9 + $0x120] sm:$0xff] }
 0x121   :  { %v5463_v6 = vadd.f32 %v262_v56, %v5397_v13  ;;  %8728 = vst [vmem:[#allocation76_spill] sm:$0xff] %v5466_v4  ;;  %1054 = vmatpush2.msra.mxu1 %v5466_v4  ;;  %v5478_v56 = vld [vmem:[#allocation9 + $0x138] sm:$0xff]  ;;  %8736 = vst [vmem:[#allocation84_spill] sm:$0xff] %v5490_v8 }
 0x122   :  { %v264_v29 = vpop.f32.mrf.mxu0  ;;  %8732 = vst [vmem:[#allocation80_spill] sm:$0xff] %v5478_v56  ;;  %1055 = vmatprep.subr.mxu1 %v5469_v2  ;;  %v5496_v2 = vld [vmem:[#allocation9 + $0x118] sm:$0xff] }
 0x123   :  { %8727 = vst [vmem:[#allocation75_spill] sm:$0xff] %v5463_v6  ;;  %v5472_v10 = vadd.f32 %v264_v29, %v5408_v38  ;;  %1056 = vmatpush2.msra.mxu1 %v5475_v47  ;;  %v5487_v29 = vld [vmem:[#allocation9 + $0x128] sm:$0xff]  ;;  %8738 = vst [vmem:[#allocation86_spill] sm:$0xff] %v5496_v2 }
 0x124   :  { %8735 = vst [vmem:[#allocation83_spill] sm:$0xff] %v5487_v29  ;;  %1057 = vmatprep.subr.mxu1 %v5478_v56  ;;  %v5502_v47 = vld [vmem:[#allocation9 + $0x108] sm:$0xff] }
 0x125   :  { %8730 = vst [vmem:[#allocation78_spill] sm:$0xff] %v5472_v10  ;;  %v268_v6 = vpop.f32.mrf.mxu0  ;;  %1058 = vmatpush2.msra.mxu1 %v5481_v3  ;;  %8740 = vst [vmem:[#allocation88_spill] sm:$0xff] %v5502_v47 }
 0x126   :  { %v5484_v63 = vadd.f32 %v268_v6, %v5397_v13  ;;  %1059 = vmatprep.subr.mxu1 %v5487_v29  ;;  %v5499_v6 = vld [vmem:[#allocation9 + $0x110] sm:$0xff]  ;;  %v5516_v29 = vld [vmem:[#allocation7 + $0x1e8] sm:$0xff] }
 0x127   :  { %v270_v10 = vpop.f32.mrf.mxu0  ;;  %8739 = vst [vmem:[#allocation87_spill] sm:$0xff] %v5499_v6  ;;  %1060 = vmatpush2.msra.mxu1 %v5490_v8  ;;  %8744 = vst [vmem:[#allocation92_spill] sm:$0xff] %v5516_v29  ;;  %1226 = vmatprep.subr.mxu0 %v5516_v29 }
 0x128   :  { %8734 = vst [vmem:[#allocation82_spill] sm:$0xff] %v5484_v63  ;;  %v5493_v4 = vadd.f32 %v270_v10, %v5408_v38  ;;  %1061 = vmatprep.subr.mxu1 %v5496_v2  ;;  %v5508_v10 = vld [vmem:[#allocation9 + $0x100] sm:$0xff] }
 0x129   :  { %8742 = vst [vmem:[#allocation90_spill] sm:$0xff] %v5508_v10  ;;  %1062 = vmatpush2.msra.mxu1 %v5499_v6  ;;  %v5525_v6 = vld [vmem:[#allocation7 + $0x1c8] sm:$0xff] }
 0x12a   :  { %8737 = vst [vmem:[#allocation85_spill] sm:$0xff] %v5493_v4  ;;  %v274_v63 = vpop.f32.mrf.mxu0  ;;  %1063 = vmatprep.subr.mxu1 %v5502_v47  ;;  %8747 = vst [vmem:[#allocation95_spill] sm:$0xff] %v5525_v6  ;;  %v5540_v47 = vld [vmem:[#allocation7 + $0x188] sm:$0xff] }
 0x12b   :  { %v5505_v56 = vadd.f32 %v274_v63, %v5397_v13  ;;  %1064 = vmatpush2.msra.mxu1 %v5508_v10  ;;  %v5519_v63 = vld [vmem:[#allocation7 + $0x1e0] sm:$0xff]  ;;  %8752 = vst [vmem:[#allocation100_spill] sm:$0xff] %v5540_v47 }
 0x12c   :  { %v276_v4 = vpop.f32.mrf.mxu0  ;;  %1297 = vmatprep.subr.mxu1 %v5090_v14  ;;  %8745 = vst [vmem:[#allocation93_spill] sm:$0xff] %v5519_v63  ;;  %1227 = vmatpush1.msra.mxu0 %v5519_v63  ;;  %v5534_v14 = vld [vmem:[#allocation7 + $0x1a8] sm:$0xff] }
 0x12d   :  { %8741 = vst [vmem:[#allocation89_spill] sm:$0xff] %v5505_v56  ;;  %v5512_v3 = vadd.f32 %v276_v4, %v5408_v38  ;;  %1228 = vmatprep.subr.mxu0 %v5525_v6  ;;  %8750 = vst [vmem:[#allocation98_spill] sm:$0xff] %v5534_v14  ;;  %v5549_v6 = vld [vmem:[#allocation7 + $0x168] sm:$0xff] }
 0x12e   :  { %8755 = vst [vmem:[#allocation103_spill] sm:$0xff] %v5549_v6 }
 0x12f   :  { %8743 = vst [vmem:[#allocation91_spill] sm:$0xff] %v5512_v3  ;;  %v280_v8 = vpop.f32.mrf.mxu0  ;;  %v5528_v3 = vld [vmem:[#allocation7 + $0x1c0] sm:$0xff] }
 0x130   :  { %v5522_v56 = vadd.f32 %v280_v8, %v5397_v13  ;;  %8748 = vst [vmem:[#allocation96_spill] sm:$0xff] %v5528_v3  ;;  %1229 = vmatpush1.msra.mxu0 %v5528_v3  ;;  %v5537_v8 = vld [vmem:[#allocation7 + $0x1a0] sm:$0xff] }
 0x131   :  { %v282_v4 = vpop.f32.mrf.mxu0  ;;  %8751 = vst [vmem:[#allocation99_spill] sm:$0xff] %v5537_v8  ;;  %1230 = vmatprep.subr.mxu0 %v5534_v14  ;;  %v5555_v14 = vld [vmem:[#allocation7 + $0x160] sm:$0xff] }
 0x132   :  { %8746 = vst [vmem:[#allocation94_spill] sm:$0xff] %v5522_v56  ;;  %v5531_v10 = vadd.f32 %v282_v4, %v5408_v38  ;;  %1231 = vmatpush1.msra.mxu0 %v5537_v8  ;;  %v5546_v4 = vld [vmem:[#allocation7 + $0x180] sm:$0xff]  ;;  %8757 = vst [vmem:[#allocation105_spill] sm:$0xff] %v5555_v14 }
 0x133   :  { %8754 = vst [vmem:[#allocation102_spill] sm:$0xff] %v5546_v4  ;;  %1232 = vmatprep.subr.mxu0 %v5540_v47  ;;  %v5561_v8 = vld [vmem:[#allocation7 + $0x140] sm:$0xff] }
 0x134   :  { %8749 = vst [vmem:[#allocation97_spill] sm:$0xff] %v5531_v10  ;;  %v286_v56 = vpop.f32.mrf.mxu0  ;;  %1233 = vmatpush1.msra.mxu0 %v5546_v4  ;;  %8759 = vst [vmem:[#allocation107_spill] sm:$0xff] %v5561_v8  ;;  %v5570_v4 = vld [vmem:[#allocation7 + $0x120] sm:$0xff] }
 0x135   :  { %v5543_v2 = vadd.f32 %v286_v56, %v5397_v13  ;;  %1234 = vmatprep.subr.mxu0 %v5549_v6  ;;  %v5558_v56 = vld [vmem:[#allocation7 + $0x148] sm:$0xff]  ;;  %8762 = vst [vmem:[#allocation110_spill] sm:$0xff] %v5570_v4 }
 0x136   :  { %v288_v10 = vpop.f32.mrf.mxu0  ;;  %8758 = vst [vmem:[#allocation106_spill] sm:$0xff] %v5558_v56  ;;  %1235 = vmatpush1.msra.mxu0 %v5555_v14  ;;  %v5576_v14 = vld [vmem:[#allocation7 + $0x108] sm:$0xff] }
 0x137   :  { %8753 = vst [vmem:[#allocation101_spill] sm:$0xff] %v5543_v2  ;;  %v5552_v3 = vadd.f32 %v288_v10, %v5408_v38  ;;  %1236 = vmatprep.subr.mxu0 %v5558_v56  ;;  %v5567_v10 = vld [vmem:[#allocation7 + $0x128] sm:$0xff]  ;;  %8764 = vst [vmem:[#allocation112_spill] sm:$0xff] %v5576_v14 }
 0x138   :  { %8761 = vst [vmem:[#allocation109_spill] sm:$0xff] %v5567_v10  ;;  %1237 = vmatpush1.msra.mxu0 %v5561_v8 }
 0x139   :  { %8756 = vst [vmem:[#allocation104_spill] sm:$0xff] %v5552_v3  ;;  %v292_v2 = vpop.f32.mrf.mxu0  ;;  %1238 = vmatprep.subr.mxu0 %v5567_v10 }
 0x13a   :  { %v5564_v47 = vadd.f32 %v292_v2, %v5397_v13  ;;  %1239 = vmatpush1.msra.mxu0 %v5570_v4  ;;  %v5579_v13 = vld [vmem:[#allocation7 + $0x100] sm:$0xff]  ;;  %v5582_v2 = vld [vmem:[#allocation7 + $0xe8] sm:$0xff] }
 0x13b   :  { %v294_v3 = vpop.f32.mrf.mxu0  ;;  %8765 = vst [vmem:[#allocation113_spill] sm:$0xff] %v5579_v13  ;;  %1240 = vmatprep.subr.mxu0 %v5576_v14  ;;  %8766 = vst [vmem:[#allocation114_spill] sm:$0xff] %v5582_v2  ;;  %v5597_v14 = vld [vmem:[#allocation7 + $0xa0] sm:$0xff] }
 0x13c   :  { %8760 = vst [vmem:[#allocation108_spill] sm:$0xff] %v5564_v47  ;;  %v5573_v6 = vadd.f32 %v294_v3, %v5408_v38  ;;  %1241 = vmatpush1.msra.mxu0 %v5579_v13  ;;  %v5585_v47 = vld [vmem:[#allocation7 + $0xe0] sm:$0xff]  ;;  %v5588_v38 = vld [vmem:[#allocation7 + $0xc8] sm:$0xff]  ;;  %8771 = vst [vmem:[#allocation119_spill] sm:$0xff] %v5597_v14 }
 0x13d   :  { %8767 = vst [vmem:[#allocation115_spill] sm:$0xff] %v5585_v47  ;;  %1242 = vmatprep.subr.mxu0 %v5582_v2  ;;  %8768 = vst [vmem:[#allocation116_spill] sm:$0xff] %v5588_v38  ;;  %v5591_v3 = vld [vmem:[#allocation7 + $0xc0] sm:$0xff]  ;;  %v5600_v13 = vld [vmem:[#allocation7 + $0x88] sm:$0xff] }
 0x13e   :  { %8763 = vst [vmem:[#allocation111_spill] sm:$0xff] %v5573_v6  ;;  %1243 = vmatpush1.msra.mxu0 %v5585_v47  ;;  %8769 = vst [vmem:[#allocation117_spill] sm:$0xff] %v5591_v3  ;;  %v5594_v6 = vld [vmem:[#allocation7 + $0xa8] sm:$0xff]  ;;  %v5603_v2 = vld [vmem:[#allocation7 + $0x80] sm:$0xff] }
 0x13f   :  { %1244 = vmatprep.subr.mxu0 %v5588_v38  ;;  %8770 = vst [vmem:[#allocation118_spill] sm:$0xff] %v5594_v6  ;;  %8772 = vst [vmem:[#allocation120_spill] sm:$0xff] %v5600_v13  ;;  %v5606_v47 = vld [vmem:[#allocation7 + $0x68] sm:$0xff]  ;;  %v5609_v38 = vld [vmem:[#allocation7 + $0x60] sm:$0xff] }
 0x140   :  { %1245 = vmatpush1.msra.mxu0 %v5591_v3  ;;  %8773 = vst [vmem:[#allocation121_spill] sm:$0xff] %v5603_v2  ;;  %8774 = vst [vmem:[#allocation122_spill] sm:$0xff] %v5606_v47  ;;  %v5612_v3 = vld [vmem:[#allocation7 + $0x48] sm:$0xff] }
 0x141   :  { %1246 = vmatprep.subr.mxu0 %v5594_v6  ;;  %8775 = vst [vmem:[#allocation123_spill] sm:$0xff] %v5609_v38  ;;  %8776 = vst [vmem:[#allocation124_spill] sm:$0xff] %v5612_v3  ;;  %v5615_v6 = vld [vmem:[#allocation7 + $0x40] sm:$0xff] }
 0x142   :  { %1247 = vmatpush1.msra.mxu0 %v5597_v14  ;;  %8777 = vst [vmem:[#allocation125_spill] sm:$0xff] %v5615_v6  ;;  %v5618_v14 = vld [vmem:[#allocation7 + $0x28] sm:$0xff] }
 0x143   :  { %1248 = vmatprep.subr.mxu0 %v5600_v13  ;;  %8778 = vst [vmem:[#allocation126_spill] sm:$0xff] %v5618_v14  ;;  %v5621_v13 = vld [vmem:[#allocation7 + $0x20] sm:$0xff] }
 0x144   :  { %1249 = vmatpush1.msra.mxu0 %v5603_v2  ;;  %8779 = vst [vmem:[#allocation127_spill] sm:$0xff] %v5621_v13  ;;  %v5624_v2 = vld [vmem:[#allocation7 + $0x8] sm:$0xff] }
 0x145   :  { %1250 = vmatprep.subr.mxu0 %v5606_v47  ;;  %8780 = vst [vmem:[#allocation128_spill] sm:$0xff] %v5624_v2  ;;  %v5627_v47 = vld [vmem:[#allocation7] sm:$0xff] }
 0x146   :  { %1251 = vmatpush1.msra.mxu0 %v5609_v38  ;;  %8781 = vst [vmem:[#allocation129_spill] sm:$0xff] %v5627_v47  ;;  %v5630_v38 = vld [vmem:[#allocation7 + $0x3e8] sm:$0xff] }
 0x147   :  { %1252 = vmatprep.subr.mxu0 %v5612_v3  ;;  %8782 = vst [vmem:[#allocation130_spill] sm:$0xff] %v5630_v38  ;;  %v5633_v3 = vld [vmem:[#allocation7 + $0x3e0] sm:$0xff] }
 0x148   :  { %1253 = vmatpush1.msra.mxu0 %v5615_v6  ;;  %8783 = vst [vmem:[#allocation131_spill] sm:$0xff] %v5633_v3  ;;  %v5636_v6 = vld [vmem:[#allocation7 + $0x3c8] sm:$0xff] }
 0x149   :  { %1254 = vmatprep.subr.mxu0 %v5618_v14  ;;  %8784 = vst [vmem:[#allocation132_spill] sm:$0xff] %v5636_v6  ;;  %v5639_v14 = vld [vmem:[#allocation7 + $0x3c0] sm:$0xff] }
 0x14a   :  { %1255 = vmatpush1.msra.mxu0 %v5621_v13  ;;  %8785 = vst [vmem:[#allocation133_spill] sm:$0xff] %v5639_v14  ;;  %v5642_v13 = vld [vmem:[#allocation7 + $0x3a8] sm:$0xff] }
 0x14b   :  { %1256 = vmatprep.subr.mxu0 %v5624_v2  ;;  %8786 = vst [vmem:[#allocation134_spill] sm:$0xff] %v5642_v13  ;;  %v5645_v2 = vld [vmem:[#allocation7 + $0x3a0] sm:$0xff] }
 0x14c   :  { %1257 = vmatpush1.msra.mxu0 %v5627_v47  ;;  %8787 = vst [vmem:[#allocation135_spill] sm:$0xff] %v5645_v2  ;;  %v5649_v47 = vpop.f32.mrf.mxu0 }
 0x14d   :  { %1258 = vmatprep.subr.mxu0 %v5630_v38  ;;  %8788 = vst [vmem:[#allocation136_spill] sm:$0xff] %v5649_v47 }
 0x14e   :  { %1259 = vmatpush2.msra.mxu0 %v5633_v3  ;;  %v5651_v38 = vpop.f32.mrf.mxu0 }
 0x14f   :  { %1260 = vmatprep.subr.mxu0 %v5636_v6  ;;  %8789 = vst [vmem:[#allocation137_spill] sm:$0xff] %v5651_v38 }
 0x150   :  { %1261 = vmatpush2.msra.mxu0 %v5639_v14 }
 0x151   :  { %1262 = vmatprep.subr.mxu0 %v5642_v13 }
 0x152   :  { %1263 = vmatpush2.msra.mxu0 %v5645_v2 }
 0x169   :  { %v5653_v4 = vpop.f32.mrf.mxu0 }
 0x16a   :  { %8790 = vst [vmem:[#allocation138_spill] sm:$0xff] %v5653_v4  ;;  %v174_v4 = vsub.s32 2, %v5361_v19 }
 0x16b   :  { %v5655_v3 = vpop.f32.mrf.mxu0 }
 0x16c   :  { %8791 = vst [vmem:[#allocation139_spill] sm:$0xff] %v5655_v3 }
 0x16d   :  { %v5657_v10 = vpop.f32.mrf.mxu0 }
 0x16e   :  { %8792 = vst [vmem:[#allocation140_spill] sm:$0xff] %v5657_v10 }
 0x16f   :  { %v5659_v6 = vpop.f32.mrf.mxu0 }
 0x170   :  { %8793 = vst [vmem:[#allocation141_spill] sm:$0xff] %v5659_v6  ;;  %v5679_v6 = vrot.slane %v5382_v16, %v174_v4 }
 0x171   :  { %v5661_v8 = vpop.f32.mrf.mxu0 }
 0x172   :  { %8794 = vst [vmem:[#allocation142_spill] sm:$0xff] %v5661_v8  ;;  %8802 = vst [vmem:[#allocation150_spill] sm:$0xff] %v5679_v6  ;;  %v178_v8 = vsub.s32 3, %v5361_v19 }
 0x173   :  { %v5663_v14 = vpop.f32.mrf.mxu0 }
 0x174   :  { %8795 = vst [vmem:[#allocation143_spill] sm:$0xff] %v5663_v14 }
 0x175   :  { %v5665_v56 = vpop.f32.mrf.mxu0 }
 0x176   :  { %8796 = vst [vmem:[#allocation144_spill] sm:$0xff] %v5665_v56  ;;  %v363_v56 = vpop.f32.mrf.mxu1 }
 0x177   :  { %v5667_v13 = vpop.f32.mrf.mxu0 }
 0x178   :  { %8797 = vst [vmem:[#allocation145_spill] sm:$0xff] %v5667_v13  ;;  %v364_v13 = vadd.f32 %v363_v56, %v5679_v6  ;;  %v365_v10 = vpop.f32.mrf.mxu1 }
 0x179   :  { %v5669_v2 = vpop.f32.mrf.mxu0 }
 0x17a   :  { %8798 = vst [vmem:[#allocation146_spill] sm:$0xff] %v5669_v2  ;;  %v5686_v2 = vrot.slane %v5382_v16, %v178_v8 }
 0x17b   :  { %v5671_v63 = vpop.f32.mrf.mxu0 }
 0x17c   :  { %8799 = vst [vmem:[#allocation147_spill] sm:$0xff] %v5671_v63 }
 0x17d   :  { %v5674_v38 = vpop.f32.mrf.mxu0 }
 0x17e   :  { %8800 = vst [vmem:[#allocation148_spill] sm:$0xff] %v5674_v38  ;;  %v366_v38 = vadd.f32 %v365_v10, %v5686_v2 }
 0x17f   :  { %v5676_v3 = vpop.f32.mrf.mxu0 }
 0x180   :  { %8801 = vst [vmem:[#allocation149_spill] sm:$0xff] %v5676_v3 }
 0x181   :  { %v5682_v14 = vpop.f32.mrf.mxu0 }
 0x182   :  { %8803 = vst [vmem:[#allocation151_spill] sm:$0xff] %v5682_v14 }
 0x183   :  { %v5688_v63 = vpop.f32.mrf.mxu0 }
 0x184   :  { %8804 = vst [vmem:[#allocation152_spill] sm:$0xff] %v5688_v63 }
 0x187   :  { %v902_v47 = vpop.f32.mrf.mxu0 }
 0x188   :  { %v909_v3 = vadd.f32 %v902_v47, %v364_v13  ;;  %v4769_v47 = vld [vmem:[#allocation7 + $0x1f0] sm:$0xff] }
 0x189   :  { %v904_v29 = vpop.f32.mrf.mxu0 }
 0x18a   :  { %v4511_v4 = vmul.f32 -1.442695, %v909_v3  ;;  %v910_v0 = vadd.f32 %v904_v29, %v366_v38 }
 0x18c   :  { %4609 = vpow2.f32 %v4511_v4  ;;  %v4512_v19 = vmul.f32 -1.442695, %v910_v0 }
 0x18e   :  { %4611 = vpow2.f32 %v4512_v19 }
 0x199   :  { %v4610_v14 = vpop.eup %4609 }
 0x19a   :  { %v925_v61 = vadd.f32 1.0, %v4610_v14 }
 0x19b   :  { %v4612_v59 = vpop.eup %4611 }
 0x19c   :  { %v926_v56 = vadd.f32 1.0, %v4612_v59  ;;  %4613 = vrcp.f32 %v925_v61  ;;  %v5867_v59 = vpop.f32.mrf.mxu1 }
 0x19e   :  { %4615 = vrcp.f32 %v926_v56  ;;  %v5869_v61 = vpop.f32.mrf.mxu1 }
 0x1a0   :  { %v5871_v0 = vpop.f32.mrf.mxu1 }
 0x1a2   :  { %v5873_v19 = vpop.f32.mrf.mxu1 }
 0x1a4   :  { %v5875_v29 = vpop.f32.mrf.mxu1 }
 0x1a9   :  { %v4614_v16 = vpop.eup %4613 }
 0x1aa   :  { %v935_v6 = vmul.f32 %v4614_v16, %v5205_v30  ;;  %v5825_v30 = vld [vmem:[#allocation7 + $0x270] sm:$0xff] }
 0x1ab   :  { %v4616_v8 = vpop.eup %4615 }
 0x1ac   :  { %v936_v63 = vmul.f32 %v4616_v8, %v5197_v25  ;;  %v5819_v25 = vld [vmem:[#allocation7 + $0x278] sm:$0xff]  ;;  %v8820_v8 = vld [vmem:[#allocation59_spill] sm:$0xff] }
 0x1ae   :  { %1065 = vmatprep.mubr.f32.mxu1 %v936_v63 }
 0x1af   :  { %1066 = vmatmul.mubr.f32.vlgmr.msra.gmra.mxu1 %v935_v6  ;;  %v5877_v6 = vpop.f32.mrf.mxu1 }
 0x1b0   :  { %1298 = vmatpush1.msra.mxu1 %v4769_v47 }
 0x1b1   :  { %1299 = vmatprep.subr.mxu1 %v5094_v18  ;;  %v8805_v18 = vld [vmem:[#allocation15_spill] sm:$0xff]  ;;  %v5879_v63 = vpop.f32.mrf.mxu1 }
 0x1b2   :  { %1300 = vmatpush1.msra.mxu1 %v5097_v21  ;;  %v8806_v21 = vld [vmem:[#allocation16_spill] sm:$0xff]  ;;  %8809 = vst [vmem:[#allocation15_spill] sm:$0xff] %v5873_v19 }
 0x1b3   :  { %1301 = vmatprep.subr.mxu1 %v5100_v23  ;;  %v5739_v23 = vld [vmem:[#allocation7 + $0x388] sm:$0xff]  ;;  %8810 = vst [vmem:[#allocation16_spill] sm:$0xff] %v5875_v29  ;;  %v5881_v14 = vpop.f32.mrf.mxu1 }
 0x1b4   :  { %1302 = vmatpush1.msra.mxu1 %v5103_v24  ;;  %1264 = vmatprep.subr.mxu0 %v5739_v23  ;;  %v5742_v24 = vld [vmem:[#allocation7 + $0x380] sm:$0xff]  ;;  %8813 = vst [vmem:[#allocation153_spill] sm:$0xff] %v5881_v14 }
 0x1b5   :  { %1303 = vmatprep.subr.mxu1 %v5107_v26  ;;  %1265 = vmatpush2.msra.mxu0 %v5742_v24  ;;  %v5745_v26 = vld [vmem:[#allocation7 + $0x368] sm:$0xff]  ;;  %v5883_v10 = vpop.f32.mrf.mxu1 }
 0x1b6   :  { %1304 = vmatpush1.msra.mxu1 %v5111_v28  ;;  %1266 = vmatprep.subr.mxu0 %v5745_v26  ;;  %v5748_v28 = vld [vmem:[#allocation7 + $0x360] sm:$0xff]  ;;  %8814 = vst [vmem:[#allocation154_spill] sm:$0xff] %v5883_v10 }
 0x1b7   :  { %1305 = vmatprep.subr.mxu1 %v5114_v31  ;;  %1267 = vmatpush2.msra.mxu0 %v5748_v28  ;;  %v5751_v31 = vld [vmem:[#allocation7 + $0x348] sm:$0xff]  ;;  %v5885_v13 = vpop.f32.mrf.mxu1 }
 0x1b8   :  { %1306 = vmatpush1.msra.mxu1 %v5117_v33  ;;  %1268 = vmatprep.subr.mxu0 %v5751_v31  ;;  %v5754_v33 = vld [vmem:[#allocation7 + $0x340] sm:$0xff]  ;;  %8815 = vst [vmem:[#allocation155_spill] sm:$0xff] %v5885_v13  ;;  %v8822_v13 = vld [vmem:[#allocation46_spill] sm:$0xff] }
 0x1b9   :  { %1307 = vmatprep.subr.mxu1 %v5121_v35  ;;  %1269 = vmatpush2.msra.mxu0 %v5754_v33  ;;  %v5757_v35 = vld [vmem:[#allocation7 + $0x328] sm:$0xff]  ;;  %v5887_v38 = vpop.f32.mrf.mxu1 }
 0x1ba   :  { %1308 = vmatpush1.msra.mxu1 %v5125_v37  ;;  %1270 = vmatprep.subr.mxu0 %v5757_v35  ;;  %v5760_v37 = vld [vmem:[#allocation7 + $0x320] sm:$0xff]  ;;  %8816 = vst [vmem:[#allocation156_spill] sm:$0xff] %v5887_v38 }
 0x1bb   :  { %1309 = vmatprep.subr.mxu1 %v5128_v40  ;;  %1271 = vmatpush2.msra.mxu0 %v5760_v37  ;;  %v5763_v40 = vld [vmem:[#allocation7 + $0x308] sm:$0xff]  ;;  %v5889_v3 = vpop.f32.mrf.mxu1  ;;  %v482_v38 = vld [vmem:[%s8251_s4] sm:$0x3] }
 0x1bc   :  { %1310 = vmatpush1.msra.mxu1 %v5131_v42  ;;  %1272 = vmatprep.subr.mxu0 %v5763_v40  ;;  %v5766_v42 = vld [vmem:[#allocation7 + $0x300] sm:$0xff]  ;;  %8817 = vst [vmem:[#allocation157_spill] sm:$0xff] %v5889_v3  ;;  %v8823_v3 = vsub.s32 0, %v8822_v13 }
 0x1bd   :  { %1311 = vmatprep.subr.mxu1 %v5135_v44  ;;  %1273 = vmatpush2.msra.mxu0 %v5766_v42  ;;  %v5769_v44 = vld [vmem:[#allocation7 + $0x2e8] sm:$0xff]  ;;  %v5891_v4 = vpop.f32.mrf.mxu1 }
 0x1be   :  { %1312 = vmatpush1.msra.mxu1 %v5139_v46  ;;  %v5771_v46 = vld [vmem:[#allocation7 + $0x2f8] sm:$0xff]  ;;  %1274 = vmatprep.subr.mxu0 %v5769_v44  ;;  %8818 = vst [vmem:[#allocation158_spill] sm:$0xff] %v5891_v4  ;;  %v5902_v10 = vrot.slane %v482_v38, %v8823_v3 }
 0x1bf   :  { %1313 = vmatprep.subr.mxu1 %v5142_v49  ;;  %v5775_v49 = vld [vmem:[#allocation7 + $0x2e0] sm:$0xff]  ;;  %v5893_v56 = vpop.f32.mrf.mxu1 }
 0x1c0   :  { %1314 = vmatpush1.msra.mxu1 %v5145_v51  ;;  %v5777_v51 = vld [vmem:[#allocation7 + $0x2f0] sm:$0xff]  ;;  %1275 = vmatpush2.msra.mxu0 %v5775_v49  ;;  %8819 = vst [vmem:[#allocation159_spill] sm:$0xff] %v5893_v56  ;;  %v8824_v56 = vsub.s32 1, %v8822_v13 }
 0x1c1   :  { %1315 = vmatprep.subr.mxu1 %v5149_v53  ;;  %v5781_v53 = vld [vmem:[#allocation7 + $0x2c8] sm:$0xff]  ;;  %v831_v16 = vpop.f32.mrf.mxu1 }
 0x1c2   :  { %1316 = vmatpush1.msra.mxu1 %v5153_v55  ;;  %v5783_v55 = vld [vmem:[#allocation7 + $0x2d8] sm:$0xff]  ;;  %1276 = vmatprep.subr.mxu0 %v5781_v53  ;;  %v907_v47 = vadd.f32 %v831_v16, %v8820_v8  ;;  %v8825_v16 = vld [vmem:[#allocation136_spill] sm:$0xff] }
 0x1c3   :  { %1317 = vmatprep.subr.mxu1 %v5156_v58  ;;  %v5787_v58 = vld [vmem:[#allocation7 + $0x2c0] sm:$0xff]  ;;  %v561_v8 = vadd.f32 %v8825_v16, %v5902_v10 }
 0x1c4   :  { %1318 = vmatpush1.msra.mxu1 %v5159_v60  ;;  %v5789_v60 = vld [vmem:[#allocation7 + $0x2d0] sm:$0xff]  ;;  %1277 = vmatpush2.msra.mxu0 %v5787_v58 }
 0x1c5   :  { %1319 = vmatprep.subr.mxu1 %v5163_v62  ;;  %v5793_v62 = vld [vmem:[#allocation7 + $0x2a8] sm:$0xff] }
 0x1c6   :  { %1320 = vmatpush1.msra.mxu1 %v5167_v1  ;;  %v5795_v1 = vld [vmem:[#allocation7 + $0x2b8] sm:$0xff]  ;;  %1278 = vmatprep.subr.mxu0 %v5793_v62 }
 0x1c7   :  { %1321 = vmatprep.subr.mxu1 %v5170_v5  ;;  %v5799_v5 = vld [vmem:[#allocation7 + $0x2a0] sm:$0xff] }
 0x1c8   :  { %1322 = vmatpush1.msra.mxu1 %v5173_v7  ;;  %v5801_v7 = vld [vmem:[#allocation7 + $0x2b0] sm:$0xff]  ;;  %1279 = vmatpush2.msra.mxu0 %v5799_v5 }
 0x1c9   :  { %1323 = vmatprep.subr.mxu1 %v5177_v9  ;;  %v5805_v9 = vld [vmem:[#allocation7 + $0x288] sm:$0xff] }
 0x1ca   :  { %1324 = vmatpush1.msra.mxu1 %v5181_v12  ;;  %v5807_v12 = vld [vmem:[#allocation7 + $0x298] sm:$0xff]  ;;  %1280 = vmatprep.subr.mxu0 %v5805_v9 }
 0x1cb   :  { %1325 = vmatprep.subr.mxu1 %v5184_v15  ;;  %v5811_v15 = vld [vmem:[#allocation7 + $0x280] sm:$0xff] }
 0x1cc   :  { %1326 = vmatpush1.msra.mxu1 %v5187_v17  ;;  %v5813_v17 = vld [vmem:[#allocation7 + $0x290] sm:$0xff]  ;;  %1281 = vmatpush2.msra.mxu0 %v5811_v15 }
 0x1cd   :  { %1327 = vmatprep.subr.mxu1 %v5191_v22  ;;  %v5817_v22 = vld [vmem:[#allocation7 + $0x268] sm:$0xff] }
 0x1ce   :  { %1328 = vmatpush1.msra.mxu1 %v5200_v27  ;;  %1282 = vmatprep.subr.mxu0 %v5817_v22  ;;  %v5823_v27 = vld [vmem:[#allocation7 + $0x260] sm:$0xff] }
 0x1cf   :  { %1329 = vmatprep.subr.mxu1 %v5208_v32  ;;  %1283 = vmatpush2.msra.mxu0 %v5823_v27  ;;  %v5829_v32 = vld [vmem:[#allocation7 + $0x248] sm:$0xff] }
 0x1d0   :  { %1330 = vmatpush2.msra.mxu1 %v5211_v34  ;;  %v5831_v34 = vld [vmem:[#allocation7 + $0x258] sm:$0xff]  ;;  %1284 = vmatprep.subr.mxu0 %v5829_v32 }
 0x1d1   :  { %1331 = vmatprep.subr.mxu1 %v5215_v36  ;;  %v5835_v36 = vld [vmem:[#allocation7 + $0x240] sm:$0xff] }
 0x1d2   :  { %1332 = vmatpush2.msra.mxu1 %v5219_v39  ;;  %v5837_v39 = vld [vmem:[#allocation7 + $0x250] sm:$0xff]  ;;  %1285 = vmatpush2.msra.mxu0 %v5835_v36 }
 0x1d3   :  { %1333 = vmatprep.subr.mxu1 %v5222_v41  ;;  %v5841_v41 = vld [vmem:[#allocation7 + $0x228] sm:$0xff] }
 0x1d4   :  { %1334 = vmatpush2.msra.mxu1 %v5226_v43  ;;  %v5843_v43 = vld [vmem:[#allocation7 + $0x238] sm:$0xff]  ;;  %1286 = vmatprep.subr.mxu0 %v5841_v41 }
 0x1d5   :  { %1335 = vmatprep.subr.mxu1 %v5230_v45  ;;  %v5845_v45 = vld [vmem:[#allocation7 + $0x220] sm:$0xff] }
 0x1d6   :  { %1336 = vmatpush2.msra.mxu1 %v5233_v48  ;;  %v5849_v48 = vld [vmem:[#allocation7 + $0x230] sm:$0xff]  ;;  %1287 = vmatpush2.msra.mxu0 %v5845_v45 }
 0x1d7   :  { %1337 = vmatprep.subr.mxu1 %v5236_v50  ;;  %v5851_v50 = vld [vmem:[#allocation7 + $0x208] sm:$0xff] }
 0x1d8   :  { %1338 = vmatpush2.msra.mxu1 %v5240_v11  ;;  %v5853_v11 = vld [vmem:[#allocation7 + $0x218] sm:$0xff]  ;;  %1288 = vmatprep.subr.mxu0 %v5851_v50 }
 0x1d9   :  { %1339 = vmatprep.subr.mxu1 %v5244_v52  ;;  %v5857_v52 = vld [vmem:[#allocation7 + $0x200] sm:$0xff] }
 0x1da   :  { %1340 = vmatpush2.msra.mxu1 %v5247_v54  ;;  %v5861_v54 = vld [vmem:[#allocation7 + $0x210] sm:$0xff]  ;;  %1289 = vmatpush2.msra.mxu0 %v5857_v52 }
 0x1db   :  { %1341 = vmatprep.subr.mxu1 %v5250_v57  ;;  %v8807_v57 = vld [vmem:[#allocation17_spill] sm:$0xff] }
 0x1dc   :  { %1342 = vmatpush2.msra.mxu1 %v5254_v20  ;;  %1462 = vmatprep.subr.mxu0 %v8807_v57  ;;  %v8808_v20 = vld [vmem:[#allocation92_spill] sm:$0xff]  ;;  %8811 = vst [vmem:[#allocation17_spill] sm:$0xff] %v5877_v6 }
 0x1dd   :  { %1343 = vmatprep.subr.mxu1 %v8805_v18  ;;  %8812 = vst [vmem:[#allocation92_spill] sm:$0xff] %v5879_v63  ;;  %v833_v18 = vpop.f32.mrf.mxu1  ;;  %v5906_v63 = vrot.slane %v482_v38, %v8824_v56  ;;  %v4770_v56 = vld [vmem:[%s8256_s9] sm:$0xff] }
 0x1de   :  { %1344 = vmatpush2.msra.mxu1 %v8806_v21  ;;  %v8821_v21 = vld [vmem:[#allocation62_spill] sm:$0xff] }
 0x1df   :  { %1345 = vmatprep.subr.mxu1 %v5771_v46  ;;  %v908_v57 = vadd.f32 %v833_v18, %v8821_v21 }
 0x1e0   :  { %1346 = vmatpush2.msra.mxu1 %v5777_v51 }
 0x1e1   :  { %1347 = vmatprep.subr.mxu1 %v5783_v55  ;;  %v4510_v14 = vmul.f32 -1.442695, %v908_v57 }
 0x1e2   :  { %1348 = vmatpush2.msra.mxu1 %v5789_v60 }
 0x1e3   :  { %1349 = vmatprep.subr.mxu1 %v5795_v1 }
 0x1e4   :  { %1350 = vmatpush2.msra.mxu1 %v5801_v7 }
 0x1e5   :  { %1351 = vmatprep.subr.mxu1 %v5807_v12 }
 0x1e6   :  { %1352 = vmatpush2.msra.mxu1 %v5813_v17 }
 0x1e7   :  { %1353 = vmatprep.subr.mxu1 %v5819_v25 }
 0x1e8   :  { %1354 = vmatpush2.msra.mxu1 %v5825_v30 }
 0x1e9   :  { %1355 = vmatprep.subr.mxu1 %v5831_v34 }
 0x1ea   :  { %1356 = vmatpush2.msra.mxu1 %v5837_v39 }
 0x1eb   :  { %1357 = vmatprep.subr.mxu1 %v5843_v43 }
 0x1ec   :  { %1358 = vmatpush2.msra.mxu1 %v5849_v48 }
 0x1ed   :  { %1359 = vmatprep.subr.mxu1 %v5853_v11 }
 0x1ee   :  { %1360 = vmatpush2.msra.mxu1 %v5861_v54 }
 0x1ef   :  { %1687 = vmatprep.subr.mxu1 %v8808_v20  ;;  %v4509_v20 = vmul.f32 -1.442695, %v907_v47 }
 0x1f1   :  { %4617 = vpow2.f32 %v4509_v20 }
 0x1f2   :  { %4619 = vpow2.f32 %v4510_v14  ;;  %v8826_v14 = vld [vmem:[#allocation137_spill] sm:$0xff] }
 0x1f3   :  { %v563_v57 = vadd.f32 %v8826_v14, %v5906_v63 }
 0x1fe   :  { %v4618_v4 = vpop.eup %4617 }
 0x1ff   :  { %v4620_v47 = vpop.eup %4619  ;;  %v923_v18 = vadd.f32 1.0, %v4618_v4 }
 0x200   :  { %v924_v29 = vadd.f32 1.0, %v4620_v47 }
 0x26f   :  { %v1067_v21 = vpop.f32.mrf.mxu1 }
 0x270   :  { %v1072_v20 = vadd.f32 %v1067_v21, %v561_v8  ;;  %v4771_v8 = vld [vmem:[%s8256_s9 + $0x8] sm:$0xff] }
 0x271   :  { %v1069_v6 = vpop.f32.mrf.mxu1 }
 0x272   :  { %4621 = vtanh.f32 %v1072_v20  ;;  %v1073_v3 = vadd.f32 %v1069_v6, %v563_v57  ;;  %v8830_v57 = vld [vmem:[#allocation93_spill] sm:$0xff]  ;;  %v8831_v20 = vld [vmem:[#allocation19_spill] sm:$0xff] }
 0x273   :  { %4623 = vrcp.f32 %v923_v18 }
 0x274   :  { %4625 = vtanh.f32 %v1073_v3  ;;  %v8832_v3 = vld [vmem:[#allocation95_spill] sm:$0xff] }
 0x275   :  { %4627 = vrcp.f32 %v924_v29  ;;  %v8829_v29 = vld [vmem:[#allocation18_spill] sm:$0xff] }
 0x27f   :  { %v4622_v13 = vpop.eup %4621 }
 0x280   :  { %v4624_v38 = vpop.eup %4623  ;;  %v1076_v16 = vsub.f32 %v4622_v13, %v4770_v56  ;;  %v8833_v13 = vld [vmem:[#allocation20_spill] sm:$0xff] }
 0x281   :  { %v4626_v4 = vpop.eup %4625 }
 0x282   :  { %v1078_v19 = vmul.f32 %v4624_v38, %v1076_v16  ;;  %v1077_v21 = vsub.f32 %v4626_v4, %v4771_v8  ;;  %v4628_v47 = vpop.eup %4627  ;;  %v8835_v38 = vld [vmem:[#allocation21_spill] sm:$0xff]  ;;  %v8837_v16 = vld [vmem:[#allocation22_spill] sm:$0xff]  ;;  %v8838_v4 = vld [vmem:[#allocation99_spill] sm:$0xff] }
 0x284   :  { %v1079_v14 = vmul.f32 %v4628_v47, %v1077_v21  ;;  %v5920_v18 = vadd.f32 %v4770_v56, %v1078_v19  ;;  %v8834_v19 = vld [vmem:[#allocation96_spill] sm:$0xff]  ;;  %v8836_v56 = vld [vmem:[#allocation98_spill] sm:$0xff] }
 0x285   :  { %v8840_v21 = vld [vmem:[#allocation100_spill] sm:$0xff] }
 0x286   :  { %v5918_v6 = vadd.f32 %v4771_v8, %v1079_v14  ;;  %8828 = vst [vmem:[#allocation62_spill] sm:$0xff] %v5920_v18  ;;  %v8839_v8 = vld [vmem:[#allocation23_spill] sm:$0xff]  ;;  %v8841_v47 = vld [vmem:[#allocation24_spill] sm:$0xff]  ;;  %v8842_v14 = vld [vmem:[#allocation102_spill] sm:$0xff] }
 0x288   :  { %8827 = vst [vmem:[#allocation59_spill] sm:$0xff] %v5918_v6  ;;  %1290 = vmatprep.mubr.f32.mxu0 %v5918_v6  ;;  %1361 = vmatprep.mubr.f32.mxu1 %v5918_v6 }
 0x289   :  { %1291 = vmatmul.mubr.f32.vlgmr.msra.gmra.mxu0 %v5920_v18  ;;  %1362 = vmatmul.mubr.f32.vlgmr.msra.gmra.mxu1 %v5920_v18 }
 0x28a   :  { %1463 = vmatpush1.msra.mxu0 %v8829_v29  ;;  %1688 = vmatpush1.msra.mxu1 %v8830_v57  ;;  %v8843_v29 = vld [vmem:[#allocation25_spill] sm:$0xff]  ;;  %v8844_v57 = vld [vmem:[#allocation103_spill] sm:$0xff] }
 0x28b   :  { %1464 = vmatprep.subr.mxu0 %v8831_v20  ;;  %1689 = vmatprep.subr.mxu1 %v8832_v3  ;;  %v8845_v20 = vld [vmem:[#allocation26_spill] sm:$0xff]  ;;  %v8846_v3 = vld [vmem:[#allocation105_spill] sm:$0xff] }
 0x28c   :  { %1465 = vmatpush1.msra.mxu0 %v8833_v13  ;;  %1690 = vmatpush1.msra.mxu1 %v8834_v19  ;;  %v8847_v13 = vld [vmem:[#allocation27_spill] sm:$0xff]  ;;  %v8848_v19 = vld [vmem:[#allocation106_spill] sm:$0xff] }
 0x28d   :  { %1466 = vmatprep.subr.mxu0 %v8835_v38  ;;  %1691 = vmatprep.subr.mxu1 %v8836_v56  ;;  %v8849_v38 = vld [vmem:[#allocation28_spill] sm:$0xff]  ;;  %v8850_v56 = vld [vmem:[#allocation107_spill] sm:$0xff] }
 0x28e   :  { %1467 = vmatpush1.msra.mxu0 %v8837_v16  ;;  %1692 = vmatpush1.msra.mxu1 %v8838_v4  ;;  %v8851_v16 = vld [vmem:[#allocation29_spill] sm:$0xff] }
 0x28f   :  { %1468 = vmatprep.subr.mxu0 %v8839_v8  ;;  %1693 = vmatprep.subr.mxu1 %v8840_v21  ;;  %v8852_v4 = vld [vmem:[#allocation109_spill] sm:$0xff]  ;;  %v8853_v8 = vld [vmem:[#allocation30_spill] sm:$0xff] }
 0x290   :  { %1469 = vmatpush1.msra.mxu0 %v8841_v47  ;;  %1694 = vmatpush1.msra.mxu1 %v8842_v14  ;;  %v8854_v21 = vld [vmem:[#allocation110_spill] sm:$0xff]  ;;  %v8855_v47 = vld [vmem:[#allocation31_spill] sm:$0xff]  ;;  %v8856_v14 = vld [vmem:[#allocation112_spill] sm:$0xff] }
 0x291   :  { %1470 = vmatprep.subr.mxu0 %v8843_v29  ;;  %1695 = vmatprep.subr.mxu1 %v8844_v57  ;;  %v8857_v29 = vld [vmem:[#allocation32_spill] sm:$0xff]  ;;  %v8858_v57 = vld [vmem:[#allocation113_spill] sm:$0xff] }
 0x292   :  { %1471 = vmatpush1.msra.mxu0 %v8845_v20  ;;  %1696 = vmatpush1.msra.mxu1 %v8846_v3  ;;  %v8859_v20 = vld [vmem:[#allocation33_spill] sm:$0xff]  ;;  %v8860_v3 = vld [vmem:[#allocation114_spill] sm:$0xff] }
 0x293   :  { %1472 = vmatprep.subr.mxu0 %v8847_v13  ;;  %1697 = vmatprep.subr.mxu1 %v8848_v19  ;;  %v8861_v13 = vld [vmem:[#allocation34_spill] sm:$0xff]  ;;  %v8862_v19 = vld [vmem:[#allocation115_spill] sm:$0xff] }
 0x294   :  { %1473 = vmatpush1.msra.mxu0 %v8849_v38  ;;  %1698 = vmatpush1.msra.mxu1 %v8850_v56  ;;  %v8863_v38 = vld [vmem:[#allocation35_spill] sm:$0xff]  ;;  %v8864_v56 = vld [vmem:[#allocation116_spill] sm:$0xff] }
 0x295   :  { %1474 = vmatprep.subr.mxu0 %v8851_v16  ;;  %1699 = vmatprep.subr.mxu1 %v8852_v4  ;;  %v8865_v16 = vld [vmem:[#allocation36_spill] sm:$0xff]  ;;  %v8866_v4 = vld [vmem:[#allocation117_spill] sm:$0xff] }
 0x296   :  { %1475 = vmatpush1.msra.mxu0 %v8853_v8  ;;  %1700 = vmatpush1.msra.mxu1 %v8854_v21  ;;  %v8867_v8 = vld [vmem:[#allocation37_spill] sm:$0xff]  ;;  %v8868_v21 = vld [vmem:[#allocation118_spill] sm:$0xff] }
 0x297   :  { %1476 = vmatprep.subr.mxu0 %v8855_v47  ;;  %1701 = vmatprep.subr.mxu1 %v8856_v14  ;;  %v8869_v47 = vld [vmem:[#allocation38_spill] sm:$0xff]  ;;  %v8870_v14 = vld [vmem:[#allocation119_spill] sm:$0xff] }
 0x298   :  { %1477 = vmatpush1.msra.mxu0 %v8857_v29  ;;  %1702 = vmatpush1.msra.mxu1 %v8858_v57  ;;  %v8871_v29 = vld [vmem:[#allocation39_spill] sm:$0xff]  ;;  %v8872_v57 = vld [vmem:[#allocation120_spill] sm:$0xff] }
 0x299   :  { %1478 = vmatprep.subr.mxu0 %v8859_v20  ;;  %1703 = vmatprep.subr.mxu1 %v8860_v3  ;;  %v8873_v20 = vld [vmem:[#allocation40_spill] sm:$0xff]  ;;  %v8874_v3 = vld [vmem:[#allocation121_spill] sm:$0xff] }
 0x29a   :  { %1479 = vmatpush1.msra.mxu0 %v8861_v13  ;;  %1704 = vmatpush1.msra.mxu1 %v8862_v19  ;;  %v8875_v13 = vld [vmem:[#allocation41_spill] sm:$0xff]  ;;  %v8876_v19 = vld [vmem:[#allocation122_spill] sm:$0xff] }
 0x29b   :  { %1480 = vmatprep.subr.mxu0 %v8863_v38  ;;  %1705 = vmatprep.subr.mxu1 %v8864_v56  ;;  %v8877_v38 = vld [vmem:[#allocation42_spill] sm:$0xff]  ;;  %v8878_v56 = vld [vmem:[#allocation123_spill] sm:$0xff] }
 0x29c   :  { %1481 = vmatpush1.msra.mxu0 %v8865_v16  ;;  %1706 = vmatpush1.msra.mxu1 %v8866_v4  ;;  %v8879_v16 = vld [vmem:[#allocation43_spill] sm:$0xff]  ;;  %v8880_v4 = vld [vmem:[#allocation124_spill] sm:$0xff] }
 0x29d   :  { %1482 = vmatprep.subr.mxu0 %v8867_v8  ;;  %1707 = vmatprep.subr.mxu1 %v8868_v21  ;;  %v8881_v8 = vld [vmem:[#allocation44_spill] sm:$0xff]  ;;  %v8882_v21 = vld [vmem:[#allocation125_spill] sm:$0xff] }
 0x29e   :  { %1483 = vmatpush1.msra.mxu0 %v8869_v47  ;;  %1708 = vmatpush1.msra.mxu1 %v8870_v14  ;;  %v8883_v47 = vld [vmem:[#allocation45_spill] sm:$0xff]  ;;  %v8884_v14 = vld [vmem:[#allocation126_spill] sm:$0xff] }
 0x29f   :  { %1484 = vmatprep.subr.mxu0 %v8871_v29  ;;  %1709 = vmatprep.subr.mxu1 %v8872_v57  ;;  %v8885_v29 = vld [vmem:[#allocation47_spill] sm:$0xff] }
 0x2a0   :  { %1485 = vmatpush1.msra.mxu0 %v8873_v20  ;;  %1710 = vmatpush1.msra.mxu1 %v8874_v3  ;;  %v8886_v57 = vld [vmem:[#allocation127_spill] sm:$0xff]  ;;  %v8887_v20 = vld [vmem:[#allocation48_spill] sm:$0xff] }
 0x2a1   :  { %1486 = vmatprep.subr.mxu0 %v8875_v13  ;;  %1711 = vmatprep.subr.mxu1 %v8876_v19  ;;  %v8888_v3 = vld [vmem:[#allocation128_spill] sm:$0xff]  ;;  %v8889_v13 = vld [vmem:[#allocation49_spill] sm:$0xff] }
 0x2a2   :  { %1487 = vmatpush1.msra.mxu0 %v8877_v38  ;;  %1712 = vmatpush1.msra.mxu1 %v8878_v56  ;;  %v8890_v19 = vld [vmem:[#allocation129_spill] sm:$0xff]  ;;  %v8891_v38 = vld [vmem:[#allocation50_spill] sm:$0xff] }
 0x2a3   :  { %1488 = vmatprep.subr.mxu0 %v8879_v16  ;;  %1713 = vmatprep.subr.mxu1 %v8880_v4  ;;  %v8892_v56 = vld [vmem:[#allocation130_spill] sm:$0xff]  ;;  %v8893_v16 = vld [vmem:[#allocation51_spill] sm:$0xff] }
 0x2a4   :  { %1489 = vmatpush1.msra.mxu0 %v8881_v8  ;;  %1714 = vmatpush1.msra.mxu1 %v8882_v21  ;;  %v8894_v4 = vld [vmem:[#allocation131_spill] sm:$0xff]  ;;  %v8895_v8 = vld [vmem:[#allocation52_spill] sm:$0xff] }
 0x2a5   :  { %1490 = vmatprep.subr.mxu0 %v8883_v47  ;;  %1715 = vmatprep.subr.mxu1 %v8884_v14  ;;  %v8896_v21 = vld [vmem:[#allocation132_spill] sm:$0xff]  ;;  %v8897_v47 = vld [vmem:[#allocation53_spill] sm:$0xff] }
 0x2a6   :  { %1491 = vmatpush1.msra.mxu0 %v8885_v29  ;;  %1716 = vmatpush1.msra.mxu1 %v8886_v57  ;;  %v8898_v14 = vld [vmem:[#allocation133_spill] sm:$0xff]  ;;  %v8899_v29 = vld [vmem:[#allocation54_spill] sm:$0xff] }
 0x2a7   :  { %1492 = vmatprep.subr.mxu0 %v8887_v20  ;;  %1717 = vmatprep.subr.mxu1 %v8888_v3  ;;  %v8900_v57 = vld [vmem:[#allocation134_spill] sm:$0xff]  ;;  %v8901_v20 = vld [vmem:[#allocation55_spill] sm:$0xff] }
 0x2a8   :  { %1493 = vmatpush1.msra.mxu0 %v8889_v13  ;;  %1718 = vmatpush1.msra.mxu1 %v8890_v19  ;;  %v8902_v3 = vld [vmem:[#allocation135_spill] sm:$0xff]  ;;  %v8903_v13 = vld [vmem:[#allocation56_spill] sm:$0xff]  ;;  %v8904_v19 = vld [vmem:[#allocation57_spill] sm:$0xff] }
 0x2a9   :  { %1494 = vmatprep.subr.mxu0 %v8891_v38  ;;  %1719 = vmatprep.subr.mxu1 %v8892_v56  ;;  %v8905_v38 = vld [vmem:[#allocation58_spill] sm:$0xff]  ;;  %v8906_v56 = vld [vmem:[#allocation60_spill] sm:$0xff] }
 0x2aa   :  { %1495 = vmatpush2.msra.mxu0 %v8893_v16  ;;  %1720 = vmatpush2.msra.mxu1 %v8894_v4  ;;  %v8907_v16 = vld [vmem:[#allocation61_spill] sm:$0xff]  ;;  %v8908_v4 = vld [vmem:[#allocation63_spill] sm:$0xff] }
 0x2ab   :  { %1496 = vmatprep.subr.mxu0 %v8895_v8  ;;  %1721 = vmatprep.subr.mxu1 %v8896_v21  ;;  %v372_v21 = vadd.f32 %v5869_v61, %v5686_v2  ;;  %v6061_v61 = vld [vmem:[#allocation7 + $0x1f0] sm:$0xff] }
 0x2ac   :  { %1497 = vmatpush2.msra.mxu0 %v8897_v47  ;;  %1722 = vmatpush2.msra.mxu1 %v8898_v14 }
 0x2ad   :  { %1498 = vmatprep.subr.mxu0 %v8899_v29  ;;  %1723 = vmatprep.subr.mxu1 %v8900_v57 }
 0x2ae   :  { %1499 = vmatpush2.msra.mxu0 %v8901_v20  ;;  %1724 = vmatpush2.msra.mxu1 %v8902_v3 }
 0x2af   :  { %1500 = vmatprep.subr.mxu0 %v8903_v13  ;;  %1725 = vmatprep.subr.mxu1 %v5739_v23  ;;  %v8909_v23 = vld [vmem:[#allocation64_spill] sm:$0xff] }
 0x2b0   :  { %1501 = vmatpush2.msra.mxu0 %v8904_v19  ;;  %1726 = vmatpush2.msra.mxu1 %v5742_v24  ;;  %v8910_v24 = vld [vmem:[#allocation65_spill] sm:$0xff] }
 0x2b1   :  { %1502 = vmatprep.subr.mxu0 %v8905_v38  ;;  %1727 = vmatprep.subr.mxu1 %v5745_v26  ;;  %v8911_v26 = vld [vmem:[#allocation67_spill] sm:$0xff] }
 0x2b2   :  { %1503 = vmatpush2.msra.mxu0 %v8906_v56  ;;  %1728 = vmatpush2.msra.mxu1 %v5748_v28  ;;  %v8912_v28 = vld [vmem:[#allocation68_spill] sm:$0xff]  ;;  %v6063_v56 = vld [vmem:[#allocation7 + $0x1d8] sm:$0xff] }
 0x2b3   :  { %1504 = vmatprep.subr.mxu0 %v8907_v16  ;;  %1729 = vmatprep.subr.mxu1 %v5751_v31  ;;  %v8913_v31 = vld [vmem:[#allocation70_spill] sm:$0xff]  ;;  %v6065_v16 = vld [vmem:[#allocation7 + $0x1d0] sm:$0xff] }
 0x2b4   :  { %1505 = vmatpush2.msra.mxu0 %v8908_v4  ;;  %1730 = vmatpush2.msra.mxu1 %v5754_v33  ;;  %v8914_v33 = vld [vmem:[#allocation71_spill] sm:$0xff]  ;;  %v6068_v4 = vld [vmem:[#allocation7 + $0x1b8] sm:$0xff] }
 0x2b5   :  { %1506 = vmatprep.subr.mxu0 %v8909_v23  ;;  %1731 = vmatprep.subr.mxu1 %v5757_v35  ;;  %v8915_v35 = vld [vmem:[#allocation72_spill] sm:$0xff]  ;;  %v6071_v23 = vld [vmem:[#allocation7 + $0x1b0] sm:$0xff] }
 0x2b6   :  { %1507 = vmatpush2.msra.mxu0 %v8910_v24  ;;  %1732 = vmatpush2.msra.mxu1 %v5760_v37  ;;  %v8916_v37 = vld [vmem:[#allocation73_spill] sm:$0xff]  ;;  %v6074_v24 = vld [vmem:[#allocation7 + $0x198] sm:$0xff] }
 0x2b7   :  { %1508 = vmatprep.subr.mxu0 %v8911_v26  ;;  %1733 = vmatprep.subr.mxu1 %v5763_v40  ;;  %v8917_v40 = vld [vmem:[#allocation74_spill] sm:$0xff]  ;;  %v6077_v26 = vld [vmem:[#allocation7 + $0x190] sm:$0xff] }
 0x2b8   :  { %1509 = vmatpush2.msra.mxu0 %v8912_v28  ;;  %1734 = vmatpush2.msra.mxu1 %v5766_v42  ;;  %v8918_v42 = vld [vmem:[#allocation76_spill] sm:$0xff]  ;;  %v6080_v28 = vld [vmem:[#allocation7 + $0x178] sm:$0xff] }
 0x2b9   :  { %1510 = vmatprep.subr.mxu0 %v8913_v31  ;;  %1735 = vmatprep.subr.mxu1 %v5769_v44  ;;  %v8919_v44 = vld [vmem:[#allocation77_spill] sm:$0xff] }
 0x2ba   :  { %1511 = vmatpush2.msra.mxu0 %v8914_v33  ;;  %1736 = vmatpush2.msra.mxu1 %v5775_v49  ;;  %v8920_v49 = vld [vmem:[#allocation79_spill] sm:$0xff]  ;;  %v6083_v31 = vld [vmem:[#allocation7 + $0x170] sm:$0xff]  ;;  %v6086_v33 = vld [vmem:[#allocation7 + $0x158] sm:$0xff] }
 0x2bb   :  { %1512 = vmatprep.subr.mxu0 %v8915_v35  ;;  %1737 = vmatprep.subr.mxu1 %v5781_v53  ;;  %v8921_v53 = vld [vmem:[#allocation80_spill] sm:$0xff]  ;;  %v6089_v35 = vld [vmem:[#allocation7 + $0x150] sm:$0xff] }
 0x2bc   :  { %1513 = vmatpush2.msra.mxu0 %v8916_v37  ;;  %1738 = vmatpush2.msra.mxu1 %v5787_v58  ;;  %v8922_v58 = vld [vmem:[#allocation81_spill] sm:$0xff]  ;;  %v6092_v37 = vld [vmem:[#allocation7 + $0x138] sm:$0xff] }
 0x2bd   :  { %1514 = vmatprep.subr.mxu0 %v8917_v40  ;;  %1739 = vmatprep.subr.mxu1 %v5793_v62  ;;  %v8923_v62 = vld [vmem:[#allocation83_spill] sm:$0xff]  ;;  %v6095_v40 = vld [vmem:[#allocation7 + $0x130] sm:$0xff] }
 0x2be   :  { %1515 = vmatpush2.msra.mxu0 %v8918_v42  ;;  %1740 = vmatpush2.msra.mxu1 %v5799_v5  ;;  %v8924_v5 = vld [vmem:[#allocation84_spill] sm:$0xff]  ;;  %v6098_v42 = vld [vmem:[#allocation7 + $0x118] sm:$0xff] }
 0x2bf   :  { %1516 = vmatprep.subr.mxu0 %v8919_v44  ;;  %1741 = vmatprep.subr.mxu1 %v5805_v9  ;;  %v8925_v9 = vld [vmem:[#allocation86_spill] sm:$0xff]  ;;  %v6101_v44 = vld [vmem:[#allocation7 + $0x110] sm:$0xff] }
 0x2c0   :  { %1517 = vmatpush2.msra.mxu0 %v8920_v49  ;;  %1742 = vmatpush2.msra.mxu1 %v5811_v15  ;;  %v8926_v15 = vld [vmem:[#allocation87_spill] sm:$0xff]  ;;  %v6104_v49 = vld [vmem:[#allocation7 + $0xf8] sm:$0xff] }
 0x2c1   :  { %1518 = vmatprep.subr.mxu0 %v8921_v53  ;;  %1743 = vmatprep.subr.mxu1 %v5817_v22  ;;  %v8927_v22 = vld [vmem:[#allocation88_spill] sm:$0xff]  ;;  %v6107_v53 = vld [vmem:[#allocation7 + $0xf0] sm:$0xff] }
 0x2c2   :  { %1519 = vmatpush2.msra.mxu0 %v8922_v58  ;;  %1744 = vmatpush2.msra.mxu1 %v5823_v27  ;;  %v8928_v27 = vld [vmem:[#allocation90_spill] sm:$0xff] }
 0x2c3   :  { %1520 = vmatprep.subr.mxu0 %v8923_v62  ;;  %1745 = vmatprep.subr.mxu1 %v5829_v32  ;;  %v6052_v32 = vld [vmem:[#allocation7 + $0x1f8] sm:$0xff]  ;;  %v6113_v62 = vld [vmem:[#allocation7 + $0xd0] sm:$0xff] }
 0x2c4   :  { %1521 = vmatpush2.msra.mxu0 %v8924_v5  ;;  %1746 = vmatpush2.msra.mxu1 %v5835_v36  ;;  %v8929_v36 = vld [vmem:[#allocation150_spill] sm:$0xff] }
 0x2c5   :  { %1522 = vmatprep.subr.mxu0 %v8925_v9  ;;  %1747 = vmatprep.subr.mxu1 %v5841_v41  ;;  %v370_v8 = vadd.f32 %v5867_v59, %v8929_v36  ;;  %v6110_v58 = vld [vmem:[#allocation7 + $0xd8] sm:$0xff]  ;;  %v6119_v9 = vld [vmem:[#allocation7 + $0xb0] sm:$0xff] }
 0x2c6   :  { %1523 = vmatpush2.msra.mxu0 %v8926_v15  ;;  %1748 = vmatpush2.msra.mxu1 %v5845_v45  ;;  %v6116_v5 = vld [vmem:[#allocation7 + $0xb8] sm:$0xff] }
 0x2c7   :  { %1524 = vmatprep.subr.mxu0 %v8927_v22  ;;  %1749 = vmatprep.subr.mxu1 %v5851_v50  ;;  %v6122_v15 = vld [vmem:[#allocation7 + $0x98] sm:$0xff]  ;;  %v6125_v22 = vld [vmem:[#allocation7 + $0x90] sm:$0xff] }
 0x2c8   :  { %1525 = vmatpush2.msra.mxu0 %v8928_v27  ;;  %1750 = vmatpush2.msra.mxu1 %v5857_v52  ;;  %v6128_v27 = vld [vmem:[#allocation7 + $0x78] sm:$0xff] }
 0x2c9   :  { %1758 = vmatprep.subr.mxu0 %v6052_v32 }
 0x349   :  { %v1363_v41 = vpop.f32.mrf.mxu1 }
 0x34a   :  { %v1370_v45 = vadd.f32 %v1363_v41, %v370_v8  ;;  %v6131_v8 = vld [vmem:[#allocation7 + $0x70] sm:$0xff]  ;;  %v6134_v41 = vld [vmem:[#allocation7 + $0x58] sm:$0xff] }
 0x34b   :  { %v1365_v47 = vpop.f32.mrf.mxu1 }
 0x34c   :  { %v4515_v14 = vmul.f32 -1.442695, %v1370_v45  ;;  %v1371_v29 = vadd.f32 %v1365_v47, %v372_v21  ;;  %v6137_v21 = vld [vmem:[#allocation7 + $0x50] sm:$0xff]  ;;  %v6140_v45 = vld [vmem:[#allocation7 + $0x38] sm:$0xff] }
 0x34d   :  { %v6143_v47 = vld [vmem:[#allocation7 + $0x30] sm:$0xff] }
 0x34e   :  { %v4516_v50 = vmul.f32 -1.442695, %v1371_v29  ;;  %4629 = vpow2.f32 %v4515_v14  ;;  %v6146_v14 = vld [vmem:[#allocation7 + $0x18] sm:$0xff]  ;;  %v6149_v29 = vld [vmem:[#allocation7 + $0x10] sm:$0xff] }
 0x350   :  { %4631 = vpow2.f32 %v4516_v50  ;;  %v6152_v50 = vld [vmem:[#allocation7 + $0x3f8] sm:$0xff] }
 0x35b   :  { %v4630_v57 = vpop.eup %4629 }
 0x35c   :  { %v1386_v52 = vadd.f32 1.0, %v4630_v57  ;;  %v6155_v57 = vld [vmem:[#allocation7 + $0x3f0] sm:$0xff] }
 0x35d   :  { %v4632_v20 = vpop.eup %4631 }
 0x35e   :  { %v1387_v3 = vadd.f32 1.0, %v4632_v20  ;;  %4633 = vrcp.f32 %v1386_v52  ;;  %v6158_v52 = vld [vmem:[#allocation7 + $0x3d8] sm:$0xff]  ;;  %v6161_v20 = vld [vmem:[#allocation7 + $0x3d0] sm:$0xff] }
 0x35f   :  { %8930 = vst [vmem:[#allocation46_spill] sm:$0xff] %v6158_v52  ;;  %8931 = vst [vmem:[#allocation136_spill] sm:$0xff] %v6161_v20 }
 0x360   :  { %4635 = vrcp.f32 %v1387_v3  ;;  %v6164_v3 = vld [vmem:[#allocation7 + $0x3b8] sm:$0xff] }
 0x36b   :  { %v4634_v13 = vpop.eup %4633 }
 0x36c   :  { %v1396_v38 = vmul.f32 %v4634_v13, %v5920_v18  ;;  %v6167_v13 = vld [vmem:[#allocation7 + $0x3b0] sm:$0xff] }
 0x36d   :  { %v4636_v19 = vpop.eup %4635  ;;  %8932 = vst [vmem:[#allocation137_spill] sm:$0xff] %v6167_v13 }
 0x36e   :  { %v1397_v59 = vmul.f32 %v4636_v19, %v5918_v6  ;;  %v6172_v19 = vld [vmem:[#allocation7 + $0x398] sm:$0xff] }
 0x36f   :  { %8933 = vst [vmem:[#allocation18_spill] sm:$0xff] %v6172_v19 }
 0x370   :  { %1526 = vmatprep.mubr.f32.mxu0 %v1397_v59  ;;  %v6175_v59 = vld [vmem:[#allocation7 + $0x390] sm:$0xff] }
 0x371   :  { %1527 = vmatmul.mubr.f32.vlgmr.msra.gmra.mxu0 %v1396_v38  ;;  %8934 = vst [vmem:[#allocation93_spill] sm:$0xff] %v6175_v59  ;;  %v6178_v38 = vld [vmem:[#allocation7 + $0x378] sm:$0xff] }
 0x372   :  { %1759 = vmatpush1.msra.mxu0 %v6061_v61  ;;  %8935 = vst [vmem:[#allocation19_spill] sm:$0xff] %v6178_v38 }
 0x373   :  { %1760 = vmatprep.subr.mxu0 %v6063_v56 }
 0x374   :  { %1761 = vmatpush1.msra.mxu0 %v6065_v16 }
 0x375   :  { %1762 = vmatprep.subr.mxu0 %v6068_v4 }
 0x376   :  { %1763 = vmatpush1.msra.mxu0 %v6071_v23 }
 0x377   :  { %1764 = vmatprep.subr.mxu0 %v6074_v24 }
 0x378   :  { %1765 = vmatpush1.msra.mxu0 %v6077_v26 }
 0x379   :  { %1766 = vmatprep.subr.mxu0 %v6080_v28 }
 0x37a   :  { %1767 = vmatpush1.msra.mxu0 %v6083_v31 }
 0x37b   :  { %1768 = vmatprep.subr.mxu0 %v6086_v33 }
 0x37c   :  { %1769 = vmatpush1.msra.mxu0 %v6089_v35 }
 0x37d   :  { %1770 = vmatprep.subr.mxu0 %v6092_v37 }
 0x37e   :  { %1771 = vmatpush1.msra.mxu0 %v6095_v40 }
 0x37f   :  { %1772 = vmatprep.subr.mxu0 %v6098_v42 }
 0x380   :  { %1773 = vmatpush1.msra.mxu0 %v6101_v44 }
 0x381   :  { %1774 = vmatprep.subr.mxu0 %v6104_v49 }
 0x382   :  { %1775 = vmatpush1.msra.mxu0 %v6107_v53 }
 0x383   :  { %1776 = vmatprep.subr.mxu0 %v6110_v58 }
 0x384   :  { %1777 = vmatpush1.msra.mxu0 %v6113_v62 }
 0x385   :  { %1778 = vmatprep.subr.mxu0 %v6116_v5 }
 0x386   :  { %1779 = vmatpush1.msra.mxu0 %v6119_v9 }
 0x387   :  { %1780 = vmatprep.subr.mxu0 %v6122_v15 }
 0x388   :  { %1781 = vmatpush1.msra.mxu0 %v6125_v22 }
 0x389   :  { %1782 = vmatprep.subr.mxu0 %v6128_v27 }
 0x38a   :  { %1783 = vmatpush1.msra.mxu0 %v6131_v8 }
 0x38b   :  { %1784 = vmatprep.subr.mxu0 %v6134_v41 }
 0x38c   :  { %1785 = vmatpush1.msra.mxu0 %v6137_v21 }
 0x38d   :  { %1786 = vmatprep.subr.mxu0 %v6140_v45 }
 0x38e   :  { %1787 = vmatpush1.msra.mxu0 %v6143_v47 }
 0x38f   :  { %1788 = vmatprep.subr.mxu0 %v6146_v14 }
 0x390   :  { %1789 = vmatpush1.msra.mxu0 %v6149_v29 }
 0x391   :  { %1790 = vmatprep.subr.mxu0 %v6152_v50 }
 0x392   :  { %1791 = vmatpush2.msra.mxu0 %v6155_v57 }
 0x393   :  { %1792 = vmatprep.subr.mxu0 %v6158_v52  ;;  %v6181_v52 = vld [vmem:[#allocation7 + $0x370] sm:$0xff] }
 0x394   :  { %1793 = vmatpush2.msra.mxu0 %v6161_v20  ;;  %8936 = vst [vmem:[#allocation95_spill] sm:$0xff] %v6181_v52  ;;  %v6184_v20 = vld [vmem:[#allocation7 + $0x358] sm:$0xff] }
 0x395   :  { %1794 = vmatprep.subr.mxu0 %v6164_v3 }
 0x396   :  { %1795 = vmatpush2.msra.mxu0 %v6167_v13  ;;  %v6187_v13 = vld [vmem:[#allocation7 + $0x350] sm:$0xff] }
 0x397   :  { %1796 = vmatprep.subr.mxu0 %v6172_v19  ;;  %v6190_v19 = vld [vmem:[#allocation7 + $0x338] sm:$0xff] }
 0x398   :  { %1797 = vmatpush2.msra.mxu0 %v6175_v59  ;;  %v6193_v59 = vld [vmem:[#allocation7 + $0x330] sm:$0xff] }
 0x399   :  { %1798 = vmatprep.subr.mxu0 %v6178_v38  ;;  %v6196_v38 = vld [vmem:[#allocation7 + $0x318] sm:$0xff] }
 0x39a   :  { %1799 = vmatpush2.msra.mxu0 %v6181_v52  ;;  %8937 = vst [vmem:[#allocation20_spill] sm:$0xff] %v6196_v38  ;;  %v6199_v52 = vld [vmem:[#allocation7 + $0x310] sm:$0xff] }
 0x39b   :  { %1800 = vmatprep.subr.mxu0 %v6184_v20  ;;  %8938 = vst [vmem:[#allocation96_spill] sm:$0xff] %v6199_v52 }
 0x39c   :  { %1801 = vmatpush2.msra.mxu0 %v6187_v13 }
 0x39d   :  { %1802 = vmatprep.subr.mxu0 %v6190_v19 }
 0x39e   :  { %1803 = vmatpush2.msra.mxu0 %v6193_v59 }
 0x39f   :  { %1804 = vmatprep.subr.mxu0 %v6196_v38 }
 0x3a0   :  { %1805 = vmatpush2.msra.mxu0 %v6199_v52 }
 0x3a1   :  { %1806 = vmatprep.subr.mxu0 %v5771_v46  ;;  %v6218_v46 = vld [vmem:[#allocation9 + $0xf8] sm:$0xff] }
 0x3a2   :  { %1807 = vmatpush2.msra.mxu0 %v5777_v51  ;;  %8939 = vst [vmem:[#allocation21_spill] sm:$0xff] %v6218_v46  ;;  %1923 = vmatprep.subr.mxu1 %v6218_v46  ;;  %v1292_v51 = vpop.f32.mrf.mxu0 }
 0x3a3   :  { %1808 = vmatprep.subr.mxu0 %v5783_v55  ;;  %v8940_v55 = vld [vmem:[#allocation66_spill] sm:$0xff] }
 0x3a4   :  { %1809 = vmatpush2.msra.mxu0 %v5789_v60  ;;  %v1368_v60 = vadd.f32 %v1292_v51, %v8940_v55 }
 0x3a5   :  { %1810 = vmatprep.subr.mxu0 %v5795_v1  ;;  %v1294_v1 = vpop.f32.mrf.mxu0 }
 0x3a6   :  { %1811 = vmatpush2.msra.mxu0 %v5801_v7  ;;  %v8941_v7 = vld [vmem:[#allocation69_spill] sm:$0xff] }
 0x3a7   :  { %1812 = vmatprep.subr.mxu0 %v5807_v12  ;;  %v1369_v12 = vadd.f32 %v1294_v1, %v8941_v7 }
 0x3a8   :  { %1813 = vmatpush2.msra.mxu0 %v5813_v17  ;;  %v4513_v17 = vmul.f32 -1.442695, %v1368_v60 }
 0x3a9   :  { %1814 = vmatprep.subr.mxu0 %v5819_v25  ;;  %v4514_v25 = vmul.f32 -1.442695, %v1369_v12 }
 0x3aa   :  { %1815 = vmatpush2.msra.mxu0 %v5825_v30  ;;  %4637 = vpow2.f32 %v4513_v17 }
 0x3ab   :  { %1816 = vmatprep.subr.mxu0 %v5831_v34  ;;  %4639 = vpow2.f32 %v4514_v25  ;;  %v8942_v34 = vld [vmem:[#allocation138_spill] sm:$0xff] }
 0x3ac   :  { %1817 = vmatpush2.msra.mxu0 %v5837_v39  ;;  %v567_v39 = vadd.f32 %v8942_v34, %v5902_v10 }
 0x3ad   :  { %1818 = vmatprep.subr.mxu0 %v5843_v43 }
 0x3ae   :  { %1819 = vmatpush2.msra.mxu0 %v5849_v48 }
 0x3af   :  { %1820 = vmatprep.subr.mxu0 %v5853_v11 }
 0x3b0   :  { %1821 = vmatpush2.msra.mxu0 %v5861_v54  ;;  %v8943_v54 = vld [vmem:[#allocation139_spill] sm:$0xff] }
 0x3b1   :  { %v569_v46 = vadd.f32 %v8943_v54, %v5906_v63 }
 0x3b7   :  { %v4638_v30 = vpop.eup %4637 }
 0x3b8   :  { %v4640_v43 = vpop.eup %4639  ;;  %v1384_v48 = vadd.f32 1.0, %v4638_v30 }
 0x3b9   :  { %v1385_v51 = vadd.f32 1.0, %v4640_v43  ;;  %v6246_v43 = vld [vmem:[#allocation9 + $0xd8] sm:$0xff] }
 0x3ba   :  { %8947 = vst [vmem:[#allocation23_spill] sm:$0xff] %v6246_v43 }
 0x431   :  { %v1528_v11 = vpop.f32.mrf.mxu0 }
 0x432   :  { %v1533_v52 = vadd.f32 %v1528_v11, %v567_v39  ;;  %v6252_v11 = vld [vmem:[#allocation9 + $0xc8] sm:$0xff] }
 0x433   :  { %v1530_v38 = vpop.f32.mrf.mxu0  ;;  %8949 = vst [vmem:[#allocation24_spill] sm:$0xff] %v6252_v11 }
 0x434   :  { %4641 = vtanh.f32 %v1533_v52  ;;  %v1534_v55 = vadd.f32 %v1530_v38, %v569_v46  ;;  %v6235_v52 = vld [vmem:[#allocation9 + $0xf0] sm:$0xff]  ;;  %v6239_v38 = vld [vmem:[#allocation9 + $0xe8] sm:$0xff]  ;;  %v6243_v46 = vld [vmem:[#allocation9 + $0xe0] sm:$0xff] }
 0x435   :  { %4643 = vrcp.f32 %v1384_v48  ;;  %8946 = vst [vmem:[#allocation99_spill] sm:$0xff] %v6243_v46  ;;  %v6249_v48 = vld [vmem:[#allocation9 + $0xd0] sm:$0xff] }
 0x436   :  { %4645 = vtanh.f32 %v1534_v55  ;;  %8948 = vst [vmem:[#allocation100_spill] sm:$0xff] %v6249_v48  ;;  %v6258_v55 = vld [vmem:[#allocation9 + $0xb8] sm:$0xff] }
 0x437   :  { %4647 = vrcp.f32 %v1385_v51  ;;  %v6255_v51 = vld [vmem:[#allocation9 + $0xc0] sm:$0xff]  ;;  %8951 = vst [vmem:[#allocation25_spill] sm:$0xff] %v6258_v55 }
 0x438   :  { %8950 = vst [vmem:[#allocation102_spill] sm:$0xff] %v6255_v51 }
 0x441   :  { %v4642_v60 = vpop.eup %4641 }
 0x442   :  { %v4644_v1 = vpop.eup %4643  ;;  %v1537_v7 = vsub.f32 %v4642_v60, %v5920_v18  ;;  %v6261_v60 = vld [vmem:[#allocation9 + $0xb0] sm:$0xff] }
 0x443   :  { %v4646_v12 = vpop.eup %4645  ;;  %8952 = vst [vmem:[#allocation103_spill] sm:$0xff] %v6261_v60 }
 0x444   :  { %v1539_v17 = vmul.f32 %v4644_v1, %v1537_v7  ;;  %v1538_v25 = vsub.f32 %v4646_v12, %v5918_v6  ;;  %v4648_v30 = vpop.eup %4647  ;;  %v6264_v1 = vld [vmem:[#allocation9 + $0xa8] sm:$0xff]  ;;  %v6267_v7 = vld [vmem:[#allocation9 + $0xa0] sm:$0xff]  ;;  %v6270_v12 = vld [vmem:[#allocation9 + $0x98] sm:$0xff] }
 0x445   :  { %8953 = vst [vmem:[#allocation26_spill] sm:$0xff] %v6264_v1  ;;  %8954 = vst [vmem:[#allocation105_spill] sm:$0xff] %v6267_v7 }
 0x446   :  { %v1540_v34 = vmul.f32 %v4648_v30, %v1538_v25  ;;  %v6233_v39 = vadd.f32 %v1539_v17, %v5920_v18  ;;  %8955 = vst [vmem:[#allocation27_spill] sm:$0xff] %v6270_v12  ;;  %v6273_v17 = vld [vmem:[#allocation9 + $0x90] sm:$0xff]  ;;  %v6276_v25 = vld [vmem:[#allocation9 + $0x88] sm:$0xff]  ;;  %v6279_v30 = vld [vmem:[#allocation9 + $0x80] sm:$0xff] }
 0x447   :  { %8956 = vst [vmem:[#allocation106_spill] sm:$0xff] %v6273_v17  ;;  %8957 = vst [vmem:[#allocation28_spill] sm:$0xff] %v6276_v25  ;;  %v6285_v18 = vld [vmem:[#allocation9 + $0x70] sm:$0xff] }
 0x448   :  { %v6230_v54 = vadd.f32 %v1540_v34, %v5918_v6  ;;  %8945 = vst [vmem:[#allocation22_spill] sm:$0xff] %v6233_v39  ;;  %8958 = vst [vmem:[#allocation107_spill] sm:$0xff] %v6279_v30  ;;  %v6282_v34 = vld [vmem:[#allocation9 + $0x78] sm:$0xff]  ;;  %v6288_v6 = vld [vmem:[#allocation9 + $0x68] sm:$0xff] }
 0x449   :  { %8959 = vst [vmem:[#allocation29_spill] sm:$0xff] %v6282_v34  ;;  %8960 = vst [vmem:[#allocation109_spill] sm:$0xff] %v6285_v18 }
 0x44a   :  { %8944 = vst [vmem:[#allocation98_spill] sm:$0xff] %v6230_v54  ;;  %1751 = vmatprep.mubr.f32.mxu1 %v6230_v54  ;;  %1822 = vmatprep.mubr.f32.mxu0 %v6230_v54  ;;  %8961 = vst [vmem:[#allocation30_spill] sm:$0xff] %v6288_v6 }
 0x44b   :  { %1752 = vmatmul.mubr.f32.vlgmr.msra.gmra.mxu1 %v6233_v39  ;;  %1823 = vmatmul.mubr.f32.vlgmr.msra.gmra.mxu0 %v6233_v39 }
 0x44c   :  { %1924 = vmatpush1.msra.mxu1 %v6235_v52 }
 0x44d   :  { %1925 = vmatprep.subr.mxu1 %v6239_v38 }
 0x44e   :  { %1926 = vmatpush1.msra.mxu1 %v6243_v46 }
 0x44f   :  { %1927 = vmatprep.subr.mxu1 %v6246_v43 }
 0x450   :  { %1928 = vmatpush1.msra.mxu1 %v6249_v48 }
 0x451   :  { %1929 = vmatprep.subr.mxu1 %v6252_v11 }
 0x452   :  { %1930 = vmatpush1.msra.mxu1 %v6255_v51  ;;  %v6464_v51 = vld [vmem:[#allocation7 + $0x128] sm:$0xff] }
 0x453   :  { %1931 = vmatprep.subr.mxu1 %v6258_v55  ;;  %v6461_v55 = vld [vmem:[#allocation7 + $0x140] sm:$0xff]  ;;  %9017 = vst [vmem:[#allocation64_spill] sm:$0xff] %v6464_v51 }
 0x454   :  { %1932 = vmatpush1.msra.mxu1 %v6261_v60  ;;  %v6458_v60 = vld [vmem:[#allocation7 + $0x148] sm:$0xff]  ;;  %9016 = vst [vmem:[#allocation63_spill] sm:$0xff] %v6461_v55 }
 0x455   :  { %1933 = vmatprep.subr.mxu1 %v6264_v1  ;;  %v6455_v1 = vld [vmem:[#allocation7 + $0x160] sm:$0xff]  ;;  %9015 = vst [vmem:[#allocation61_spill] sm:$0xff] %v6458_v60 }
 0x456   :  { %1934 = vmatpush1.msra.mxu1 %v6267_v7  ;;  %v6291_v7 = vld [vmem:[#allocation9 + $0x60] sm:$0xff]  ;;  %9014 = vst [vmem:[#allocation60_spill] sm:$0xff] %v6455_v1 }
 0x457   :  { %1935 = vmatprep.subr.mxu1 %v6270_v12  ;;  %8962 = vst [vmem:[#allocation110_spill] sm:$0xff] %v6291_v7  ;;  %v6294_v12 = vld [vmem:[#allocation9 + $0x58] sm:$0xff] }
 0x458   :  { %1936 = vmatpush1.msra.mxu1 %v6273_v17  ;;  %8963 = vst [vmem:[#allocation31_spill] sm:$0xff] %v6294_v12  ;;  %v6297_v17 = vld [vmem:[#allocation9 + $0x50] sm:$0xff] }
 0x459   :  { %1937 = vmatprep.subr.mxu1 %v6276_v25  ;;  %8964 = vst [vmem:[#allocation112_spill] sm:$0xff] %v6297_v17  ;;  %v6300_v25 = vld [vmem:[#allocation9 + $0x48] sm:$0xff] }
 0x45a   :  { %1938 = vmatpush1.msra.mxu1 %v6279_v30  ;;  %8965 = vst [vmem:[#allocation32_spill] sm:$0xff] %v6300_v25  ;;  %v6303_v30 = vld [vmem:[#allocation9 + $0x40] sm:$0xff] }
 0x45b   :  { %1939 = vmatprep.subr.mxu1 %v6282_v34  ;;  %8966 = vst [vmem:[#allocation113_spill] sm:$0xff] %v6303_v30  ;;  %v6399_v34 = vld [vmem:[#allocation9 + $0x140] sm:$0xff] }
 0x45c   :  { %1940 = vmatpush1.msra.mxu1 %v6285_v18  ;;  %v6308_v18 = vld [vmem:[#allocation9 + $0x38] sm:$0xff]  ;;  %8998 = vst [vmem:[#allocation129_spill] sm:$0xff] %v6399_v34 }
 0x45d   :  { %1941 = vmatprep.subr.mxu1 %v6288_v6  ;;  %8967 = vst [vmem:[#allocation33_spill] sm:$0xff] %v6308_v18  ;;  %v6311_v6 = vld [vmem:[#allocation9 + $0x30] sm:$0xff] }
 0x45e   :  { %1942 = vmatpush1.msra.mxu1 %v6291_v7  ;;  %8968 = vst [vmem:[#allocation114_spill] sm:$0xff] %v6311_v6  ;;  %v6314_v7 = vld [vmem:[#allocation9 + $0x28] sm:$0xff] }
 0x45f   :  { %1943 = vmatprep.subr.mxu1 %v6294_v12  ;;  %8969 = vst [vmem:[#allocation34_spill] sm:$0xff] %v6314_v7  ;;  %v6317_v12 = vld [vmem:[#allocation9 + $0x20] sm:$0xff] }
 0x460   :  { %1944 = vmatpush1.msra.mxu1 %v6297_v17  ;;  %8970 = vst [vmem:[#allocation115_spill] sm:$0xff] %v6317_v12  ;;  %v6320_v17 = vld [vmem:[#allocation9 + $0x18] sm:$0xff] }
 0x461   :  { %1945 = vmatprep.subr.mxu1 %v6300_v25  ;;  %8971 = vst [vmem:[#allocation35_spill] sm:$0xff] %v6320_v17  ;;  %v6382_v25 = vld [vmem:[#allocation9 + $0x170] sm:$0xff] }
 0x462   :  { %1946 = vmatpush1.msra.mxu1 %v6303_v30  ;;  %v6323_v30 = vld [vmem:[#allocation9 + $0x10] sm:$0xff]  ;;  %8992 = vst [vmem:[#allocation126_spill] sm:$0xff] %v6382_v25 }
 0x463   :  { %1947 = vmatprep.subr.mxu1 %v6308_v18  ;;  %8972 = vst [vmem:[#allocation116_spill] sm:$0xff] %v6323_v30  ;;  %v6326_v18 = vld [vmem:[#allocation9 + $0x8] sm:$0xff] }
 0x464   :  { %1948 = vmatpush1.msra.mxu1 %v6311_v6  ;;  %8973 = vst [vmem:[#allocation36_spill] sm:$0xff] %v6326_v18  ;;  %v6329_v6 = vld [vmem:[#allocation9] sm:$0xff] }
 0x465   :  { %1949 = vmatprep.subr.mxu1 %v6314_v7  ;;  %8974 = vst [vmem:[#allocation117_spill] sm:$0xff] %v6329_v6  ;;  %v6332_v7 = vld [vmem:[#allocation9 + $0x1f8] sm:$0xff] }
 0x466   :  { %1950 = vmatpush1.msra.mxu1 %v6317_v12  ;;  %8975 = vst [vmem:[#allocation37_spill] sm:$0xff] %v6332_v7  ;;  %v6335_v12 = vld [vmem:[#allocation9 + $0x1f0] sm:$0xff] }
 0x467   :  { %1951 = vmatprep.subr.mxu1 %v6320_v17  ;;  %8976 = vst [vmem:[#allocation118_spill] sm:$0xff] %v6335_v12  ;;  %v6338_v17 = vld [vmem:[#allocation9 + $0x1e8] sm:$0xff] }
 0x468   :  { %1952 = vmatpush1.msra.mxu1 %v6323_v30  ;;  %8977 = vst [vmem:[#allocation38_spill] sm:$0xff] %v6338_v17  ;;  %v6341_v30 = vld [vmem:[#allocation9 + $0x1e0] sm:$0xff] }
 0x469   :  { %1953 = vmatprep.subr.mxu1 %v6326_v18  ;;  %8978 = vst [vmem:[#allocation119_spill] sm:$0xff] %v6341_v30  ;;  %v6344_v18 = vld [vmem:[#allocation9 + $0x1d8] sm:$0xff] }
 0x46a   :  { %1954 = vmatpush1.msra.mxu1 %v6329_v6  ;;  %8979 = vst [vmem:[#allocation39_spill] sm:$0xff] %v6344_v18  ;;  %v6347_v6 = vld [vmem:[#allocation9 + $0x1d0] sm:$0xff] }
 0x46b   :  { %1955 = vmatprep.subr.mxu1 %v6332_v7  ;;  %8980 = vst [vmem:[#allocation120_spill] sm:$0xff] %v6347_v6  ;;  %v6350_v7 = vld [vmem:[#allocation9 + $0x1c8] sm:$0xff] }
 0x46c   :  { %1956 = vmatpush2.msra.mxu1 %v6335_v12  ;;  %8981 = vst [vmem:[#allocation40_spill] sm:$0xff] %v6350_v7  ;;  %v6353_v12 = vld [vmem:[#allocation9 + $0x1c0] sm:$0xff] }
 0x46d   :  { %1957 = vmatprep.subr.mxu1 %v6338_v17  ;;  %8982 = vst [vmem:[#allocation121_spill] sm:$0xff] %v6353_v12  ;;  %v6356_v17 = vld [vmem:[#allocation9 + $0x1b8] sm:$0xff] }
 0x46e   :  { %1958 = vmatpush2.msra.mxu1 %v6341_v30  ;;  %8983 = vst [vmem:[#allocation41_spill] sm:$0xff] %v6356_v17  ;;  %v6359_v30 = vld [vmem:[#allocation9 + $0x1b0] sm:$0xff] }
 0x46f   :  { %1959 = vmatprep.subr.mxu1 %v6344_v18  ;;  %8984 = vst [vmem:[#allocation122_spill] sm:$0xff] %v6359_v30  ;;  %v6362_v18 = vld [vmem:[#allocation9 + $0x1a8] sm:$0xff] }
 0x470   :  { %1960 = vmatpush2.msra.mxu1 %v6347_v6  ;;  %8985 = vst [vmem:[#allocation42_spill] sm:$0xff] %v6362_v18  ;;  %v6365_v6 = vld [vmem:[#allocation9 + $0x1a0] sm:$0xff] }
 0x471   :  { %1961 = vmatprep.subr.mxu1 %v6350_v7  ;;  %8986 = vst [vmem:[#allocation123_spill] sm:$0xff] %v6365_v6  ;;  %v6368_v7 = vld [vmem:[#allocation9 + $0x198] sm:$0xff] }
 0x472   :  { %1962 = vmatpush2.msra.mxu1 %v6353_v12  ;;  %8987 = vst [vmem:[#allocation43_spill] sm:$0xff] %v6368_v7  ;;  %v6371_v12 = vld [vmem:[#allocation9 + $0x190] sm:$0xff] }
 0x473   :  { %1963 = vmatprep.subr.mxu1 %v6356_v17  ;;  %8988 = vst [vmem:[#allocation124_spill] sm:$0xff] %v6371_v12  ;;  %v6374_v17 = vld [vmem:[#allocation9 + $0x188] sm:$0xff] }
 0x474   :  { %1964 = vmatpush2.msra.mxu1 %v6359_v30  ;;  %8989 = vst [vmem:[#allocation44_spill] sm:$0xff] %v6374_v17  ;;  %v6377_v30 = vld [vmem:[#allocation9 + $0x180] sm:$0xff] }
 0x475   :  { %1965 = vmatprep.subr.mxu1 %v6362_v18  ;;  %8990 = vst [vmem:[#allocation125_spill] sm:$0xff] %v6377_v30  ;;  %v6380_v18 = vld [vmem:[#allocation9 + $0x178] sm:$0xff] }
 0x476   :  { %1966 = vmatpush2.msra.mxu1 %v6365_v6  ;;  %8991 = vst [vmem:[#allocation45_spill] sm:$0xff] %v6380_v18  ;;  %v6384_v6 = vld [vmem:[#allocation9 + $0x168] sm:$0xff] }
 0x477   :  { %1967 = vmatprep.subr.mxu1 %v6368_v7  ;;  %8993 = vst [vmem:[#allocation47_spill] sm:$0xff] %v6384_v6  ;;  %v6387_v7 = vld [vmem:[#allocation9 + $0x160] sm:$0xff] }
 0x478   :  { %1968 = vmatpush2.msra.mxu1 %v6371_v12  ;;  %8994 = vst [vmem:[#allocation127_spill] sm:$0xff] %v6387_v7  ;;  %v6390_v12 = vld [vmem:[#allocation9 + $0x158] sm:$0xff] }
 0x479   :  { %1969 = vmatprep.subr.mxu1 %v6374_v17  ;;  %8995 = vst [vmem:[#allocation48_spill] sm:$0xff] %v6390_v12  ;;  %v6393_v17 = vld [vmem:[#allocation9 + $0x150] sm:$0xff] }
 0x47a   :  { %1970 = vmatpush2.msra.mxu1 %v6377_v30  ;;  %8996 = vst [vmem:[#allocation128_spill] sm:$0xff] %v6393_v17  ;;  %v6396_v30 = vld [vmem:[#allocation9 + $0x148] sm:$0xff] }
 0x47b   :  { %1971 = vmatprep.subr.mxu1 %v6380_v18  ;;  %8997 = vst [vmem:[#allocation49_spill] sm:$0xff] %v6396_v30  ;;  %v6402_v18 = vld [vmem:[#allocation9 + $0x138] sm:$0xff] }
 0x47c   :  { %1972 = vmatpush2.msra.mxu1 %v6382_v25  ;;  %8999 = vst [vmem:[#allocation50_spill] sm:$0xff] %v6402_v18  ;;  %v6405_v25 = vld [vmem:[#allocation9 + $0x130] sm:$0xff] }
 0x47d   :  { %1973 = vmatprep.subr.mxu1 %v6384_v6  ;;  %9000 = vst [vmem:[#allocation130_spill] sm:$0xff] %v6405_v25  ;;  %v6408_v6 = vld [vmem:[#allocation9 + $0x128] sm:$0xff] }
 0x47e   :  { %1974 = vmatpush2.msra.mxu1 %v6387_v7  ;;  %9001 = vst [vmem:[#allocation51_spill] sm:$0xff] %v6408_v6  ;;  %v6411_v7 = vld [vmem:[#allocation9 + $0x120] sm:$0xff] }
 0x47f   :  { %1975 = vmatprep.subr.mxu1 %v6390_v12  ;;  %9002 = vst [vmem:[#allocation131_spill] sm:$0xff] %v6411_v7  ;;  %v6414_v12 = vld [vmem:[#allocation9 + $0x118] sm:$0xff] }
 0x480   :  { %1976 = vmatpush2.msra.mxu1 %v6393_v17  ;;  %9003 = vst [vmem:[#allocation52_spill] sm:$0xff] %v6414_v12  ;;  %v6417_v17 = vld [vmem:[#allocation9 + $0x110] sm:$0xff] }
 0x481   :  { %1977 = vmatprep.subr.mxu1 %v6396_v30  ;;  %9004 = vst [vmem:[#allocation132_spill] sm:$0xff] %v6417_v17  ;;  %v6420_v30 = vld [vmem:[#allocation9 + $0x108] sm:$0xff] }
 0x482   :  { %1978 = vmatpush2.msra.mxu1 %v6399_v34  ;;  %9005 = vst [vmem:[#allocation53_spill] sm:$0xff] %v6420_v30  ;;  %v6423_v34 = vld [vmem:[#allocation9 + $0x100] sm:$0xff] }
 0x483   :  { %1979 = vmatprep.subr.mxu1 %v6402_v18  ;;  %9006 = vst [vmem:[#allocation133_spill] sm:$0xff] %v6423_v34  ;;  %v6452_v18 = vld [vmem:[#allocation7 + $0x168] sm:$0xff] }
 0x484   :  { %1980 = vmatpush2.msra.mxu1 %v6405_v25  ;;  %v6428_v25 = vld [vmem:[#allocation7 + $0x1e8] sm:$0xff]  ;;  %9013 = vst [vmem:[#allocation58_spill] sm:$0xff] %v6452_v18 }
 0x485   :  { %1981 = vmatprep.subr.mxu1 %v6408_v6  ;;  %v6431_v6 = vld [vmem:[#allocation7 + $0x1e0] sm:$0xff]  ;;  %2148 = vmatprep.subr.mxu0 %v6428_v25 }
 0x486   :  { %1982 = vmatpush2.msra.mxu1 %v6411_v7  ;;  %v6434_v7 = vld [vmem:[#allocation7 + $0x1c8] sm:$0xff]  ;;  %2149 = vmatpush1.msra.mxu0 %v6431_v6 }
 0x487   :  { %1983 = vmatprep.subr.mxu1 %v6414_v12  ;;  %9007 = vst [vmem:[#allocation54_spill] sm:$0xff] %v6434_v7  ;;  %v6437_v12 = vld [vmem:[#allocation7 + $0x1c0] sm:$0xff]  ;;  %2150 = vmatprep.subr.mxu0 %v6434_v7 }
 0x488   :  { %1984 = vmatpush2.msra.mxu1 %v6417_v17  ;;  %9008 = vst [vmem:[#allocation134_spill] sm:$0xff] %v6437_v12  ;;  %v6440_v17 = vld [vmem:[#allocation7 + $0x1a8] sm:$0xff]  ;;  %2151 = vmatpush1.msra.mxu0 %v6437_v12 }
 0x489   :  { %1985 = vmatprep.subr.mxu1 %v6420_v30  ;;  %9009 = vst [vmem:[#allocation55_spill] sm:$0xff] %v6440_v17  ;;  %2152 = vmatprep.subr.mxu0 %v6440_v17  ;;  %v6449_v30 = vld [vmem:[#allocation7 + $0x180] sm:$0xff] }
 0x48a   :  { %1986 = vmatpush2.msra.mxu1 %v6423_v34  ;;  %v6443_v34 = vld [vmem:[#allocation7 + $0x1a0] sm:$0xff]  ;;  %9012 = vst [vmem:[#allocation57_spill] sm:$0xff] %v6449_v30 }
 0x48b   :  { %2219 = vmatprep.subr.mxu1 %v6052_v32  ;;  %9010 = vst [vmem:[#allocation135_spill] sm:$0xff] %v6443_v34  ;;  %v6446_v32 = vld [vmem:[#allocation7 + $0x188] sm:$0xff]  ;;  %2153 = vmatpush1.msra.mxu0 %v6443_v34 }
 0x48c   :  { %9011 = vst [vmem:[#allocation56_spill] sm:$0xff] %v6446_v32  ;;  %2154 = vmatprep.subr.mxu0 %v6446_v32  ;;  %v6467_v32 = vld [vmem:[#allocation7 + $0x120] sm:$0xff] }
 0x48d   :  { %2155 = vmatpush1.msra.mxu0 %v6449_v30  ;;  %9018 = vst [vmem:[#allocation65_spill] sm:$0xff] %v6467_v32  ;;  %v6470_v30 = vld [vmem:[#allocation7 + $0x108] sm:$0xff] }
 0x48e   :  { %2156 = vmatprep.subr.mxu0 %v6452_v18  ;;  %9019 = vst [vmem:[#allocation67_spill] sm:$0xff] %v6470_v30  ;;  %v6473_v18 = vld [vmem:[#allocation7 + $0x100] sm:$0xff] }
 0x48f   :  { %2157 = vmatpush1.msra.mxu0 %v6455_v1  ;;  %9020 = vst [vmem:[#allocation68_spill] sm:$0xff] %v6473_v18  ;;  %v6476_v1 = vld [vmem:[#allocation7 + $0xe8] sm:$0xff] }
 0x490   :  { %2158 = vmatprep.subr.mxu0 %v6458_v60  ;;  %9021 = vst [vmem:[#allocation70_spill] sm:$0xff] %v6476_v1  ;;  %v6479_v60 = vld [vmem:[#allocation7 + $0xe0] sm:$0xff] }
 0x491   :  { %2159 = vmatpush1.msra.mxu0 %v6461_v55  ;;  %9022 = vst [vmem:[#allocation71_spill] sm:$0xff] %v6479_v60  ;;  %v6482_v55 = vld [vmem:[#allocation7 + $0xc8] sm:$0xff] }
 0x492   :  { %2160 = vmatprep.subr.mxu0 %v6464_v51  ;;  %9023 = vst [vmem:[#allocation72_spill] sm:$0xff] %v6482_v55  ;;  %v6485_v51 = vld [vmem:[#allocation7 + $0xc0] sm:$0xff] }
 0x493   :  { %2161 = vmatpush1.msra.mxu0 %v6467_v32  ;;  %9024 = vst [vmem:[#allocation73_spill] sm:$0xff] %v6485_v51  ;;  %v6488_v32 = vld [vmem:[#allocation7 + $0xa8] sm:$0xff] }
 0x494   :  { %2162 = vmatprep.subr.mxu0 %v6470_v30  ;;  %9025 = vst [vmem:[#allocation74_spill] sm:$0xff] %v6488_v32  ;;  %v6491_v30 = vld [vmem:[#allocation7 + $0xa0] sm:$0xff] }
 0x495   :  { %2163 = vmatpush1.msra.mxu0 %v6473_v18  ;;  %9026 = vst [vmem:[#allocation76_spill] sm:$0xff] %v6491_v30  ;;  %v6494_v18 = vld [vmem:[#allocation7 + $0x88] sm:$0xff] }
 0x496   :  { %2164 = vmatprep.subr.mxu0 %v6476_v1  ;;  %9027 = vst [vmem:[#allocation77_spill] sm:$0xff] %v6494_v18  ;;  %v6497_v1 = vld [vmem:[#allocation7 + $0x80] sm:$0xff] }
 0x497   :  { %2165 = vmatpush1.msra.mxu0 %v6479_v60  ;;  %9028 = vst [vmem:[#allocation79_spill] sm:$0xff] %v6497_v1  ;;  %v6500_v60 = vld [vmem:[#allocation7 + $0x68] sm:$0xff] }
 0x498   :  { %2166 = vmatprep.subr.mxu0 %v6482_v55  ;;  %9029 = vst [vmem:[#allocation80_spill] sm:$0xff] %v6500_v60  ;;  %v6503_v55 = vld [vmem:[#allocation7 + $0x60] sm:$0xff] }
 0x499   :  { %2167 = vmatpush1.msra.mxu0 %v6485_v51  ;;  %9030 = vst [vmem:[#allocation81_spill] sm:$0xff] %v6503_v55  ;;  %v6506_v51 = vld [vmem:[#allocation7 + $0x48] sm:$0xff] }
 0x49a   :  { %2168 = vmatprep.subr.mxu0 %v6488_v32  ;;  %9031 = vst [vmem:[#allocation83_spill] sm:$0xff] %v6506_v51  ;;  %v6509_v32 = vld [vmem:[#allocation7 + $0x40] sm:$0xff] }
 0x49b   :  { %2169 = vmatpush1.msra.mxu0 %v6491_v30  ;;  %9032 = vst [vmem:[#allocation84_spill] sm:$0xff] %v6509_v32  ;;  %v6512_v30 = vld [vmem:[#allocation7 + $0x28] sm:$0xff] }
 0x49c   :  { %2170 = vmatprep.subr.mxu0 %v6494_v18  ;;  %9033 = vst [vmem:[#allocation86_spill] sm:$0xff] %v6512_v30  ;;  %v6515_v18 = vld [vmem:[#allocation7 + $0x20] sm:$0xff] }
 0x49d   :  { %2171 = vmatpush1.msra.mxu0 %v6497_v1  ;;  %9034 = vst [vmem:[#allocation87_spill] sm:$0xff] %v6515_v18  ;;  %v6518_v1 = vld [vmem:[#allocation7 + $0x8] sm:$0xff] }
 0x49e   :  { %2172 = vmatprep.subr.mxu0 %v6500_v60  ;;  %9035 = vst [vmem:[#allocation88_spill] sm:$0xff] %v6518_v1  ;;  %v6521_v60 = vld [vmem:[#allocation7] sm:$0xff] }
 0x49f   :  { %2173 = vmatpush1.msra.mxu0 %v6503_v55  ;;  %9036 = vst [vmem:[#allocation90_spill] sm:$0xff] %v6521_v60  ;;  %v6524_v55 = vld [vmem:[#allocation7 + $0x3e8] sm:$0xff] }
 0x4a0   :  { %2174 = vmatprep.subr.mxu0 %v6506_v51  ;;  %9037 = vst [vmem:[#allocation66_spill] sm:$0xff] %v6524_v55  ;;  %v6527_v51 = vld [vmem:[#allocation7 + $0x3e0] sm:$0xff] }
 0x4a1   :  { %2175 = vmatpush1.msra.mxu0 %v6509_v32  ;;  %9038 = vst [vmem:[#allocation69_spill] sm:$0xff] %v6527_v51  ;;  %v6530_v32 = vld [vmem:[#allocation7 + $0x3c8] sm:$0xff] }
 0x4a2   :  { %2176 = vmatprep.subr.mxu0 %v6512_v30  ;;  %9039 = vst [vmem:[#allocation138_spill] sm:$0xff] %v6530_v32  ;;  %v6533_v30 = vld [vmem:[#allocation7 + $0x3c0] sm:$0xff] }
 0x4a3   :  { %2177 = vmatpush1.msra.mxu0 %v6515_v18  ;;  %9040 = vst [vmem:[#allocation139_spill] sm:$0xff] %v6533_v30  ;;  %v6536_v18 = vld [vmem:[#allocation7 + $0x3a8] sm:$0xff] }
 0x4a4   :  { %2178 = vmatprep.subr.mxu0 %v6518_v1  ;;  %9041 = vst [vmem:[#allocation160_spill] sm:$0xff] %v6536_v18  ;;  %v6539_v1 = vld [vmem:[#allocation7 + $0x3a0] sm:$0xff] }
 0x4a5   :  { %2179 = vmatpush1.msra.mxu0 %v6521_v60  ;;  %9042 = vst [vmem:[#allocation161_spill] sm:$0xff] %v6539_v1 }
 0x4a6   :  { %2180 = vmatprep.subr.mxu0 %v6524_v55  ;;  %v376_v55 = vadd.f32 %v5871_v0, %v8929_v36 }
 0x4a7   :  { %2181 = vmatpush2.msra.mxu0 %v6527_v51  ;;  %v9043_v51 = vld [vmem:[#allocation15_spill] sm:$0xff] }
 0x4a8   :  { %2182 = vmatprep.subr.mxu0 %v6530_v32  ;;  %v378_v11 = vadd.f32 %v9043_v51, %v5686_v2  ;;  %v6700_v51 = vld [vmem:[#allocation7 + $0x238] sm:$0xff] }
 0x4a9   :  { %2183 = vmatpush2.msra.mxu0 %v6533_v30  ;;  %9053 = vst [vmem:[#allocation15_spill] sm:$0xff] %v6700_v51 }
 0x4aa   :  { %2184 = vmatprep.subr.mxu0 %v6536_v18 }
 0x4ab   :  { %2185 = vmatpush2.msra.mxu0 %v6539_v1 }
 0x50b   :  { %v1824_v60 = vpop.f32.mrf.mxu0 }
 0x50c   :  { %v1831_v34 = vadd.f32 %v1824_v60, %v376_v55  ;;  %v6702_v55 = vld [vmem:[#allocation7 + $0x220] sm:$0xff]  ;;  %v6706_v60 = vld [vmem:[#allocation7 + $0x230] sm:$0xff] }
 0x50d   :  { %v1826_v48 = vpop.f32.mrf.mxu0 }
 0x50e   :  { %v4519_v32 = vmul.f32 -1.442695, %v1831_v34  ;;  %v1832_v17 = vadd.f32 %v1826_v48, %v378_v11  ;;  %v6694_v48 = vld [vmem:[#allocation7 + $0x250] sm:$0xff]  ;;  %v6698_v11 = vld [vmem:[#allocation7 + $0x228] sm:$0xff]  ;;  %v1753_v34 = vpop.f32.mrf.mxu1 }
 0x510   :  { %v4520_v43 = vmul.f32 -1.442695, %v1832_v17  ;;  %4649 = vpow2.f32 %v4519_v32  ;;  %v6718_v17 = vld [vmem:[#allocation7 + $0x210] sm:$0xff]  ;;  %v9058_v32 = vld [vmem:[#allocation75_spill] sm:$0xff] }
 0x512   :  { %4651 = vpow2.f32 %v4520_v43  ;;  %v6692_v43 = vld [vmem:[#allocation7 + $0x240] sm:$0xff] }
 0x51d   :  { %v4650_v30 = vpop.eup %4649 }
 0x51e   :  { %v1847_v12 = vadd.f32 1.0, %v4650_v30  ;;  %v9057_v30 = vld [vmem:[#allocation21_spill] sm:$0xff] }
 0x51f   :  { %v4652_v46 = vpop.eup %4651 }
 0x520   :  { %v1848_v18 = vadd.f32 1.0, %v4652_v46  ;;  %4653 = vrcp.f32 %v1847_v12  ;;  %v6688_v46 = vld [vmem:[#allocation7 + $0x258] sm:$0xff]  ;;  %v6714_v12 = vld [vmem:[#allocation7 + $0x200] sm:$0xff] }
 0x522   :  { %4655 = vrcp.f32 %v1848_v18  ;;  %v9044_v18 = vld [vmem:[#allocation46_spill] sm:$0xff] }
 0x523   :  { %9054 = vst [vmem:[#allocation46_spill] sm:$0xff] %v6706_v60 }
 0x52d   :  { %v4654_v1 = vpop.eup %4653 }
 0x52e   :  { %v1857_v36 = vmul.f32 %v4654_v1, %v6233_v39  ;;  %v6708_v1 = vld [vmem:[#allocation7 + $0x208] sm:$0xff] }
 0x52f   :  { %v4656_v7 = vpop.eup %4655 }
 0x530   :  { %v1858_v0 = vmul.f32 %v4656_v7, %v6230_v54  ;;  %v6710_v7 = vld [vmem:[#allocation7 + $0x218] sm:$0xff] }
 0x532   :  { %1987 = vmatprep.mubr.f32.mxu1 %v1858_v0  ;;  %v1829_v0 = vadd.f32 %v1753_v34, %v9058_v32 }
 0x533   :  { %1988 = vmatmul.mubr.f32.vlgmr.msra.gmra.mxu1 %v1857_v36  ;;  %v9045_v36 = vld [vmem:[#allocation136_spill] sm:$0xff] }
 0x534   :  { %2220 = vmatpush1.msra.mxu1 %v6061_v61  ;;  %v9046_v61 = vld [vmem:[#allocation137_spill] sm:$0xff]  ;;  %9055 = vst [vmem:[#allocation136_spill] sm:$0xff] %v6710_v7 }
 0x535   :  { %2221 = vmatprep.subr.mxu1 %v6063_v56  ;;  %v9047_v56 = vld [vmem:[#allocation18_spill] sm:$0xff]  ;;  %9056 = vst [vmem:[#allocation137_spill] sm:$0xff] %v6718_v17 }
 0x536   :  { %2222 = vmatpush1.msra.mxu1 %v6065_v16  ;;  %v9048_v16 = vld [vmem:[#allocation93_spill] sm:$0xff] }
 0x537   :  { %2223 = vmatprep.subr.mxu1 %v6068_v4  ;;  %v9049_v4 = vld [vmem:[#allocation19_spill] sm:$0xff] }
 0x538   :  { %2224 = vmatpush1.msra.mxu1 %v6071_v23  ;;  %v9050_v23 = vld [vmem:[#allocation95_spill] sm:$0xff] }
 0x539   :  { %2225 = vmatprep.subr.mxu1 %v6074_v24  ;;  %v9051_v24 = vld [vmem:[#allocation20_spill] sm:$0xff] }
 0x53a   :  { %2226 = vmatpush1.msra.mxu1 %v6077_v26  ;;  %v9052_v26 = vld [vmem:[#allocation96_spill] sm:$0xff] }
 0x53b   :  { %2227 = vmatprep.subr.mxu1 %v6080_v28  ;;  %v6596_v28 = vld [vmem:[#allocation7 + $0x388] sm:$0xff] }
 0x53c   :  { %2228 = vmatpush1.msra.mxu1 %v6083_v31  ;;  %2186 = vmatprep.subr.mxu0 %v6596_v28  ;;  %v6599_v31 = vld [vmem:[#allocation7 + $0x380] sm:$0xff] }
 0x53d   :  { %2229 = vmatprep.subr.mxu1 %v6086_v33  ;;  %2187 = vmatpush2.msra.mxu0 %v6599_v31  ;;  %v6602_v33 = vld [vmem:[#allocation7 + $0x368] sm:$0xff] }
 0x53e   :  { %2230 = vmatpush1.msra.mxu1 %v6089_v35  ;;  %2188 = vmatprep.subr.mxu0 %v6602_v33  ;;  %v6605_v35 = vld [vmem:[#allocation7 + $0x360] sm:$0xff] }
 0x53f   :  { %2231 = vmatprep.subr.mxu1 %v6092_v37  ;;  %2189 = vmatpush2.msra.mxu0 %v6605_v35  ;;  %v6608_v37 = vld [vmem:[#allocation7 + $0x348] sm:$0xff] }
 0x540   :  { %2232 = vmatpush1.msra.mxu1 %v6095_v40  ;;  %2190 = vmatprep.subr.mxu0 %v6608_v37  ;;  %v6611_v40 = vld [vmem:[#allocation7 + $0x340] sm:$0xff] }
 0x541   :  { %2233 = vmatprep.subr.mxu1 %v6098_v42  ;;  %2191 = vmatpush2.msra.mxu0 %v6611_v40  ;;  %v6614_v42 = vld [vmem:[#allocation7 + $0x328] sm:$0xff] }
 0x542   :  { %2234 = vmatpush1.msra.mxu1 %v6101_v44  ;;  %2192 = vmatprep.subr.mxu0 %v6614_v42  ;;  %v6617_v44 = vld [vmem:[#allocation7 + $0x320] sm:$0xff] }
 0x543   :  { %2235 = vmatprep.subr.mxu1 %v6104_v49  ;;  %2193 = vmatpush2.msra.mxu0 %v6617_v44  ;;  %v6620_v49 = vld [vmem:[#allocation7 + $0x308] sm:$0xff] }
 0x544   :  { %2236 = vmatpush1.msra.mxu1 %v6107_v53  ;;  %2194 = vmatprep.subr.mxu0 %v6620_v49  ;;  %v6623_v53 = vld [vmem:[#allocation7 + $0x300] sm:$0xff] }
 0x545   :  { %2237 = vmatprep.subr.mxu1 %v6110_v58  ;;  %2195 = vmatpush2.msra.mxu0 %v6623_v53  ;;  %v6626_v58 = vld [vmem:[#allocation7 + $0x2e8] sm:$0xff] }
 0x546   :  { %2238 = vmatpush1.msra.mxu1 %v6113_v62  ;;  %v6628_v62 = vld [vmem:[#allocation7 + $0x2f8] sm:$0xff]  ;;  %2196 = vmatprep.subr.mxu0 %v6626_v58 }
 0x547   :  { %2239 = vmatprep.subr.mxu1 %v6116_v5  ;;  %v6632_v5 = vld [vmem:[#allocation7 + $0x2e0] sm:$0xff] }
 0x548   :  { %2240 = vmatpush1.msra.mxu1 %v6119_v9  ;;  %v6634_v9 = vld [vmem:[#allocation7 + $0x2f0] sm:$0xff]  ;;  %2197 = vmatpush2.msra.mxu0 %v6632_v5 }
 0x549   :  { %2241 = vmatprep.subr.mxu1 %v6122_v15  ;;  %v6638_v15 = vld [vmem:[#allocation7 + $0x2c8] sm:$0xff] }
 0x54a   :  { %2242 = vmatpush1.msra.mxu1 %v6125_v22  ;;  %v6640_v22 = vld [vmem:[#allocation7 + $0x2d8] sm:$0xff]  ;;  %2198 = vmatprep.subr.mxu0 %v6638_v15 }
 0x54b   :  { %2243 = vmatprep.subr.mxu1 %v6128_v27  ;;  %v6644_v27 = vld [vmem:[#allocation7 + $0x2c0] sm:$0xff] }
 0x54c   :  { %2244 = vmatpush1.msra.mxu1 %v6131_v8  ;;  %v6646_v8 = vld [vmem:[#allocation7 + $0x2d0] sm:$0xff]  ;;  %2199 = vmatpush2.msra.mxu0 %v6644_v27 }
 0x54d   :  { %2245 = vmatprep.subr.mxu1 %v6134_v41  ;;  %v6650_v41 = vld [vmem:[#allocation7 + $0x2a8] sm:$0xff] }
 0x54e   :  { %2246 = vmatpush1.msra.mxu1 %v6137_v21  ;;  %v6652_v21 = vld [vmem:[#allocation7 + $0x2b8] sm:$0xff]  ;;  %2200 = vmatprep.subr.mxu0 %v6650_v41 }
 0x54f   :  { %2247 = vmatprep.subr.mxu1 %v6140_v45  ;;  %v6656_v45 = vld [vmem:[#allocation7 + $0x2a0] sm:$0xff] }
 0x550   :  { %2248 = vmatpush1.msra.mxu1 %v6143_v47  ;;  %v6658_v47 = vld [vmem:[#allocation7 + $0x2b0] sm:$0xff]  ;;  %2201 = vmatpush2.msra.mxu0 %v6656_v45 }
 0x551   :  { %2249 = vmatprep.subr.mxu1 %v6146_v14  ;;  %v6662_v14 = vld [vmem:[#allocation7 + $0x288] sm:$0xff] }
 0x552   :  { %2250 = vmatpush1.msra.mxu1 %v6149_v29  ;;  %v6664_v29 = vld [vmem:[#allocation7 + $0x298] sm:$0xff]  ;;  %2202 = vmatprep.subr.mxu0 %v6662_v14 }
 0x553   :  { %2251 = vmatprep.subr.mxu1 %v6152_v50  ;;  %v6668_v50 = vld [vmem:[#allocation7 + $0x280] sm:$0xff] }
 0x554   :  { %2252 = vmatpush2.msra.mxu1 %v6155_v57  ;;  %v6670_v57 = vld [vmem:[#allocation7 + $0x290] sm:$0xff]  ;;  %2203 = vmatpush2.msra.mxu0 %v6668_v50 }
 0x555   :  { %2253 = vmatprep.subr.mxu1 %v9044_v18  ;;  %v1755_v18 = vpop.f32.mrf.mxu1 }
 0x556   :  { %2254 = vmatpush2.msra.mxu1 %v9045_v36  ;;  %v9059_v36 = vld [vmem:[#allocation78_spill] sm:$0xff] }
 0x557   :  { %2255 = vmatprep.subr.mxu1 %v6164_v3  ;;  %v6676_v3 = vld [vmem:[#allocation7 + $0x278] sm:$0xff] }
 0x558   :  { %2256 = vmatpush2.msra.mxu1 %v9046_v61  ;;  %v1830_v61 = vadd.f32 %v1755_v18, %v9059_v36 }
 0x559   :  { %2257 = vmatprep.subr.mxu1 %v9047_v56  ;;  %v4517_v56 = vmul.f32 -1.442695, %v1829_v0 }
 0x55a   :  { %2258 = vmatpush2.msra.mxu1 %v9048_v16  ;;  %v4518_v16 = vmul.f32 -1.442695, %v1830_v61 }
 0x55b   :  { %2259 = vmatprep.subr.mxu1 %v9049_v4  ;;  %4657 = vpow2.f32 %v4517_v56 }
 0x55c   :  { %2260 = vmatpush2.msra.mxu1 %v9050_v23  ;;  %4659 = vpow2.f32 %v4518_v16  ;;  %v9060_v23 = vld [vmem:[#allocation140_spill] sm:$0xff] }
 0x55d   :  { %2261 = vmatprep.subr.mxu1 %v6184_v20  ;;  %v6674_v20 = vld [vmem:[#allocation7 + $0x268] sm:$0xff] }
 0x55e   :  { %2262 = vmatpush2.msra.mxu1 %v6187_v13  ;;  %2204 = vmatprep.subr.mxu0 %v6674_v20  ;;  %v6680_v13 = vld [vmem:[#allocation7 + $0x260] sm:$0xff] }
 0x55f   :  { %2263 = vmatprep.subr.mxu1 %v6190_v19  ;;  %v6682_v19 = vld [vmem:[#allocation7 + $0x270] sm:$0xff]  ;;  %2205 = vmatpush2.msra.mxu0 %v6680_v13 }
 0x560   :  { %2264 = vmatpush2.msra.mxu1 %v6193_v59  ;;  %v6686_v59 = vld [vmem:[#allocation7 + $0x248] sm:$0xff] }
 0x561   :  { %2265 = vmatprep.subr.mxu1 %v9051_v24  ;;  %2206 = vmatprep.subr.mxu0 %v6686_v59  ;;  %v573_v24 = vadd.f32 %v9060_v23, %v5902_v10 }
 0x562   :  { %2266 = vmatpush2.msra.mxu1 %v9052_v26  ;;  %2207 = vmatpush2.msra.mxu0 %v6692_v43 }
 0x563   :  { %2267 = vmatprep.subr.mxu1 %v6628_v62  ;;  %2208 = vmatprep.subr.mxu0 %v6698_v11 }
 0x564   :  { %2268 = vmatpush2.msra.mxu1 %v6634_v9  ;;  %2209 = vmatpush2.msra.mxu0 %v6702_v55 }
 0x565   :  { %2269 = vmatprep.subr.mxu1 %v6640_v22  ;;  %2210 = vmatprep.subr.mxu0 %v6708_v1 }
 0x566   :  { %2270 = vmatpush2.msra.mxu1 %v6646_v8  ;;  %2211 = vmatpush2.msra.mxu0 %v6714_v12 }
 0x567   :  { %2271 = vmatprep.subr.mxu1 %v6652_v21  ;;  %2384 = vmatprep.subr.mxu0 %v9057_v30  ;;  %v9061_v30 = vld [vmem:[#allocation141_spill] sm:$0xff] }
 0x568   :  { %2272 = vmatpush2.msra.mxu1 %v6658_v47  ;;  %v4658_v4 = vpop.eup %4657 }
 0x569   :  { %2273 = vmatprep.subr.mxu1 %v6664_v29  ;;  %v4660_v26 = vpop.eup %4659 }
 0x56a   :  { %2274 = vmatpush2.msra.mxu1 %v6670_v57  ;;  %v1846_v34 = vadd.f32 1.0, %v4660_v26  ;;  %v9068_v26 = vld [vmem:[#allocation55_spill] sm:$0xff] }
 0x56b   :  { %2275 = vmatprep.subr.mxu1 %v6676_v3 }
 0x56c   :  { %2276 = vmatpush2.msra.mxu1 %v6682_v19 }
 0x56d   :  { %2277 = vmatprep.subr.mxu1 %v6688_v46 }
 0x56e   :  { %2278 = vmatpush2.msra.mxu1 %v6694_v48 }
 0x56f   :  { %2279 = vmatprep.subr.mxu1 %v6700_v51 }
 0x570   :  { %2280 = vmatpush2.msra.mxu1 %v6706_v60 }
 0x571   :  { %2281 = vmatprep.subr.mxu1 %v6710_v7 }
 0x572   :  { %2282 = vmatpush2.msra.mxu1 %v6718_v17  ;;  %v1845_v17 = vadd.f32 1.0, %v4658_v4 }
 0x573   :  { %2609 = vmatprep.subr.mxu1 %v6428_v25  ;;  %v575_v25 = vadd.f32 %v9061_v30, %v5906_v63 }
 0x5f3   :  { %v1989_v7 = vpop.f32.mrf.mxu1 }
 0x5f4   :  { %v1994_v60 = vadd.f32 %v1989_v7, %v573_v24  ;;  %v9067_v24 = vld [vmem:[#allocation23_spill] sm:$0xff] }
 0x5f5   :  { %v1991_v51 = vpop.f32.mrf.mxu1 }
 0x5f6   :  { %4661 = vtanh.f32 %v1994_v60  ;;  %v1995_v32 = vadd.f32 %v1991_v51, %v575_v25  ;;  %v9064_v51 = vld [vmem:[#allocation54_spill] sm:$0xff]  ;;  %v9065_v60 = vld [vmem:[#allocation99_spill] sm:$0xff]  ;;  %v9069_v25 = vld [vmem:[#allocation100_spill] sm:$0xff] }
 0x5f7   :  { %4663 = vrcp.f32 %v1845_v17  ;;  %v9066_v17 = vld [vmem:[#allocation134_spill] sm:$0xff] }
 0x5f8   :  { %4665 = vtanh.f32 %v1995_v32  ;;  %v9071_v32 = vld [vmem:[#allocation24_spill] sm:$0xff] }
 0x5f9   :  { %4667 = vrcp.f32 %v1846_v34  ;;  %v9070_v34 = vld [vmem:[#allocation135_spill] sm:$0xff] }
 0x603   :  { %v4662_v0 = vpop.eup %4661 }
 0x604   :  { %v4664_v18 = vpop.eup %4663  ;;  %v1998_v36 = vsub.f32 %v4662_v0, %v6233_v39  ;;  %v9075_v0 = vld [vmem:[#allocation25_spill] sm:$0xff] }
 0x605   :  { %v4666_v61 = vpop.eup %4665 }
 0x606   :  { %v2000_v56 = vmul.f32 %v4664_v18, %v1998_v36  ;;  %v1999_v16 = vsub.f32 %v4666_v61, %v6230_v54  ;;  %v4668_v4 = vpop.eup %4667  ;;  %v9076_v18 = vld [vmem:[#allocation58_spill] sm:$0xff]  ;;  %v9077_v36 = vld [vmem:[#allocation103_spill] sm:$0xff]  ;;  %v9078_v61 = vld [vmem:[#allocation60_spill] sm:$0xff] }
 0x608   :  { %v2001_v23 = vmul.f32 %v4668_v4, %v1999_v16  ;;  %v6736_v7 = vadd.f32 %v2000_v56, %v6233_v39  ;;  %v9079_v56 = vld [vmem:[#allocation26_spill] sm:$0xff]  ;;  %v9080_v16 = vld [vmem:[#allocation61_spill] sm:$0xff] }
 0x609   :  { %v9081_v4 = vld [vmem:[#allocation105_spill] sm:$0xff]  ;;  %v7006_v39 = vld [vmem:[#allocation7 + $0x338] sm:$0xff] }
 0x60a   :  { %v6733_v30 = vadd.f32 %v2001_v23, %v6230_v54  ;;  %9063 = vst [vmem:[#allocation93_spill] sm:$0xff] %v6736_v7  ;;  %v9082_v23 = vld [vmem:[#allocation63_spill] sm:$0xff]  ;;  %9168 = vst [vmem:[#allocation21_spill] sm:$0xff] %v7006_v39  ;;  %v7009_v54 = vld [vmem:[#allocation7 + $0x330] sm:$0xff] }
 0x60b   :  { %9169 = vst [vmem:[#allocation75_spill] sm:$0xff] %v7009_v54 }
 0x60c   :  { %9062 = vst [vmem:[#allocation18_spill] sm:$0xff] %v6733_v30  ;;  %2212 = vmatprep.mubr.f32.mxu0 %v6733_v30  ;;  %2283 = vmatprep.mubr.f32.mxu1 %v6733_v30 }
 0x60d   :  { %2213 = vmatmul.mubr.f32.vlgmr.msra.gmra.mxu0 %v6736_v7  ;;  %2284 = vmatmul.mubr.f32.vlgmr.msra.gmra.mxu1 %v6736_v7 }
 0x60e   :  { %2385 = vmatpush1.msra.mxu0 %v6235_v52  ;;  %2610 = vmatpush1.msra.mxu1 %v6431_v6  ;;  %v9072_v52 = vld [vmem:[#allocation56_spill] sm:$0xff]  ;;  %v9073_v6 = vld [vmem:[#allocation102_spill] sm:$0xff] }
 0x60f   :  { %2386 = vmatprep.subr.mxu0 %v6239_v38  ;;  %2611 = vmatprep.subr.mxu1 %v9064_v51  ;;  %v9074_v38 = vld [vmem:[#allocation57_spill] sm:$0xff]  ;;  %v9083_v51 = vld [vmem:[#allocation27_spill] sm:$0xff] }
 0x610   :  { %2387 = vmatpush1.msra.mxu0 %v9065_v60  ;;  %2612 = vmatpush1.msra.mxu1 %v9066_v17  ;;  %v9084_v60 = vld [vmem:[#allocation64_spill] sm:$0xff]  ;;  %v9085_v17 = vld [vmem:[#allocation106_spill] sm:$0xff] }
 0x611   :  { %2388 = vmatprep.subr.mxu0 %v9067_v24  ;;  %2613 = vmatprep.subr.mxu1 %v9068_v26  ;;  %v9086_v24 = vld [vmem:[#allocation65_spill] sm:$0xff]  ;;  %v9087_v26 = vld [vmem:[#allocation28_spill] sm:$0xff] }
 0x612   :  { %2389 = vmatpush1.msra.mxu0 %v9069_v25  ;;  %2614 = vmatpush1.msra.mxu1 %v9070_v34  ;;  %v9088_v25 = vld [vmem:[#allocation67_spill] sm:$0xff] }
 0x613   :  { %2390 = vmatprep.subr.mxu0 %v9071_v32  ;;  %2615 = vmatprep.subr.mxu1 %v9072_v52  ;;  %v9089_v34 = vld [vmem:[#allocation107_spill] sm:$0xff]  ;;  %v9090_v32 = vld [vmem:[#allocation68_spill] sm:$0xff]  ;;  %v9091_v52 = vld [vmem:[#allocation29_spill] sm:$0xff] }
 0x614   :  { %2391 = vmatpush1.msra.mxu0 %v9073_v6  ;;  %2616 = vmatpush1.msra.mxu1 %v9074_v38  ;;  %v9092_v6 = vld [vmem:[#allocation70_spill] sm:$0xff]  ;;  %v9093_v38 = vld [vmem:[#allocation109_spill] sm:$0xff] }
 0x615   :  { %2392 = vmatprep.subr.mxu0 %v9075_v0  ;;  %2617 = vmatprep.subr.mxu1 %v9076_v18  ;;  %v9094_v0 = vld [vmem:[#allocation71_spill] sm:$0xff]  ;;  %v9095_v18 = vld [vmem:[#allocation30_spill] sm:$0xff] }
 0x616   :  { %2393 = vmatpush1.msra.mxu0 %v9077_v36  ;;  %2618 = vmatpush1.msra.mxu1 %v9078_v61  ;;  %v9096_v36 = vld [vmem:[#allocation72_spill] sm:$0xff]  ;;  %v9097_v61 = vld [vmem:[#allocation110_spill] sm:$0xff] }
 0x617   :  { %2394 = vmatprep.subr.mxu0 %v9079_v56  ;;  %2619 = vmatprep.subr.mxu1 %v9080_v16  ;;  %v9098_v56 = vld [vmem:[#allocation73_spill] sm:$0xff]  ;;  %v9099_v16 = vld [vmem:[#allocation31_spill] sm:$0xff] }
 0x618   :  { %2395 = vmatpush1.msra.mxu0 %v9081_v4  ;;  %2620 = vmatpush1.msra.mxu1 %v9082_v23  ;;  %v9100_v4 = vld [vmem:[#allocation74_spill] sm:$0xff]  ;;  %v9101_v23 = vld [vmem:[#allocation112_spill] sm:$0xff] }
 0x619   :  { %2396 = vmatprep.subr.mxu0 %v9083_v51  ;;  %2621 = vmatprep.subr.mxu1 %v9084_v60  ;;  %v9102_v51 = vld [vmem:[#allocation76_spill] sm:$0xff] }
 0x61a   :  { %2397 = vmatpush1.msra.mxu0 %v9085_v17  ;;  %2622 = vmatpush1.msra.mxu1 %v9086_v24  ;;  %v9103_v60 = vld [vmem:[#allocation32_spill] sm:$0xff]  ;;  %v9104_v17 = vld [vmem:[#allocation77_spill] sm:$0xff] }
 0x61b   :  { %2398 = vmatprep.subr.mxu0 %v9087_v26  ;;  %2623 = vmatprep.subr.mxu1 %v9088_v25  ;;  %v9105_v24 = vld [vmem:[#allocation113_spill] sm:$0xff]  ;;  %v9106_v26 = vld [vmem:[#allocation79_spill] sm:$0xff] }
 0x61c   :  { %2399 = vmatpush1.msra.mxu0 %v9089_v34  ;;  %2624 = vmatpush1.msra.mxu1 %v9090_v32  ;;  %v9107_v25 = vld [vmem:[#allocation33_spill] sm:$0xff]  ;;  %v9108_v34 = vld [vmem:[#allocation80_spill] sm:$0xff]  ;;  %v9109_v32 = vld [vmem:[#allocation114_spill] sm:$0xff] }
 0x61d   :  { %2400 = vmatprep.subr.mxu0 %v9091_v52  ;;  %2625 = vmatprep.subr.mxu1 %v9092_v6  ;;  %v9110_v52 = vld [vmem:[#allocation81_spill] sm:$0xff]  ;;  %v9111_v6 = vld [vmem:[#allocation34_spill] sm:$0xff] }
 0x61e   :  { %2401 = vmatpush1.msra.mxu0 %v9093_v38  ;;  %2626 = vmatpush1.msra.mxu1 %v9094_v0  ;;  %v9112_v38 = vld [vmem:[#allocation83_spill] sm:$0xff] }
 0x61f   :  { %2402 = vmatprep.subr.mxu0 %v9095_v18  ;;  %2627 = vmatprep.subr.mxu1 %v9096_v36  ;;  %v9113_v0 = vld [vmem:[#allocation115_spill] sm:$0xff]  ;;  %v9114_v18 = vld [vmem:[#allocation84_spill] sm:$0xff] }
 0x620   :  { %2403 = vmatpush1.msra.mxu0 %v9097_v61  ;;  %2628 = vmatpush1.msra.mxu1 %v9098_v56  ;;  %v9115_v36 = vld [vmem:[#allocation35_spill] sm:$0xff]  ;;  %v9116_v61 = vld [vmem:[#allocation86_spill] sm:$0xff]  ;;  %v9117_v56 = vld [vmem:[#allocation116_spill] sm:$0xff] }
 0x621   :  { %2404 = vmatprep.subr.mxu0 %v9099_v16  ;;  %2629 = vmatprep.subr.mxu1 %v9100_v4  ;;  %v9118_v16 = vld [vmem:[#allocation87_spill] sm:$0xff]  ;;  %v9119_v4 = vld [vmem:[#allocation36_spill] sm:$0xff] }
 0x622   :  { %2405 = vmatpush1.msra.mxu0 %v9101_v23  ;;  %2630 = vmatpush1.msra.mxu1 %v9102_v51  ;;  %v9120_v23 = vld [vmem:[#allocation88_spill] sm:$0xff]  ;;  %v9121_v51 = vld [vmem:[#allocation117_spill] sm:$0xff] }
 0x623   :  { %2406 = vmatprep.subr.mxu0 %v9103_v60  ;;  %2631 = vmatprep.subr.mxu1 %v9104_v17  ;;  %v9122_v60 = vld [vmem:[#allocation90_spill] sm:$0xff]  ;;  %v9123_v17 = vld [vmem:[#allocation37_spill] sm:$0xff] }
 0x624   :  { %2407 = vmatpush1.msra.mxu0 %v9105_v24  ;;  %2632 = vmatpush1.msra.mxu1 %v9106_v26  ;;  %v9124_v24 = vld [vmem:[#allocation66_spill] sm:$0xff] }
 0x625   :  { %2408 = vmatprep.subr.mxu0 %v9107_v25  ;;  %2633 = vmatprep.subr.mxu1 %v9108_v34  ;;  %v9125_v26 = vld [vmem:[#allocation118_spill] sm:$0xff]  ;;  %v9126_v25 = vld [vmem:[#allocation69_spill] sm:$0xff] }
 0x626   :  { %2409 = vmatpush1.msra.mxu0 %v9109_v32  ;;  %2634 = vmatpush1.msra.mxu1 %v9110_v52  ;;  %v9127_v34 = vld [vmem:[#allocation38_spill] sm:$0xff]  ;;  %v9129_v52 = vld [vmem:[#allocation119_spill] sm:$0xff] }
 0x627   :  { %2410 = vmatprep.subr.mxu0 %v9111_v6  ;;  %2635 = vmatprep.subr.mxu1 %v9112_v38  ;;  %v9128_v32 = vld [vmem:[#allocation138_spill] sm:$0xff]  ;;  %v9130_v6 = vld [vmem:[#allocation139_spill] sm:$0xff] }
 0x628   :  { %2411 = vmatpush1.msra.mxu0 %v9113_v0  ;;  %2636 = vmatpush1.msra.mxu1 %v9114_v18  ;;  %v9131_v38 = vld [vmem:[#allocation39_spill] sm:$0xff]  ;;  %v9132_v0 = vld [vmem:[#allocation160_spill] sm:$0xff] }
 0x629   :  { %2412 = vmatprep.subr.mxu0 %v9115_v36  ;;  %2637 = vmatprep.subr.mxu1 %v9116_v61  ;;  %v9133_v18 = vld [vmem:[#allocation120_spill] sm:$0xff]  ;;  %v9134_v36 = vld [vmem:[#allocation161_spill] sm:$0xff] }
 0x62a   :  { %2413 = vmatpush1.msra.mxu0 %v9117_v56  ;;  %2638 = vmatpush1.msra.mxu1 %v9118_v16  ;;  %v9135_v61 = vld [vmem:[#allocation40_spill] sm:$0xff]  ;;  %v9136_v56 = vld [vmem:[#allocation121_spill] sm:$0xff] }
 0x62b   :  { %2414 = vmatprep.subr.mxu0 %v9119_v4  ;;  %2639 = vmatprep.subr.mxu1 %v9120_v23  ;;  %v9137_v16 = vld [vmem:[#allocation41_spill] sm:$0xff]  ;;  %v9138_v4 = vld [vmem:[#allocation122_spill] sm:$0xff] }
 0x62c   :  { %2415 = vmatpush1.msra.mxu0 %v9121_v51  ;;  %2640 = vmatpush1.msra.mxu1 %v9122_v60  ;;  %v9139_v23 = vld [vmem:[#allocation42_spill] sm:$0xff]  ;;  %v9140_v51 = vld [vmem:[#allocation123_spill] sm:$0xff]  ;;  %v9162_v60 = vld [vmem:[#allocation16_spill] sm:$0xff] }
 0x62d   :  { %2416 = vmatprep.subr.mxu0 %v9123_v17  ;;  %2641 = vmatprep.subr.mxu1 %v9124_v24  ;;  %v9163_v24 = vld [vmem:[#allocation17_spill] sm:$0xff] }
 0x62e   :  { %2417 = vmatpush2.msra.mxu0 %v9125_v26  ;;  %2642 = vmatpush2.msra.mxu1 %v9126_v25  ;;  %v384_v26 = vadd.f32 %v9163_v24, %v5686_v2  ;;  %v6959_v24 = vld [vmem:[#allocation7 + $0x30] sm:$0xff] }
 0x62f   :  { %2418 = vmatprep.subr.mxu0 %v9127_v34  ;;  %2643 = vmatprep.subr.mxu1 %v9128_v32 }
 0x630   :  { %2419 = vmatpush2.msra.mxu0 %v9129_v52  ;;  %2644 = vmatpush2.msra.mxu1 %v9130_v6 }
 0x631   :  { %2420 = vmatprep.subr.mxu0 %v9131_v38  ;;  %2645 = vmatprep.subr.mxu1 %v9132_v0 }
 0x632   :  { %2421 = vmatpush2.msra.mxu0 %v9133_v18  ;;  %2646 = vmatpush2.msra.mxu1 %v9134_v36 }
 0x633   :  { %2422 = vmatprep.subr.mxu0 %v9135_v61  ;;  %2647 = vmatprep.subr.mxu1 %v6596_v28  ;;  %v9141_v28 = vld [vmem:[#allocation43_spill] sm:$0xff] }
 0x634   :  { %2423 = vmatpush2.msra.mxu0 %v9136_v56  ;;  %2648 = vmatpush2.msra.mxu1 %v6599_v31  ;;  %v9142_v31 = vld [vmem:[#allocation124_spill] sm:$0xff]  ;;  %v6877_v56 = vld [vmem:[#allocation7 + $0x1f0] sm:$0xff] }
 0x635   :  { %2424 = vmatprep.subr.mxu0 %v9137_v16  ;;  %2649 = vmatprep.subr.mxu1 %v6602_v33  ;;  %v9143_v33 = vld [vmem:[#allocation44_spill] sm:$0xff]  ;;  %v6879_v16 = vld [vmem:[#allocation7 + $0x1d8] sm:$0xff] }
 0x636   :  { %2425 = vmatpush2.msra.mxu0 %v9138_v4  ;;  %2650 = vmatpush2.msra.mxu1 %v6605_v35  ;;  %v9144_v35 = vld [vmem:[#allocation125_spill] sm:$0xff] }
 0x637   :  { %2426 = vmatprep.subr.mxu0 %v9139_v23  ;;  %2651 = vmatprep.subr.mxu1 %v6608_v37  ;;  %v9145_v37 = vld [vmem:[#allocation45_spill] sm:$0xff]  ;;  %v6884_v23 = vld [vmem:[#allocation7 + $0x1b8] sm:$0xff] }
 0x638   :  { %2427 = vmatpush2.msra.mxu0 %v9140_v51  ;;  %2652 = vmatpush2.msra.mxu1 %v6611_v40  ;;  %v9146_v40 = vld [vmem:[#allocation126_spill] sm:$0xff]  ;;  %v6881_v4 = vld [vmem:[#allocation7 + $0x1d0] sm:$0xff] }
 0x639   :  { %2428 = vmatprep.subr.mxu0 %v9141_v28  ;;  %2653 = vmatprep.subr.mxu1 %v6614_v42  ;;  %v9147_v42 = vld [vmem:[#allocation47_spill] sm:$0xff]  ;;  %v6887_v51 = vld [vmem:[#allocation7 + $0x1b0] sm:$0xff]  ;;  %v6890_v28 = vld [vmem:[#allocation7 + $0x198] sm:$0xff] }
 0x63a   :  { %2429 = vmatpush2.msra.mxu0 %v9142_v31  ;;  %2654 = vmatpush2.msra.mxu1 %v6617_v44  ;;  %v9148_v44 = vld [vmem:[#allocation127_spill] sm:$0xff]  ;;  %v6893_v31 = vld [vmem:[#allocation7 + $0x190] sm:$0xff] }
 0x63b   :  { %2430 = vmatprep.subr.mxu0 %v9143_v33  ;;  %2655 = vmatprep.subr.mxu1 %v6620_v49  ;;  %v9149_v49 = vld [vmem:[#allocation48_spill] sm:$0xff]  ;;  %v6896_v33 = vld [vmem:[#allocation7 + $0x178] sm:$0xff] }
 0x63c   :  { %2431 = vmatpush2.msra.mxu0 %v9144_v35  ;;  %2656 = vmatpush2.msra.mxu1 %v6623_v53  ;;  %v9150_v53 = vld [vmem:[#allocation128_spill] sm:$0xff]  ;;  %v6899_v35 = vld [vmem:[#allocation7 + $0x170] sm:$0xff] }
 0x63d   :  { %2432 = vmatprep.subr.mxu0 %v9145_v37  ;;  %2657 = vmatprep.subr.mxu1 %v6626_v58  ;;  %v9151_v58 = vld [vmem:[#allocation49_spill] sm:$0xff]  ;;  %v6902_v37 = vld [vmem:[#allocation7 + $0x158] sm:$0xff] }
 0x63e   :  { %2433 = vmatpush2.msra.mxu0 %v9146_v40  ;;  %2658 = vmatpush2.msra.mxu1 %v6632_v5  ;;  %v9152_v5 = vld [vmem:[#allocation129_spill] sm:$0xff] }
 0x63f   :  { %2434 = vmatprep.subr.mxu0 %v9147_v42  ;;  %2659 = vmatprep.subr.mxu1 %v6638_v15  ;;  %v9153_v15 = vld [vmem:[#allocation50_spill] sm:$0xff]  ;;  %v6905_v40 = vld [vmem:[#allocation7 + $0x150] sm:$0xff] }
 0x640   :  { %2435 = vmatpush2.msra.mxu0 %v9148_v44  ;;  %2660 = vmatpush2.msra.mxu1 %v6644_v27  ;;  %v9154_v27 = vld [vmem:[#allocation130_spill] sm:$0xff]  ;;  %v6911_v44 = vld [vmem:[#allocation7 + $0x130] sm:$0xff] }
 0x641   :  { %2436 = vmatprep.subr.mxu0 %v9149_v49  ;;  %2661 = vmatprep.subr.mxu1 %v6650_v41  ;;  %v9155_v41 = vld [vmem:[#allocation51_spill] sm:$0xff]  ;;  %v6908_v42 = vld [vmem:[#allocation7 + $0x138] sm:$0xff] }
 0x642   :  { %2437 = vmatpush2.msra.mxu0 %v9150_v53  ;;  %2662 = vmatpush2.msra.mxu1 %v6656_v45  ;;  %v9156_v45 = vld [vmem:[#allocation131_spill] sm:$0xff]  ;;  %v6914_v49 = vld [vmem:[#allocation7 + $0x118] sm:$0xff]  ;;  %v6917_v53 = vld [vmem:[#allocation7 + $0x110] sm:$0xff] }
 0x643   :  { %2438 = vmatprep.subr.mxu0 %v9151_v58  ;;  %2663 = vmatprep.subr.mxu1 %v6662_v14  ;;  %v9157_v14 = vld [vmem:[#allocation52_spill] sm:$0xff]  ;;  %v6920_v58 = vld [vmem:[#allocation7 + $0xf8] sm:$0xff] }
 0x644   :  { %2439 = vmatpush2.msra.mxu0 %v9152_v5  ;;  %2664 = vmatpush2.msra.mxu1 %v6668_v50  ;;  %v9158_v50 = vld [vmem:[#allocation132_spill] sm:$0xff]  ;;  %v6923_v5 = vld [vmem:[#allocation7 + $0xf0] sm:$0xff] }
 0x645   :  { %2440 = vmatprep.subr.mxu0 %v9153_v15  ;;  %2665 = vmatprep.subr.mxu1 %v6674_v20  ;;  %v9159_v20 = vld [vmem:[#allocation53_spill] sm:$0xff]  ;;  %v6926_v15 = vld [vmem:[#allocation7 + $0xd8] sm:$0xff] }
 0x646   :  { %2441 = vmatpush2.msra.mxu0 %v9154_v27  ;;  %2666 = vmatpush2.msra.mxu1 %v6680_v13  ;;  %v9160_v13 = vld [vmem:[#allocation133_spill] sm:$0xff] }
 0x647   :  { %2442 = vmatprep.subr.mxu0 %v9155_v41  ;;  %2667 = vmatprep.subr.mxu1 %v6686_v59  ;;  %v6868_v59 = vld [vmem:[#allocation7 + $0x1f8] sm:$0xff]  ;;  %v6929_v27 = vld [vmem:[#allocation7 + $0xd0] sm:$0xff] }
 0x648   :  { %2443 = vmatpush2.msra.mxu0 %v9156_v45  ;;  %2668 = vmatpush2.msra.mxu1 %v6692_v43  ;;  %v9161_v43 = vld [vmem:[#allocation150_spill] sm:$0xff]  ;;  %v6935_v45 = vld [vmem:[#allocation7 + $0xb0] sm:$0xff] }
 0x649   :  { %2444 = vmatprep.subr.mxu0 %v9157_v14  ;;  %2669 = vmatprep.subr.mxu1 %v6698_v11  ;;  %v382_v17 = vadd.f32 %v9162_v60, %v9161_v43  ;;  %v6932_v41 = vld [vmem:[#allocation7 + $0xb8] sm:$0xff] }
 0x64a   :  { %2445 = vmatpush2.msra.mxu0 %v9158_v50  ;;  %2670 = vmatpush2.msra.mxu1 %v6702_v55  ;;  %v6938_v14 = vld [vmem:[#allocation7 + $0x98] sm:$0xff]  ;;  %v6941_v50 = vld [vmem:[#allocation7 + $0x90] sm:$0xff] }
 0x64b   :  { %2446 = vmatprep.subr.mxu0 %v9159_v20  ;;  %2671 = vmatprep.subr.mxu1 %v6708_v1  ;;  %v6944_v20 = vld [vmem:[#allocation7 + $0x78] sm:$0xff] }
 0x64c   :  { %2447 = vmatpush2.msra.mxu0 %v9160_v13  ;;  %2672 = vmatpush2.msra.mxu1 %v6714_v12  ;;  %v6947_v13 = vld [vmem:[#allocation7 + $0x70] sm:$0xff]  ;;  %v6950_v60 = vld [vmem:[#allocation7 + $0x58] sm:$0xff] }
 0x64d   :  { %2680 = vmatprep.subr.mxu0 %v6868_v59 }
 0x6cd   :  { %v2285_v11 = vpop.f32.mrf.mxu1 }
 0x6ce   :  { %v2292_v55 = vadd.f32 %v2285_v11, %v382_v17  ;;  %v6953_v17 = vld [vmem:[#allocation7 + $0x50] sm:$0xff]  ;;  %v6956_v11 = vld [vmem:[#allocation7 + $0x38] sm:$0xff] }
 0x6cf   :  { %v2287_v25 = vpop.f32.mrf.mxu1 }
 0x6d0   :  { %v4523_v34 = vmul.f32 -1.442695, %v2292_v55  ;;  %v2293_v32 = vadd.f32 %v2287_v25, %v384_v26  ;;  %v6962_v26 = vld [vmem:[#allocation7 + $0x18] sm:$0xff]  ;;  %v6965_v55 = vld [vmem:[#allocation7 + $0x10] sm:$0xff] }
 0x6d1   :  { %v6968_v25 = vld [vmem:[#allocation7 + $0x3f8] sm:$0xff] }
 0x6d2   :  { %v4524_v1 = vmul.f32 -1.442695, %v2293_v32  ;;  %4669 = vpow2.f32 %v4523_v34  ;;  %v6971_v34 = vld [vmem:[#allocation7 + $0x3f0] sm:$0xff]  ;;  %v6974_v32 = vld [vmem:[#allocation7 + $0x3d8] sm:$0xff] }
 0x6d4   :  { %4671 = vpow2.f32 %v4524_v1  ;;  %v6977_v1 = vld [vmem:[#allocation7 + $0x3d0] sm:$0xff] }
 0x6df   :  { %v4670_v52 = vpop.eup %4669 }
 0x6e0   :  { %v2308_v12 = vadd.f32 1.0, %v4670_v52  ;;  %v6980_v52 = vld [vmem:[#allocation7 + $0x3b8] sm:$0xff] }
 0x6e1   :  { %v4672_v6 = vpop.eup %4671 }
 0x6e2   :  { %v2309_v38 = vadd.f32 1.0, %v4672_v6  ;;  %4673 = vrcp.f32 %v2308_v12  ;;  %v6983_v12 = vld [vmem:[#allocation7 + $0x3b0] sm:$0xff]  ;;  %v6988_v6 = vld [vmem:[#allocation7 + $0x398] sm:$0xff] }
 0x6e4   :  { %4675 = vrcp.f32 %v2309_v38  ;;  %v6991_v38 = vld [vmem:[#allocation7 + $0x390] sm:$0xff] }
 0x6ef   :  { %v4674_v0 = vpop.eup %4673 }
 0x6f0   :  { %v2318_v61 = vmul.f32 %v4674_v0, %v6736_v7  ;;  %v6994_v0 = vld [vmem:[#allocation7 + $0x378] sm:$0xff] }
 0x6f1   :  { %v4676_v18 = vpop.eup %4675  ;;  %9164 = vst [vmem:[#allocation19_spill] sm:$0xff] %v6994_v0 }
 0x6f2   :  { %v2319_v36 = vmul.f32 %v4676_v18, %v6733_v30  ;;  %v6997_v18 = vld [vmem:[#allocation7 + $0x370] sm:$0xff] }
 0x6f3   :  { %9165 = vst [vmem:[#allocation95_spill] sm:$0xff] %v6997_v18 }
 0x6f4   :  { %2448 = vmatprep.mubr.f32.mxu0 %v2319_v36  ;;  %v7000_v36 = vld [vmem:[#allocation7 + $0x358] sm:$0xff] }
 0x6f5   :  { %2449 = vmatmul.mubr.f32.vlgmr.msra.gmra.mxu0 %v2318_v61  ;;  %9166 = vst [vmem:[#allocation20_spill] sm:$0xff] %v7000_v36  ;;  %v7003_v61 = vld [vmem:[#allocation7 + $0x350] sm:$0xff] }
 0x6f6   :  { %2681 = vmatpush1.msra.mxu0 %v6877_v56  ;;  %9167 = vst [vmem:[#allocation96_spill] sm:$0xff] %v7003_v61 }
 0x6f7   :  { %2682 = vmatprep.subr.mxu0 %v6879_v16 }
 0x6f8   :  { %2683 = vmatpush1.msra.mxu0 %v6881_v4 }
 0x6f9   :  { %2684 = vmatprep.subr.mxu0 %v6884_v23 }
 0x6fa   :  { %2685 = vmatpush1.msra.mxu0 %v6887_v51 }
 0x6fb   :  { %2686 = vmatprep.subr.mxu0 %v6890_v28 }
 0x6fc   :  { %2687 = vmatpush1.msra.mxu0 %v6893_v31 }
 0x6fd   :  { %2688 = vmatprep.subr.mxu0 %v6896_v33 }
 0x6fe   :  { %2689 = vmatpush1.msra.mxu0 %v6899_v35 }
 0x6ff   :  { %2690 = vmatprep.subr.mxu0 %v6902_v37 }
 0x700   :  { %2691 = vmatpush1.msra.mxu0 %v6905_v40 }
 0x701   :  { %2692 = vmatprep.subr.mxu0 %v6908_v42 }
 0x702   :  { %2693 = vmatpush1.msra.mxu0 %v6911_v44 }
 0x703   :  { %2694 = vmatprep.subr.mxu0 %v6914_v49 }
 0x704   :  { %2695 = vmatpush1.msra.mxu0 %v6917_v53 }
 0x705   :  { %2696 = vmatprep.subr.mxu0 %v6920_v58 }
 0x706   :  { %2697 = vmatpush1.msra.mxu0 %v6923_v5 }
 0x707   :  { %2698 = vmatprep.subr.mxu0 %v6926_v15 }
 0x708   :  { %2699 = vmatpush1.msra.mxu0 %v6929_v27 }
 0x709   :  { %2700 = vmatprep.subr.mxu0 %v6932_v41 }
 0x70a   :  { %2701 = vmatpush1.msra.mxu0 %v6935_v45 }
 0x70b   :  { %2702 = vmatprep.subr.mxu0 %v6938_v14 }
 0x70c   :  { %2703 = vmatpush1.msra.mxu0 %v6941_v50 }
 0x70d   :  { %2704 = vmatprep.subr.mxu0 %v6944_v20 }
 0x70e   :  { %2705 = vmatpush1.msra.mxu0 %v6947_v13 }
 0x70f   :  { %2706 = vmatprep.subr.mxu0 %v6950_v60 }
 0x710   :  { %2707 = vmatpush1.msra.mxu0 %v6953_v17 }
 0x711   :  { %2708 = vmatprep.subr.mxu0 %v6956_v11 }
 0x712   :  { %2709 = vmatpush1.msra.mxu0 %v6959_v24 }
 0x713   :  { %2710 = vmatprep.subr.mxu0 %v6962_v26 }
 0x714   :  { %2711 = vmatpush1.msra.mxu0 %v6965_v55 }
 0x715   :  { %2712 = vmatprep.subr.mxu0 %v6968_v25 }
 0x716   :  { %2713 = vmatpush2.msra.mxu0 %v6971_v34 }
 0x717   :  { %2714 = vmatprep.subr.mxu0 %v6974_v32 }
 0x718   :  { %2715 = vmatpush2.msra.mxu0 %v6977_v1 }
 0x719   :  { %2716 = vmatprep.subr.mxu0 %v6980_v52 }
 0x71a   :  { %2717 = vmatpush2.msra.mxu0 %v6983_v12 }
 0x71b   :  { %2718 = vmatprep.subr.mxu0 %v6988_v6 }
 0x71c   :  { %2719 = vmatpush2.msra.mxu0 %v6991_v38 }
 0x71d   :  { %2720 = vmatprep.subr.mxu0 %v6994_v0  ;;  %v7012_v0 = vld [vmem:[#allocation7 + $0x318] sm:$0xff] }
 0x71e   :  { %2721 = vmatpush2.msra.mxu0 %v6997_v18  ;;  %9170 = vst [vmem:[#allocation78_spill] sm:$0xff] %v7012_v0  ;;  %v7015_v18 = vld [vmem:[#allocation7 + $0x310] sm:$0xff] }
 0x71f   :  { %2722 = vmatprep.subr.mxu0 %v7000_v36  ;;  %9171 = vst [vmem:[#allocation140_spill] sm:$0xff] %v7015_v18 }
 0x720   :  { %2723 = vmatpush2.msra.mxu0 %v7003_v61 }
 0x721   :  { %2724 = vmatprep.subr.mxu0 %v7006_v39  ;;  %v9180_v39 = vld [vmem:[#allocation143_spill] sm:$0xff] }
 0x722   :  { %2725 = vmatpush2.msra.mxu0 %v7009_v54 }
 0x723   :  { %2726 = vmatprep.subr.mxu0 %v7012_v0 }
 0x724   :  { %2727 = vmatpush2.msra.mxu0 %v7015_v18 }
 0x725   :  { %2728 = vmatprep.subr.mxu0 %v6628_v62  ;;  %v9172_v62 = vld [vmem:[#allocation15_spill] sm:$0xff] }
 0x726   :  { %2729 = vmatpush2.msra.mxu0 %v6634_v9  ;;  %v9173_v9 = vld [vmem:[#allocation46_spill] sm:$0xff] }
 0x727   :  { %2730 = vmatprep.subr.mxu0 %v6640_v22  ;;  %v9174_v22 = vld [vmem:[#allocation136_spill] sm:$0xff] }
 0x728   :  { %2731 = vmatpush2.msra.mxu0 %v6646_v8  ;;  %v9175_v8 = vld [vmem:[#allocation137_spill] sm:$0xff] }
 0x729   :  { %2732 = vmatprep.subr.mxu0 %v6652_v21  ;;  %v7034_v21 = vld [vmem:[#allocation9 + $0xf8] sm:$0xff] }
 0x72a   :  { %2733 = vmatpush2.msra.mxu0 %v6658_v47  ;;  %9176 = vst [vmem:[#allocation141_spill] sm:$0xff] %v7034_v21  ;;  %2845 = vmatprep.subr.mxu1 %v7034_v21  ;;  %v2214_v47 = vpop.f32.mrf.mxu0  ;;  %v581_v21 = vadd.f32 %v9180_v39, %v5906_v63 }
 0x72b   :  { %2734 = vmatprep.subr.mxu0 %v6664_v29  ;;  %v9177_v29 = vld [vmem:[#allocation82_spill] sm:$0xff] }
 0x72c   :  { %2735 = vmatpush2.msra.mxu0 %v6670_v57  ;;  %v2290_v57 = vadd.f32 %v2214_v47, %v9177_v29 }
 0x72d   :  { %2736 = vmatprep.subr.mxu0 %v6676_v3  ;;  %v2216_v3 = vpop.f32.mrf.mxu0 }
 0x72e   :  { %2737 = vmatpush2.msra.mxu0 %v6682_v19  ;;  %v9178_v19 = vld [vmem:[#allocation85_spill] sm:$0xff]  ;;  %v4521_v18 = vmul.f32 -1.442695, %v2290_v57 }
 0x72f   :  { %2738 = vmatprep.subr.mxu0 %v6688_v46  ;;  %v2291_v46 = vadd.f32 %v2216_v3, %v9178_v19 }
 0x730   :  { %2739 = vmatpush2.msra.mxu0 %v6694_v48  ;;  %4677 = vpow2.f32 %v4521_v18 }
 0x731   :  { %2740 = vmatprep.subr.mxu0 %v9172_v62  ;;  %v4522_v48 = vmul.f32 -1.442695, %v2291_v46 }
 0x732   :  { %2741 = vmatpush2.msra.mxu0 %v9173_v9  ;;  %v9179_v9 = vld [vmem:[#allocation142_spill] sm:$0xff] }
 0x733   :  { %2742 = vmatprep.subr.mxu0 %v9174_v22  ;;  %4679 = vpow2.f32 %v4522_v48  ;;  %v579_v22 = vadd.f32 %v9179_v9, %v5902_v10 }
 0x734   :  { %2743 = vmatpush2.msra.mxu0 %v9175_v8 }
 0x73d   :  { %v4678_v62 = vpop.eup %4677 }
 0x73e   :  { %v2306_v8 = vadd.f32 1.0, %v4678_v62 }
 0x740   :  { %v4680_v0 = vpop.eup %4679 }
 0x741   :  { %v2307_v47 = vadd.f32 1.0, %v4680_v0  ;;  %v7051_v0 = vld [vmem:[#allocation9 + $0xf0] sm:$0xff] }
 0x7b5   :  { %v2450_v54 = vpop.f32.mrf.mxu0 }
 0x7b6   :  { %v2455_v61 = vadd.f32 %v2450_v54, %v579_v22  ;;  %v7065_v22 = vld [vmem:[#allocation9 + $0xd0] sm:$0xff] }
 0x7b7   :  { %v2452_v36 = vpop.f32.mrf.mxu0  ;;  %9186 = vst [vmem:[#allocation100_spill] sm:$0xff] %v7065_v22 }
 0x7b8   :  { %4681 = vtanh.f32 %v2455_v61  ;;  %v2456_v29 = vadd.f32 %v2452_v36, %v581_v21  ;;  %v7055_v36 = vld [vmem:[#allocation9 + $0xe8] sm:$0xff]  ;;  %v7059_v61 = vld [vmem:[#allocation9 + $0xe0] sm:$0xff]  ;;  %v7062_v21 = vld [vmem:[#allocation9 + $0xd8] sm:$0xff] }
 0x7b9   :  { %4683 = vrcp.f32 %v2306_v8  ;;  %9183 = vst [vmem:[#allocation134_spill] sm:$0xff] %v7055_v36  ;;  %9184 = vst [vmem:[#allocation23_spill] sm:$0xff] %v7059_v61  ;;  %v7068_v8 = vld [vmem:[#allocation9 + $0xc8] sm:$0xff] }
 0x7ba   :  { %4685 = vtanh.f32 %v2456_v29  ;;  %9185 = vst [vmem:[#allocation55_spill] sm:$0xff] %v7062_v21  ;;  %9187 = vst [vmem:[#allocation135_spill] sm:$0xff] %v7068_v8  ;;  %v7074_v29 = vld [vmem:[#allocation9 + $0xb8] sm:$0xff] }
 0x7bb   :  { %4687 = vrcp.f32 %v2307_v47  ;;  %v7071_v47 = vld [vmem:[#allocation9 + $0xc0] sm:$0xff]  ;;  %9189 = vst [vmem:[#allocation56_spill] sm:$0xff] %v7074_v29 }
 0x7bc   :  { %9188 = vst [vmem:[#allocation24_spill] sm:$0xff] %v7071_v47 }
 0x7c5   :  { %v4682_v18 = vpop.eup %4681 }
 0x7c6   :  { %v4684_v57 = vpop.eup %4683  ;;  %v2459_v3 = vsub.f32 %v4682_v18, %v6736_v7  ;;  %v7077_v18 = vld [vmem:[#allocation9 + $0xb0] sm:$0xff] }
 0x7c7   :  { %v4686_v19 = vpop.eup %4685  ;;  %9190 = vst [vmem:[#allocation102_spill] sm:$0xff] %v7077_v18 }
 0x7c8   :  { %v2461_v46 = vmul.f32 %v4684_v57, %v2459_v3  ;;  %v2460_v48 = vsub.f32 %v4686_v19, %v6733_v30  ;;  %v4688_v62 = vpop.eup %4687  ;;  %v7080_v57 = vld [vmem:[#allocation9 + $0xa8] sm:$0xff]  ;;  %v7083_v3 = vld [vmem:[#allocation9 + $0xa0] sm:$0xff]  ;;  %v7086_v19 = vld [vmem:[#allocation9 + $0x98] sm:$0xff] }
 0x7c9   :  { %9191 = vst [vmem:[#allocation57_spill] sm:$0xff] %v7080_v57  ;;  %9192 = vst [vmem:[#allocation25_spill] sm:$0xff] %v7083_v3 }
 0x7ca   :  { %v2462_v9 = vmul.f32 %v4688_v62, %v2460_v48  ;;  %v7049_v54 = vadd.f32 %v2461_v46, %v6736_v7  ;;  %9193 = vst [vmem:[#allocation58_spill] sm:$0xff] %v7086_v19  ;;  %v7089_v46 = vld [vmem:[#allocation9 + $0x90] sm:$0xff]  ;;  %v7092_v48 = vld [vmem:[#allocation9 + $0x88] sm:$0xff]  ;;  %v7095_v62 = vld [vmem:[#allocation9 + $0x80] sm:$0xff] }
 0x7cb   :  { %9194 = vst [vmem:[#allocation103_spill] sm:$0xff] %v7089_v46  ;;  %9195 = vst [vmem:[#allocation60_spill] sm:$0xff] %v7092_v48  ;;  %v7101_v7 = vld [vmem:[#allocation9 + $0x70] sm:$0xff] }
 0x7cc   :  { %v7046_v39 = vadd.f32 %v2462_v9, %v6733_v30  ;;  %9182 = vst [vmem:[#allocation99_spill] sm:$0xff] %v7049_v54  ;;  %9196 = vst [vmem:[#allocation26_spill] sm:$0xff] %v7095_v62  ;;  %v7098_v9 = vld [vmem:[#allocation9 + $0x78] sm:$0xff]  ;;  %v7104_v30 = vld [vmem:[#allocation9 + $0x68] sm:$0xff] }
 0x7cd   :  { %9197 = vst [vmem:[#allocation61_spill] sm:$0xff] %v7098_v9  ;;  %9198 = vst [vmem:[#allocation105_spill] sm:$0xff] %v7101_v7 }
 0x7ce   :  { %9181 = vst [vmem:[#allocation54_spill] sm:$0xff] %v7046_v39  ;;  %2673 = vmatprep.mubr.f32.mxu1 %v7046_v39  ;;  %2744 = vmatprep.mubr.f32.mxu0 %v7046_v39  ;;  %9199 = vst [vmem:[#allocation63_spill] sm:$0xff] %v7104_v30 }
 0x7cf   :  { %2674 = vmatmul.mubr.f32.vlgmr.msra.gmra.mxu1 %v7049_v54  ;;  %2745 = vmatmul.mubr.f32.vlgmr.msra.gmra.mxu0 %v7049_v54 }
 0x7d0   :  { %2846 = vmatpush1.msra.mxu1 %v7051_v0 }
 0x7d1   :  { %2847 = vmatprep.subr.mxu1 %v7055_v36 }
 0x7d2   :  { %2848 = vmatpush1.msra.mxu1 %v7059_v61 }
 0x7d3   :  { %2849 = vmatprep.subr.mxu1 %v7062_v21 }
 0x7d4   :  { %2850 = vmatpush1.msra.mxu1 %v7065_v22 }
 0x7d5   :  { %2851 = vmatprep.subr.mxu1 %v7068_v8 }
 0x7d6   :  { %2852 = vmatpush1.msra.mxu1 %v7071_v47  ;;  %v7280_v47 = vld [vmem:[#allocation7 + $0x128] sm:$0xff] }
 0x7d7   :  { %2853 = vmatprep.subr.mxu1 %v7074_v29  ;;  %v7277_v29 = vld [vmem:[#allocation7 + $0x140] sm:$0xff]  ;;  %9255 = vst [vmem:[#allocation122_spill] sm:$0xff] %v7280_v47 }
 0x7d8   :  { %2854 = vmatpush1.msra.mxu1 %v7077_v18  ;;  %v7274_v18 = vld [vmem:[#allocation7 + $0x148] sm:$0xff]  ;;  %9254 = vst [vmem:[#allocation41_spill] sm:$0xff] %v7277_v29 }
 0x7d9   :  { %2855 = vmatprep.subr.mxu1 %v7080_v57  ;;  %v7271_v57 = vld [vmem:[#allocation7 + $0x160] sm:$0xff]  ;;  %9253 = vst [vmem:[#allocation121_spill] sm:$0xff] %v7274_v18 }
 0x7da   :  { %2856 = vmatpush1.msra.mxu1 %v7083_v3  ;;  %v7107_v3 = vld [vmem:[#allocation9 + $0x60] sm:$0xff]  ;;  %9252 = vst [vmem:[#allocation40_spill] sm:$0xff] %v7271_v57 }
 0x7db   :  { %2857 = vmatprep.subr.mxu1 %v7086_v19  ;;  %9200 = vst [vmem:[#allocation27_spill] sm:$0xff] %v7107_v3  ;;  %v7110_v19 = vld [vmem:[#allocation9 + $0x58] sm:$0xff] }
 0x7dc   :  { %2858 = vmatpush1.msra.mxu1 %v7089_v46  ;;  %9201 = vst [vmem:[#allocation64_spill] sm:$0xff] %v7110_v19  ;;  %v7113_v46 = vld [vmem:[#allocation9 + $0x50] sm:$0xff] }
 0x7dd   :  { %2859 = vmatprep.subr.mxu1 %v7092_v48  ;;  %9202 = vst [vmem:[#allocation106_spill] sm:$0xff] %v7113_v46  ;;  %v7116_v48 = vld [vmem:[#allocation9 + $0x48] sm:$0xff] }
 0x7de   :  { %2860 = vmatpush1.msra.mxu1 %v7095_v62  ;;  %9203 = vst [vmem:[#allocation65_spill] sm:$0xff] %v7116_v48  ;;  %v7119_v62 = vld [vmem:[#allocation9 + $0x40] sm:$0xff] }
 0x7df   :  { %2861 = vmatprep.subr.mxu1 %v7098_v9  ;;  %9204 = vst [vmem:[#allocation28_spill] sm:$0xff] %v7119_v62  ;;  %v7215_v9 = vld [vmem:[#allocation9 + $0x140] sm:$0xff] }
 0x7e0   :  { %2862 = vmatpush1.msra.mxu1 %v7101_v7  ;;  %v7124_v7 = vld [vmem:[#allocation9 + $0x38] sm:$0xff]  ;;  %9236 = vst [vmem:[#allocation36_spill] sm:$0xff] %v7215_v9 }
 0x7e1   :  { %2863 = vmatprep.subr.mxu1 %v7104_v30  ;;  %9205 = vst [vmem:[#allocation67_spill] sm:$0xff] %v7124_v7  ;;  %v7127_v30 = vld [vmem:[#allocation9 + $0x30] sm:$0xff] }
 0x7e2   :  { %2864 = vmatpush1.msra.mxu1 %v7107_v3  ;;  %9206 = vst [vmem:[#allocation107_spill] sm:$0xff] %v7127_v30  ;;  %v7130_v3 = vld [vmem:[#allocation9 + $0x28] sm:$0xff] }
 0x7e3   :  { %2865 = vmatprep.subr.mxu1 %v7110_v19  ;;  %9207 = vst [vmem:[#allocation68_spill] sm:$0xff] %v7130_v3  ;;  %v7133_v19 = vld [vmem:[#allocation9 + $0x20] sm:$0xff] }
 0x7e4   :  { %2866 = vmatpush1.msra.mxu1 %v7113_v46  ;;  %9208 = vst [vmem:[#allocation29_spill] sm:$0xff] %v7133_v19  ;;  %v7136_v46 = vld [vmem:[#allocation9 + $0x18] sm:$0xff] }
 0x7e5   :  { %2867 = vmatprep.subr.mxu1 %v7116_v48  ;;  %9209 = vst [vmem:[#allocation70_spill] sm:$0xff] %v7136_v46  ;;  %v7198_v48 = vld [vmem:[#allocation9 + $0x170] sm:$0xff] }
 0x7e6   :  { %2868 = vmatpush1.msra.mxu1 %v7119_v62  ;;  %v7139_v62 = vld [vmem:[#allocation9 + $0x10] sm:$0xff]  ;;  %9230 = vst [vmem:[#allocation115_spill] sm:$0xff] %v7198_v48 }
 0x7e7   :  { %2869 = vmatprep.subr.mxu1 %v7124_v7  ;;  %9210 = vst [vmem:[#allocation109_spill] sm:$0xff] %v7139_v62  ;;  %v7142_v7 = vld [vmem:[#allocation9 + $0x8] sm:$0xff] }
 0x7e8   :  { %2870 = vmatpush1.msra.mxu1 %v7127_v30  ;;  %9211 = vst [vmem:[#allocation71_spill] sm:$0xff] %v7142_v7  ;;  %v7145_v30 = vld [vmem:[#allocation9] sm:$0xff] }
 0x7e9   :  { %2871 = vmatprep.subr.mxu1 %v7130_v3  ;;  %9212 = vst [vmem:[#allocation30_spill] sm:$0xff] %v7145_v30  ;;  %v7148_v3 = vld [vmem:[#allocation9 + $0x1f8] sm:$0xff] }
 0x7ea   :  { %2872 = vmatpush1.msra.mxu1 %v7133_v19  ;;  %9213 = vst [vmem:[#allocation72_spill] sm:$0xff] %v7148_v3  ;;  %v7151_v19 = vld [vmem:[#allocation9 + $0x1f0] sm:$0xff] }
 0x7eb   :  { %2873 = vmatprep.subr.mxu1 %v7136_v46  ;;  %9214 = vst [vmem:[#allocation110_spill] sm:$0xff] %v7151_v19  ;;  %v7154_v46 = vld [vmem:[#allocation9 + $0x1e8] sm:$0xff] }
 0x7ec   :  { %2874 = vmatpush1.msra.mxu1 %v7139_v62  ;;  %9215 = vst [vmem:[#allocation73_spill] sm:$0xff] %v7154_v46  ;;  %v7157_v62 = vld [vmem:[#allocation9 + $0x1e0] sm:$0xff] }
 0x7ed   :  { %2875 = vmatprep.subr.mxu1 %v7142_v7  ;;  %9216 = vst [vmem:[#allocation31_spill] sm:$0xff] %v7157_v62  ;;  %v7160_v7 = vld [vmem:[#allocation9 + $0x1d8] sm:$0xff] }
 0x7ee   :  { %2876 = vmatpush1.msra.mxu1 %v7145_v30  ;;  %9217 = vst [vmem:[#allocation74_spill] sm:$0xff] %v7160_v7  ;;  %v7163_v30 = vld [vmem:[#allocation9 + $0x1d0] sm:$0xff] }
 0x7ef   :  { %2877 = vmatprep.subr.mxu1 %v7148_v3  ;;  %9218 = vst [vmem:[#allocation112_spill] sm:$0xff] %v7163_v30  ;;  %v7166_v3 = vld [vmem:[#allocation9 + $0x1c8] sm:$0xff] }
 0x7f0   :  { %2878 = vmatpush2.msra.mxu1 %v7151_v19  ;;  %9219 = vst [vmem:[#allocation76_spill] sm:$0xff] %v7166_v3  ;;  %v7169_v19 = vld [vmem:[#allocation9 + $0x1c0] sm:$0xff] }
 0x7f1   :  { %2879 = vmatprep.subr.mxu1 %v7154_v46  ;;  %9220 = vst [vmem:[#allocation32_spill] sm:$0xff] %v7169_v19  ;;  %v7172_v46 = vld [vmem:[#allocation9 + $0x1b8] sm:$0xff] }
 0x7f2   :  { %2880 = vmatpush2.msra.mxu1 %v7157_v62  ;;  %9221 = vst [vmem:[#allocation77_spill] sm:$0xff] %v7172_v46  ;;  %v7175_v62 = vld [vmem:[#allocation9 + $0x1b0] sm:$0xff] }
 0x7f3   :  { %2881 = vmatprep.subr.mxu1 %v7160_v7  ;;  %9222 = vst [vmem:[#allocation113_spill] sm:$0xff] %v7175_v62  ;;  %v7178_v7 = vld [vmem:[#allocation9 + $0x1a8] sm:$0xff] }
 0x7f4   :  { %2882 = vmatpush2.msra.mxu1 %v7163_v30  ;;  %9223 = vst [vmem:[#allocation79_spill] sm:$0xff] %v7178_v7  ;;  %v7181_v30 = vld [vmem:[#allocation9 + $0x1a0] sm:$0xff] }
 0x7f5   :  { %2883 = vmatprep.subr.mxu1 %v7166_v3  ;;  %9224 = vst [vmem:[#allocation33_spill] sm:$0xff] %v7181_v30  ;;  %v7184_v3 = vld [vmem:[#allocation9 + $0x198] sm:$0xff] }
 0x7f6   :  { %2884 = vmatpush2.msra.mxu1 %v7169_v19  ;;  %9225 = vst [vmem:[#allocation80_spill] sm:$0xff] %v7184_v3  ;;  %v7187_v19 = vld [vmem:[#allocation9 + $0x190] sm:$0xff] }
 0x7f7   :  { %2885 = vmatprep.subr.mxu1 %v7172_v46  ;;  %9226 = vst [vmem:[#allocation114_spill] sm:$0xff] %v7187_v19  ;;  %v7190_v46 = vld [vmem:[#allocation9 + $0x188] sm:$0xff] }
 0x7f8   :  { %2886 = vmatpush2.msra.mxu1 %v7175_v62  ;;  %9227 = vst [vmem:[#allocation81_spill] sm:$0xff] %v7190_v46  ;;  %v7193_v62 = vld [vmem:[#allocation9 + $0x180] sm:$0xff] }
 0x7f9   :  { %2887 = vmatprep.subr.mxu1 %v7178_v7  ;;  %9228 = vst [vmem:[#allocation34_spill] sm:$0xff] %v7193_v62  ;;  %v7196_v7 = vld [vmem:[#allocation9 + $0x178] sm:$0xff] }
 0x7fa   :  { %2888 = vmatpush2.msra.mxu1 %v7181_v30  ;;  %9229 = vst [vmem:[#allocation83_spill] sm:$0xff] %v7196_v7  ;;  %v7200_v30 = vld [vmem:[#allocation9 + $0x168] sm:$0xff] }
 0x7fb   :  { %2889 = vmatprep.subr.mxu1 %v7184_v3  ;;  %9231 = vst [vmem:[#allocation84_spill] sm:$0xff] %v7200_v30  ;;  %v7203_v3 = vld [vmem:[#allocation9 + $0x160] sm:$0xff] }
 0x7fc   :  { %2890 = vmatpush2.msra.mxu1 %v7187_v19  ;;  %9232 = vst [vmem:[#allocation35_spill] sm:$0xff] %v7203_v3  ;;  %v7206_v19 = vld [vmem:[#allocation9 + $0x158] sm:$0xff] }
 0x7fd   :  { %2891 = vmatprep.subr.mxu1 %v7190_v46  ;;  %9233 = vst [vmem:[#allocation86_spill] sm:$0xff] %v7206_v19  ;;  %v7209_v46 = vld [vmem:[#allocation9 + $0x150] sm:$0xff] }
 0x7fe   :  { %2892 = vmatpush2.msra.mxu1 %v7193_v62  ;;  %9234 = vst [vmem:[#allocation116_spill] sm:$0xff] %v7209_v46  ;;  %v7212_v62 = vld [vmem:[#allocation9 + $0x148] sm:$0xff] }
 0x7ff   :  { %2893 = vmatprep.subr.mxu1 %v7196_v7  ;;  %9235 = vst [vmem:[#allocation87_spill] sm:$0xff] %v7212_v62  ;;  %v7218_v7 = vld [vmem:[#allocation9 + $0x138] sm:$0xff] }
 0x800   :  { %2894 = vmatpush2.msra.mxu1 %v7198_v48  ;;  %9237 = vst [vmem:[#allocation88_spill] sm:$0xff] %v7218_v7  ;;  %v7221_v48 = vld [vmem:[#allocation9 + $0x130] sm:$0xff] }
 0x801   :  { %2895 = vmatprep.subr.mxu1 %v7200_v30  ;;  %9238 = vst [vmem:[#allocation117_spill] sm:$0xff] %v7221_v48  ;;  %v7224_v30 = vld [vmem:[#allocation9 + $0x128] sm:$0xff] }
 0x802   :  { %2896 = vmatpush2.msra.mxu1 %v7203_v3  ;;  %9239 = vst [vmem:[#allocation90_spill] sm:$0xff] %v7224_v30  ;;  %v7227_v3 = vld [vmem:[#allocation9 + $0x120] sm:$0xff] }
 0x803   :  { %2897 = vmatprep.subr.mxu1 %v7206_v19  ;;  %9240 = vst [vmem:[#allocation37_spill] sm:$0xff] %v7227_v3  ;;  %v7230_v19 = vld [vmem:[#allocation9 + $0x118] sm:$0xff] }
 0x804   :  { %2898 = vmatpush2.msra.mxu1 %v7209_v46  ;;  %9241 = vst [vmem:[#allocation66_spill] sm:$0xff] %v7230_v19  ;;  %v7233_v46 = vld [vmem:[#allocation9 + $0x110] sm:$0xff] }
 0x805   :  { %2899 = vmatprep.subr.mxu1 %v7212_v62  ;;  %9242 = vst [vmem:[#allocation118_spill] sm:$0xff] %v7233_v46  ;;  %v7236_v62 = vld [vmem:[#allocation9 + $0x108] sm:$0xff] }
 0x806   :  { %2900 = vmatpush2.msra.mxu1 %v7215_v9  ;;  %9243 = vst [vmem:[#allocation69_spill] sm:$0xff] %v7236_v62  ;;  %v7239_v9 = vld [vmem:[#allocation9 + $0x100] sm:$0xff] }
 0x807   :  { %2901 = vmatprep.subr.mxu1 %v7218_v7  ;;  %9244 = vst [vmem:[#allocation38_spill] sm:$0xff] %v7239_v9  ;;  %v7268_v7 = vld [vmem:[#allocation7 + $0x168] sm:$0xff] }
 0x808   :  { %2902 = vmatpush2.msra.mxu1 %v7221_v48  ;;  %v7244_v48 = vld [vmem:[#allocation7 + $0x1e8] sm:$0xff]  ;;  %9251 = vst [vmem:[#allocation161_spill] sm:$0xff] %v7268_v7 }
 0x809   :  { %2903 = vmatprep.subr.mxu1 %v7224_v30  ;;  %v7247_v30 = vld [vmem:[#allocation7 + $0x1e0] sm:$0xff]  ;;  %3070 = vmatprep.subr.mxu0 %v7244_v48 }
 0x80a   :  { %2904 = vmatpush2.msra.mxu1 %v7227_v3  ;;  %v7250_v3 = vld [vmem:[#allocation7 + $0x1c8] sm:$0xff]  ;;  %3071 = vmatpush1.msra.mxu0 %v7247_v30 }
 0x80b   :  { %2905 = vmatprep.subr.mxu1 %v7230_v19  ;;  %9245 = vst [vmem:[#allocation138_spill] sm:$0xff] %v7250_v3  ;;  %v7253_v19 = vld [vmem:[#allocation7 + $0x1c0] sm:$0xff]  ;;  %3072 = vmatprep.subr.mxu0 %v7250_v3 }
 0x80c   :  { %2906 = vmatpush2.msra.mxu1 %v7233_v46  ;;  %9246 = vst [vmem:[#allocation119_spill] sm:$0xff] %v7253_v19  ;;  %v7256_v46 = vld [vmem:[#allocation7 + $0x1a8] sm:$0xff]  ;;  %3073 = vmatpush1.msra.mxu0 %v7253_v19 }
 0x80d   :  { %2907 = vmatprep.subr.mxu1 %v7236_v62  ;;  %9247 = vst [vmem:[#allocation139_spill] sm:$0xff] %v7256_v46  ;;  %3074 = vmatprep.subr.mxu0 %v7256_v46  ;;  %v7265_v62 = vld [vmem:[#allocation7 + $0x180] sm:$0xff] }
 0x80e   :  { %2908 = vmatpush2.msra.mxu1 %v7239_v9  ;;  %v7259_v9 = vld [vmem:[#allocation7 + $0x1a0] sm:$0xff]  ;;  %9250 = vst [vmem:[#allocation120_spill] sm:$0xff] %v7265_v62 }
 0x80f   :  { %3141 = vmatprep.subr.mxu1 %v6868_v59  ;;  %9248 = vst [vmem:[#allocation39_spill] sm:$0xff] %v7259_v9  ;;  %v7262_v59 = vld [vmem:[#allocation7 + $0x188] sm:$0xff]  ;;  %3075 = vmatpush1.msra.mxu0 %v7259_v9 }
 0x810   :  { %9249 = vst [vmem:[#allocation160_spill] sm:$0xff] %v7262_v59  ;;  %3076 = vmatprep.subr.mxu0 %v7262_v59  ;;  %v7283_v59 = vld [vmem:[#allocation7 + $0x120] sm:$0xff] }
 0x811   :  { %3077 = vmatpush1.msra.mxu0 %v7265_v62  ;;  %9256 = vst [vmem:[#allocation42_spill] sm:$0xff] %v7283_v59  ;;  %v7286_v62 = vld [vmem:[#allocation7 + $0x108] sm:$0xff] }
 0x812   :  { %3078 = vmatprep.subr.mxu0 %v7268_v7  ;;  %9257 = vst [vmem:[#allocation123_spill] sm:$0xff] %v7286_v62  ;;  %v7289_v7 = vld [vmem:[#allocation7 + $0x100] sm:$0xff] }
 0x813   :  { %3079 = vmatpush1.msra.mxu0 %v7271_v57  ;;  %9258 = vst [vmem:[#allocation43_spill] sm:$0xff] %v7289_v7  ;;  %v7292_v57 = vld [vmem:[#allocation7 + $0xe8] sm:$0xff] }
 0x814   :  { %3080 = vmatprep.subr.mxu0 %v7274_v18  ;;  %9259 = vst [vmem:[#allocation124_spill] sm:$0xff] %v7292_v57  ;;  %v7295_v18 = vld [vmem:[#allocation7 + $0xe0] sm:$0xff] }
 0x815   :  { %3081 = vmatpush1.msra.mxu0 %v7277_v29  ;;  %9260 = vst [vmem:[#allocation44_spill] sm:$0xff] %v7295_v18  ;;  %v7298_v29 = vld [vmem:[#allocation7 + $0xc8] sm:$0xff] }
 0x816   :  { %3082 = vmatprep.subr.mxu0 %v7280_v47  ;;  %9261 = vst [vmem:[#allocation125_spill] sm:$0xff] %v7298_v29  ;;  %v7301_v47 = vld [vmem:[#allocation7 + $0xc0] sm:$0xff] }
 0x817   :  { %3083 = vmatpush1.msra.mxu0 %v7283_v59  ;;  %9262 = vst [vmem:[#allocation45_spill] sm:$0xff] %v7301_v47  ;;  %v7304_v59 = vld [vmem:[#allocation7 + $0xa8] sm:$0xff] }
 0x818   :  { %3084 = vmatprep.subr.mxu0 %v7286_v62  ;;  %9263 = vst [vmem:[#allocation126_spill] sm:$0xff] %v7304_v59  ;;  %v7307_v62 = vld [vmem:[#allocation7 + $0xa0] sm:$0xff] }
 0x819   :  { %3085 = vmatpush1.msra.mxu0 %v7289_v7  ;;  %9264 = vst [vmem:[#allocation47_spill] sm:$0xff] %v7307_v62  ;;  %v7310_v7 = vld [vmem:[#allocation7 + $0x88] sm:$0xff] }
 0x81a   :  { %3086 = vmatprep.subr.mxu0 %v7292_v57  ;;  %9265 = vst [vmem:[#allocation127_spill] sm:$0xff] %v7310_v7  ;;  %v7313_v57 = vld [vmem:[#allocation7 + $0x80] sm:$0xff] }
 0x81b   :  { %3087 = vmatpush1.msra.mxu0 %v7295_v18  ;;  %9266 = vst [vmem:[#allocation48_spill] sm:$0xff] %v7313_v57  ;;  %v7316_v18 = vld [vmem:[#allocation7 + $0x68] sm:$0xff] }
 0x81c   :  { %3088 = vmatprep.subr.mxu0 %v7298_v29  ;;  %9267 = vst [vmem:[#allocation128_spill] sm:$0xff] %v7316_v18  ;;  %v7319_v29 = vld [vmem:[#allocation7 + $0x60] sm:$0xff] }
 0x81d   :  { %3089 = vmatpush1.msra.mxu0 %v7301_v47  ;;  %9268 = vst [vmem:[#allocation49_spill] sm:$0xff] %v7319_v29  ;;  %v7322_v47 = vld [vmem:[#allocation7 + $0x48] sm:$0xff] }
 0x81e   :  { %3090 = vmatprep.subr.mxu0 %v7304_v59  ;;  %9269 = vst [vmem:[#allocation129_spill] sm:$0xff] %v7322_v47  ;;  %v7325_v59 = vld [vmem:[#allocation7 + $0x40] sm:$0xff] }
 0x81f   :  { %3091 = vmatpush1.msra.mxu0 %v7307_v62  ;;  %9270 = vst [vmem:[#allocation50_spill] sm:$0xff] %v7325_v59  ;;  %v7328_v62 = vld [vmem:[#allocation7 + $0x28] sm:$0xff] }
 0x820   :  { %3092 = vmatprep.subr.mxu0 %v7310_v7  ;;  %9271 = vst [vmem:[#allocation130_spill] sm:$0xff] %v7328_v62  ;;  %v7331_v7 = vld [vmem:[#allocation7 + $0x20] sm:$0xff] }
 0x821   :  { %3093 = vmatpush1.msra.mxu0 %v7313_v57  ;;  %9272 = vst [vmem:[#allocation51_spill] sm:$0xff] %v7331_v7  ;;  %v7334_v57 = vld [vmem:[#allocation7 + $0x8] sm:$0xff] }
 0x822   :  { %3094 = vmatprep.subr.mxu0 %v7316_v18  ;;  %9273 = vst [vmem:[#allocation131_spill] sm:$0xff] %v7334_v57  ;;  %v7337_v18 = vld [vmem:[#allocation7] sm:$0xff] }
 0x823   :  { %3095 = vmatpush1.msra.mxu0 %v7319_v29  ;;  %9274 = vst [vmem:[#allocation52_spill] sm:$0xff] %v7337_v18  ;;  %v7340_v29 = vld [vmem:[#allocation7 + $0x3e8] sm:$0xff] }
 0x824   :  { %3096 = vmatprep.subr.mxu0 %v7322_v47  ;;  %9275 = vst [vmem:[#allocation132_spill] sm:$0xff] %v7340_v29  ;;  %v7343_v47 = vld [vmem:[#allocation7 + $0x3e0] sm:$0xff] }
 0x825   :  { %3097 = vmatpush1.msra.mxu0 %v7325_v59  ;;  %9276 = vst [vmem:[#allocation53_spill] sm:$0xff] %v7343_v47  ;;  %v7346_v59 = vld [vmem:[#allocation7 + $0x3c8] sm:$0xff] }
 0x826   :  { %3098 = vmatprep.subr.mxu0 %v7328_v62  ;;  %9277 = vst [vmem:[#allocation133_spill] sm:$0xff] %v7346_v59  ;;  %v7349_v62 = vld [vmem:[#allocation7 + $0x3c0] sm:$0xff] }
 0x827   :  { %3099 = vmatpush1.msra.mxu0 %v7331_v7  ;;  %9278 = vst [vmem:[#allocation16_spill] sm:$0xff] %v7349_v62  ;;  %v7352_v7 = vld [vmem:[#allocation7 + $0x3a8] sm:$0xff] }
 0x828   :  { %3100 = vmatprep.subr.mxu0 %v7334_v57  ;;  %9279 = vst [vmem:[#allocation17_spill] sm:$0xff] %v7352_v7  ;;  %v7355_v57 = vld [vmem:[#allocation7 + $0x3a0] sm:$0xff] }
 0x829   :  { %3101 = vmatpush1.msra.mxu0 %v7337_v18  ;;  %9280 = vst [vmem:[#allocation15_spill] sm:$0xff] %v7355_v57 }
 0x82a   :  { %3102 = vmatprep.subr.mxu0 %v7340_v29  ;;  %v9281_v29 = vld [vmem:[#allocation92_spill] sm:$0xff] }
 0x82b   :  { %3103 = vmatpush2.msra.mxu0 %v7343_v47  ;;  %v388_v18 = vadd.f32 %v9281_v29, %v9161_v43  ;;  %v9282_v47 = vld [vmem:[#allocation153_spill] sm:$0xff] }
 0x82c   :  { %3104 = vmatprep.subr.mxu0 %v7346_v59  ;;  %v390_v9 = vadd.f32 %v9282_v47, %v5686_v2  ;;  %v7524_v47 = vld [vmem:[#allocation7 + $0x208] sm:$0xff] }
 0x82d   :  { %3105 = vmatpush2.msra.mxu0 %v7349_v62 }
 0x82e   :  { %3106 = vmatprep.subr.mxu0 %v7352_v7 }
 0x82f   :  { %3107 = vmatpush2.msra.mxu0 %v7355_v57 }
 0x88f   :  { %v2746_v8 = vpop.f32.mrf.mxu0 }
 0x890   :  { %v2753_v22 = vadd.f32 %v2746_v8, %v388_v18  ;;  %v7522_v8 = vld [vmem:[#allocation7 + $0x230] sm:$0xff]  ;;  %v7526_v18 = vld [vmem:[#allocation7 + $0x218] sm:$0xff] }
 0x891   :  { %v2748_v46 = vpop.f32.mrf.mxu0  ;;  %9291 = vst [vmem:[#allocation46_spill] sm:$0xff] %v7522_v8  ;;  %9292 = vst [vmem:[#allocation136_spill] sm:$0xff] %v7526_v18 }
 0x892   :  { %v4527_v59 = vmul.f32 -1.442695, %v2753_v22  ;;  %v2754_v21 = vadd.f32 %v2748_v46, %v390_v9  ;;  %v7518_v22 = vld [vmem:[#allocation7 + $0x220] sm:$0xff]  ;;  %v2675_v46 = vpop.f32.mrf.mxu1 }
 0x894   :  { %v4528_v19 = vmul.f32 -1.442695, %v2754_v21  ;;  %4689 = vpow2.f32 %v4527_v59  ;;  %v7516_v21 = vld [vmem:[#allocation7 + $0x238] sm:$0xff]  ;;  %v2677_v59 = vpop.f32.mrf.mxu1 }
 0x896   :  { %4691 = vpow2.f32 %v4528_v19  ;;  %v9294_v19 = vld [vmem:[#allocation141_spill] sm:$0xff] }
 0x8a1   :  { %v4690_v62 = vpop.eup %4689 }
 0x8a2   :  { %v2769_v61 = vadd.f32 1.0, %v4690_v62  ;;  %v9295_v62 = vld [vmem:[#allocation89_spill] sm:$0xff] }
 0x8a3   :  { %v4692_v3 = vpop.eup %4691  ;;  %v2751_v9 = vadd.f32 %v2675_v46, %v9295_v62 }
 0x8a4   :  { %v2770_v7 = vadd.f32 1.0, %v4692_v3  ;;  %4693 = vrcp.f32 %v2769_v61  ;;  %v7514_v61 = vld [vmem:[#allocation7 + $0x228] sm:$0xff]  ;;  %v7534_v3 = vld [vmem:[#allocation7 + $0x210] sm:$0xff] }
 0x8a5   :  { %9293 = vst [vmem:[#allocation137_spill] sm:$0xff] %v7534_v3 }
 0x8a6   :  { %4695 = vrcp.f32 %v2770_v7  ;;  %v9283_v7 = vld [vmem:[#allocation19_spill] sm:$0xff] }
 0x8b1   :  { %v4694_v57 = vpop.eup %4693 }
 0x8b2   :  { %v2779_v43 = vmul.f32 %v4694_v57, %v7049_v54  ;;  %v7530_v57 = vld [vmem:[#allocation7 + $0x200] sm:$0xff] }
 0x8b3   :  { %v4696_v36 = vpop.eup %4695 }
 0x8b4   :  { %v2780_v29 = vmul.f32 %v4696_v36, %v7046_v39  ;;  %v7510_v36 = vld [vmem:[#allocation7 + $0x250] sm:$0xff] }
 0x8b6   :  { %2909 = vmatprep.mubr.f32.mxu1 %v2780_v29  ;;  %v9296_v29 = vld [vmem:[#allocation91_spill] sm:$0xff] }
 0x8b7   :  { %2910 = vmatmul.mubr.f32.vlgmr.msra.gmra.mxu1 %v2779_v43  ;;  %v9284_v43 = vld [vmem:[#allocation95_spill] sm:$0xff] }
 0x8b8   :  { %3142 = vmatpush1.msra.mxu1 %v6877_v56  ;;  %v9285_v56 = vld [vmem:[#allocation20_spill] sm:$0xff] }
 0x8b9   :  { %3143 = vmatprep.subr.mxu1 %v6879_v16  ;;  %v9286_v16 = vld [vmem:[#allocation96_spill] sm:$0xff] }
 0x8ba   :  { %3144 = vmatpush1.msra.mxu1 %v6881_v4  ;;  %v9287_v4 = vld [vmem:[#allocation21_spill] sm:$0xff] }
 0x8bb   :  { %3145 = vmatprep.subr.mxu1 %v6884_v23  ;;  %v9288_v23 = vld [vmem:[#allocation75_spill] sm:$0xff] }
 0x8bc   :  { %3146 = vmatpush1.msra.mxu1 %v6887_v51  ;;  %v9289_v51 = vld [vmem:[#allocation78_spill] sm:$0xff] }
 0x8bd   :  { %3147 = vmatprep.subr.mxu1 %v6890_v28  ;;  %v9290_v28 = vld [vmem:[#allocation140_spill] sm:$0xff] }
 0x8be   :  { %3148 = vmatpush1.msra.mxu1 %v6893_v31  ;;  %v7412_v31 = vld [vmem:[#allocation7 + $0x388] sm:$0xff] }
 0x8bf   :  { %3149 = vmatprep.subr.mxu1 %v6896_v33  ;;  %3108 = vmatprep.subr.mxu0 %v7412_v31  ;;  %v7415_v33 = vld [vmem:[#allocation7 + $0x380] sm:$0xff] }
 0x8c0   :  { %3150 = vmatpush1.msra.mxu1 %v6899_v35  ;;  %3109 = vmatpush2.msra.mxu0 %v7415_v33  ;;  %v7418_v35 = vld [vmem:[#allocation7 + $0x368] sm:$0xff] }
 0x8c1   :  { %3151 = vmatprep.subr.mxu1 %v6902_v37  ;;  %3110 = vmatprep.subr.mxu0 %v7418_v35  ;;  %v7421_v37 = vld [vmem:[#allocation7 + $0x360] sm:$0xff] }
 0x8c2   :  { %3152 = vmatpush1.msra.mxu1 %v6905_v40  ;;  %3111 = vmatpush2.msra.mxu0 %v7421_v37  ;;  %v7424_v40 = vld [vmem:[#allocation7 + $0x348] sm:$0xff] }
 0x8c3   :  { %3153 = vmatprep.subr.mxu1 %v6908_v42  ;;  %3112 = vmatprep.subr.mxu0 %v7424_v40  ;;  %v7427_v42 = vld [vmem:[#allocation7 + $0x340] sm:$0xff] }
 0x8c4   :  { %3154 = vmatpush1.msra.mxu1 %v6911_v44  ;;  %3113 = vmatpush2.msra.mxu0 %v7427_v42  ;;  %v7430_v44 = vld [vmem:[#allocation7 + $0x328] sm:$0xff] }
 0x8c5   :  { %3155 = vmatprep.subr.mxu1 %v6914_v49  ;;  %3114 = vmatprep.subr.mxu0 %v7430_v44  ;;  %v7433_v49 = vld [vmem:[#allocation7 + $0x320] sm:$0xff] }
 0x8c6   :  { %3156 = vmatpush1.msra.mxu1 %v6917_v53  ;;  %3115 = vmatpush2.msra.mxu0 %v7433_v49  ;;  %v7436_v53 = vld [vmem:[#allocation7 + $0x308] sm:$0xff] }
 0x8c7   :  { %3157 = vmatprep.subr.mxu1 %v6920_v58  ;;  %3116 = vmatprep.subr.mxu0 %v7436_v53  ;;  %v7439_v58 = vld [vmem:[#allocation7 + $0x300] sm:$0xff] }
 0x8c8   :  { %3158 = vmatpush1.msra.mxu1 %v6923_v5  ;;  %3117 = vmatpush2.msra.mxu0 %v7439_v58  ;;  %v7442_v5 = vld [vmem:[#allocation7 + $0x2e8] sm:$0xff] }
 0x8c9   :  { %3159 = vmatprep.subr.mxu1 %v6926_v15  ;;  %v7444_v15 = vld [vmem:[#allocation7 + $0x2f8] sm:$0xff]  ;;  %3118 = vmatprep.subr.mxu0 %v7442_v5 }
 0x8ca   :  { %3160 = vmatpush1.msra.mxu1 %v6929_v27  ;;  %v7448_v27 = vld [vmem:[#allocation7 + $0x2e0] sm:$0xff] }
 0x8cb   :  { %3161 = vmatprep.subr.mxu1 %v6932_v41  ;;  %v7450_v41 = vld [vmem:[#allocation7 + $0x2f0] sm:$0xff]  ;;  %3119 = vmatpush2.msra.mxu0 %v7448_v27 }
 0x8cc   :  { %3162 = vmatpush1.msra.mxu1 %v6935_v45  ;;  %v7454_v45 = vld [vmem:[#allocation7 + $0x2c8] sm:$0xff] }
 0x8cd   :  { %3163 = vmatprep.subr.mxu1 %v6938_v14  ;;  %v7456_v14 = vld [vmem:[#allocation7 + $0x2d8] sm:$0xff]  ;;  %3120 = vmatprep.subr.mxu0 %v7454_v45 }
 0x8ce   :  { %3164 = vmatpush1.msra.mxu1 %v6941_v50  ;;  %v7460_v50 = vld [vmem:[#allocation7 + $0x2c0] sm:$0xff] }
 0x8cf   :  { %3165 = vmatprep.subr.mxu1 %v6944_v20  ;;  %v7462_v20 = vld [vmem:[#allocation7 + $0x2d0] sm:$0xff]  ;;  %3121 = vmatpush2.msra.mxu0 %v7460_v50 }
 0x8d0   :  { %3166 = vmatpush1.msra.mxu1 %v6947_v13  ;;  %v7466_v13 = vld [vmem:[#allocation7 + $0x2a8] sm:$0xff] }
 0x8d1   :  { %3167 = vmatprep.subr.mxu1 %v6950_v60  ;;  %v7468_v60 = vld [vmem:[#allocation7 + $0x2b8] sm:$0xff]  ;;  %3122 = vmatprep.subr.mxu0 %v7466_v13 }
 0x8d2   :  { %3168 = vmatpush1.msra.mxu1 %v6953_v17  ;;  %v7472_v17 = vld [vmem:[#allocation7 + $0x2a0] sm:$0xff] }
 0x8d3   :  { %3169 = vmatprep.subr.mxu1 %v6956_v11  ;;  %v7474_v11 = vld [vmem:[#allocation7 + $0x2b0] sm:$0xff]  ;;  %3123 = vmatpush2.msra.mxu0 %v7472_v17 }
 0x8d4   :  { %3170 = vmatpush1.msra.mxu1 %v6959_v24  ;;  %v7478_v24 = vld [vmem:[#allocation7 + $0x288] sm:$0xff] }
 0x8d5   :  { %3171 = vmatprep.subr.mxu1 %v6962_v26  ;;  %v7480_v26 = vld [vmem:[#allocation7 + $0x298] sm:$0xff]  ;;  %3124 = vmatprep.subr.mxu0 %v7478_v24 }
 0x8d6   :  { %3172 = vmatpush1.msra.mxu1 %v6965_v55  ;;  %v7484_v55 = vld [vmem:[#allocation7 + $0x280] sm:$0xff] }
 0x8d7   :  { %3173 = vmatprep.subr.mxu1 %v6968_v25  ;;  %v7486_v25 = vld [vmem:[#allocation7 + $0x290] sm:$0xff]  ;;  %3125 = vmatpush2.msra.mxu0 %v7484_v55 }
 0x8d8   :  { %3174 = vmatpush2.msra.mxu1 %v6971_v34  ;;  %v7490_v34 = vld [vmem:[#allocation7 + $0x268] sm:$0xff] }
 0x8d9   :  { %3175 = vmatprep.subr.mxu1 %v6974_v32  ;;  %v7492_v32 = vld [vmem:[#allocation7 + $0x278] sm:$0xff]  ;;  %3126 = vmatprep.subr.mxu0 %v7490_v34 }
 0x8da   :  { %3176 = vmatpush2.msra.mxu1 %v6977_v1  ;;  %v7496_v1 = vld [vmem:[#allocation7 + $0x260] sm:$0xff] }
 0x8db   :  { %3177 = vmatprep.subr.mxu1 %v6980_v52  ;;  %v7498_v52 = vld [vmem:[#allocation7 + $0x270] sm:$0xff]  ;;  %3127 = vmatpush2.msra.mxu0 %v7496_v1 }
 0x8dc   :  { %3178 = vmatpush2.msra.mxu1 %v6983_v12  ;;  %v7502_v12 = vld [vmem:[#allocation7 + $0x248] sm:$0xff] }
 0x8dd   :  { %3179 = vmatprep.subr.mxu1 %v6988_v6  ;;  %v7504_v6 = vld [vmem:[#allocation7 + $0x258] sm:$0xff]  ;;  %3128 = vmatprep.subr.mxu0 %v7502_v12 }
 0x8de   :  { %3180 = vmatpush2.msra.mxu1 %v6991_v38  ;;  %v7508_v38 = vld [vmem:[#allocation7 + $0x240] sm:$0xff] }
 0x8df   :  { %3181 = vmatprep.subr.mxu1 %v9283_v7  ;;  %3129 = vmatpush2.msra.mxu0 %v7508_v38  ;;  %v2752_v7 = vadd.f32 %v2677_v59, %v9296_v29 }
 0x8e0   :  { %3182 = vmatpush2.msra.mxu1 %v9284_v43  ;;  %3130 = vmatprep.subr.mxu0 %v7514_v61  ;;  %v4525_v43 = vmul.f32 -1.442695, %v2751_v9 }
 0x8e1   :  { %3183 = vmatprep.subr.mxu1 %v9285_v56  ;;  %3131 = vmatpush2.msra.mxu0 %v7518_v22  ;;  %v4526_v56 = vmul.f32 -1.442695, %v2752_v7 }
 0x8e2   :  { %3184 = vmatpush2.msra.mxu1 %v9286_v16  ;;  %3132 = vmatprep.subr.mxu0 %v7524_v47  ;;  %4697 = vpow2.f32 %v4525_v43 }
 0x8e3   :  { %3185 = vmatprep.subr.mxu1 %v9287_v4  ;;  %3133 = vmatpush2.msra.mxu0 %v7530_v57  ;;  %4699 = vpow2.f32 %v4526_v56  ;;  %v9297_v4 = vld [vmem:[#allocation144_spill] sm:$0xff] }
 0x8e4   :  { %3186 = vmatpush2.msra.mxu1 %v9288_v23  ;;  %3306 = vmatprep.subr.mxu0 %v9294_v19  ;;  %v585_v23 = vadd.f32 %v9297_v4, %v5902_v10  ;;  %v9298_v19 = vld [vmem:[#allocation145_spill] sm:$0xff] }
 0x8e5   :  { %3187 = vmatprep.subr.mxu1 %v9289_v51 }
 0x8e6   :  { %3188 = vmatpush2.msra.mxu1 %v9290_v28 }
 0x8e7   :  { %3189 = vmatprep.subr.mxu1 %v7444_v15 }
 0x8e8   :  { %3190 = vmatpush2.msra.mxu1 %v7450_v41 }
 0x8e9   :  { %3191 = vmatprep.subr.mxu1 %v7456_v14 }
 0x8ea   :  { %3192 = vmatpush2.msra.mxu1 %v7462_v20 }
 0x8eb   :  { %3193 = vmatprep.subr.mxu1 %v7468_v60 }
 0x8ec   :  { %3194 = vmatpush2.msra.mxu1 %v7474_v11 }
 0x8ed   :  { %3195 = vmatprep.subr.mxu1 %v7480_v26 }
 0x8ee   :  { %3196 = vmatpush2.msra.mxu1 %v7486_v25 }
 0x8ef   :  { %3197 = vmatprep.subr.mxu1 %v7492_v32  ;;  %v4698_v16 = vpop.eup %4697 }
 0x8f0   :  { %3198 = vmatpush2.msra.mxu1 %v7498_v52  ;;  %v4700_v51 = vpop.eup %4699  ;;  %v2767_v28 = vadd.f32 1.0, %v4698_v16 }
 0x8f1   :  { %3199 = vmatprep.subr.mxu1 %v7504_v6  ;;  %v2768_v46 = vadd.f32 1.0, %v4700_v51  ;;  %v9304_v51 = vld [vmem:[#allocation119_spill] sm:$0xff] }
 0x8f2   :  { %3200 = vmatpush2.msra.mxu1 %v7510_v36 }
 0x8f3   :  { %3201 = vmatprep.subr.mxu1 %v7516_v21 }
 0x8f4   :  { %3202 = vmatpush2.msra.mxu1 %v7522_v8 }
 0x8f5   :  { %3203 = vmatprep.subr.mxu1 %v7526_v18 }
 0x8f6   :  { %3204 = vmatpush2.msra.mxu1 %v7534_v3 }
 0x8f7   :  { %3531 = vmatprep.subr.mxu1 %v7244_v48  ;;  %v587_v48 = vadd.f32 %v9298_v19, %v5906_v63 }
 0x977   :  { %v2911_v3 = vpop.f32.mrf.mxu1 }
 0x978   :  { %v2916_v18 = vadd.f32 %v2911_v3, %v585_v23  ;;  %v9303_v23 = vld [vmem:[#allocation23_spill] sm:$0xff] }
 0x979   :  { %v2913_v8 = vpop.f32.mrf.mxu1 }
 0x97a   :  { %4701 = vtanh.f32 %v2916_v18  ;;  %v2917_v62 = vadd.f32 %v2913_v8, %v587_v48  ;;  %v9301_v8 = vld [vmem:[#allocation134_spill] sm:$0xff]  ;;  %v9306_v48 = vld [vmem:[#allocation139_spill] sm:$0xff] }
 0x97b   :  { %4703 = vrcp.f32 %v2767_v28  ;;  %v9302_v18 = vld [vmem:[#allocation138_spill] sm:$0xff]  ;;  %v9305_v28 = vld [vmem:[#allocation55_spill] sm:$0xff] }
 0x97c   :  { %4705 = vtanh.f32 %v2917_v62  ;;  %v9308_v62 = vld [vmem:[#allocation39_spill] sm:$0xff] }
 0x97d   :  { %4707 = vrcp.f32 %v2768_v46  ;;  %v9307_v46 = vld [vmem:[#allocation100_spill] sm:$0xff] }
 0x987   :  { %v4702_v9 = vpop.eup %4701 }
 0x988   :  { %v4704_v59 = vpop.eup %4703  ;;  %v2920_v29 = vsub.f32 %v4702_v9, %v7049_v54  ;;  %v9309_v9 = vld [vmem:[#allocation135_spill] sm:$0xff] }
 0x989   :  { %v4706_v7 = vpop.eup %4705 }
 0x98a   :  { %v2922_v43 = vmul.f32 %v4704_v59, %v2920_v29  ;;  %v2921_v56 = vsub.f32 %v4706_v7, %v7046_v39  ;;  %v4708_v16 = vpop.eup %4707  ;;  %v9312_v59 = vld [vmem:[#allocation120_spill] sm:$0xff]  ;;  %v9314_v7 = vld [vmem:[#allocation161_spill] sm:$0xff] }
 0x98b   :  { %v9313_v29 = vld [vmem:[#allocation56_spill] sm:$0xff] }
 0x98c   :  { %v2923_v4 = vmul.f32 %v4708_v16, %v2921_v56  ;;  %v7552_v3 = vadd.f32 %v2922_v43, %v7049_v54  ;;  %v9315_v43 = vld [vmem:[#allocation102_spill] sm:$0xff]  ;;  %v9316_v56 = vld [vmem:[#allocation40_spill] sm:$0xff]  ;;  %v9317_v16 = vld [vmem:[#allocation57_spill] sm:$0xff] }
 0x98d   :  { %v7819_v54 = vld [vmem:[#allocation7 + $0x350] sm:$0xff] }
 0x98e   :  { %v7549_v19 = vadd.f32 %v2923_v4, %v7046_v39  ;;  %9300 = vst [vmem:[#allocation85_spill] sm:$0xff] %v7552_v3  ;;  %v9318_v4 = vld [vmem:[#allocation121_spill] sm:$0xff]  ;;  %9405 = vst [vmem:[#allocation153_spill] sm:$0xff] %v7819_v54  ;;  %v7822_v39 = vld [vmem:[#allocation7 + $0x338] sm:$0xff] }
 0x98f   :  { %9406 = vst [vmem:[#allocation19_spill] sm:$0xff] %v7822_v39 }
 0x990   :  { %9299 = vst [vmem:[#allocation82_spill] sm:$0xff] %v7549_v19  ;;  %3134 = vmatprep.mubr.f32.mxu0 %v7549_v19  ;;  %3205 = vmatprep.mubr.f32.mxu1 %v7549_v19 }
 0x991   :  { %3135 = vmatmul.mubr.f32.vlgmr.msra.gmra.mxu0 %v7552_v3  ;;  %3206 = vmatmul.mubr.f32.vlgmr.msra.gmra.mxu1 %v7552_v3 }
 0x992   :  { %3307 = vmatpush1.msra.mxu0 %v7051_v0  ;;  %3532 = vmatpush1.msra.mxu1 %v7247_v30  ;;  %v9310_v0 = vld [vmem:[#allocation160_spill] sm:$0xff] }
 0x993   :  { %3308 = vmatprep.subr.mxu0 %v9301_v8  ;;  %3533 = vmatprep.subr.mxu1 %v9302_v18  ;;  %v9311_v30 = vld [vmem:[#allocation24_spill] sm:$0xff]  ;;  %v9319_v8 = vld [vmem:[#allocation25_spill] sm:$0xff] }
 0x994   :  { %3309 = vmatpush1.msra.mxu0 %v9303_v23  ;;  %3534 = vmatpush1.msra.mxu1 %v9304_v51  ;;  %v9320_v18 = vld [vmem:[#allocation41_spill] sm:$0xff]  ;;  %v9321_v23 = vld [vmem:[#allocation58_spill] sm:$0xff] }
 0x995   :  { %3310 = vmatprep.subr.mxu0 %v9305_v28  ;;  %3535 = vmatprep.subr.mxu1 %v9306_v48  ;;  %v9322_v51 = vld [vmem:[#allocation122_spill] sm:$0xff]  ;;  %v9323_v28 = vld [vmem:[#allocation103_spill] sm:$0xff] }
 0x996   :  { %3311 = vmatpush1.msra.mxu0 %v9307_v46  ;;  %3536 = vmatpush1.msra.mxu1 %v9308_v62  ;;  %v9324_v48 = vld [vmem:[#allocation42_spill] sm:$0xff]  ;;  %v9325_v46 = vld [vmem:[#allocation60_spill] sm:$0xff]  ;;  %v9326_v62 = vld [vmem:[#allocation123_spill] sm:$0xff] }
 0x997   :  { %3312 = vmatprep.subr.mxu0 %v9309_v9  ;;  %3537 = vmatprep.subr.mxu1 %v9310_v0  ;;  %v9327_v9 = vld [vmem:[#allocation26_spill] sm:$0xff]  ;;  %v9328_v0 = vld [vmem:[#allocation43_spill] sm:$0xff] }
 0x998   :  { %3313 = vmatpush1.msra.mxu0 %v9311_v30  ;;  %3538 = vmatpush1.msra.mxu1 %v9312_v59  ;;  %v9329_v30 = vld [vmem:[#allocation61_spill] sm:$0xff]  ;;  %v9330_v59 = vld [vmem:[#allocation124_spill] sm:$0xff] }
 0x999   :  { %3314 = vmatprep.subr.mxu0 %v9313_v29  ;;  %3539 = vmatprep.subr.mxu1 %v9314_v7  ;;  %v9331_v29 = vld [vmem:[#allocation105_spill] sm:$0xff]  ;;  %v9332_v7 = vld [vmem:[#allocation44_spill] sm:$0xff] }
 0x99a   :  { %3315 = vmatpush1.msra.mxu0 %v9315_v43  ;;  %3540 = vmatpush1.msra.mxu1 %v9316_v56  ;;  %v9333_v43 = vld [vmem:[#allocation63_spill] sm:$0xff]  ;;  %v9334_v56 = vld [vmem:[#allocation125_spill] sm:$0xff] }
 0x99b   :  { %3316 = vmatprep.subr.mxu0 %v9317_v16  ;;  %3541 = vmatprep.subr.mxu1 %v9318_v4  ;;  %v9335_v16 = vld [vmem:[#allocation27_spill] sm:$0xff]  ;;  %v9336_v4 = vld [vmem:[#allocation45_spill] sm:$0xff] }
 0x99c   :  { %3317 = vmatpush1.msra.mxu0 %v9319_v8  ;;  %3542 = vmatpush1.msra.mxu1 %v9320_v18  ;;  %v9337_v8 = vld [vmem:[#allocation64_spill] sm:$0xff]  ;;  %v9338_v18 = vld [vmem:[#allocation126_spill] sm:$0xff] }
 0x99d   :  { %3318 = vmatprep.subr.mxu0 %v9321_v23  ;;  %3543 = vmatprep.subr.mxu1 %v9322_v51  ;;  %v9339_v23 = vld [vmem:[#allocation106_spill] sm:$0xff]  ;;  %v9340_v51 = vld [vmem:[#allocation47_spill] sm:$0xff] }
 0x99e   :  { %3319 = vmatpush1.msra.mxu0 %v9323_v28  ;;  %3544 = vmatpush1.msra.mxu1 %v9324_v48  ;;  %v9341_v28 = vld [vmem:[#allocation65_spill] sm:$0xff]  ;;  %v9342_v48 = vld [vmem:[#allocation127_spill] sm:$0xff] }
 0x99f   :  { %3320 = vmatprep.subr.mxu0 %v9325_v46  ;;  %3545 = vmatprep.subr.mxu1 %v9326_v62  ;;  %v9343_v46 = vld [vmem:[#allocation28_spill] sm:$0xff] }
 0x9a0   :  { %3321 = vmatpush1.msra.mxu0 %v9327_v9  ;;  %3546 = vmatpush1.msra.mxu1 %v9328_v0  ;;  %v9344_v62 = vld [vmem:[#allocation48_spill] sm:$0xff]  ;;  %v9345_v9 = vld [vmem:[#allocation67_spill] sm:$0xff] }
 0x9a1   :  { %3322 = vmatprep.subr.mxu0 %v9329_v30  ;;  %3547 = vmatprep.subr.mxu1 %v9330_v59  ;;  %v9346_v0 = vld [vmem:[#allocation128_spill] sm:$0xff]  ;;  %v9347_v30 = vld [vmem:[#allocation107_spill] sm:$0xff]  ;;  %v9348_v59 = vld [vmem:[#allocation49_spill] sm:$0xff] }
 0x9a2   :  { %3323 = vmatpush1.msra.mxu0 %v9331_v29  ;;  %3548 = vmatpush1.msra.mxu1 %v9332_v7  ;;  %v9349_v29 = vld [vmem:[#allocation68_spill] sm:$0xff]  ;;  %v9350_v7 = vld [vmem:[#allocation129_spill] sm:$0xff] }
 0x9a3   :  { %3324 = vmatprep.subr.mxu0 %v9333_v43  ;;  %3549 = vmatprep.subr.mxu1 %v9334_v56  ;;  %v9351_v43 = vld [vmem:[#allocation29_spill] sm:$0xff]  ;;  %v9352_v56 = vld [vmem:[#allocation50_spill] sm:$0xff] }
 0x9a4   :  { %3325 = vmatpush1.msra.mxu0 %v9335_v16  ;;  %3550 = vmatpush1.msra.mxu1 %v9336_v4  ;;  %v9353_v16 = vld [vmem:[#allocation70_spill] sm:$0xff] }
 0x9a5   :  { %3326 = vmatprep.subr.mxu0 %v9337_v8  ;;  %3551 = vmatprep.subr.mxu1 %v9338_v18  ;;  %v9354_v4 = vld [vmem:[#allocation130_spill] sm:$0xff]  ;;  %v9355_v8 = vld [vmem:[#allocation109_spill] sm:$0xff]  ;;  %v9356_v18 = vld [vmem:[#allocation51_spill] sm:$0xff] }
 0x9a6   :  { %3327 = vmatpush1.msra.mxu0 %v9339_v23  ;;  %3552 = vmatpush1.msra.mxu1 %v9340_v51  ;;  %v9357_v23 = vld [vmem:[#allocation71_spill] sm:$0xff] }
 0x9a7   :  { %3328 = vmatprep.subr.mxu0 %v9341_v28  ;;  %3553 = vmatprep.subr.mxu1 %v9342_v48  ;;  %v9358_v51 = vld [vmem:[#allocation131_spill] sm:$0xff]  ;;  %v9359_v28 = vld [vmem:[#allocation30_spill] sm:$0xff]  ;;  %v9360_v48 = vld [vmem:[#allocation52_spill] sm:$0xff] }
 0x9a8   :  { %3329 = vmatpush1.msra.mxu0 %v9343_v46  ;;  %3554 = vmatpush1.msra.mxu1 %v9344_v62  ;;  %v9361_v46 = vld [vmem:[#allocation72_spill] sm:$0xff] }
 0x9a9   :  { %3330 = vmatprep.subr.mxu0 %v9345_v9  ;;  %3555 = vmatprep.subr.mxu1 %v9346_v0  ;;  %v9362_v62 = vld [vmem:[#allocation132_spill] sm:$0xff]  ;;  %v9363_v9 = vld [vmem:[#allocation110_spill] sm:$0xff]  ;;  %v9364_v0 = vld [vmem:[#allocation53_spill] sm:$0xff] }
 0x9aa   :  { %3331 = vmatpush1.msra.mxu0 %v9347_v30  ;;  %3556 = vmatpush1.msra.mxu1 %v9348_v59  ;;  %v9365_v30 = vld [vmem:[#allocation73_spill] sm:$0xff] }
 0x9ab   :  { %3332 = vmatprep.subr.mxu0 %v9349_v29  ;;  %3557 = vmatprep.subr.mxu1 %v9350_v7  ;;  %v9366_v59 = vld [vmem:[#allocation133_spill] sm:$0xff]  ;;  %v9367_v29 = vld [vmem:[#allocation31_spill] sm:$0xff]  ;;  %v9368_v7 = vld [vmem:[#allocation16_spill] sm:$0xff] }
 0x9ac   :  { %3333 = vmatpush1.msra.mxu0 %v9351_v43  ;;  %3558 = vmatpush1.msra.mxu1 %v9352_v56  ;;  %v9369_v43 = vld [vmem:[#allocation74_spill] sm:$0xff]  ;;  %v9370_v56 = vld [vmem:[#allocation17_spill] sm:$0xff] }
 0x9ad   :  { %3334 = vmatprep.subr.mxu0 %v9353_v16  ;;  %3559 = vmatprep.subr.mxu1 %v9354_v4  ;;  %v9371_v16 = vld [vmem:[#allocation112_spill] sm:$0xff]  ;;  %v9372_v4 = vld [vmem:[#allocation15_spill] sm:$0xff] }
 0x9ae   :  { %3335 = vmatpush1.msra.mxu0 %v9355_v8  ;;  %3560 = vmatpush1.msra.mxu1 %v9356_v18  ;;  %v9373_v8 = vld [vmem:[#allocation76_spill] sm:$0xff] }
 0x9af   :  { %3336 = vmatprep.subr.mxu0 %v9357_v23  ;;  %3561 = vmatprep.subr.mxu1 %v9358_v51  ;;  %v9374_v18 = vld [vmem:[#allocation32_spill] sm:$0xff]  ;;  %v9375_v23 = vld [vmem:[#allocation77_spill] sm:$0xff] }
 0x9b0   :  { %3337 = vmatpush1.msra.mxu0 %v9359_v28  ;;  %3562 = vmatpush1.msra.mxu1 %v9360_v48  ;;  %v9376_v51 = vld [vmem:[#allocation113_spill] sm:$0xff]  ;;  %v9377_v28 = vld [vmem:[#allocation79_spill] sm:$0xff] }
 0x9b1   :  { %3338 = vmatprep.subr.mxu0 %v9361_v46  ;;  %3563 = vmatprep.subr.mxu1 %v9362_v62  ;;  %v9378_v48 = vld [vmem:[#allocation33_spill] sm:$0xff]  ;;  %v9400_v46 = vld [vmem:[#allocation154_spill] sm:$0xff] }
 0x9b2   :  { %3339 = vmatpush2.msra.mxu0 %v9363_v9  ;;  %3564 = vmatpush2.msra.mxu1 %v9364_v0  ;;  %v9401_v9 = vld [vmem:[#allocation155_spill] sm:$0xff] }
 0x9b3   :  { %3340 = vmatprep.subr.mxu0 %v9365_v30  ;;  %3565 = vmatprep.subr.mxu1 %v9366_v59  ;;  %v396_v0 = vadd.f32 %v9401_v9, %v5686_v2  ;;  %v7772_v9 = vld [vmem:[#allocation7 + $0x38] sm:$0xff] }
 0x9b4   :  { %3341 = vmatpush2.msra.mxu0 %v9367_v29  ;;  %3566 = vmatpush2.msra.mxu1 %v9368_v7 }
 0x9b5   :  { %3342 = vmatprep.subr.mxu0 %v9369_v43  ;;  %3567 = vmatprep.subr.mxu1 %v9370_v56 }
 0x9b6   :  { %3343 = vmatpush2.msra.mxu0 %v9371_v16  ;;  %3568 = vmatpush2.msra.mxu1 %v9372_v4 }
 0x9b7   :  { %3344 = vmatprep.subr.mxu0 %v9373_v8  ;;  %3569 = vmatprep.subr.mxu1 %v7412_v31  ;;  %v9379_v31 = vld [vmem:[#allocation80_spill] sm:$0xff] }
 0x9b8   :  { %3345 = vmatpush2.msra.mxu0 %v9374_v18  ;;  %3570 = vmatpush2.msra.mxu1 %v7415_v33  ;;  %v9380_v33 = vld [vmem:[#allocation114_spill] sm:$0xff] }
 0x9b9   :  { %3346 = vmatprep.subr.mxu0 %v9375_v23  ;;  %3571 = vmatprep.subr.mxu1 %v7418_v35  ;;  %v9381_v35 = vld [vmem:[#allocation81_spill] sm:$0xff] }
 0x9ba   :  { %3347 = vmatpush2.msra.mxu0 %v9376_v51  ;;  %3572 = vmatpush2.msra.mxu1 %v7421_v37  ;;  %v9382_v37 = vld [vmem:[#allocation34_spill] sm:$0xff]  ;;  %v7693_v23 = vld [vmem:[#allocation7 + $0x1f0] sm:$0xff] }
 0x9bb   :  { %3348 = vmatprep.subr.mxu0 %v9377_v28  ;;  %3573 = vmatprep.subr.mxu1 %v7424_v40  ;;  %v9383_v40 = vld [vmem:[#allocation83_spill] sm:$0xff]  ;;  %v7695_v51 = vld [vmem:[#allocation7 + $0x1d8] sm:$0xff]  ;;  %v7697_v28 = vld [vmem:[#allocation7 + $0x1d0] sm:$0xff] }
 0x9bc   :  { %3349 = vmatpush2.msra.mxu0 %v9378_v48  ;;  %3574 = vmatpush2.msra.mxu1 %v7427_v42  ;;  %v9384_v42 = vld [vmem:[#allocation115_spill] sm:$0xff]  ;;  %v7700_v48 = vld [vmem:[#allocation7 + $0x1b8] sm:$0xff] }
 0x9bd   :  { %3350 = vmatprep.subr.mxu0 %v9379_v31  ;;  %3575 = vmatprep.subr.mxu1 %v7430_v44  ;;  %v9385_v44 = vld [vmem:[#allocation84_spill] sm:$0xff]  ;;  %v7703_v31 = vld [vmem:[#allocation7 + $0x1b0] sm:$0xff] }
 0x9be   :  { %3351 = vmatpush2.msra.mxu0 %v9380_v33  ;;  %3576 = vmatpush2.msra.mxu1 %v7433_v49  ;;  %v9386_v49 = vld [vmem:[#allocation35_spill] sm:$0xff]  ;;  %v7706_v33 = vld [vmem:[#allocation7 + $0x198] sm:$0xff] }
 0x9bf   :  { %3352 = vmatprep.subr.mxu0 %v9381_v35  ;;  %3577 = vmatprep.subr.mxu1 %v7436_v53  ;;  %v9387_v53 = vld [vmem:[#allocation86_spill] sm:$0xff]  ;;  %v7709_v35 = vld [vmem:[#allocation7 + $0x190] sm:$0xff] }
 0x9c0   :  { %3353 = vmatpush2.msra.mxu0 %v9382_v37  ;;  %3578 = vmatpush2.msra.mxu1 %v7439_v58  ;;  %v9388_v58 = vld [vmem:[#allocation116_spill] sm:$0xff]  ;;  %v7712_v37 = vld [vmem:[#allocation7 + $0x178] sm:$0xff] }
 0x9c1   :  { %3354 = vmatprep.subr.mxu0 %v9383_v40  ;;  %3579 = vmatprep.subr.mxu1 %v7442_v5  ;;  %v9389_v5 = vld [vmem:[#allocation87_spill] sm:$0xff]  ;;  %v7715_v40 = vld [vmem:[#allocation7 + $0x170] sm:$0xff] }
 0x9c2   :  { %3355 = vmatpush2.msra.mxu0 %v9384_v42  ;;  %3580 = vmatpush2.msra.mxu1 %v7448_v27  ;;  %v9390_v27 = vld [vmem:[#allocation36_spill] sm:$0xff]  ;;  %v7718_v42 = vld [vmem:[#allocation7 + $0x158] sm:$0xff] }
 0x9c3   :  { %3356 = vmatprep.subr.mxu0 %v9385_v44  ;;  %3581 = vmatprep.subr.mxu1 %v7454_v45  ;;  %v9391_v45 = vld [vmem:[#allocation88_spill] sm:$0xff]  ;;  %v7721_v44 = vld [vmem:[#allocation7 + $0x150] sm:$0xff] }
 0x9c4   :  { %3357 = vmatpush2.msra.mxu0 %v9386_v49  ;;  %3582 = vmatpush2.msra.mxu1 %v7460_v50  ;;  %v9392_v50 = vld [vmem:[#allocation117_spill] sm:$0xff]  ;;  %v7724_v49 = vld [vmem:[#allocation7 + $0x138] sm:$0xff] }
 0x9c5   :  { %3358 = vmatprep.subr.mxu0 %v9387_v53  ;;  %3583 = vmatprep.subr.mxu1 %v7466_v13  ;;  %v9393_v13 = vld [vmem:[#allocation90_spill] sm:$0xff]  ;;  %v7727_v53 = vld [vmem:[#allocation7 + $0x130] sm:$0xff] }
 0x9c6   :  { %3359 = vmatpush2.msra.mxu0 %v9388_v58  ;;  %3584 = vmatpush2.msra.mxu1 %v7472_v17  ;;  %v9394_v17 = vld [vmem:[#allocation37_spill] sm:$0xff]  ;;  %v7730_v58 = vld [vmem:[#allocation7 + $0x118] sm:$0xff] }
 0x9c7   :  { %3360 = vmatprep.subr.mxu0 %v9389_v5  ;;  %3585 = vmatprep.subr.mxu1 %v7478_v24  ;;  %v9395_v24 = vld [vmem:[#allocation66_spill] sm:$0xff]  ;;  %v7733_v5 = vld [vmem:[#allocation7 + $0x110] sm:$0xff] }
 0x9c8   :  { %3361 = vmatpush2.msra.mxu0 %v9390_v27  ;;  %3586 = vmatpush2.msra.mxu1 %v7484_v55  ;;  %v9396_v55 = vld [vmem:[#allocation118_spill] sm:$0xff] }
 0x9c9   :  { %3362 = vmatprep.subr.mxu0 %v9391_v45  ;;  %3587 = vmatprep.subr.mxu1 %v7490_v34  ;;  %v9397_v34 = vld [vmem:[#allocation69_spill] sm:$0xff]  ;;  %v7736_v27 = vld [vmem:[#allocation7 + $0xf8] sm:$0xff] }
 0x9ca   :  { %3363 = vmatpush2.msra.mxu0 %v9392_v50  ;;  %3588 = vmatpush2.msra.mxu1 %v7496_v1  ;;  %v9398_v1 = vld [vmem:[#allocation38_spill] sm:$0xff]  ;;  %v7739_v45 = vld [vmem:[#allocation7 + $0xf0] sm:$0xff] }
 0x9cb   :  { %3364 = vmatprep.subr.mxu0 %v9393_v13  ;;  %3589 = vmatprep.subr.mxu1 %v7502_v12  ;;  %v7684_v12 = vld [vmem:[#allocation7 + $0x1f8] sm:$0xff]  ;;  %v7745_v13 = vld [vmem:[#allocation7 + $0xd0] sm:$0xff] }
 0x9cc   :  { %3365 = vmatpush2.msra.mxu0 %v9394_v17  ;;  %3590 = vmatpush2.msra.mxu1 %v7508_v38  ;;  %v9399_v38 = vld [vmem:[#allocation150_spill] sm:$0xff] }
 0x9cd   :  { %3366 = vmatprep.subr.mxu0 %v9395_v24  ;;  %3591 = vmatprep.subr.mxu1 %v7514_v61  ;;  %v394_v62 = vadd.f32 %v9400_v46, %v9399_v38  ;;  %v7742_v50 = vld [vmem:[#allocation7 + $0xd8] sm:$0xff]  ;;  %v7751_v24 = vld [vmem:[#allocation7 + $0xb0] sm:$0xff] }
 0x9ce   :  { %3367 = vmatpush2.msra.mxu0 %v9396_v55  ;;  %3592 = vmatpush2.msra.mxu1 %v7518_v22  ;;  %v7748_v17 = vld [vmem:[#allocation7 + $0xb8] sm:$0xff]  ;;  %v7763_v46 = vld [vmem:[#allocation7 + $0x70] sm:$0xff] }
 0x9cf   :  { %3368 = vmatprep.subr.mxu0 %v9397_v34  ;;  %3593 = vmatprep.subr.mxu1 %v7524_v47  ;;  %v7754_v55 = vld [vmem:[#allocation7 + $0x98] sm:$0xff]  ;;  %v7757_v34 = vld [vmem:[#allocation7 + $0x90] sm:$0xff] }
 0x9d0   :  { %3369 = vmatpush2.msra.mxu0 %v9398_v1  ;;  %3594 = vmatpush2.msra.mxu1 %v7530_v57  ;;  %v7760_v1 = vld [vmem:[#allocation7 + $0x78] sm:$0xff] }
 0x9d1   :  { %3602 = vmatprep.subr.mxu0 %v7684_v12 }
 0xa51   :  { %v3207_v61 = vpop.f32.mrf.mxu1 }
 0xa52   :  { %v3214_v22 = vadd.f32 %v3207_v61, %v394_v62  ;;  %v7766_v62 = vld [vmem:[#allocation7 + $0x58] sm:$0xff]  ;;  %v7769_v61 = vld [vmem:[#allocation7 + $0x50] sm:$0xff] }
 0xa53   :  { %v3209_v30 = vpop.f32.mrf.mxu1 }
 0xa54   :  { %v4531_v59 = vmul.f32 -1.442695, %v3214_v22  ;;  %v3215_v29 = vadd.f32 %v3209_v30, %v396_v0  ;;  %v7775_v0 = vld [vmem:[#allocation7 + $0x30] sm:$0xff]  ;;  %v7778_v22 = vld [vmem:[#allocation7 + $0x18] sm:$0xff] }
 0xa55   :  { %v7781_v30 = vld [vmem:[#allocation7 + $0x10] sm:$0xff] }
 0xa56   :  { %v4532_v47 = vmul.f32 -1.442695, %v3215_v29  ;;  %4709 = vpow2.f32 %v4531_v59  ;;  %v7784_v59 = vld [vmem:[#allocation7 + $0x3f8] sm:$0xff]  ;;  %v7787_v29 = vld [vmem:[#allocation7 + $0x3f0] sm:$0xff] }
 0xa58   :  { %4711 = vpow2.f32 %v4532_v47  ;;  %v7790_v47 = vld [vmem:[#allocation7 + $0x3d8] sm:$0xff] }
 0xa63   :  { %v4710_v7 = vpop.eup %4709 }
 0xa64   :  { %v3230_v57 = vadd.f32 1.0, %v4710_v7  ;;  %v7793_v7 = vld [vmem:[#allocation7 + $0x3d0] sm:$0xff] }
 0xa65   :  { %v4712_v43 = vpop.eup %4711 }
 0xa66   :  { %v3231_v56 = vadd.f32 1.0, %v4712_v43  ;;  %4713 = vrcp.f32 %v3230_v57  ;;  %v7796_v57 = vld [vmem:[#allocation7 + $0x3b8] sm:$0xff]  ;;  %v7799_v43 = vld [vmem:[#allocation7 + $0x3b0] sm:$0xff] }
 0xa68   :  { %4715 = vrcp.f32 %v3231_v56  ;;  %v7804_v56 = vld [vmem:[#allocation7 + $0x398] sm:$0xff] }
 0xa73   :  { %v4714_v16 = vpop.eup %4713 }
 0xa74   :  { %v3240_v18 = vmul.f32 %v4714_v16, %v7552_v3  ;;  %v7807_v16 = vld [vmem:[#allocation7 + $0x390] sm:$0xff] }
 0xa75   :  { %v4716_v4 = vpop.eup %4715  ;;  %9402 = vst [vmem:[#allocation142_spill] sm:$0xff] %v7807_v16 }
 0xa76   :  { %v3241_v8 = vmul.f32 %v4716_v4, %v7549_v19  ;;  %v7810_v4 = vld [vmem:[#allocation7 + $0x378] sm:$0xff] }
 0xa77   :  { %9403 = vst [vmem:[#allocation143_spill] sm:$0xff] %v7810_v4 }
 0xa78   :  { %3370 = vmatprep.mubr.f32.mxu0 %v3241_v8  ;;  %v7813_v8 = vld [vmem:[#allocation7 + $0x370] sm:$0xff] }
 0xa79   :  { %3371 = vmatmul.mubr.f32.vlgmr.msra.gmra.mxu0 %v3240_v18  ;;  %9404 = vst [vmem:[#allocation92_spill] sm:$0xff] %v7813_v8  ;;  %v7816_v18 = vld [vmem:[#allocation7 + $0x358] sm:$0xff] }
 0xa7a   :  { %3603 = vmatpush1.msra.mxu0 %v7693_v23 }
 0xa7b   :  { %3604 = vmatprep.subr.mxu0 %v7695_v51 }
 0xa7c   :  { %3605 = vmatpush1.msra.mxu0 %v7697_v28 }
 0xa7d   :  { %3606 = vmatprep.subr.mxu0 %v7700_v48 }
 0xa7e   :  { %3607 = vmatpush1.msra.mxu0 %v7703_v31 }
 0xa7f   :  { %3608 = vmatprep.subr.mxu0 %v7706_v33 }
 0xa80   :  { %3609 = vmatpush1.msra.mxu0 %v7709_v35 }
 0xa81   :  { %3610 = vmatprep.subr.mxu0 %v7712_v37 }
 0xa82   :  { %3611 = vmatpush1.msra.mxu0 %v7715_v40 }
 0xa83   :  { %3612 = vmatprep.subr.mxu0 %v7718_v42 }
 0xa84   :  { %3613 = vmatpush1.msra.mxu0 %v7721_v44 }
 0xa85   :  { %3614 = vmatprep.subr.mxu0 %v7724_v49 }
 0xa86   :  { %3615 = vmatpush1.msra.mxu0 %v7727_v53 }
 0xa87   :  { %3616 = vmatprep.subr.mxu0 %v7730_v58 }
 0xa88   :  { %3617 = vmatpush1.msra.mxu0 %v7733_v5 }
 0xa89   :  { %3618 = vmatprep.subr.mxu0 %v7736_v27 }
 0xa8a   :  { %3619 = vmatpush1.msra.mxu0 %v7739_v45 }
 0xa8b   :  { %3620 = vmatprep.subr.mxu0 %v7742_v50 }
 0xa8c   :  { %3621 = vmatpush1.msra.mxu0 %v7745_v13 }
 0xa8d   :  { %3622 = vmatprep.subr.mxu0 %v7748_v17 }
 0xa8e   :  { %3623 = vmatpush1.msra.mxu0 %v7751_v24 }
 0xa8f   :  { %3624 = vmatprep.subr.mxu0 %v7754_v55 }
 0xa90   :  { %3625 = vmatpush1.msra.mxu0 %v7757_v34 }
 0xa91   :  { %3626 = vmatprep.subr.mxu0 %v7760_v1 }
 0xa92   :  { %3627 = vmatpush1.msra.mxu0 %v7763_v46 }
 0xa93   :  { %3628 = vmatprep.subr.mxu0 %v7766_v62 }
 0xa94   :  { %3629 = vmatpush1.msra.mxu0 %v7769_v61 }
 0xa95   :  { %3630 = vmatprep.subr.mxu0 %v7772_v9 }
 0xa96   :  { %3631 = vmatpush1.msra.mxu0 %v7775_v0 }
 0xa97   :  { %3632 = vmatprep.subr.mxu0 %v7778_v22 }
 0xa98   :  { %3633 = vmatpush1.msra.mxu0 %v7781_v30 }
 0xa99   :  { %3634 = vmatprep.subr.mxu0 %v7784_v59 }
 0xa9a   :  { %3635 = vmatpush2.msra.mxu0 %v7787_v29 }
 0xa9b   :  { %3636 = vmatprep.subr.mxu0 %v7790_v47 }
 0xa9c   :  { %3637 = vmatpush2.msra.mxu0 %v7793_v7 }
 0xa9d   :  { %3638 = vmatprep.subr.mxu0 %v7796_v57 }
 0xa9e   :  { %3639 = vmatpush2.msra.mxu0 %v7799_v43 }
 0xa9f   :  { %3640 = vmatprep.subr.mxu0 %v7804_v56 }
 0xaa0   :  { %3641 = vmatpush2.msra.mxu0 %v7807_v16  ;;  %v7825_v16 = vld [vmem:[#allocation7 + $0x330] sm:$0xff] }
 0xaa1   :  { %3642 = vmatprep.subr.mxu0 %v7810_v4  ;;  %9407 = vst [vmem:[#allocation95_spill] sm:$0xff] %v7825_v16  ;;  %v7828_v4 = vld [vmem:[#allocation7 + $0x318] sm:$0xff] }
 0xaa2   :  { %3643 = vmatpush2.msra.mxu0 %v7813_v8  ;;  %9408 = vst [vmem:[#allocation20_spill] sm:$0xff] %v7828_v4  ;;  %v7831_v8 = vld [vmem:[#allocation7 + $0x310] sm:$0xff] }
 0xaa3   :  { %3644 = vmatprep.subr.mxu0 %v7816_v18  ;;  %9409 = vst [vmem:[#allocation96_spill] sm:$0xff] %v7831_v8 }
 0xaa4   :  { %3645 = vmatpush2.msra.mxu0 %v7819_v54 }
 0xaa5   :  { %3646 = vmatprep.subr.mxu0 %v7822_v39 }
 0xaa6   :  { %3647 = vmatpush2.msra.mxu0 %v7825_v16  ;;  %v9417_v16 = vld [vmem:[#allocation147_spill] sm:$0xff] }
 0xaa7   :  { %3648 = vmatprep.subr.mxu0 %v7828_v4 }
 0xaa8   :  { %3649 = vmatpush2.msra.mxu0 %v7831_v8 }
 0xaa9   :  { %3650 = vmatprep.subr.mxu0 %v7444_v15  ;;  %v9410_v15 = vld [vmem:[#allocation46_spill] sm:$0xff] }
 0xaaa   :  { %3651 = vmatpush2.msra.mxu0 %v7450_v41  ;;  %v9411_v41 = vld [vmem:[#allocation136_spill] sm:$0xff] }
 0xaab   :  { %3652 = vmatprep.subr.mxu0 %v7456_v14  ;;  %v9412_v14 = vld [vmem:[#allocation137_spill] sm:$0xff] }
 0xaac   :  { %3653 = vmatpush2.msra.mxu0 %v7462_v20  ;;  %v7850_v20 = vld [vmem:[#allocation9 + $0xf8] sm:$0xff] }
 0xaad   :  { %3654 = vmatprep.subr.mxu0 %v7468_v60  ;;  %9413 = vst [vmem:[#allocation21_spill] sm:$0xff] %v7850_v20  ;;  %3767 = vmatprep.subr.mxu1 %v7850_v20  ;;  %v3136_v60 = vpop.f32.mrf.mxu0  ;;  %v593_v20 = vadd.f32 %v9417_v16, %v5906_v63 }
 0xaae   :  { %3655 = vmatpush2.msra.mxu0 %v7474_v11  ;;  %v9414_v11 = vld [vmem:[#allocation94_spill] sm:$0xff] }
 0xaaf   :  { %3656 = vmatprep.subr.mxu0 %v7480_v26  ;;  %v3212_v26 = vadd.f32 %v3136_v60, %v9414_v11 }
 0xab0   :  { %3657 = vmatpush2.msra.mxu0 %v7486_v25  ;;  %v3138_v25 = vpop.f32.mrf.mxu0 }
 0xab1   :  { %3658 = vmatprep.subr.mxu0 %v7492_v32  ;;  %v9415_v32 = vld [vmem:[#allocation97_spill] sm:$0xff] }
 0xab2   :  { %3659 = vmatpush2.msra.mxu0 %v7498_v52  ;;  %v3213_v52 = vadd.f32 %v3138_v25, %v9415_v32 }
 0xab3   :  { %3660 = vmatprep.subr.mxu0 %v7504_v6  ;;  %v4529_v6 = vmul.f32 -1.442695, %v3212_v26 }
 0xab4   :  { %3661 = vmatpush2.msra.mxu0 %v7510_v36  ;;  %v4530_v36 = vmul.f32 -1.442695, %v3213_v52 }
 0xab5   :  { %3662 = vmatprep.subr.mxu0 %v7516_v21  ;;  %4717 = vpow2.f32 %v4529_v6 }
 0xab6   :  { %3663 = vmatpush2.msra.mxu0 %v9410_v15  ;;  %4719 = vpow2.f32 %v4530_v36  ;;  %v9416_v15 = vld [vmem:[#allocation146_spill] sm:$0xff] }
 0xab7   :  { %3664 = vmatprep.subr.mxu0 %v9411_v41  ;;  %v591_v41 = vadd.f32 %v9416_v15, %v5902_v10 }
 0xab8   :  { %3665 = vmatpush2.msra.mxu0 %v9412_v14 }
 0xac2   :  { %v4718_v21 = vpop.eup %4717 }
 0xac3   :  { %v4720_v8 = vpop.eup %4719  ;;  %v3228_v14 = vadd.f32 1.0, %v4718_v21 }
 0xac4   :  { %v3229_v60 = vadd.f32 1.0, %v4720_v8  ;;  %v7875_v8 = vld [vmem:[#allocation9 + $0xe0] sm:$0xff] }
 0xb39   :  { %v3372_v4 = vpop.f32.mrf.mxu0 }
 0xb3a   :  { %v3377_v39 = vadd.f32 %v3372_v4, %v591_v41  ;;  %v7881_v41 = vld [vmem:[#allocation9 + $0xd0] sm:$0xff] }
 0xb3b   :  { %v3374_v54 = vpop.f32.mrf.mxu0  ;;  %9419 = vst [vmem:[#allocation78_spill] sm:$0xff] %v7881_v41 }
 0xb3c   :  { %4721 = vtanh.f32 %v3377_v39  ;;  %v3378_v11 = vadd.f32 %v3374_v54, %v593_v20  ;;  %v7867_v39 = vld [vmem:[#allocation9 + $0xf0] sm:$0xff]  ;;  %v7871_v54 = vld [vmem:[#allocation9 + $0xe8] sm:$0xff]  ;;  %v7878_v20 = vld [vmem:[#allocation9 + $0xd8] sm:$0xff] }
 0xb3d   :  { %4723 = vrcp.f32 %v3228_v14  ;;  %9418 = vst [vmem:[#allocation75_spill] sm:$0xff] %v7878_v20  ;;  %v7884_v14 = vld [vmem:[#allocation9 + $0xc8] sm:$0xff] }
 0xb3e   :  { %4725 = vtanh.f32 %v3378_v11  ;;  %9420 = vst [vmem:[#allocation140_spill] sm:$0xff] %v7884_v14  ;;  %v7890_v11 = vld [vmem:[#allocation9 + $0xb8] sm:$0xff] }
 0xb3f   :  { %4727 = vrcp.f32 %v3229_v60  ;;  %v7887_v60 = vld [vmem:[#allocation9 + $0xc0] sm:$0xff]  ;;  %9422 = vst [vmem:[#allocation89_spill] sm:$0xff] %v7890_v11 }
 0xb40   :  { %9421 = vst [vmem:[#allocation141_spill] sm:$0xff] %v7887_v60 }
 0xb49   :  { %v4722_v26 = vpop.eup %4721 }
 0xb4a   :  { %v4724_v25 = vpop.eup %4723  ;;  %v3381_v32 = vsub.f32 %v4722_v26, %v7552_v3  ;;  %v7893_v26 = vld [vmem:[#allocation9 + $0xb0] sm:$0xff] }
 0xb4b   :  { %v4726_v52 = vpop.eup %4725  ;;  %9423 = vst [vmem:[#allocation91_spill] sm:$0xff] %v7893_v26 }
 0xb4c   :  { %v3383_v6 = vmul.f32 %v4724_v25, %v3381_v32  ;;  %v3382_v36 = vsub.f32 %v4726_v52, %v7549_v19  ;;  %v4728_v21 = vpop.eup %4727  ;;  %v7896_v25 = vld [vmem:[#allocation9 + $0xa8] sm:$0xff]  ;;  %v7899_v32 = vld [vmem:[#allocation9 + $0xa0] sm:$0xff]  ;;  %v7902_v52 = vld [vmem:[#allocation9 + $0x98] sm:$0xff] }
 0xb4d   :  { %9424 = vst [vmem:[#allocation144_spill] sm:$0xff] %v7896_v25  ;;  %9425 = vst [vmem:[#allocation145_spill] sm:$0xff] %v7899_v32 }
 0xb4e   :  { %v3384_v15 = vmul.f32 %v4728_v21, %v3382_v36  ;;  %v7865_v4 = vadd.f32 %v3383_v6, %v7552_v3  ;;  %9426 = vst [vmem:[#allocation134_spill] sm:$0xff] %v7902_v52  ;;  %v7905_v6 = vld [vmem:[#allocation9 + $0x90] sm:$0xff]  ;;  %v7908_v36 = vld [vmem:[#allocation9 + $0x88] sm:$0xff]  ;;  %v7911_v21 = vld [vmem:[#allocation9 + $0x80] sm:$0xff] }
 0xb4f   :  { %9427 = vst [vmem:[#allocation138_spill] sm:$0xff] %v7905_v6  ;;  %9428 = vst [vmem:[#allocation23_spill] sm:$0xff] %v7908_v36  ;;  %v7917_v3 = vld [vmem:[#allocation9 + $0x70] sm:$0xff] }
 0xb50   :  { %v7862_v16 = vadd.f32 %v3384_v15, %v7549_v19  ;;  %9429 = vst [vmem:[#allocation119_spill] sm:$0xff] %v7911_v21  ;;  %v7914_v15 = vld [vmem:[#allocation9 + $0x78] sm:$0xff]  ;;  %9431 = vst [vmem:[#allocation139_spill] sm:$0xff] %v7917_v3  ;;  %v7920_v19 = vld [vmem:[#allocation9 + $0x68] sm:$0xff] }
 0xb51   :  { %9430 = vst [vmem:[#allocation55_spill] sm:$0xff] %v7914_v15  ;;  %9432 = vst [vmem:[#allocation100_spill] sm:$0xff] %v7920_v19 }
 0xb52   :  { %3595 = vmatprep.mubr.f32.mxu1 %v7862_v16  ;;  %3666 = vmatprep.mubr.f32.mxu0 %v7862_v16 }
 0xb53   :  { %3596 = vmatmul.mubr.f32.vlgmr.msra.gmra.mxu1 %v7865_v4  ;;  %3667 = vmatmul.mubr.f32.vlgmr.msra.gmra.mxu0 %v7865_v4 }
 0xb54   :  { %3768 = vmatpush1.msra.mxu1 %v7867_v39 }
 0xb55   :  { %3769 = vmatprep.subr.mxu1 %v7871_v54 }
 0xb56   :  { %3770 = vmatpush1.msra.mxu1 %v7875_v8 }
 0xb57   :  { %3771 = vmatprep.subr.mxu1 %v7878_v20 }
 0xb58   :  { %3772 = vmatpush1.msra.mxu1 %v7881_v41 }
 0xb59   :  { %3773 = vmatprep.subr.mxu1 %v7884_v14 }
 0xb5a   :  { %3774 = vmatpush1.msra.mxu1 %v7887_v60 }
 0xb5b   :  { %3775 = vmatprep.subr.mxu1 %v7890_v11  ;;  %v3916_v11 = vld [vmem:[#allocation7 + $0x1a0] sm:$0xff] }
 0xb5c   :  { %3776 = vmatpush1.msra.mxu1 %v7893_v26  ;;  %v3921_v26 = vld [vmem:[#allocation7 + $0x1c8] sm:$0xff] }
 0xb5d   :  { %3777 = vmatprep.subr.mxu1 %v7896_v25  ;;  %v3736_v25 = vld [vmem:[#allocation9 + $0x108] sm:$0xff] }
 0xb5e   :  { %3778 = vmatpush1.msra.mxu1 %v7899_v32  ;;  %v7923_v32 = vld [vmem:[#allocation9 + $0x60] sm:$0xff] }
 0xb5f   :  { %3779 = vmatprep.subr.mxu1 %v7902_v52  ;;  %9433 = vst [vmem:[#allocation39_spill] sm:$0xff] %v7923_v32  ;;  %v7926_v52 = vld [vmem:[#allocation9 + $0x58] sm:$0xff] }
 0xb60   :  { %3780 = vmatpush1.msra.mxu1 %v7905_v6  ;;  %9434 = vst [vmem:[#allocation135_spill] sm:$0xff] %v7926_v52  ;;  %v7929_v6 = vld [vmem:[#allocation9 + $0x50] sm:$0xff] }
 0xb61   :  { %3781 = vmatprep.subr.mxu1 %v7908_v36  ;;  %9435 = vst [vmem:[#allocation160_spill] sm:$0xff] %v7929_v6  ;;  %v7932_v36 = vld [vmem:[#allocation9 + $0x48] sm:$0xff] }
 0xb62   :  { %3782 = vmatpush1.msra.mxu1 %v7911_v21  ;;  %9436 = vst [vmem:[#allocation24_spill] sm:$0xff] %v7932_v36  ;;  %v7935_v21 = vld [vmem:[#allocation9 + $0x40] sm:$0xff] }
 0xb63   :  { %3783 = vmatprep.subr.mxu1 %v7914_v15  ;;  %9437 = vst [vmem:[#allocation120_spill] sm:$0xff] %v7935_v21  ;;  %v8031_v15 = vld [vmem:[#allocation9 + $0x140] sm:$0xff] }
 0xb64   :  { %3784 = vmatpush1.msra.mxu1 %v7917_v3  ;;  %v7940_v3 = vld [vmem:[#allocation9 + $0x38] sm:$0xff]  ;;  %9469 = vst [vmem:[#allocation48_spill] sm:$0xff] %v8031_v15 }
 0xb65   :  { %3785 = vmatprep.subr.mxu1 %v7920_v19  ;;  %9438 = vst [vmem:[#allocation56_spill] sm:$0xff] %v7940_v3  ;;  %v7943_v19 = vld [vmem:[#allocation9 + $0x30] sm:$0xff] }
 0xb66   :  { %3786 = vmatpush1.msra.mxu1 %v7923_v32  ;;  %9439 = vst [vmem:[#allocation161_spill] sm:$0xff] %v7943_v19  ;;  %v7946_v32 = vld [vmem:[#allocation9 + $0x28] sm:$0xff] }
 0xb67   :  { %3787 = vmatprep.subr.mxu1 %v7926_v52  ;;  %9440 = vst [vmem:[#allocation102_spill] sm:$0xff] %v7946_v32  ;;  %v7949_v52 = vld [vmem:[#allocation9 + $0x20] sm:$0xff] }
 0xb68   :  { %3788 = vmatpush1.msra.mxu1 %v7929_v6  ;;  %9441 = vst [vmem:[#allocation40_spill] sm:$0xff] %v7949_v52  ;;  %v7952_v6 = vld [vmem:[#allocation9 + $0x18] sm:$0xff] }
 0xb69   :  { %3789 = vmatprep.subr.mxu1 %v7932_v36  ;;  %9442 = vst [vmem:[#allocation57_spill] sm:$0xff] %v7952_v6  ;;  %v8014_v36 = vld [vmem:[#allocation9 + $0x170] sm:$0xff] }
 0xb6a   :  { %3790 = vmatpush1.msra.mxu1 %v7935_v21  ;;  %v7955_v21 = vld [vmem:[#allocation9 + $0x10] sm:$0xff]  ;;  %9463 = vst [vmem:[#allocation126_spill] sm:$0xff] %v8014_v36 }
 0xb6b   :  { %3791 = vmatprep.subr.mxu1 %v7940_v3  ;;  %9443 = vst [vmem:[#allocation121_spill] sm:$0xff] %v7955_v21  ;;  %v7958_v3 = vld [vmem:[#allocation9 + $0x8] sm:$0xff] }
 0xb6c   :  { %3792 = vmatpush1.msra.mxu1 %v7943_v19  ;;  %9444 = vst [vmem:[#allocation25_spill] sm:$0xff] %v7958_v3  ;;  %v7961_v19 = vld [vmem:[#allocation9] sm:$0xff] }
 0xb6d   :  { %3793 = vmatprep.subr.mxu1 %v7946_v32  ;;  %9445 = vst [vmem:[#allocation41_spill] sm:$0xff] %v7961_v19  ;;  %v7964_v32 = vld [vmem:[#allocation9 + $0x1f8] sm:$0xff] }
 0xb6e   :  { %3794 = vmatpush1.msra.mxu1 %v7949_v52  ;;  %9446 = vst [vmem:[#allocation58_spill] sm:$0xff] %v7964_v32  ;;  %v7967_v52 = vld [vmem:[#allocation9 + $0x1f0] sm:$0xff] }
 0xb6f   :  { %3795 = vmatprep.subr.mxu1 %v7952_v6  ;;  %9447 = vst [vmem:[#allocation122_spill] sm:$0xff] %v7967_v52  ;;  %v7970_v6 = vld [vmem:[#allocation9 + $0x1e8] sm:$0xff] }
 0xb70   :  { %3796 = vmatpush1.msra.mxu1 %v7955_v21  ;;  %9448 = vst [vmem:[#allocation103_spill] sm:$0xff] %v7970_v6  ;;  %v7973_v21 = vld [vmem:[#allocation9 + $0x1e0] sm:$0xff] }
 0xb71   :  { %3797 = vmatprep.subr.mxu1 %v7958_v3  ;;  %9449 = vst [vmem:[#allocation42_spill] sm:$0xff] %v7973_v21  ;;  %v7976_v3 = vld [vmem:[#allocation9 + $0x1d8] sm:$0xff] }
 0xb72   :  { %3798 = vmatpush1.msra.mxu1 %v7961_v19  ;;  %9450 = vst [vmem:[#allocation60_spill] sm:$0xff] %v7976_v3  ;;  %v7979_v19 = vld [vmem:[#allocation9 + $0x1d0] sm:$0xff] }
 0xb73   :  { %3799 = vmatprep.subr.mxu1 %v7964_v32  ;;  %9451 = vst [vmem:[#allocation123_spill] sm:$0xff] %v7979_v19  ;;  %v7982_v32 = vld [vmem:[#allocation9 + $0x1c8] sm:$0xff] }
 0xb74   :  { %3800 = vmatpush2.msra.mxu1 %v7967_v52  ;;  %9452 = vst [vmem:[#allocation26_spill] sm:$0xff] %v7982_v32  ;;  %v7985_v52 = vld [vmem:[#allocation9 + $0x1c0] sm:$0xff] }
 0xb75   :  { %3801 = vmatprep.subr.mxu1 %v7970_v6  ;;  %9453 = vst [vmem:[#allocation43_spill] sm:$0xff] %v7985_v52  ;;  %v7988_v6 = vld [vmem:[#allocation9 + $0x1b8] sm:$0xff] }
 0xb76   :  { %3802 = vmatpush2.msra.mxu1 %v7973_v21  ;;  %9454 = vst [vmem:[#allocation61_spill] sm:$0xff] %v7988_v6  ;;  %v7991_v21 = vld [vmem:[#allocation9 + $0x1b0] sm:$0xff] }
 0xb77   :  { %3803 = vmatprep.subr.mxu1 %v7976_v3  ;;  %9455 = vst [vmem:[#allocation124_spill] sm:$0xff] %v7991_v21  ;;  %v7994_v3 = vld [vmem:[#allocation9 + $0x1a8] sm:$0xff] }
 0xb78   :  { %3804 = vmatpush2.msra.mxu1 %v7979_v19  ;;  %9456 = vst [vmem:[#allocation105_spill] sm:$0xff] %v7994_v3  ;;  %v7997_v19 = vld [vmem:[#allocation9 + $0x1a0] sm:$0xff] }
 0xb79   :  { %3805 = vmatprep.subr.mxu1 %v7982_v32  ;;  %9457 = vst [vmem:[#allocation44_spill] sm:$0xff] %v7997_v19  ;;  %v8000_v32 = vld [vmem:[#allocation9 + $0x198] sm:$0xff] }
 0xb7a   :  { %3806 = vmatpush2.msra.mxu1 %v7985_v52  ;;  %9458 = vst [vmem:[#allocation63_spill] sm:$0xff] %v8000_v32  ;;  %v8003_v52 = vld [vmem:[#allocation9 + $0x190] sm:$0xff] }
 0xb7b   :  { %3807 = vmatprep.subr.mxu1 %v7988_v6  ;;  %9459 = vst [vmem:[#allocation125_spill] sm:$0xff] %v8003_v52  ;;  %v8006_v6 = vld [vmem:[#allocation9 + $0x188] sm:$0xff] }
 0xb7c   :  { %3808 = vmatpush2.msra.mxu1 %v7991_v21  ;;  %9460 = vst [vmem:[#allocation27_spill] sm:$0xff] %v8006_v6  ;;  %v8009_v21 = vld [vmem:[#allocation9 + $0x180] sm:$0xff] }
 0xb7d   :  { %3809 = vmatprep.subr.mxu1 %v7994_v3  ;;  %9461 = vst [vmem:[#allocation45_spill] sm:$0xff] %v8009_v21  ;;  %v8012_v3 = vld [vmem:[#allocation9 + $0x178] sm:$0xff] }
 0xb7e   :  { %3810 = vmatpush2.msra.mxu1 %v7997_v19  ;;  %9462 = vst [vmem:[#allocation64_spill] sm:$0xff] %v8012_v3  ;;  %v8016_v19 = vld [vmem:[#allocation9 + $0x168] sm:$0xff] }
 0xb7f   :  { %3811 = vmatprep.subr.mxu1 %v8000_v32  ;;  %9464 = vst [vmem:[#allocation106_spill] sm:$0xff] %v8016_v19  ;;  %v8019_v32 = vld [vmem:[#allocation9 + $0x160] sm:$0xff] }
 0xb80   :  { %3812 = vmatpush2.msra.mxu1 %v8003_v52  ;;  %9465 = vst [vmem:[#allocation47_spill] sm:$0xff] %v8019_v32  ;;  %v8022_v52 = vld [vmem:[#allocation9 + $0x158] sm:$0xff] }
 0xb81   :  { %3813 = vmatprep.subr.mxu1 %v8006_v6  ;;  %9466 = vst [vmem:[#allocation65_spill] sm:$0xff] %v8022_v52  ;;  %v8025_v6 = vld [vmem:[#allocation9 + $0x150] sm:$0xff] }
 0xb82   :  { %3814 = vmatpush2.msra.mxu1 %v8009_v21  ;;  %9467 = vst [vmem:[#allocation127_spill] sm:$0xff] %v8025_v6  ;;  %v8028_v21 = vld [vmem:[#allocation9 + $0x148] sm:$0xff] }
 0xb83   :  { %3815 = vmatprep.subr.mxu1 %v8012_v3  ;;  %9468 = vst [vmem:[#allocation28_spill] sm:$0xff] %v8028_v21  ;;  %v8034_v3 = vld [vmem:[#allocation9 + $0x138] sm:$0xff] }
 0xb84   :  { %3816 = vmatpush2.msra.mxu1 %v8014_v36  ;;  %9470 = vst [vmem:[#allocation67_spill] sm:$0xff] %v8034_v3  ;;  %v8037_v36 = vld [vmem:[#allocation9 + $0x130] sm:$0xff] }
 0xb85   :  { %3817 = vmatprep.subr.mxu1 %v8016_v19  ;;  %9471 = vst [vmem:[#allocation128_spill] sm:$0xff] %v8037_v36  ;;  %v8040_v19 = vld [vmem:[#allocation9 + $0x128] sm:$0xff] }
 0xb86   :  { %3818 = vmatpush2.msra.mxu1 %v8019_v32  ;;  %9472 = vst [vmem:[#allocation107_spill] sm:$0xff] %v8040_v19  ;;  %v8043_v32 = vld [vmem:[#allocation9 + $0x120] sm:$0xff] }
 0xb87   :  { %3819 = vmatprep.subr.mxu1 %v8022_v52  ;;  %9473 = vst [vmem:[#allocation49_spill] sm:$0xff] %v8043_v32  ;;  %v3738_v52 = vld [vmem:[#allocation9 + $0x118] sm:$0xff] }
 0xb88   :  { %3820 = vmatpush2.msra.mxu1 %v8025_v6  ;;  %v3737_v6 = vld [vmem:[#allocation9 + $0x110] sm:$0xff] }
 0xb89   :  { %3821 = vmatprep.subr.mxu1 %v8028_v21  ;;  %v3735_v21 = vld [vmem:[#allocation9 + $0x100] sm:$0xff] }
 0xb8a   :  { %3822 = vmatpush2.msra.mxu1 %v8031_v15  ;;  %v3925_v15 = vld [vmem:[#allocation7 + $0x1e8] sm:$0xff] }
 0xb8b   :  { %3823 = vmatprep.subr.mxu1 %v8034_v3  ;;  %3992 = vmatprep.subr.mxu0 %v3925_v15  ;;  %v3924_v3 = vld [vmem:[#allocation7 + $0x1e0] sm:$0xff]  ;;  %v3889_v15 = vld [vmem:[#allocation7 + $0xc8] sm:$0xff] }
 0xb8c   :  { %3824 = vmatpush2.msra.mxu1 %v8037_v36  ;;  %3993 = vmatpush1.msra.mxu0 %v3924_v3  ;;  %v3920_v36 = vld [vmem:[#allocation7 + $0x1c0] sm:$0xff]  ;;  %v3901_v3 = vld [vmem:[#allocation7 + $0x128] sm:$0xff] }
 0xb8d   :  { %3825 = vmatprep.subr.mxu1 %v8040_v19  ;;  %3994 = vmatprep.subr.mxu0 %v3921_v26  ;;  %v3917_v19 = vld [vmem:[#allocation7 + $0x1a8] sm:$0xff]  ;;  %v3900_v26 = vld [vmem:[#allocation7 + $0x120] sm:$0xff] }
 0xb8e   :  { %3826 = vmatpush2.msra.mxu1 %v8043_v32  ;;  %3995 = vmatpush1.msra.mxu0 %v3920_v36  ;;  %v3913_v32 = vld [vmem:[#allocation7 + $0x188] sm:$0xff] }
 0xb8f   :  { %3827 = vmatprep.subr.mxu1 %v3738_v52  ;;  %3996 = vmatprep.subr.mxu0 %v3917_v19  ;;  %v3912_v52 = vld [vmem:[#allocation7 + $0x180] sm:$0xff]  ;;  %v3897_v36 = vld [vmem:[#allocation7 + $0x108] sm:$0xff] }
 0xb90   :  { %3828 = vmatpush2.msra.mxu1 %v3737_v6  ;;  %3997 = vmatpush1.msra.mxu0 %v3916_v11  ;;  %v3908_v6 = vld [vmem:[#allocation7 + $0x160] sm:$0xff]  ;;  %v3893_v11 = vld [vmem:[#allocation7 + $0xe8] sm:$0xff] }
 0xb91   :  { %3829 = vmatprep.subr.mxu1 %v3736_v25  ;;  %3998 = vmatprep.subr.mxu0 %v3913_v32  ;;  %v3909_v25 = vld [vmem:[#allocation7 + $0x168] sm:$0xff]  ;;  %v3896_v19 = vld [vmem:[#allocation7 + $0x100] sm:$0xff] }
 0xb92   :  { %3830 = vmatpush2.msra.mxu1 %v3735_v21  ;;  %3999 = vmatpush1.msra.mxu0 %v3912_v52  ;;  %v3904_v21 = vld [vmem:[#allocation7 + $0x140] sm:$0xff] }
 0xb93   :  { %4063 = vmatprep.subr.mxu1 %v7684_v12  ;;  %4000 = vmatprep.subr.mxu0 %v3909_v25  ;;  %v3905_v12 = vld [vmem:[#allocation7 + $0x148] sm:$0xff]  ;;  %v3892_v32 = vld [vmem:[#allocation7 + $0xe0] sm:$0xff] }
 0xb94   :  { %4001 = vmatpush1.msra.mxu0 %v3908_v6  ;;  %v3888_v52 = vld [vmem:[#allocation7 + $0xc0] sm:$0xff]  ;;  %v3885_v25 = vld [vmem:[#allocation7 + $0xa8] sm:$0xff] }
 0xb95   :  { %4002 = vmatprep.subr.mxu0 %v3905_v12  ;;  %v3884_v6 = vld [vmem:[#allocation7 + $0xa0] sm:$0xff]  ;;  %v3881_v12 = vld [vmem:[#allocation7 + $0x88] sm:$0xff] }
 0xb96   :  { %4003 = vmatpush1.msra.mxu0 %v3904_v21  ;;  %v3880_v21 = vld [vmem:[#allocation7 + $0x80] sm:$0xff] }
 0xb97   :  { %4004 = vmatprep.subr.mxu0 %v3901_v3  ;;  %v3877_v3 = vld [vmem:[#allocation7 + $0x68] sm:$0xff] }
 0xb98   :  { %4005 = vmatpush1.msra.mxu0 %v3900_v26  ;;  %v3876_v26 = vld [vmem:[#allocation7 + $0x60] sm:$0xff] }
 0xb99   :  { %4006 = vmatprep.subr.mxu0 %v3897_v36  ;;  %v3873_v36 = vld [vmem:[#allocation7 + $0x48] sm:$0xff] }
 0xb9a   :  { %4007 = vmatpush1.msra.mxu0 %v3896_v19  ;;  %v3872_v19 = vld [vmem:[#allocation7 + $0x40] sm:$0xff] }
 0xb9b   :  { %4008 = vmatprep.subr.mxu0 %v3893_v11  ;;  %v3869_v11 = vld [vmem:[#allocation7 + $0x28] sm:$0xff] }
 0xb9c   :  { %4009 = vmatpush1.msra.mxu0 %v3892_v32  ;;  %v3868_v32 = vld [vmem:[#allocation7 + $0x20] sm:$0xff] }
 0xb9d   :  { %4010 = vmatprep.subr.mxu0 %v3889_v15  ;;  %v3865_v15 = vld [vmem:[#allocation7 + $0x8] sm:$0xff] }
 0xb9e   :  { %4011 = vmatpush1.msra.mxu0 %v3888_v52  ;;  %v3864_v52 = vld [vmem:[#allocation7] sm:$0xff] }
 0xb9f   :  { %4012 = vmatprep.subr.mxu0 %v3885_v25  ;;  %v3989_v25 = vld [vmem:[#allocation7 + $0x3e8] sm:$0xff] }
 0xba0   :  { %4013 = vmatpush1.msra.mxu0 %v3884_v6  ;;  %v3988_v6 = vld [vmem:[#allocation7 + $0x3e0] sm:$0xff] }
 0xba1   :  { %4014 = vmatprep.subr.mxu0 %v3881_v12  ;;  %v3985_v12 = vld [vmem:[#allocation7 + $0x3c8] sm:$0xff] }
 0xba2   :  { %4015 = vmatpush1.msra.mxu0 %v3880_v21  ;;  %v3984_v21 = vld [vmem:[#allocation7 + $0x3c0] sm:$0xff] }
 0xba3   :  { %4016 = vmatprep.subr.mxu0 %v3877_v3  ;;  %v3981_v3 = vld [vmem:[#allocation7 + $0x3a8] sm:$0xff] }
 0xba4   :  { %4017 = vmatpush1.msra.mxu0 %v3876_v26  ;;  %v3980_v26 = vld [vmem:[#allocation7 + $0x3a0] sm:$0xff] }
 0xba5   :  { %4018 = vmatprep.subr.mxu0 %v3873_v36  ;;  %v9474_v36 = vld [vmem:[#allocation156_spill] sm:$0xff] }
 0xba6   :  { %4019 = vmatpush1.msra.mxu0 %v3872_v19  ;;  %v400_v19 = vadd.f32 %v9474_v36, %v9399_v38 }
 0xba7   :  { %4020 = vmatprep.subr.mxu0 %v3869_v11 }
 0xba8   :  { %4021 = vmatpush1.msra.mxu0 %v3868_v32  ;;  %v9475_v32 = vld [vmem:[#allocation157_spill] sm:$0xff] }
 0xba9   :  { %4022 = vmatprep.subr.mxu0 %v3865_v15  ;;  %v402_v15 = vadd.f32 %v9475_v32, %v5686_v2  ;;  %v3931_v32 = vld [vmem:[#allocation7 + $0x218] sm:$0xff] }
 0xbaa   :  { %4023 = vmatpush1.msra.mxu0 %v3864_v52 }
 0xbab   :  { %4024 = vmatprep.subr.mxu0 %v3989_v25 }
 0xbac   :  { %4025 = vmatpush2.msra.mxu0 %v3988_v6 }
 0xbad   :  { %4026 = vmatprep.subr.mxu0 %v3985_v12 }
 0xbae   :  { %4027 = vmatpush2.msra.mxu0 %v3984_v21 }
 0xbaf   :  { %4028 = vmatprep.subr.mxu0 %v3981_v3 }
 0xbb0   :  { %4029 = vmatpush2.msra.mxu0 %v3980_v26 }
 0xc13   :  { %v3668_v11 = vpop.f32.mrf.mxu0 }
 0xc14   :  { %v3675_v52 = vadd.f32 %v3668_v11, %v400_v19  ;;  %v3934_v19 = vld [vmem:[#allocation7 + $0x230] sm:$0xff]  ;;  %v3932_v11 = vld [vmem:[#allocation7 + $0x220] sm:$0xff] }
 0xc15   :  { %v3670_v60 = vpop.f32.mrf.mxu0 }
 0xc16   :  { %v4535_v25 = vmul.f32 -1.442695, %v3675_v52  ;;  %v3676_v14 = vadd.f32 %v3670_v60, %v402_v15  ;;  %v3933_v60 = vld [vmem:[#allocation7 + $0x228] sm:$0xff]  ;;  %v3930_v52 = vld [vmem:[#allocation7 + $0x210] sm:$0xff] }
 0xc17   :  { %v3929_v15 = vld [vmem:[#allocation7 + $0x208] sm:$0xff] }
 0xc18   :  { %v4536_v6 = vmul.f32 -1.442695, %v3676_v14  ;;  %4729 = vpow2.f32 %v4535_v25  ;;  %v3935_v14 = vld [vmem:[#allocation7 + $0x238] sm:$0xff]  ;;  %v3928_v25 = vld [vmem:[#allocation7 + $0x200] sm:$0xff] }
 0xc1a   :  { %4731 = vpow2.f32 %v4536_v6  ;;  %v4360_v6 = vld [vmem:[#allocation10 + $0xf8] sm:$0xff] }
 0xc25   :  { %v4730_v12 = vpop.eup %4729 }
 0xc26   :  { %v3691_v21 = vadd.f32 1.0, %v4730_v12  ;;  %v9484_v12 = vld [vmem:[#allocation21_spill] sm:$0xff] }
 0xc27   :  { %v4732_v41 = vpop.eup %4731 }
 0xc28   :  { %v3692_v3 = vadd.f32 1.0, %v4732_v41  ;;  %4733 = vrcp.f32 %v3691_v21  ;;  %v3936_v41 = vld [vmem:[#allocation7 + $0x240] sm:$0xff]  ;;  %v3597_v21 = vpop.f32.mrf.mxu1 }
 0xc2a   :  { %4735 = vrcp.f32 %v3692_v3  ;;  %v9485_v3 = vld [vmem:[#allocation101_spill] sm:$0xff] }
 0xc35   :  { %v4734_v26 = vpop.eup %4733 }
 0xc36   :  { %v3701_v38 = vmul.f32 %v4734_v26, %v7865_v4  ;;  %v3673_v26 = vadd.f32 %v3597_v21, %v9485_v3  ;;  %v9500_v21 = vld [vmem:[#allocation23_spill] sm:$0xff]  ;;  %v4335_v3 = vld [vmem:[#allocation10 + $0x30] sm:$0xff] }
 0xc37   :  { %v4736_v20 = vpop.eup %4735 }
 0xc38   :  { %v3702_v36 = vmul.f32 %v4736_v20, %v7862_v16  ;;  %v3938_v20 = vld [vmem:[#allocation7 + $0x250] sm:$0xff] }
 0xc3a   :  { %3831 = vmatprep.mubr.f32.mxu1 %v3702_v36  ;;  %v3599_v36 = vpop.f32.mrf.mxu1 }
 0xc3b   :  { %3832 = vmatmul.mubr.f32.vlgmr.msra.gmra.mxu1 %v3701_v38  ;;  %v9476_v38 = vld [vmem:[#allocation142_spill] sm:$0xff] }
 0xc3c   :  { %4064 = vmatpush1.msra.mxu1 %v7693_v23  ;;  %v9477_v23 = vld [vmem:[#allocation143_spill] sm:$0xff] }
 0xc3d   :  { %4065 = vmatprep.subr.mxu1 %v7695_v51  ;;  %v9478_v51 = vld [vmem:[#allocation92_spill] sm:$0xff] }
 0xc3e   :  { %4066 = vmatpush1.msra.mxu1 %v7697_v28  ;;  %v9479_v28 = vld [vmem:[#allocation153_spill] sm:$0xff] }
 0xc3f   :  { %4067 = vmatprep.subr.mxu1 %v7700_v48  ;;  %v9480_v48 = vld [vmem:[#allocation19_spill] sm:$0xff] }
 0xc40   :  { %4068 = vmatpush1.msra.mxu1 %v7703_v31  ;;  %v9481_v31 = vld [vmem:[#allocation95_spill] sm:$0xff] }
 0xc41   :  { %4069 = vmatprep.subr.mxu1 %v7706_v33  ;;  %v9482_v33 = vld [vmem:[#allocation20_spill] sm:$0xff] }
 0xc42   :  { %4070 = vmatpush1.msra.mxu1 %v7709_v35  ;;  %v9483_v35 = vld [vmem:[#allocation96_spill] sm:$0xff] }
 0xc43   :  { %4071 = vmatprep.subr.mxu1 %v7712_v37  ;;  %v3977_v37 = vld [vmem:[#allocation7 + $0x388] sm:$0xff] }
 0xc44   :  { %4072 = vmatpush1.msra.mxu1 %v7715_v40  ;;  %4030 = vmatprep.subr.mxu0 %v3977_v37  ;;  %v3976_v40 = vld [vmem:[#allocation7 + $0x380] sm:$0xff] }
 0xc45   :  { %4073 = vmatprep.subr.mxu1 %v7718_v42  ;;  %4031 = vmatpush2.msra.mxu0 %v3976_v40  ;;  %v3973_v42 = vld [vmem:[#allocation7 + $0x368] sm:$0xff] }
 0xc46   :  { %4074 = vmatpush1.msra.mxu1 %v7721_v44  ;;  %4032 = vmatprep.subr.mxu0 %v3973_v42  ;;  %v3972_v44 = vld [vmem:[#allocation7 + $0x360] sm:$0xff]  ;;  %v9488_v42 = vld [vmem:[#allocation149_spill] sm:$0xff] }
 0xc47   :  { %4075 = vmatprep.subr.mxu1 %v7724_v49  ;;  %4033 = vmatpush2.msra.mxu0 %v3972_v44  ;;  %v3969_v49 = vld [vmem:[#allocation7 + $0x348] sm:$0xff]  ;;  %v599_v44 = vadd.f32 %v9488_v42, %v5906_v63 }
 0xc48   :  { %4076 = vmatpush1.msra.mxu1 %v7727_v53  ;;  %4034 = vmatprep.subr.mxu0 %v3969_v49  ;;  %v3968_v53 = vld [vmem:[#allocation7 + $0x340] sm:$0xff]  ;;  %v9507_v42 = vld [vmem:[#allocation160_spill] sm:$0xff] }
 0xc49   :  { %4077 = vmatprep.subr.mxu1 %v7730_v58  ;;  %4035 = vmatpush2.msra.mxu0 %v3968_v53  ;;  %v3965_v58 = vld [vmem:[#allocation7 + $0x328] sm:$0xff] }
 0xc4a   :  { %4078 = vmatpush1.msra.mxu1 %v7733_v5  ;;  %4036 = vmatprep.subr.mxu0 %v3965_v58  ;;  %v3964_v5 = vld [vmem:[#allocation7 + $0x320] sm:$0xff] }
 0xc4b   :  { %4079 = vmatprep.subr.mxu1 %v7736_v27  ;;  %4037 = vmatpush2.msra.mxu0 %v3964_v5  ;;  %v3961_v27 = vld [vmem:[#allocation7 + $0x308] sm:$0xff] }
 0xc4c   :  { %4080 = vmatpush1.msra.mxu1 %v7739_v45  ;;  %4038 = vmatprep.subr.mxu0 %v3961_v27  ;;  %v3960_v45 = vld [vmem:[#allocation7 + $0x300] sm:$0xff] }
 0xc4d   :  { %4081 = vmatprep.subr.mxu1 %v7742_v50  ;;  %v3959_v50 = vld [vmem:[#allocation7 + $0x2f8] sm:$0xff]  ;;  %4039 = vmatpush2.msra.mxu0 %v3960_v45 }
 0xc4e   :  { %4082 = vmatpush1.msra.mxu1 %v7745_v13  ;;  %v3957_v13 = vld [vmem:[#allocation7 + $0x2e8] sm:$0xff] }
 0xc4f   :  { %4083 = vmatprep.subr.mxu1 %v7748_v17  ;;  %v3958_v17 = vld [vmem:[#allocation7 + $0x2f0] sm:$0xff]  ;;  %4040 = vmatprep.subr.mxu0 %v3957_v13 }
 0xc50   :  { %4084 = vmatpush1.msra.mxu1 %v7751_v24  ;;  %v3956_v24 = vld [vmem:[#allocation7 + $0x2e0] sm:$0xff] }
 0xc51   :  { %4085 = vmatprep.subr.mxu1 %v7754_v55  ;;  %v3955_v55 = vld [vmem:[#allocation7 + $0x2d8] sm:$0xff]  ;;  %4041 = vmatpush2.msra.mxu0 %v3956_v24 }
 0xc52   :  { %4086 = vmatpush1.msra.mxu1 %v7757_v34  ;;  %v3953_v34 = vld [vmem:[#allocation7 + $0x2c8] sm:$0xff] }
 0xc53   :  { %4087 = vmatprep.subr.mxu1 %v7760_v1  ;;  %v3954_v1 = vld [vmem:[#allocation7 + $0x2d0] sm:$0xff]  ;;  %4042 = vmatprep.subr.mxu0 %v3953_v34 }
 0xc54   :  { %4088 = vmatpush1.msra.mxu1 %v7763_v46  ;;  %v3952_v46 = vld [vmem:[#allocation7 + $0x2c0] sm:$0xff] }
 0xc55   :  { %4089 = vmatprep.subr.mxu1 %v7766_v62  ;;  %v3951_v62 = vld [vmem:[#allocation7 + $0x2b8] sm:$0xff]  ;;  %4043 = vmatpush2.msra.mxu0 %v3952_v46 }
 0xc56   :  { %4090 = vmatpush1.msra.mxu1 %v7769_v61  ;;  %v3949_v61 = vld [vmem:[#allocation7 + $0x2a8] sm:$0xff] }
 0xc57   :  { %4091 = vmatprep.subr.mxu1 %v7772_v9  ;;  %v3950_v9 = vld [vmem:[#allocation7 + $0x2b0] sm:$0xff]  ;;  %4044 = vmatprep.subr.mxu0 %v3949_v61 }
 0xc58   :  { %4092 = vmatpush1.msra.mxu1 %v7775_v0  ;;  %v3948_v0 = vld [vmem:[#allocation7 + $0x2a0] sm:$0xff]  ;;  %v4359_v61 = vld [vmem:[#allocation10 + $0xf0] sm:$0xff] }
 0xc59   :  { %4093 = vmatprep.subr.mxu1 %v7778_v22  ;;  %v3947_v22 = vld [vmem:[#allocation7 + $0x298] sm:$0xff]  ;;  %4045 = vmatpush2.msra.mxu0 %v3948_v0  ;;  %v9489_v0 = vld [vmem:[#allocation59_spill] sm:$0xff] }
 0xc5a   :  { %4094 = vmatpush1.msra.mxu1 %v7781_v30  ;;  %v3945_v30 = vld [vmem:[#allocation7 + $0x288] sm:$0xff] }
 0xc5b   :  { %4095 = vmatprep.subr.mxu1 %v7784_v59  ;;  %v3946_v59 = vld [vmem:[#allocation7 + $0x290] sm:$0xff]  ;;  %4046 = vmatprep.subr.mxu0 %v3945_v30  ;;  %v4342_v30 = vld [vmem:[#allocation10 + $0x68] sm:$0xff] }
 0xc5c   :  { %4096 = vmatpush2.msra.mxu1 %v7787_v29  ;;  %v3944_v29 = vld [vmem:[#allocation7 + $0x280] sm:$0xff] }
 0xc5d   :  { %4097 = vmatprep.subr.mxu1 %v7790_v47  ;;  %v3943_v47 = vld [vmem:[#allocation7 + $0x278] sm:$0xff]  ;;  %4047 = vmatpush2.msra.mxu0 %v3944_v29  ;;  %v4341_v29 = vld [vmem:[#allocation10 + $0x60] sm:$0xff] }
 0xc5e   :  { %4098 = vmatpush2.msra.mxu1 %v7793_v7  ;;  %v3941_v7 = vld [vmem:[#allocation7 + $0x268] sm:$0xff] }
 0xc5f   :  { %4099 = vmatprep.subr.mxu1 %v7796_v57  ;;  %v3942_v57 = vld [vmem:[#allocation7 + $0x270] sm:$0xff]  ;;  %4048 = vmatprep.subr.mxu0 %v3941_v7  ;;  %v9490_v7 = vld [vmem:[#allocation75_spill] sm:$0xff] }
 0xc60   :  { %4100 = vmatpush2.msra.mxu1 %v7799_v43  ;;  %v3940_v43 = vld [vmem:[#allocation7 + $0x260] sm:$0xff] }
 0xc61   :  { %4101 = vmatprep.subr.mxu1 %v7804_v56  ;;  %v3939_v56 = vld [vmem:[#allocation7 + $0x258] sm:$0xff]  ;;  %4049 = vmatpush2.msra.mxu0 %v3940_v43 }
 0xc62   :  { %4102 = vmatpush2.msra.mxu1 %v9476_v38  ;;  %v9486_v38 = vld [vmem:[#allocation104_spill] sm:$0xff]  ;;  %v9491_v43 = vld [vmem:[#allocation78_spill] sm:$0xff] }
 0xc63   :  { %4103 = vmatprep.subr.mxu1 %v9477_v23  ;;  %v3674_v23 = vadd.f32 %v3599_v36, %v9486_v38  ;;  %v4350_v36 = vld [vmem:[#allocation10 + $0xa8] sm:$0xff]  ;;  %v9502_v38 = vld [vmem:[#allocation55_spill] sm:$0xff] }
 0xc64   :  { %4104 = vmatpush2.msra.mxu1 %v9478_v51  ;;  %v4533_v51 = vmul.f32 -1.442695, %v3673_v26  ;;  %v9501_v26 = vld [vmem:[#allocation119_spill] sm:$0xff] }
 0xc65   :  { %4105 = vmatprep.subr.mxu1 %v7816_v18  ;;  %v3937_v18 = vld [vmem:[#allocation7 + $0x248] sm:$0xff] }
 0xc66   :  { %4106 = vmatpush2.msra.mxu1 %v9479_v28  ;;  %4050 = vmatprep.subr.mxu0 %v3937_v18  ;;  %v4534_v28 = vmul.f32 -1.442695, %v3674_v23  ;;  %4737 = vpow2.f32 %v4533_v51  ;;  %v9492_v18 = vld [vmem:[#allocation140_spill] sm:$0xff]  ;;  %v9503_v51 = vld [vmem:[#allocation139_spill] sm:$0xff] }
 0xc67   :  { %4107 = vmatprep.subr.mxu1 %v9480_v48  ;;  %4051 = vmatpush2.msra.mxu0 %v3936_v41  ;;  %v9494_v41 = vld [vmem:[#allocation89_spill] sm:$0xff]  ;;  %v4334_v23 = vld [vmem:[#allocation10 + $0x28] sm:$0xff] }
 0xc68   :  { %4108 = vmatpush2.msra.mxu1 %v9481_v31  ;;  %4052 = vmatprep.subr.mxu0 %v3933_v60  ;;  %4739 = vpow2.f32 %v4534_v28  ;;  %v9487_v31 = vld [vmem:[#allocation148_spill] sm:$0xff]  ;;  %v4353_v60 = vld [vmem:[#allocation10 + $0xc0] sm:$0xff] }
 0xc69   :  { %4109 = vmatprep.subr.mxu1 %v9482_v33  ;;  %4053 = vmatpush2.msra.mxu0 %v3932_v11  ;;  %v597_v33 = vadd.f32 %v9487_v31, %v5902_v10  ;;  %v4337_v11 = vld [vmem:[#allocation10 + $0x40] sm:$0xff] }
 0xc6a   :  { %4110 = vmatpush2.msra.mxu1 %v9483_v35  ;;  %4054 = vmatprep.subr.mxu0 %v3929_v15  ;;  %v4352_v15 = vld [vmem:[#allocation10 + $0xb8] sm:$0xff]  ;;  %v4349_v28 = vld [vmem:[#allocation10 + $0xa0] sm:$0xff] }
 0xc6b   :  { %4111 = vmatprep.subr.mxu1 %v3959_v50  ;;  %4055 = vmatpush2.msra.mxu0 %v3928_v25  ;;  %v4336_v25 = vld [vmem:[#allocation10 + $0x38] sm:$0xff]  ;;  %v4333_v31 = vld [vmem:[#allocation10 + $0x20] sm:$0xff] }
 0xc6c   :  { %4112 = vmatpush2.msra.mxu1 %v3958_v17  ;;  %4228 = vmatprep.subr.mxu0 %v9484_v12  ;;  %v4351_v12 = vld [vmem:[#allocation10 + $0xb0] sm:$0xff] }
 0xc6d   :  { %4113 = vmatprep.subr.mxu1 %v3955_v55 }
 0xc6e   :  { %4114 = vmatpush2.msra.mxu1 %v3954_v1 }
 0xc6f   :  { %4115 = vmatprep.subr.mxu1 %v3951_v62  ;;  %v4344_v62 = vld [vmem:[#allocation10 + $0x78] sm:$0xff] }
 0xc70   :  { %4116 = vmatpush2.msra.mxu1 %v3950_v9  ;;  %v4343_v9 = vld [vmem:[#allocation10 + $0x70] sm:$0xff] }
 0xc71   :  { %4117 = vmatprep.subr.mxu1 %v3947_v22  ;;  %v4358_v22 = vld [vmem:[#allocation10 + $0xe8] sm:$0xff] }
 0xc72   :  { %4118 = vmatpush2.msra.mxu1 %v3946_v59  ;;  %v4357_v59 = vld [vmem:[#allocation10 + $0xe0] sm:$0xff] }
 0xc73   :  { %4119 = vmatprep.subr.mxu1 %v3943_v47  ;;  %v4738_v48 = vpop.eup %4737  ;;  %v4356_v47 = vld [vmem:[#allocation10 + $0xd8] sm:$0xff] }
 0xc74   :  { %4120 = vmatpush2.msra.mxu1 %v3942_v57  ;;  %v3689_v37 = vadd.f32 1.0, %v4738_v48  ;;  %v4340_v57 = vld [vmem:[#allocation10 + $0x58] sm:$0xff]  ;;  %v9504_v48 = vld [vmem:[#allocation100_spill] sm:$0xff] }
 0xc75   :  { %4121 = vmatprep.subr.mxu1 %v3939_v56  ;;  %v4740_v35 = vpop.eup %4739  ;;  %v4355_v56 = vld [vmem:[#allocation10 + $0xd0] sm:$0xff] }
 0xc76   :  { %4122 = vmatpush2.msra.mxu1 %v3938_v20  ;;  %v3690_v58 = vadd.f32 1.0, %v4740_v35  ;;  %v9493_v20 = vld [vmem:[#allocation141_spill] sm:$0xff]  ;;  %v4348_v35 = vld [vmem:[#allocation10 + $0x98] sm:$0xff] }
 0xc77   :  { %4123 = vmatprep.subr.mxu1 %v3935_v14  ;;  %v9495_v14 = vld [vmem:[#allocation91_spill] sm:$0xff] }
 0xc78   :  { %4124 = vmatpush2.msra.mxu1 %v3934_v19  ;;  %v9496_v19 = vld [vmem:[#allocation144_spill] sm:$0xff] }
 0xc79   :  { %4125 = vmatprep.subr.mxu1 %v3931_v32  ;;  %v9497_v32 = vld [vmem:[#allocation145_spill] sm:$0xff] }
 0xc7a   :  { %4126 = vmatpush2.msra.mxu1 %v3930_v52  ;;  %v9498_v52 = vld [vmem:[#allocation134_spill] sm:$0xff] }
 0xc7b   :  { %4542 = vmatprep.subr.mxu1 %v4360_v6  ;;  %v9499_v6 = vld [vmem:[#allocation138_spill] sm:$0xff] }
 0xcfb   :  { %v3833_v40 = vpop.f32.mrf.mxu1 }
 0xcfc   :  { %v3838_v49 = vadd.f32 %v3833_v40, %v597_v33  ;;  %v9505_v33 = vld [vmem:[#allocation39_spill] sm:$0xff]  ;;  %v4332_v40 = vld [vmem:[#allocation10 + $0x18] sm:$0xff] }
 0xcfd   :  { %v3835_v53 = vpop.f32.mrf.mxu1 }
 0xcfe   :  { %4741 = vtanh.f32 %v3838_v49  ;;  %v3839_v5 = vadd.f32 %v3835_v53, %v599_v44  ;;  %v4347_v44 = vld [vmem:[#allocation10 + $0x90] sm:$0xff]  ;;  %v9508_v49 = vld [vmem:[#allocation24_spill] sm:$0xff] }
 0xcff   :  { %4743 = vrcp.f32 %v3689_v37  ;;  %v9506_v37 = vld [vmem:[#allocation135_spill] sm:$0xff]  ;;  %v4331_v53 = vld [vmem:[#allocation10 + $0x10] sm:$0xff] }
 0xd00   :  { %4745 = vtanh.f32 %v3839_v5  ;;  %v4346_v5 = vld [vmem:[#allocation10 + $0x88] sm:$0xff] }
 0xd01   :  { %4747 = vrcp.f32 %v3690_v58  ;;  %v9509_v58 = vld [vmem:[#allocation120_spill] sm:$0xff] }
 0xd0b   :  { %v4742_v27 = vpop.eup %4741 }
 0xd0c   :  { %v4744_v45 = vpop.eup %4743  ;;  %v3842_v50 = vsub.f32 %v4742_v27, %v7865_v4  ;;  %v9510_v27 = vld [vmem:[#allocation56_spill] sm:$0xff] }
 0xd0d   :  { %v4746_v13 = vpop.eup %4745 }
 0xd0e   :  { %v3844_v17 = vmul.f32 %v4744_v45, %v3842_v50  ;;  %v3843_v24 = vsub.f32 %v4746_v13, %v7862_v16  ;;  %v4748_v55 = vpop.eup %4747  ;;  %v4330_v45 = vld [vmem:[#allocation10 + $0x8] sm:$0xff]  ;;  %v9511_v50 = vld [vmem:[#allocation161_spill] sm:$0xff]  ;;  %v4345_v13 = vld [vmem:[#allocation10 + $0x80] sm:$0xff] }
 0xd10   :  { %v3845_v34 = vmul.f32 %v4748_v55, %v3843_v24  ;;  %v8115_v46 = vadd.f32 %v3844_v17, %v7865_v4  ;;  %v9512_v17 = vld [vmem:[#allocation102_spill] sm:$0xff]  ;;  %v4329_v24 = vld [vmem:[#allocation10] sm:$0xff]  ;;  %v9513_v55 = vld [vmem:[#allocation40_spill] sm:$0xff] }
 0xd12   :  { %v8112_v1 = vadd.f32 %v3845_v34, %v7862_v16  ;;  %v9514_v34 = vld [vmem:[#allocation57_spill] sm:$0xff] }
 0xd14   :  { %4056 = vmatprep.mubr.f32.mxu0 %v8112_v1  ;;  %4127 = vmatprep.mubr.f32.mxu1 %v8112_v1 }
 0xd15   :  { %4057 = vmatmul.mubr.f32.vlgmr.msra.gmra.mxu0 %v8115_v46  ;;  %4128 = vmatmul.mubr.f32.vlgmr.msra.gmra.mxu1 %v8115_v46 }
 0xd16   :  { %4543 = vmatpush3.msra.mxu1 %v4344_v62  ;;  %4432 = vmatprep.mubr.f32.mxu1 %v9489_v0  ;;  %v9515_v62 = vld [vmem:[#allocation121_spill] sm:$0xff] }
 0xd17   :  { %4544 = vmatprep.subr.mxu1 %v4359_v61  ;;  %4229 = vmatpush1.msra.mxu0 %v7867_v39  ;;  %v4339_v39 = vld [vmem:[#allocation10 + $0x50] sm:$0xff] }
 0xd18   :  { %4545 = vmatpush3.msra.mxu1 %v4343_v9  ;;  %4230 = vmatprep.subr.mxu0 %v7871_v54  ;;  %v4354_v54 = vld [vmem:[#allocation10 + $0xc8] sm:$0xff]  ;;  %v9516_v61 = vld [vmem:[#allocation25_spill] sm:$0xff]  ;;  %v9517_v9 = vld [vmem:[#allocation62_spill] sm:$0xff] }
 0xd19   :  { %4546 = vmatprep.subr.mxu1 %v4358_v22  ;;  %4231 = vmatpush1.msra.mxu0 %v7875_v8  ;;  %v4338_v8 = vld [vmem:[#allocation10 + $0x48] sm:$0xff]  ;;  %v9518_v0 = vld [vmem:[#allocation41_spill] sm:$0xff]  ;;  %v9519_v22 = vld [vmem:[#allocation98_spill] sm:$0xff] }
 0xd1a   :  { %4547 = vmatpush3.msra.mxu1 %v4342_v30  ;;  %4232 = vmatprep.subr.mxu0 %v9490_v7  ;;  %v9520_v30 = vld [vmem:[#allocation58_spill] sm:$0xff] }
 0xd1b   :  { %4548 = vmatprep.subr.mxu1 %v4357_v59  ;;  %4233 = vmatpush1.msra.mxu0 %v9491_v43  ;;  %v9521_v59 = vld [vmem:[#allocation122_spill] sm:$0xff]  ;;  %v9526_v43 = vld [vmem:[#allocation60_spill] sm:$0xff] }
 0xd1c   :  { %4549 = vmatpush3.msra.mxu1 %v4341_v29  ;;  %4234 = vmatprep.subr.mxu0 %v9492_v18  ;;  %v9522_v29 = vld [vmem:[#allocation103_spill] sm:$0xff]  ;;  %v9524_v7 = vld [vmem:[#allocation42_spill] sm:$0xff] }
 0xd1d   :  { %4550 = vmatprep.subr.mxu1 %v4356_v47  ;;  %4235 = vmatpush1.msra.mxu0 %v9493_v20  ;;  %v9523_v47 = vld [vmem:[#allocation22_spill] sm:$0xff]  ;;  %v9530_v20 = vld [vmem:[#allocation43_spill] sm:$0xff] }
 0xd1e   :  { %4551 = vmatpush3.msra.mxu1 %v4340_v57  ;;  %4236 = vmatprep.subr.mxu0 %v9494_v41  ;;  %v9525_v57 = vld [vmem:[#allocation18_spill] sm:$0xff]  ;;  %v9532_v41 = vld [vmem:[#allocation61_spill] sm:$0xff] }
 0xd1f   :  { %4552 = vmatprep.subr.mxu1 %v4355_v56  ;;  %4237 = vmatpush1.msra.mxu0 %v9495_v14  ;;  %v9527_v56 = vld [vmem:[#allocation123_spill] sm:$0xff]  ;;  %v9528_v18 = vld [vmem:[#allocation26_spill] sm:$0xff]  ;;  %v9534_v14 = vld [vmem:[#allocation105_spill] sm:$0xff] }
 0xd20   :  { %4553 = vmatpush3.msra.mxu1 %v4339_v39  ;;  %4238 = vmatprep.subr.mxu0 %v9496_v19  ;;  %v9529_v39 = vld [vmem:[#allocation93_spill] sm:$0xff]  ;;  %v9536_v19 = vld [vmem:[#allocation44_spill] sm:$0xff] }
 0xd21   :  { %4554 = vmatprep.subr.mxu1 %v4354_v54  ;;  %4239 = vmatpush1.msra.mxu0 %v9497_v32  ;;  %v9531_v54 = vld [vmem:[#allocation54_spill] sm:$0xff]  ;;  %v9538_v32 = vld [vmem:[#allocation63_spill] sm:$0xff] }
 0xd22   :  { %4555 = vmatpush3.msra.mxu1 %v4338_v8  ;;  %4240 = vmatprep.subr.mxu0 %v9498_v52  ;;  %v9533_v8 = vld [vmem:[#allocation124_spill] sm:$0xff]  ;;  %v9540_v52 = vld [vmem:[#allocation27_spill] sm:$0xff] }
 0xd23   :  { %4556 = vmatprep.subr.mxu1 %v4353_v60  ;;  %4241 = vmatpush1.msra.mxu0 %v9499_v6  ;;  %v9535_v60 = vld [vmem:[#allocation99_spill] sm:$0xff]  ;;  %v9542_v6 = vld [vmem:[#allocation45_spill] sm:$0xff] }
 0xd24   :  { %4557 = vmatpush3.msra.mxu1 %v4337_v11  ;;  %4242 = vmatprep.subr.mxu0 %v9500_v21  ;;  %v9537_v11 = vld [vmem:[#allocation82_spill] sm:$0xff] }
 0xd25   :  { %4558 = vmatprep.subr.mxu1 %v4352_v15  ;;  %4243 = vmatpush1.msra.mxu0 %v9501_v26  ;;  %v9539_v15 = vld [vmem:[#allocation125_spill] sm:$0xff]  ;;  %v9544_v21 = vld [vmem:[#allocation126_spill] sm:$0xff]  ;;  %v9546_v26 = vld [vmem:[#allocation47_spill] sm:$0xff] }
 0xd26   :  { %4559 = vmatpush3.msra.mxu1 %v4336_v25  ;;  %4244 = vmatprep.subr.mxu0 %v9502_v38  ;;  %v9541_v25 = vld [vmem:[#allocation85_spill] sm:$0xff]  ;;  %v9548_v38 = vld [vmem:[#allocation127_spill] sm:$0xff] }
 0xd27   :  { %4560 = vmatprep.subr.mxu1 %v4351_v12  ;;  %4245 = vmatpush1.msra.mxu0 %v9503_v51  ;;  %v9543_v12 = vld [vmem:[#allocation64_spill] sm:$0xff]  ;;  %v9551_v51 = vld [vmem:[#allocation67_spill] sm:$0xff] }
 0xd28   :  { %4561 = vmatpush3.msra.mxu1 %v4335_v3  ;;  %4246 = vmatprep.subr.mxu0 %v9504_v48  ;;  %v9545_v3 = vld [vmem:[#allocation106_spill] sm:$0xff]  ;;  %v9553_v48 = vld [vmem:[#allocation107_spill] sm:$0xff] }
 0xd29   :  { %4562 = vmatprep.subr.mxu1 %v4350_v36  ;;  %4247 = vmatpush1.msra.mxu0 %v9505_v33  ;;  %v9547_v36 = vld [vmem:[#allocation65_spill] sm:$0xff] }
 0xd2a   :  { %4563 = vmatpush3.msra.mxu1 %v4334_v23  ;;  %4248 = vmatprep.subr.mxu0 %v9506_v37  ;;  %v9549_v23 = vld [vmem:[#allocation28_spill] sm:$0xff]  ;;  %v4198_v33 = vld [vmem:[#allocation9 + $0x110] sm:$0xff]  ;;  %v4196_v37 = vld [vmem:[#allocation9 + $0x100] sm:$0xff] }
 0xd2b   :  { %4564 = vmatprep.subr.mxu1 %v4349_v28  ;;  %4249 = vmatpush1.msra.mxu0 %v9507_v42  ;;  %v9552_v28 = vld [vmem:[#allocation128_spill] sm:$0xff]  ;;  %v9556_v42 = vld [vmem:[#allocation158_spill] sm:$0xff] }
 0xd2c   :  { %4565 = vmatpush3.msra.mxu1 %v4333_v31  ;;  %4250 = vmatprep.subr.mxu0 %v9508_v49  ;;  %v4199_v31 = vld [vmem:[#allocation9 + $0x118] sm:$0xff] }
 0xd2d   :  { %4566 = vmatprep.subr.mxu1 %v4348_v35  ;;  %4251 = vmatpush1.msra.mxu0 %v9509_v58  ;;  %v4197_v35 = vld [vmem:[#allocation9 + $0x108] sm:$0xff] }
 0xd2e   :  { %4567 = vmatpush3.msra.mxu1 %v4332_v40  ;;  %4252 = vmatprep.subr.mxu0 %v9510_v27  ;;  %v9555_v40 = vld [vmem:[#allocation150_spill] sm:$0xff] }
 0xd2f   :  { %4568 = vmatprep.subr.mxu1 %v4347_v44  ;;  %4253 = vmatpush1.msra.mxu0 %v9511_v50  ;;  %v406_v44 = vadd.f32 %v9556_v42, %v9555_v40 }
 0xd30   :  { %4569 = vmatpush3.msra.mxu1 %v4331_v53  ;;  %4254 = vmatprep.subr.mxu0 %v9512_v17  ;;  %v9557_v53 = vld [vmem:[#allocation159_spill] sm:$0xff] }
 0xd31   :  { %4570 = vmatprep.subr.mxu1 %v4346_v5  ;;  %4255 = vmatpush1.msra.mxu0 %v9513_v55  ;;  %v408_v58 = vadd.f32 %v9557_v53, %v5686_v2 }
 0xd32   :  { %4571 = vmatpush3.msra.mxu1 %v4330_v45  ;;  %4256 = vmatprep.subr.mxu0 %v9514_v34 }
 0xd33   :  { %4572 = vmatprep.subr.mxu1 %v4345_v13  ;;  %4257 = vmatpush1.msra.mxu0 %v9515_v62 }
 0xd34   :  { %4573 = vmatpush3.msra.mxu1 %v4329_v24  ;;  %4258 = vmatprep.subr.mxu0 %v9516_v61  ;;  %v8201_v61 = vld [vmem:[%s8255_s8] ss:$0 sm:$0xff] }
 0xd35   :  { %4433 = vmatmul.mubr.f32.vlgmr.msra.gmra.mxu1 %v9517_v9  ;;  %4259 = vmatpush1.msra.mxu0 %v9518_v0 }
 0xd36   :  { %4437 = vmatprep.mubr.f32.mxu1 %v9519_v22  ;;  %4260 = vmatprep.subr.mxu0 %v9520_v30 }
 0xd37   :  { %4261 = vmatpush2.msra.mxu0 %v9521_v59 }
 0xd38   :  { %4262 = vmatprep.subr.mxu0 %v9522_v29 }
 0xd39   :  { %4438 = vmatmul.mubr.f32.gmra.mxu1 %v9523_v47  ;;  %4263 = vmatpush2.msra.mxu0 %v9524_v7 }
 0xd3a   :  { %4442 = vmatprep.mubr.f32.mxu1 %v9525_v57  ;;  %4264 = vmatprep.subr.mxu0 %v9526_v43 }
 0xd3b   :  { %4265 = vmatpush2.msra.mxu0 %v9527_v56 }
 0xd3c   :  { %4266 = vmatprep.subr.mxu0 %v9528_v18 }
 0xd3d   :  { %4443 = vmatmul.mubr.f32.gmra.mxu1 %v9529_v39  ;;  %4267 = vmatpush2.msra.mxu0 %v9530_v20 }
 0xd3e   :  { %4447 = vmatprep.mubr.f32.mxu1 %v9531_v54  ;;  %4268 = vmatprep.subr.mxu0 %v9532_v41 }
 0xd3f   :  { %4269 = vmatpush2.msra.mxu0 %v9533_v8 }
 0xd40   :  { %4270 = vmatprep.subr.mxu0 %v9534_v14 }
 0xd41   :  { %4448 = vmatmul.mubr.f32.gmra.mxu1 %v9535_v60  ;;  %4271 = vmatpush2.msra.mxu0 %v9536_v19 }
 0xd42   :  { %4452 = vmatprep.mubr.f32.mxu1 %v9537_v11  ;;  %4272 = vmatprep.subr.mxu0 %v9538_v32 }
 0xd43   :  { %4273 = vmatpush2.msra.mxu0 %v9539_v15 }
 0xd44   :  { %4274 = vmatprep.subr.mxu0 %v9540_v52 }
 0xd45   :  { %4453 = vmatmul.mubr.f32.gmra.mxu1 %v9541_v25  ;;  %4275 = vmatpush2.msra.mxu0 %v9542_v6 }
 0xd46   :  { %4457 = vmatprep.mubr.f32.mxu1 %v7862_v16  ;;  %4276 = vmatprep.subr.mxu0 %v9543_v12  ;;  %v9550_v16 = vld [vmem:[#allocation48_spill] sm:$0xff] }
 0xd47   :  { %4277 = vmatpush2.msra.mxu0 %v9544_v21 }
 0xd48   :  { %4278 = vmatprep.subr.mxu0 %v9545_v3 }
 0xd49   :  { %4458 = vmatmul.mubr.f32.gmra.mxu1 %v7865_v4  ;;  %4279 = vmatpush2.msra.mxu0 %v9546_v26  ;;  %v9554_v4 = vld [vmem:[#allocation49_spill] sm:$0xff] }
 0xd4a   :  { %4462 = vmatprep.mubr.f32.mxu1 %v8112_v1  ;;  %4280 = vmatprep.subr.mxu0 %v9547_v36 }
 0xd4b   :  { %4281 = vmatpush2.msra.mxu0 %v9548_v38  ;;  %v9558_v38 = vld [vmem:[#allocation108_spill] sm:$0xff] }
 0xd4c   :  { %4282 = vmatprep.subr.mxu0 %v9549_v23 }
 0xd4d   :  { %4463 = vmatmul.mubr.f32.gmra.mxu1 %v8115_v46  ;;  %4283 = vmatpush2.msra.mxu0 %v9550_v16 }
 0xd4e   :  { %4284 = vmatprep.subr.mxu0 %v9551_v51  ;;  %v9559_v51 = vld [vmem:[#allocation111_spill] sm:$0xff] }
 0xd4f   :  { %4285 = vmatpush2.msra.mxu0 %v9552_v28 }
 0xd50   :  { %4286 = vmatprep.subr.mxu0 %v9553_v48 }
 0xd51   :  { %4287 = vmatpush2.msra.mxu0 %v9554_v4 }
 0xd52   :  { %4288 = vmatprep.subr.mxu0 %v4199_v31 }
 0xd53   :  { %4289 = vmatpush2.msra.mxu0 %v4198_v33  ;;  %v9560_v33 = vld [vmem:[#allocation151_spill] sm:$0xff] }
 0xd54   :  { %4290 = vmatprep.subr.mxu0 %v4197_v35  ;;  %v603_v35 = vadd.f32 %v9560_v33, %v5902_v10 }
 0xd55   :  { %4291 = vmatpush2.msra.mxu0 %v4196_v37 }
 0xdd5   :  { %v4129_v49 = vpop.f32.mrf.mxu1  ;;  %v4058_v36 = vpop.f32.mrf.mxu0 }
 0xdd6   :  { %v4136_v5 = vadd.f32 %v4129_v49, %v406_v44  ;;  %v4134_v23 = vadd.f32 %v4058_v36, %v9558_v38  ;;  %v9561_v44 = vld [vmem:[#allocation152_spill] sm:$0xff] }
 0xdd7   :  { %v4131_v27 = vpop.f32.mrf.mxu1  ;;  %v4060_v16 = vpop.f32.mrf.mxu0  ;;  %v605_v49 = vadd.f32 %v9561_v44, %v5906_v63 }
 0xdd8   :  { %v4539_v45 = vmul.f32 -1.442695, %v4136_v5  ;;  %v4137_v50 = vadd.f32 %v4131_v27, %v408_v58  ;;  %v4135_v28 = vadd.f32 %v4060_v16, %v9559_v51  ;;  %v4537_v48 = vmul.f32 -1.442695, %v4134_v23 }
 0xdda   :  { %v4540_v13 = vmul.f32 -1.442695, %v4137_v50  ;;  %4749 = vpow2.f32 %v4539_v45  ;;  %v4538_v4 = vmul.f32 -1.442695, %v4135_v28 }
 0xddc   :  { %4751 = vpow2.f32 %v4540_v13 }
 0xde7   :  { %v4750_v17 = vpop.eup %4749 }
 0xde8   :  { %v4152_v24 = vadd.f32 1.0, %v4750_v17 }
 0xde9   :  { %v4752_v55 = vpop.eup %4751 }
 0xdea   :  { %v4153_v34 = vadd.f32 1.0, %v4752_v55  ;;  %4753 = vrcp.f32 %v4152_v24 }
 0xdec   :  { %4755 = vrcp.f32 %v4153_v34 }
 0xded   :  { %4757 = vpow2.f32 %v4537_v48 }
 0xdee   :  { %4759 = vpow2.f32 %v4538_v4 }
 0xdf5   :  { %v4574_v62 = vpop.f32.mrf.mxu1 }
 0xdf7   :  { %v4575_v2 = vpop.f32.mrf.mxu1  ;;  %v4754_v0 = vpop.eup %4753 }
 0xdf8   :  { %v4576_v9 = vadd.f32 %v4575_v2, %v4574_v62  ;;  %v4162_v57 = vmul.f32 %v4754_v0, %v8115_v46 }
 0xdf9   :  { %v4577_v22 = vpop.f32.mrf.mxu1  ;;  %v4756_v30 = vpop.eup %4755 }
 0xdfa   :  { %v4435_v59 = vadd.f32 %v4576_v9, %v8201_v61  ;;  %v4163_v47 = vmul.f32 %v4756_v30, %v8112_v1  ;;  %v4758_v31 = vpop.eup %4757 }
 0xdfb   :  { %v4578_v29 = vpop.f32.mrf.mxu1  ;;  %v4760_v37 = vpop.eup %4759  ;;  %v4150_v40 = vadd.f32 1.0, %v4758_v31 }
 0xdfc   :  { %4473 = vst [vmem:[%s8257_s10] sm:$0xff] %v4435_v59  ;;  %v4579_v7 = vadd.f32 %v4578_v29, %v4577_v22  ;;  %4292 = vmatprep.mubr.f32.mxu0 %v4163_v47  ;;  %v4151_v5 = vadd.f32 1.0, %v4760_v37 }
 0xdfd   :  { %v4580_v43 = vpop.f32.mrf.mxu1  ;;  %4293 = vmatmul.mubr.f32.vlgmr.msra.gmra.mxu0 %v4162_v57 }
 0xdfe   :  { %v4440_v56 = vadd.f32 %v4579_v7, %v8201_v61 }
 0xdff   :  { %v4581_v18 = vpop.f32.mrf.mxu1 }
 0xe00   :  { %4474 = vst [vmem:[%s8257_s10 + $0x8] sm:$0xff] %v4440_v56  ;;  %v4582_v39 = vadd.f32 %v4581_v18, %v4580_v43 }
 0xe01   :  { %v4583_v20 = vpop.f32.mrf.mxu1 }
 0xe02   :  { %v4445_v54 = vadd.f32 %v4582_v39, %v8201_v61 }
 0xe03   :  { %v4584_v41 = vpop.f32.mrf.mxu1 }
 0xe04   :  { %4475 = vst [vmem:[%s8257_s10 + $0x10] sm:$0xff] %v4445_v54  ;;  %v4585_v8 = vadd.f32 %v4584_v41, %v4583_v20 }
 0xe05   :  { %v4586_v14 = vpop.f32.mrf.mxu1 }
 0xe06   :  { %v4450_v60 = vadd.f32 %v4585_v8, %v8201_v61 }
 0xe07   :  { %v4587_v19 = vpop.f32.mrf.mxu1 }
 0xe08   :  { %4476 = vst [vmem:[%s8257_s10 + $0x18] sm:$0xff] %v4450_v60  ;;  %v4588_v11 = vadd.f32 %v4587_v19, %v4586_v14 }
 0xe09   :  { %v4589_v32 = vpop.f32.mrf.mxu1 }
 0xe0a   :  { %v4455_v15 = vadd.f32 %v4588_v11, %v8201_v61 }
 0xe0b   :  { %v4590_v52 = vpop.f32.mrf.mxu1 }
 0xe0c   :  { %4477 = vst [vmem:[%s8257_s10 + $0x20] sm:$0xff] %v4455_v15  ;;  %v4591_v25 = vadd.f32 %v4590_v52, %v4589_v32 }
 0xe0d   :  { %v4592_v6 = vpop.f32.mrf.mxu1 }
 0xe0e   :  { %v4460_v12 = vadd.f32 %v4591_v25, %v8201_v61 }
 0xe0f   :  { %v4593_v21 = vpop.f32.mrf.mxu1 }
 0xe10   :  { %4478 = vst [vmem:[%s8257_s10 + $0x28] sm:$0xff] %v4460_v12  ;;  %v4594_v3 = vadd.f32 %v4593_v21, %v4592_v6 }
 0xe12   :  { %v4465_v26 = vadd.f32 %v4594_v3, %v8201_v61 }
 0xe14   :  { %4479 = vst [vmem:[%s8257_s10 + $0x30] sm:$0xff] %v4465_v26 }
 0xebd   :  { %v4294_v42 = vpop.f32.mrf.mxu0 }
 0xebe   :  { %v4299_v53 = vadd.f32 %v4294_v42, %v603_v35 }
 0xebf   :  { %v4296_v58 = vpop.f32.mrf.mxu0 }
 0xec0   :  { %4761 = vtanh.f32 %v4299_v53  ;;  %v4300_v27 = vadd.f32 %v4296_v58, %v605_v49 }
 0xec1   :  { %4763 = vrcp.f32 %v4150_v40 }
 0xec2   :  { %4765 = vtanh.f32 %v4300_v27 }
 0xec3   :  { %4767 = vrcp.f32 %v4151_v5 }
 0xecd   :  { %v4762_v45 = vpop.eup %4761 }
 0xece   :  { %v4764_v50 = vpop.eup %4763  ;;  %v4303_v13 = vsub.f32 %v4762_v45, %v8115_v46 }
 0xecf   :  { %v4766_v17 = vpop.eup %4765 }
 0xed0   :  { %v4304_v10 = vsub.f32 %v4766_v17, %v8112_v1  ;;  %v4305_v24 = vmul.f32 %v4764_v50, %v4303_v13  ;;  %v4768_v55 = vpop.eup %4767 }
 0xed2   :  { %v4306_v34 = vmul.f32 %v4768_v55, %v4304_v10  ;;  %v4307_v62 = vadd.f32 %v4305_v24, %v8115_v46 }
 0xed4   :  { %v4308_v63 = vadd.f32 %v4306_v34, %v8112_v1 }
 0xed6   :  { %4467 = vmatprep.mubr.f32.mxu1 %v4308_v63 }
 0xed7   :  { %4468 = vmatmul.mubr.f32.gmra.mxu1 %v4307_v62 }
 0xf97   :  { %v4595_v2 = vpop.f32.mrf.mxu1 }
 0xf99   :  { %v4596_v9 = vpop.f32.mrf.mxu1 }
 0xf9a   :  { %v4597_v0 = vadd.f32 %v4596_v9, %v4595_v2 }
 0xf9c   :  { %v4470_v22 = vadd.f32 %v4597_v0, %v8201_v61 }
 0xf9e   :  { %4480 = vst [vmem:[%s8257_s10 + $0x38] sm:$0xff] %v4470_v22 }
 0xf9f   :  { %4485 = vsyncpa [#allocation6], 1 }
 0xfa0   :  { %4486 = vsyncpa [#allocation8], 1 }
 0xfa1   :  { %4487 = vsyncpa [#allocation11], 1 }

</bundles_post_ra>
